<compile_context>
chip_gen: v7x
topology: tpu7x:2x2x1
jax: 0.10.0
libtpu: 0.0.40
codegen_flags: <defaults>
</compile_context>

<pallas_src>
import functools
import math
from collections import namedtuple

import numpy as np
import jax
import jax.numpy as jnp
from jax.experimental import pallas as pl
from jax.experimental.pallas import tpu as pltpu

_LANE = 128

LayerCfg = namedtuple("LayerCfg", "stride cin cout cin_pad cout_pad hout wout")


def _round_up(v, m):
    return (v + m - 1) // m * m


# ----------------------------------------------------------------------------
# Fused segment kernel: a run of conv+ReLU layers (first may be stride-2, the
# rest stride-1), optionally followed by global-mean + head dot.
# One grid step = one image; intermediates live in VMEM scratch.
# ----------------------------------------------------------------------------
def _segment_kernel(*refs, cfg, fsz, pad, has_head, inv_hw):
    nL = len(cfg)
    x_ref = refs[0]
    w_refs = refs[1:1 + nL]
    pos = 1 + nL
    head_ref = refs[pos] if has_head else None
    if has_head:
        pos += 1
    out_ref = refs[pos]
    scratch = refs[pos + 1:]                # nL-1 padded intermediate activations

    for l, c in enumerate(cfg):
        hout, wout, cin_pad = c.hout, c.wout, c.cin_pad

        # im2col patch in VMEM: lane-aligned concat of fsz*fsz contiguous windows.
        pieces = []
        for kh in range(fsz):
            for kw in range(fsz):
                if l == 0 and c.stride == 2:
                    rh, qh = kh % 2, kh // 2
                    rw, qw = kw % 2, kw // 2
                    win = x_ref[0, rh * 2 + rw, qh:qh + hout, qw:qw + wout, :]
                elif l == 0:
                    win = x_ref[0, kh:kh + hout, kw:kw + wout, :]
                else:
                    win = scratch[l - 1][kh:kh + hout, kw:kw + wout, :]
                pieces.append(win)
        patch = jnp.concatenate(pieces, axis=-1)
        patch = patch.reshape(hout * wout, fsz * fsz * cin_pad)

        # Single K-folded MXU matmul (bf16 in, f32 accumulate) + ReLU.
        y = jnp.dot(patch, w_refs[l][...], preferred_element_type=jnp.float32)
        y = jnp.maximum(y, 0.0)

        if l < nL - 1:
            # Next layer's input: spatially padded activation in VMEM scratch.
            yb = y.reshape(hout, wout, c.cout_pad).astype(jnp.bfloat16)
            ps = scratch[l]
            hp2, wp2 = hout + 2 * pad, wout + 2 * pad
            if pad > 0:
                zrow = jnp.zeros((pad, wp2, c.cout_pad), jnp.bfloat16)
                zcol = jnp.zeros((hout, pad, c.cout_pad), jnp.bfloat16)
                ps[0:pad, :, :] = zrow                         # top border
                ps[pad + hout:hp2, :, :] = zrow                # bottom border
                ps[pad:pad + hout, 0:pad, :] = zcol            # left border
                ps[pad:pad + hout, pad + wout:wp2, :] = zcol   # right border
            ps[pad:pad + hout, pad:pad + wout, :] = yb
        elif has_head:
            # Global spatial mean, then head dot on the MXU.
            pooled = jnp.sum(y, axis=0, keepdims=True) * inv_hw       # (1, C) f32
            res = jnp.dot(pooled, head_ref[...],
                          preferred_element_type=jnp.float32)          # (1, 128)
            out_ref[...] = res.reshape(1, 1, _LANE)
        else:
            # Single aligned, lane-dense store of the UNPADDED activation.
            out_ref[...] = y.reshape(1, hout, wout, c.cout_pad).astype(out_ref.dtype)


# ----------------------------------------------------------------------------
# pallas_call wrapper for one segment
# ----------------------------------------------------------------------------
def _run_segment(x_in, wk_list, head_mat, cfg, *, fsz, pad, has_head):
    N = x_in.shape[0]
    nL = len(cfg)

    x_block = (1,) + x_in.shape[1:]
    if x_in.ndim == 5:                       # phase-decomposed (stride-2 entry)
        x_spec = pl.BlockSpec(x_block, lambda n: (n, 0, 0, 0, 0))
    else:                                    # pre-padded NHWC (stride-1 entry)
        x_spec = pl.BlockSpec(x_block, lambda n: (n, 0, 0, 0))

    in_specs = [x_spec] + [pl.BlockSpec(w.shape, lambda n: (0, 0)) for w in wk_list]
    args = [x_in] + list(wk_list)

    if has_head:
        in_specs.append(pl.BlockSpec(head_mat.shape, lambda n: (0, 0)))
        args.append(head_mat)
        out_shape = jax.ShapeDtypeStruct((N, 1, _LANE), jnp.float32)
        out_spec = pl.BlockSpec((1, 1, _LANE), lambda n: (n, 0, 0))
        last = cfg[-1]
        inv_hw = 1.0 / float(last.hout * last.wout)
    else:
        last = cfg[-1]
        out_shape = jax.ShapeDtypeStruct(
            (N, last.hout, last.wout, last.cout_pad), jnp.bfloat16)
        out_spec = pl.BlockSpec((1, last.hout, last.wout, last.cout_pad),
                                lambda n: (n, 0, 0, 0))
        inv_hw = None

    scratch_shapes = [
        pltpu.VMEM((cfg[l].hout + 2 * pad, cfg[l].wout + 2 * pad, cfg[l].cout_pad),
                   jnp.bfloat16)
        for l in range(nL - 1)
    ]

    kernel = functools.partial(_segment_kernel, cfg=cfg, fsz=fsz, pad=pad,
                               has_head=has_head, inv_hw=inv_hw)
    return pl.pallas_call(
        kernel,
        out_shape=out_shape,
        grid=(N,),
        in_specs=in_specs,
        out_specs=out_spec,
        scratch_shapes=scratch_shapes,
        compiler_params=pltpu.CompilerParams(dimension_semantics=("parallel",)),
    )(*args)


# ----------------------------------------------------------------------------
# Static plan (segmentation at stride-2 layers) and one-time parameter packing
# ----------------------------------------------------------------------------
def build_plan(d, H, W, cout_list, strides, *, fsz, pad):
    layers = []
    cin, h, w = d, H, W
    for cout, s in zip(cout_list, strides):
        assert h >= 5 and w >= 5            # mirrors the module's per-layer assert
        hp, wp = h + 2 * pad, w + 2 * pad
        hout = (hp - fsz) // s + 1
        wout = (wp - fsz) // s + 1
        layers.append(LayerCfg(stride=s, cin=cin, cout=cout,
                               cin_pad=_round_up(cin, _LANE),
                               cout_pad=_round_up(cout, _LANE),
                               hout=hout, wout=wout))
        cin, h, w = cout, hout, wout
    segments, cur = [], []
    for lc in layers:
        if lc.stride == 2 and cur:
            segments.append(tuple(cur))
            cur = []
        cur.append(lc)
    segments.append(tuple(cur))
    return tuple(segments)


def prepare_params(conv_weights, head_w, segments, *, fsz):
    """One-time weight packing (hoisted out of the forward path)."""
    layers = [c for seg in segments for c in seg]
    wk_list = []
    for w_oihw, c in zip(conv_weights, layers):
        scale = 1.0 / math.sqrt(c.cin * fsz * fsz)        # W / h**0.5, h = W[0].numel()
        wk = jnp.transpose(w_oihw, (2, 3, 1, 0)) * scale  # (fsz, fsz, cin, cout)
        wk = jnp.pad(wk, ((0, 0), (0, 0), (0, c.cin_pad - c.cin),
                          (0, c.cout_pad - c.cout)))
        wk = wk.reshape(fsz * fsz * c.cin_pad, c.cout_pad).astype(jnp.bfloat16)
        wk_list.append(wk)
    last = layers[-1]
    hw = head_w.astype(jnp.float32) / float(last.cout)    # W / len(W)
    hw = jnp.pad(hw, (0, last.cout_pad - last.cout))
    head_mat = jnp.tile(hw[:, None], (1, _LANE))          # (cout_pad, 128) f32
    return wk_list, head_mat


def _phase_decompose(xp):
    """Padded NHWC -> (N, 2*2, Hq, Wq, C) so stride-2 taps are contiguous windows."""
    N, Hp, Wp, C = xp.shape
    Hq, Wq = -(-Hp // 2), -(-Wp // 2)
    xpe = jnp.pad(xp, ((0, 0), (0, Hq * 2 - Hp), (0, Wq * 2 - Wp), (0, 0)))
    xph = xpe.reshape(N, Hq, 2, Wq, 2, C)
    return jnp.transpose(xph, (0, 2, 4, 1, 3, 5)).reshape(N, 4, Hq, Wq, C)


# ----------------------------------------------------------------------------
# CV forward
# ----------------------------------------------------------------------------
def cv_forward(x, wk_list, head_mat, *, segments, fsz, pad):
    """CV.forward with act=ReLU. x: (N, d, H, W) f32 -> (N,) f32."""
    N, d, H, W = x.shape
    cpad0 = segments[0][0].cin_pad
    xh = jnp.transpose(x, (0, 2, 3, 1))                   # NCHW -> NHWC (one pass)
    cur = jnp.pad(xh, ((0, 0), (pad, pad), (pad, pad), (0, cpad0 - d)))
    cur = cur.astype(jnp.bfloat16)

    wi, n_seg = 0, len(segments)
    for si, cfg in enumerate(segments):
        if cfg[0].stride == 2:
            cur = _phase_decompose(cur)
        seg_w = wk_list[wi:wi + len(cfg)]
        wi += len(cfg)
        is_last = si == n_seg - 1
        cur = _run_segment(cur, seg_w, head_mat if is_last else None, cfg,
                           fsz=fsz, pad=pad, has_head=is_last)
        if not is_last:
            # Spatial zero-pad for the next segment; XLA fuses it with the
            # phase-decompose transpose above (single tiny HBM pass).
            cur = jnp.pad(cur, ((0, 0), (pad, pad), (pad, pad), (0, 0)))
    return cur[:, 0, 0]


# ----------------------------------------------------------------------------
# Pure-JAX reference mirroring the PyTorch module exactly
# ----------------------------------------------------------------------------
def _ref_forward(x, conv_weights, head_w, *, fsz, pad, strides):
    out = x
    for w, s in zip(conv_weights, strides):
        h = w.shape[1] * w.shape[2] * w.shape[3]
        out = jax.lax.conv_general_dilated(
            out, w / math.sqrt(h), (s, s), [(pad, pad), (pad, pad)],
            dimension_numbers=("NCHW", "OIHW", "NCHW"))
        out = jnp.maximum(out, 0.0)                       # act = ReLU
    pooled = out.reshape(out.shape[0], out.shape[1], -1).mean(-1)   # (N, C)
    return pooled @ (head_w / head_w.shape[0])


# ----------------------------------------------------------------------------
if __name__ == "__main__":
    # Small CV config: d=4, h=8, L1=2, L2=2, h_base=2, fsz=3, pad=1,
    # stride_first=False, act=ReLU; input batch=2, spatial 16x16.
    d, h, L1, L2, h_base = 4, 8, 2, 2, 2.0
    fsz, pad, stride_first = 3, 1, False
    B, H, W = 2, 16, 16

    key = jax.random.PRNGKey(0)
    keys = iter(jax.random.split(key, L1 * L2 + 2))

    # Build parameters exactly like CV.__init__ (torch.stack(W_ij) -> OIHW).
    weights, strides, couts = [], [], []
    h1 = d
    for i in range(L1):
        h2 = round(h * h_base ** i)
        for j in range(L2):
            weights.append(jax.random.normal(next(keys), (h2, h1, fsz, fsz),
                                             dtype=jnp.float32))
            strides.append(2 if (j == 0 and (i > 0 or stride_first)) else 1)
            couts.append(h2)
            h1 = h2
    head_w = jax.random.normal(next(keys), (h1,), dtype=jnp.float32)
    x = jax.random.normal(next(keys), (B, d, H, W), dtype=jnp.float32)

    segments = build_plan(d, H, W, couts, strides, fsz=fsz, pad=pad)
    wk_list, head_mat = prepare_params(weights, head_w, segments, fsz=fsz)

    fwd = jax.jit(functools.partial(cv_forward, segments=segments, fsz=fsz, pad=pad))
    out = jax.block_until_ready(fwd(x, wk_list, head_mat))
    ref = jax.block_until_ready(
        _ref_forward(x, weights, head_w, fsz=fsz, pad=pad, strides=strides))

    assert out.shape == (B,), out.shape
    # bf16 activations/weights with f32 accumulation -> tolerant comparison.
    assert np.allclose(np.asarray(out), np.asarray(ref), rtol=1e-1, atol=2e-2), \
        (np.asarray(out), np.asarray(ref))

    print("KERNEL_OK")
</pallas_src>

<mosaic_0001>
module attributes {stable_mosaic.version = 11 : i64} {
  func.func @_segment_kernel(%arg0: i32, %arg1: memref<1x18x18x128xbf16, #tpu.memory_space<vmem>>, %arg2: memref<1152x128xbf16, #tpu.memory_space<vmem>>, %arg3: memref<1152x128xbf16, #tpu.memory_space<vmem>>, %arg4: memref<1x16x16x128xbf16, #tpu.memory_space<vmem>>, %arg5: memref<18x18x128xbf16, #tpu.memory_space<vmem>>) attributes {dimension_semantics = [#tpu.dimension_semantics<parallel>], iteration_bounds = array<i64: 2>, scalar_prefetch = 0 : i64, scratch_operands = 1 : i64, tpu.core_type = #tpu.core_type<tc>, window_params = [{transform_indices = @transform_0, window_bounds = array<i64: 1, 18, 18, 128>}, {pipeline_mode = #tpu.pipeline_mode<synchronous>, transform_indices = @transform_1, window_bounds = array<i64: 1152, 128>}, {pipeline_mode = #tpu.pipeline_mode<synchronous>, transform_indices = @transform_2, window_bounds = array<i64: 1152, 128>}, {transform_indices = @transform_3, window_bounds = array<i64: 1, 16, 16, 128>}]} {
    %c0 = arith.constant 0 : index
    %c0_0 = arith.constant 0 : index
    %c0_1 = arith.constant 0 : index
    %c0_2 = arith.constant 0 : index
    %0 = vector.load %arg1[%c0, %c0_0, %c0_1, %c0_2] : memref<1x18x18x128xbf16, #tpu.memory_space<vmem>>, vector<1x16x16x128xbf16>
    %1 = vector.shape_cast %0 : vector<1x16x16x128xbf16> to vector<16x16x128xbf16>
    %c0_3 = arith.constant 0 : index
    %c0_4 = arith.constant 0 : index
    %c1 = arith.constant 1 : index
    %c0_5 = arith.constant 0 : index
    %2 = vector.load %arg1[%c0_3, %c0_4, %c1, %c0_5] : memref<1x18x18x128xbf16, #tpu.memory_space<vmem>>, vector<1x16x16x128xbf16>
    %3 = vector.shape_cast %2 : vector<1x16x16x128xbf16> to vector<16x16x128xbf16>
    %c0_6 = arith.constant 0 : index
    %c0_7 = arith.constant 0 : index
    %c2 = arith.constant 2 : index
    %c0_8 = arith.constant 0 : index
    %4 = vector.load %arg1[%c0_6, %c0_7, %c2, %c0_8] : memref<1x18x18x128xbf16, #tpu.memory_space<vmem>>, vector<1x16x16x128xbf16>
    %5 = vector.shape_cast %4 : vector<1x16x16x128xbf16> to vector<16x16x128xbf16>
    %c0_9 = arith.constant 0 : index
    %c1_10 = arith.constant 1 : index
    %c0_11 = arith.constant 0 : index
    %c0_12 = arith.constant 0 : index
    %6 = vector.load %arg1[%c0_9, %c1_10, %c0_11, %c0_12] : memref<1x18x18x128xbf16, #tpu.memory_space<vmem>>, vector<1x16x16x128xbf16>
    %7 = vector.shape_cast %6 : vector<1x16x16x128xbf16> to vector<16x16x128xbf16>
    %c0_13 = arith.constant 0 : index
    %c1_14 = arith.constant 1 : index
    %c1_15 = arith.constant 1 : index
    %c0_16 = arith.constant 0 : index
    %8 = vector.load %arg1[%c0_13, %c1_14, %c1_15, %c0_16] : memref<1x18x18x128xbf16, #tpu.memory_space<vmem>>, vector<1x16x16x128xbf16>
    %9 = vector.shape_cast %8 : vector<1x16x16x128xbf16> to vector<16x16x128xbf16>
    %c0_17 = arith.constant 0 : index
    %c1_18 = arith.constant 1 : index
    %c2_19 = arith.constant 2 : index
    %c0_20 = arith.constant 0 : index
    %10 = vector.load %arg1[%c0_17, %c1_18, %c2_19, %c0_20] : memref<1x18x18x128xbf16, #tpu.memory_space<vmem>>, vector<1x16x16x128xbf16>
    %11 = vector.shape_cast %10 : vector<1x16x16x128xbf16> to vector<16x16x128xbf16>
    %c0_21 = arith.constant 0 : index
    %c2_22 = arith.constant 2 : index
    %c0_23 = arith.constant 0 : index
    %c0_24 = arith.constant 0 : index
    %12 = vector.load %arg1[%c0_21, %c2_22, %c0_23, %c0_24] : memref<1x18x18x128xbf16, #tpu.memory_space<vmem>>, vector<1x16x16x128xbf16>
    %13 = vector.shape_cast %12 : vector<1x16x16x128xbf16> to vector<16x16x128xbf16>
    %c0_25 = arith.constant 0 : index
    %c2_26 = arith.constant 2 : index
    %c1_27 = arith.constant 1 : index
    %c0_28 = arith.constant 0 : index
    %14 = vector.load %arg1[%c0_25, %c2_26, %c1_27, %c0_28] : memref<1x18x18x128xbf16, #tpu.memory_space<vmem>>, vector<1x16x16x128xbf16>
    %15 = vector.shape_cast %14 : vector<1x16x16x128xbf16> to vector<16x16x128xbf16>
    %c0_29 = arith.constant 0 : index
    %c2_30 = arith.constant 2 : index
    %c2_31 = arith.constant 2 : index
    %c0_32 = arith.constant 0 : index
    %16 = vector.load %arg1[%c0_29, %c2_30, %c2_31, %c0_32] : memref<1x18x18x128xbf16, #tpu.memory_space<vmem>>, vector<1x16x16x128xbf16>
    %17 = vector.shape_cast %16 : vector<1x16x16x128xbf16> to vector<16x16x128xbf16>
    %18 = tpu.concatenate %1, %3, %5, %7, %9, %11, %13, %15, %17 in 2 : vector<16x16x128xbf16>, vector<16x16x128xbf16>, vector<16x16x128xbf16>, vector<16x16x128xbf16>, vector<16x16x128xbf16>, vector<16x16x128xbf16>, vector<16x16x128xbf16>, vector<16x16x128xbf16>, vector<16x16x128xbf16> -> vector<16x16x1152xbf16>
    %19 = vector.shape_cast %18 : vector<16x16x1152xbf16> to vector<256x1152xbf16>
    %c0_33 = arith.constant 0 : index
    %c0_34 = arith.constant 0 : index
    %20 = vector.load %arg2[%c0_33, %c0_34] : memref<1152x128xbf16, #tpu.memory_space<vmem>>, vector<1152x128xbf16>
    %cst = arith.constant dense<0.000000e+00> : vector<256x128xf32>
    %21 = tpu.matmul %19, %20, %cst {dimension_numbers = #tpu.dot_dimension_numbers<[1], [0], [0], [1], [0, 0, 1, 1], [], []>} : vector<256x1152xbf16>, vector<1152x128xbf16>, vector<256x128xf32> -> vector<256x128xf32>
    %cst_35 = arith.constant 0.000000e+00 : f32
    %22 = vector.broadcast %cst_35 : f32 to vector<256x128xf32>
    %23 = arith.maximumf %21, %22 : vector<256x128xf32>
    %24 = vector.shape_cast %23 : vector<256x128xf32> to vector<16x16x128xf32>
    %25 = arith.truncf %24 : vector<16x16x128xf32> to vector<16x16x128xbf16>
    %cst_36 = arith.constant 0.000000e+00 : bf16
    %26 = vector.broadcast %cst_36 : bf16 to vector<1x18x128xbf16>
    %cst_37 = arith.constant 0.000000e+00 : bf16
    %27 = vector.broadcast %cst_37 : bf16 to vector<16x1x128xbf16>
    %c0_38 = arith.constant 0 : index
    %c0_39 = arith.constant 0 : index
    %c0_40 = arith.constant 0 : index
    %28 = vector.load %arg5[%c0_38, %c0_39, %c0_40] : memref<18x18x128xbf16, #tpu.memory_space<vmem>>, vector<1x18x128xbf16>
    tpu.vector_store %arg5[%c0_38, %c0_39, %c0_40], %26 {strides = array<i32>} : memref<18x18x128xbf16, #tpu.memory_space<vmem>>, vector<1x18x128xbf16>,
    %c17 = arith.constant 17 : index
    %c0_41 = arith.constant 0 : index
    %c0_42 = arith.constant 0 : index
    %29 = vector.load %arg5[%c17, %c0_41, %c0_42] : memref<18x18x128xbf16, #tpu.memory_space<vmem>>, vector<1x18x128xbf16>
    tpu.vector_store %arg5[%c17, %c0_41, %c0_42], %26 {strides = array<i32>} : memref<18x18x128xbf16, #tpu.memory_space<vmem>>, vector<1x18x128xbf16>,
    %c1_43 = arith.constant 1 : index
    %c0_44 = arith.constant 0 : index
    %c0_45 = arith.constant 0 : index
    %30 = vector.load %arg5[%c1_43, %c0_44, %c0_45] : memref<18x18x128xbf16, #tpu.memory_space<vmem>>, vector<16x1x128xbf16>
    tpu.vector_store %arg5[%c1_43, %c0_44, %c0_45], %27 {strides = array<i32>} : memref<18x18x128xbf16, #tpu.memory_space<vmem>>, vector<16x1x128xbf16>,
    %c1_46 = arith.constant 1 : index
    %c17_47 = arith.constant 17 : index
    %c0_48 = arith.constant 0 : index
    %31 = vector.load %arg5[%c1_46, %c17_47, %c0_48] : memref<18x18x128xbf16, #tpu.memory_space<vmem>>, vector<16x1x128xbf16>
    tpu.vector_store %arg5[%c1_46, %c17_47, %c0_48], %27 {strides = array<i32>} : memref<18x18x128xbf16, #tpu.memory_space<vmem>>, vector<16x1x128xbf16>,
    %c1_49 = arith.constant 1 : index
    %c1_50 = arith.constant 1 : index
    %c0_51 = arith.constant 0 : index
    %32 = vector.load %arg5[%c1_49, %c1_50, %c0_51] : memref<18x18x128xbf16, #tpu.memory_space<vmem>>, vector<16x16x128xbf16>
    tpu.vector_store %arg5[%c1_49, %c1_50, %c0_51], %25 {strides = array<i32>} : memref<18x18x128xbf16, #tpu.memory_space<vmem>>, vector<16x16x128xbf16>,
    %c0_52 = arith.constant 0 : index
    %c0_53 = arith.constant 0 : index
    %c0_54 = arith.constant 0 : index
    %33 = vector.load %arg5[%c0_52, %c0_53, %c0_54] : memref<18x18x128xbf16, #tpu.memory_space<vmem>>, vector<16x16x128xbf16>
    %c0_55 = arith.constant 0 : index
    %c1_56 = arith.constant 1 : index
    %c0_57 = arith.constant 0 : index
    %34 = vector.load %arg5[%c0_55, %c1_56, %c0_57] : memref<18x18x128xbf16, #tpu.memory_space<vmem>>, vector<16x16x128xbf16>
    %c0_58 = arith.constant 0 : index
    %c2_59 = arith.constant 2 : index
    %c0_60 = arith.constant 0 : index
    %35 = vector.load %arg5[%c0_58, %c2_59, %c0_60] : memref<18x18x128xbf16, #tpu.memory_space<vmem>>, vector<16x16x128xbf16>
    %c1_61 = arith.constant 1 : index
    %c0_62 = arith.constant 0 : index
    %c0_63 = arith.constant 0 : index
    %36 = vector.load %arg5[%c1_61, %c0_62, %c0_63] : memref<18x18x128xbf16, #tpu.memory_space<vmem>>, vector<16x16x128xbf16>
    %c1_64 = arith.constant 1 : index
    %c1_65 = arith.constant 1 : index
    %c0_66 = arith.constant 0 : index
    %37 = vector.load %arg5[%c1_64, %c1_65, %c0_66] : memref<18x18x128xbf16, #tpu.memory_space<vmem>>, vector<16x16x128xbf16>
    %c1_67 = arith.constant 1 : index
    %c2_68 = arith.constant 2 : index
    %c0_69 = arith.constant 0 : index
    %38 = vector.load %arg5[%c1_67, %c2_68, %c0_69] : memref<18x18x128xbf16, #tpu.memory_space<vmem>>, vector<16x16x128xbf16>
    %c2_70 = arith.constant 2 : index
    %c0_71 = arith.constant 0 : index
    %c0_72 = arith.constant 0 : index
    %39 = vector.load %arg5[%c2_70, %c0_71, %c0_72] : memref<18x18x128xbf16, #tpu.memory_space<vmem>>, vector<16x16x128xbf16>
    %c2_73 = arith.constant 2 : index
    %c1_74 = arith.constant 1 : index
    %c0_75 = arith.constant 0 : index
    %40 = vector.load %arg5[%c2_73, %c1_74, %c0_75] : memref<18x18x128xbf16, #tpu.memory_space<vmem>>, vector<16x16x128xbf16>
    %c2_76 = arith.constant 2 : index
    %c2_77 = arith.constant 2 : index
    %c0_78 = arith.constant 0 : index
    %41 = vector.load %arg5[%c2_76, %c2_77, %c0_78] : memref<18x18x128xbf16, #tpu.memory_space<vmem>>, vector<16x16x128xbf16>
    %42 = tpu.concatenate %33, %34, %35, %36, %37, %38, %39, %40, %41 in 2 : vector<16x16x128xbf16>, vector<16x16x128xbf16>, vector<16x16x128xbf16>, vector<16x16x128xbf16>, vector<16x16x128xbf16>, vector<16x16x128xbf16>, vector<16x16x128xbf16>, vector<16x16x128xbf16>, vector<16x16x128xbf16> -> vector<16x16x1152xbf16>
    %43 = vector.shape_cast %42 : vector<16x16x1152xbf16> to vector<256x1152xbf16>
    %c0_79 = arith.constant 0 : index
    %c0_80 = arith.constant 0 : index
    %44 = vector.load %arg3[%c0_79, %c0_80] : memref<1152x128xbf16, #tpu.memory_space<vmem>>, vector<1152x128xbf16>
    %cst_81 = arith.constant dense<0.000000e+00> : vector<256x128xf32>
    %45 = tpu.matmul %43, %44, %cst_81 {dimension_numbers = #tpu.dot_dimension_numbers<[1], [0], [0], [1], [0, 0, 1, 1], [], []>} : vector<256x1152xbf16>, vector<1152x128xbf16>, vector<256x128xf32> -> vector<256x128xf32>
    %cst_82 = arith.constant 0.000000e+00 : f32
    %46 = vector.broadcast %cst_82 : f32 to vector<256x128xf32>
    %47 = arith.maximumf %45, %46 : vector<256x128xf32>
    %48 = vector.shape_cast %47 : vector<256x128xf32> to vector<1x16x16x128xf32>
    %49 = arith.truncf %48 : vector<1x16x16x128xf32> to vector<1x16x16x128xbf16>
    %c0_83 = arith.constant 0 : index
    %c0_84 = arith.constant 0 : index
    %c0_85 = arith.constant 0 : index
    %c0_86 = arith.constant 0 : index
    %50 = vector.load %arg4[%c0_83, %c0_84, %c0_85, %c0_86] : memref<1x16x16x128xbf16, #tpu.memory_space<vmem>>, vector<1x16x16x128xbf16>
    tpu.vector_store %arg4[%c0_83, %c0_84, %c0_85, %c0_86], %49 {strides = array<i32>} : memref<1x16x16x128xbf16, #tpu.memory_space<vmem>>, vector<1x16x16x128xbf16>,
    return
  }
  func.func @transform_0(%arg0: i32) -> (i32, i32, i32, i32) {
    %c0_i32 = arith.constant 0 : i32
    %c0_i32_0 = arith.constant 0 : i32
    %c0_i32_1 = arith.constant 0 : i32
    %c0_i32_2 = arith.constant 0 : i32
    return %arg0, %c0_i32, %c0_i32_0, %c0_i32_1 : i32, i32, i32, i32
  }
  func.func @transform_1(%arg0: i32) -> (i32, i32) {
    %c0_i32 = arith.constant 0 : i32
    %c0_i32_0 = arith.constant 0 : i32
    %c0_i32_1 = arith.constant 0 : i32
    return %c0_i32, %c0_i32_0 : i32, i32
  }
  func.func @transform_2(%arg0: i32) -> (i32, i32) {
    %c0_i32 = arith.constant 0 : i32
    %c0_i32_0 = arith.constant 0 : i32
    %c0_i32_1 = arith.constant 0 : i32
    return %c0_i32, %c0_i32_0 : i32, i32
  }
  func.func @transform_3(%arg0: i32) -> (i32, i32, i32, i32) {
    %c0_i32 = arith.constant 0 : i32
    %c0_i32_0 = arith.constant 0 : i32
    %c0_i32_1 = arith.constant 0 : i32
    %c0_i32_2 = arith.constant 0 : i32
    return %arg0, %c0_i32, %c0_i32_0, %c0_i32_1 : i32, i32, i32, i32
  }
}

module attributes {stable_mosaic.version = 11 : i64} {
  func.func @_segment_kernel(%arg0: i32, %arg1: memref<1x4x9x9x128xbf16, #tpu.memory_space<vmem>>, %arg2: memref<1152x128xbf16, #tpu.memory_space<vmem>>, %arg3: memref<1152x128xbf16, #tpu.memory_space<vmem>>, %arg4: memref<128x128xf32, #tpu.memory_space<vmem>>, %arg5: memref<1x1x128xf32, #tpu.memory_space<vmem>>, %arg6: memref<10x10x128xbf16, #tpu.memory_space<vmem>>) attributes {dimension_semantics = [#tpu.dimension_semantics<parallel>], iteration_bounds = array<i64: 2>, scalar_prefetch = 0 : i64, scratch_operands = 1 : i64, tpu.core_type = #tpu.core_type<tc>, window_params = [{transform_indices = @transform_0, window_bounds = array<i64: 1, 4, 9, 9, 128>}, {pipeline_mode = #tpu.pipeline_mode<synchronous>, transform_indices = @transform_1, window_bounds = array<i64: 1152, 128>}, {pipeline_mode = #tpu.pipeline_mode<synchronous>, transform_indices = @transform_2, window_bounds = array<i64: 1152, 128>}, {pipeline_mode = #tpu.pipeline_mode<synchronous>, transform_indices = @transform_3, window_bounds = array<i64: 128, 128>}, {transform_indices = @transform_4, window_bounds = array<i64: 1, 1, 128>}]} {
    %c0 = arith.constant 0 : index
    %c0_0 = arith.constant 0 : index
    %c0_1 = arith.constant 0 : index
    %c0_2 = arith.constant 0 : index
    %c0_3 = arith.constant 0 : index
    %0 = vector.load %arg1[%c0, %c0_0, %c0_1, %c0_2, %c0_3] : memref<1x4x9x9x128xbf16, #tpu.memory_space<vmem>>, vector<1x1x8x8x128xbf16>
    %1 = vector.shape_cast %0 : vector<1x1x8x8x128xbf16> to vector<8x8x128xbf16>
    %c0_4 = arith.constant 0 : index
    %c1 = arith.constant 1 : index
    %c0_5 = arith.constant 0 : index
    %c0_6 = arith.constant 0 : index
    %c0_7 = arith.constant 0 : index
    %2 = vector.load %arg1[%c0_4, %c1, %c0_5, %c0_6, %c0_7] : memref<1x4x9x9x128xbf16, #tpu.memory_space<vmem>>, vector<1x1x8x8x128xbf16>
    %3 = vector.shape_cast %2 : vector<1x1x8x8x128xbf16> to vector<8x8x128xbf16>
    %c0_8 = arith.constant 0 : index
    %c0_9 = arith.constant 0 : index
    %c0_10 = arith.constant 0 : index
    %c1_11 = arith.constant 1 : index
    %c0_12 = arith.constant 0 : index
    %4 = vector.load %arg1[%c0_8, %c0_9, %c0_10, %c1_11, %c0_12] : memref<1x4x9x9x128xbf16, #tpu.memory_space<vmem>>, vector<1x1x8x8x128xbf16>
    %5 = vector.shape_cast %4 : vector<1x1x8x8x128xbf16> to vector<8x8x128xbf16>
    %c0_13 = arith.constant 0 : index
    %c2 = arith.constant 2 : index
    %c0_14 = arith.constant 0 : index
    %c0_15 = arith.constant 0 : index
    %c0_16 = arith.constant 0 : index
    %6 = vector.load %arg1[%c0_13, %c2, %c0_14, %c0_15, %c0_16] : memref<1x4x9x9x128xbf16, #tpu.memory_space<vmem>>, vector<1x1x8x8x128xbf16>
    %7 = vector.shape_cast %6 : vector<1x1x8x8x128xbf16> to vector<8x8x128xbf16>
    %c0_17 = arith.constant 0 : index
    %c3 = arith.constant 3 : index
    %c0_18 = arith.constant 0 : index
    %c0_19 = arith.constant 0 : index
    %c0_20 = arith.constant 0 : index
    %8 = vector.load %arg1[%c0_17, %c3, %c0_18, %c0_19, %c0_20] : memref<1x4x9x9x128xbf16, #tpu.memory_space<vmem>>, vector<1x1x8x8x128xbf16>
    %9 = vector.shape_cast %8 : vector<1x1x8x8x128xbf16> to vector<8x8x128xbf16>
    %c0_21 = arith.constant 0 : index
    %c2_22 = arith.constant 2 : index
    %c0_23 = arith.constant 0 : index
    %c1_24 = arith.constant 1 : index
    %c0_25 = arith.constant 0 : index
    %10 = vector.load %arg1[%c0_21, %c2_22, %c0_23, %c1_24, %c0_25] : memref<1x4x9x9x128xbf16, #tpu.memory_space<vmem>>, vector<1x1x8x8x128xbf16>
    %11 = vector.shape_cast %10 : vector<1x1x8x8x128xbf16> to vector<8x8x128xbf16>
    %c0_26 = arith.constant 0 : index
    %c0_27 = arith.constant 0 : index
    %c1_28 = arith.constant 1 : index
    %c0_29 = arith.constant 0 : index
    %c0_30 = arith.constant 0 : index
    %12 = vector.load %arg1[%c0_26, %c0_27, %c1_28, %c0_29, %c0_30] : memref<1x4x9x9x128xbf16, #tpu.memory_space<vmem>>, vector<1x1x8x8x128xbf16>
    %13 = vector.shape_cast %12 : vector<1x1x8x8x128xbf16> to vector<8x8x128xbf16>
    %c0_31 = arith.constant 0 : index
    %c1_32 = arith.constant 1 : index
    %c1_33 = arith.constant 1 : index
    %c0_34 = arith.constant 0 : index
    %c0_35 = arith.constant 0 : index
    %14 = vector.load %arg1[%c0_31, %c1_32, %c1_33, %c0_34, %c0_35] : memref<1x4x9x9x128xbf16, #tpu.memory_space<vmem>>, vector<1x1x8x8x128xbf16>
    %15 = vector.shape_cast %14 : vector<1x1x8x8x128xbf16> to vector<8x8x128xbf16>
    %c0_36 = arith.constant 0 : index
    %c0_37 = arith.constant 0 : index
    %c1_38 = arith.constant 1 : index
    %c1_39 = arith.constant 1 : index
    %c0_40 = arith.constant 0 : index
    %16 = vector.load %arg1[%c0_36, %c0_37, %c1_38, %c1_39, %c0_40] : memref<1x4x9x9x128xbf16, #tpu.memory_space<vmem>>, vector<1x1x8x8x128xbf16>
    %17 = vector.shape_cast %16 : vector<1x1x8x8x128xbf16> to vector<8x8x128xbf16>
    %18 = tpu.concatenate %1, %3, %5, %7, %9, %11, %13, %15, %17 in 2 : vector<8x8x128xbf16>, vector<8x8x128xbf16>, vector<8x8x128xbf16>, vector<8x8x128xbf16>, vector<8x8x128xbf16>, vector<8x8x128xbf16>, vector<8x8x128xbf16>, vector<8x8x128xbf16>, vector<8x8x128xbf16> -> vector<8x8x1152xbf16>
    %19 = vector.shape_cast %18 : vector<8x8x1152xbf16> to vector<64x1152xbf16>
    %c0_41 = arith.constant 0 : index
    %c0_42 = arith.constant 0 : index
    %20 = vector.load %arg2[%c0_41, %c0_42] : memref<1152x128xbf16, #tpu.memory_space<vmem>>, vector<1152x128xbf16>
    %cst = arith.constant dense<0.000000e+00> : vector<64x128xf32>
    %21 = tpu.matmul %19, %20, %cst {dimension_numbers = #tpu.dot_dimension_numbers<[1], [0], [0], [1], [0, 0, 1, 1], [], []>} : vector<64x1152xbf16>, vector<1152x128xbf16>, vector<64x128xf32> -> vector<64x128xf32>
    %cst_43 = arith.constant 0.000000e+00 : f32
    %22 = vector.broadcast %cst_43 : f32 to vector<64x128xf32>
    %23 = arith.maximumf %21, %22 : vector<64x128xf32>
    %24 = vector.shape_cast %23 : vector<64x128xf32> to vector<8x8x128xf32>
    %25 = arith.truncf %24 : vector<8x8x128xf32> to vector<8x8x128xbf16>
    %cst_44 = arith.constant 0.000000e+00 : bf16
    %26 = vector.broadcast %cst_44 : bf16 to vector<1x10x128xbf16>
    %cst_45 = arith.constant 0.000000e+00 : bf16
    %27 = vector.broadcast %cst_45 : bf16 to vector<8x1x128xbf16>
    %c0_46 = arith.constant 0 : index
    %c0_47 = arith.constant 0 : index
    %c0_48 = arith.constant 0 : index
    %28 = vector.load %arg6[%c0_46, %c0_47, %c0_48] : memref<10x10x128xbf16, #tpu.memory_space<vmem>>, vector<1x10x128xbf16>
    tpu.vector_store %arg6[%c0_46, %c0_47, %c0_48], %26 {strides = array<i32>} : memref<10x10x128xbf16, #tpu.memory_space<vmem>>, vector<1x10x128xbf16>,
    %c9 = arith.constant 9 : index
    %c0_49 = arith.constant 0 : index
    %c0_50 = arith.constant 0 : index
    %29 = vector.load %arg6[%c9, %c0_49, %c0_50] : memref<10x10x128xbf16, #tpu.memory_space<vmem>>, vector<1x10x128xbf16>
    tpu.vector_store %arg6[%c9, %c0_49, %c0_50], %26 {strides = array<i32>} : memref<10x10x128xbf16, #tpu.memory_space<vmem>>, vector<1x10x128xbf16>,
    %c1_51 = arith.constant 1 : index
    %c0_52 = arith.constant 0 : index
    %c0_53 = arith.constant 0 : index
    %30 = vector.load %arg6[%c1_51, %c0_52, %c0_53] : memref<10x10x128xbf16, #tpu.memory_space<vmem>>, vector<8x1x128xbf16>
    tpu.vector_store %arg6[%c1_51, %c0_52, %c0_53], %27 {strides = array<i32>} : memref<10x10x128xbf16, #tpu.memory_space<vmem>>, vector<8x1x128xbf16>,
    %c1_54 = arith.constant 1 : index
    %c9_55 = arith.constant 9 : index
    %c0_56 = arith.constant 0 : index
    %31 = vector.load %arg6[%c1_54, %c9_55, %c0_56] : memref<10x10x128xbf16, #tpu.memory_space<vmem>>, vector<8x1x128xbf16>
    tpu.vector_store %arg6[%c1_54, %c9_55, %c0_56], %27 {strides = array<i32>} : memref<10x10x128xbf16, #tpu.memory_space<vmem>>, vector<8x1x128xbf16>,
    %c1_57 = arith.constant 1 : index
    %c1_58 = arith.constant 1 : index
    %c0_59 = arith.constant 0 : index
    %32 = vector.load %arg6[%c1_57, %c1_58, %c0_59] : memref<10x10x128xbf16, #tpu.memory_space<vmem>>, vector<8x8x128xbf16>
    tpu.vector_store %arg6[%c1_57, %c1_58, %c0_59], %25 {strides = array<i32>} : memref<10x10x128xbf16, #tpu.memory_space<vmem>>, vector<8x8x128xbf16>,
    %c0_60 = arith.constant 0 : index
    %c0_61 = arith.constant 0 : index
    %c0_62 = arith.constant 0 : index
    %33 = vector.load %arg6[%c0_60, %c0_61, %c0_62] : memref<10x10x128xbf16, #tpu.memory_space<vmem>>, vector<8x8x128xbf16>
    %c0_63 = arith.constant 0 : index
    %c1_64 = arith.constant 1 : index
    %c0_65 = arith.constant 0 : index
    %34 = vector.load %arg6[%c0_63, %c1_64, %c0_65] : memref<10x10x128xbf16, #tpu.memory_space<vmem>>, vector<8x8x128xbf16>
    %c0_66 = arith.constant 0 : index
    %c2_67 = arith.constant 2 : index
    %c0_68 = arith.constant 0 : index
    %35 = vector.load %arg6[%c0_66, %c2_67, %c0_68] : memref<10x10x128xbf16, #tpu.memory_space<vmem>>, vector<8x8x128xbf16>
    %c1_69 = arith.constant 1 : index
    %c0_70 = arith.constant 0 : index
    %c0_71 = arith.constant 0 : index
    %36 = vector.load %arg6[%c1_69, %c0_70, %c0_71] : memref<10x10x128xbf16, #tpu.memory_space<vmem>>, vector<8x8x128xbf16>
    %c1_72 = arith.constant 1 : index
    %c1_73 = arith.constant 1 : index
    %c0_74 = arith.constant 0 : index
    %37 = vector.load %arg6[%c1_72, %c1_73, %c0_74] : memref<10x10x128xbf16, #tpu.memory_space<vmem>>, vector<8x8x128xbf16>
    %c1_75 = arith.constant 1 : index
    %c2_76 = arith.constant 2 : index
    %c0_77 = arith.constant 0 : index
    %38 = vector.load %arg6[%c1_75, %c2_76, %c0_77] : memref<10x10x128xbf16, #tpu.memory_space<vmem>>, vector<8x8x128xbf16>
    %c2_78 = arith.constant 2 : index
    %c0_79 = arith.constant 0 : index
    %c0_80 = arith.constant 0 : index
    %39 = vector.load %arg6[%c2_78, %c0_79, %c0_80] : memref<10x10x128xbf16, #tpu.memory_space<vmem>>, vector<8x8x128xbf16>
    %c2_81 = arith.constant 2 : index
    %c1_82 = arith.constant 1 : index
    %c0_83 = arith.constant 0 : index
    %40 = vector.load %arg6[%c2_81, %c1_82, %c0_83] : memref<10x10x128xbf16, #tpu.memory_space<vmem>>, vector<8x8x128xbf16>
    %c2_84 = arith.constant 2 : index
    %c2_85 = arith.constant 2 : index
    %c0_86 = arith.constant 0 : index
    %41 = vector.load %arg6[%c2_84, %c2_85, %c0_86] : memref<10x10x128xbf16, #tpu.memory_space<vmem>>, vector<8x8x128xbf16>
    %42 = tpu.concatenate %33, %34, %35, %36, %37, %38, %39, %40, %41 in 2 : vector<8x8x128xbf16>, vector<8x8x128xbf16>, vector<8x8x128xbf16>, vector<8x8x128xbf16>, vector<8x8x128xbf16>, vector<8x8x128xbf16>, vector<8x8x128xbf16>, vector<8x8x128xbf16>, vector<8x8x128xbf16> -> vector<8x8x1152xbf16>
    %43 = vector.shape_cast %42 : vector<8x8x1152xbf16> to vector<64x1152xbf16>
    %c0_87 = arith.constant 0 : index
    %c0_88 = arith.constant 0 : index
    %44 = vector.load %arg3[%c0_87, %c0_88] : memref<1152x128xbf16, #tpu.memory_space<vmem>>, vector<1152x128xbf16>
    %cst_89 = arith.constant dense<0.000000e+00> : vector<64x128xf32>
    %45 = tpu.matmul %43, %44, %cst_89 {dimension_numbers = #tpu.dot_dimension_numbers<[1], [0], [0], [1], [0, 0, 1, 1], [], []>} : vector<64x1152xbf16>, vector<1152x128xbf16>, vector<64x128xf32> -> vector<64x128xf32>
    %cst_90 = arith.constant 0.000000e+00 : f32
    %46 = vector.broadcast %cst_90 : f32 to vector<64x128xf32>
    %47 = arith.maximumf %45, %46 : vector<64x128xf32>
    %cst_91 = arith.constant dense<0.000000e+00> : vector<128xf32>
    %48 = vector.multi_reduction <add>, %47, %cst_91 [0] : vector<64x128xf32> to vector<128xf32>
    %49 = vector.shape_cast %48 : vector<128xf32> to vector<1x128xf32>
    %cst_92 = arith.constant 1.562500e-02 : f32
    %50 = vector.broadcast %cst_92 : f32 to vector<1x128xf32>
    %51 = arith.mulf %49, %50 : vector<1x128xf32>
    %c0_93 = arith.constant 0 : index
    %c0_94 = arith.constant 0 : index
    %52 = vector.load %arg4[%c0_93, %c0_94] : memref<128x128xf32, #tpu.memory_space<vmem>>, vector<128x128xf32>
    %cst_95 = arith.constant dense<0.000000e+00> : vector<1x128xf32>
    %53 = tpu.matmul %51, %52, %cst_95 {dimension_numbers = #tpu.dot_dimension_numbers<[1], [0], [0], [1], [0, 0, 1, 1], [], []>} : vector<1x128xf32>, vector<128x128xf32>, vector<1x128xf32> -> vector<1x128xf32>
    %54 = vector.shape_cast %53 : vector<1x128xf32> to vector<1x1x128xf32>
    %c0_96 = arith.constant 0 : index
    %c0_97 = arith.constant 0 : index
    %c0_98 = arith.constant 0 : index
    %55 = vector.load %arg5[%c0_96, %c0_97, %c0_98] : memref<1x1x128xf32, #tpu.memory_space<vmem>>, vector<1x1x128xf32>
    tpu.vector_store %arg5[%c0_96, %c0_97, %c0_98], %54 {strides = array<i32>} : memref<1x1x128xf32, #tpu.memory_space<vmem>>, vector<1x1x128xf32>,
    return
  }
  func.func @transform_0(%arg0: i32) -> (i32, i32, i32, i32, i32) {
    %c0_i32 = arith.constant 0 : i32
    %c0_i32_0 = arith.constant 0 : i32
    %c0_i32_1 = arith.constant 0 : i32
    %c0_i32_2 = arith.constant 0 : i32
    %c0_i32_3 = arith.constant 0 : i32
    return %arg0, %c0_i32, %c0_i32_0, %c0_i32_1, %c0_i32_2 : i32, i32, i32, i32, i32
  }
  func.func @transform_1(%arg0: i32) -> (i32, i32) {
    %c0_i32 = arith.constant 0 : i32
    %c0_i32_0 = arith.constant 0 : i32
    %c0_i32_1 = arith.constant 0 : i32
    return %c0_i32, %c0_i32_0 : i32, i32
  }
  func.func @transform_2(%arg0: i32) -> (i32, i32) {
    %c0_i32 = arith.constant 0 : i32
    %c0_i32_0 = arith.constant 0 : i32
    %c0_i32_1 = arith.constant 0 : i32
    return %c0_i32, %c0_i32_0 : i32, i32
  }
  func.func @transform_3(%arg0: i32) -> (i32, i32) {
    %c0_i32 = arith.constant 0 : i32
    %c0_i32_0 = arith.constant 0 : i32
    %c0_i32_1 = arith.constant 0 : i32
    return %c0_i32, %c0_i32_0 : i32, i32
  }
  func.func @transform_4(%arg0: i32) -> (i32, i32, i32) {
    %c0_i32 = arith.constant 0 : i32
    %c0_i32_0 = arith.constant 0 : i32
    %c0_i32_1 = arith.constant 0 : i32
    return %arg0, %c0_i32, %c0_i32_0 : i32, i32, i32
  }
}

</mosaic_0001>

<bundles_post_ra>
// kernel: cv_forward.3
= control target key start
LH: loop header
LB: loop body
LE: loop exit
PB: predicated region body
PF: predicated region fallthrough
CT: control target
= control target key end

     0   :  { %s4606_s15 = smov 0   ;;  %s5487_s0 = inlined_call_operand.vmem [shape: bf16[2,4,9,9,128], index: 0, kind: input, shape index: {}]   ;;  %s5488_s1 = inlined_call_operand.vmem [shape: bf16[1152,128], index: 1, kind: input, shape index: {}]   ;;  %s5489_s2 = inlined_call_operand.vmem [shape: bf16[1152,128], index: 2, kind: input, shape index: {}]   ;;  %s5490_s3 = inlined_call_operand.vmem [shape: f32[128,128], index: 3, kind: input, shape index: {}]   ;;  %s5491_s4 = inlined_call_operand.vmem [shape: f32[2,1,128], index: 4, kind: output, shape index: {}]  }
   0x1 LB: > { %s3468_s16 = sadd.s32 4294967295, %s4575_s15   ;;  %p3472_p0 = scmp.ge.s32.totalorder %s4575_s15, 1  ;;  %s4575_s15 = sphi %s4606_s15, %s14_s15  }
   0x2   : > { %p162_p1 = scmp.lt.s32.totalorder %s4575_s15, 3 }
   0x4   : > { %p163_p2 = pnand %p3472_p0, %p162_p1 }
   0x5   : > { %v4317_v0 = vld [vmem:[%s5488_s1 + $0x40] sm:$0xff] (!%p163_p2)   ;;  %v4321_v4 = vld [vmem:[%s5488_s1 + $0x48] sm:$0xff] (!%p163_p2)   ;;  %v4325_v8 = vld [vmem:[%s5488_s1 + $0x50] sm:$0xff] (!%p163_p2)   ;;  %p186_p3 = scmp.lt.s32.totalorder (!%p163_p2), %s3468_s16, 1  ;;  %vm1627_vm0 = vcmask (!%p163_p2), 1040384   ;;  %vm1784_vm5 = vcmask (!%p163_p2), 1043456  }
   0x6   : > { %166 = sbr.rel (%p163_p2) target bundleno = 876 (0x36c), region = 36  ;;  %v4318_v1 = vld [vmem:[%s5488_s1 + $0xc0] sm:$0xff] (!%p163_p2)   ;;  %3836 = vmatprep.subr.bf16.mxu0 (!%p163_p2), %v4317_v0  ;;  %v4322_v5 = vld [vmem:[%s5488_s1 + $0xc8] sm:$0xff] (!%p163_p2)   ;;  %v4326_v9 = vld [vmem:[%s5488_s1 + $0xd0] sm:$0xff] (!%p163_p2)   ;;  %vm1628_vm1 = vsmask.f32 (!%p163_p2), 256 }
   0x7   : > { %v4319_v2 = vld [vmem:[%s5488_s1] sm:$0xff] (!%p163_p2)   ;;  %3876 = vmatprep.subr.bf16.mxu1 (!%p163_p2), %v4318_v1  ;;  %v4323_v6 = vld [vmem:[%s5488_s1 + $0x8] sm:$0xff] (!%p163_p2)   ;;  %v4327_v10 = vld [vmem:[%s5488_s1 + $0x10] sm:$0xff] (!%p163_p2)   ;;  %vm1654_vm3 = vsmask.f32 (!%p163_p2), 7938  ;;  %vm4579_vm7 = vmmov (!%p163_p2), 0  }
   0x8   : > { %v4320_v3 = vld [vmem:[%s5488_s1 + $0x80] sm:$0xff] (!%p163_p2)   ;;  %3837 = vmatpush3.bf16.msra.mxu0 (!%p163_p2), %v4319_v2  ;;  %v4324_v7 = vld [vmem:[%s5488_s1 + $0x88] sm:$0xff] (!%p163_p2)   ;;  %v4328_v11 = vld [vmem:[%s5488_s1 + $0x90] sm:$0xff] (!%p163_p2)  }
   0x9   : > { %3877 = vmatpush3.bf16.msra.mxu1 (!%p163_p2), %v4320_v3  ;;  %3838 = vmatprep.subr.bf16.mxu0 (!%p163_p2), %v4321_v4  ;;  %v4329_v12 = vld [vmem:[%s5488_s1 + $0x58] sm:$0xff] (!%p163_p2)   ;;  %v4333_v16 = vld [vmem:[%s5488_s1 + $0x60] sm:$0xff] (!%p163_p2)   ;;  %v4337_v20 = vld [vmem:[%s5488_s1 + $0x68] sm:$0xff] (!%p163_p2)  }
   0xa   : > { %3878 = vmatprep.subr.bf16.mxu1 (!%p163_p2), %v4322_v5  ;;  %v4330_v13 = vld [vmem:[%s5488_s1 + $0xd8] sm:$0xff] (!%p163_p2)   ;;  %v4334_v17 = vld [vmem:[%s5488_s1 + $0xe0] sm:$0xff] (!%p163_p2)   ;;  %v4338_v21 = vld [vmem:[%s5488_s1 + $0xe8] sm:$0xff] (!%p163_p2)  }
   0xb   : > { %v4331_v14 = vld [vmem:[%s5488_s1 + $0x18] sm:$0xff] (!%p163_p2)   ;;  %v4335_v18 = vld [vmem:[%s5488_s1 + $0x20] sm:$0xff] (!%p163_p2)   ;;  %v4339_v22 = vld [vmem:[%s5488_s1 + $0x28] sm:$0xff] (!%p163_p2)  }
   0xc   : > { %3839 = vmatpush3.bf16.msra.mxu0 (!%p163_p2), %v4323_v6  ;;  %v4332_v15 = vld [vmem:[%s5488_s1 + $0x98] sm:$0xff] (!%p163_p2)   ;;  %v4336_v19 = vld [vmem:[%s5488_s1 + $0xa0] sm:$0xff] (!%p163_p2)   ;;  %v4340_v23 = vld [vmem:[%s5488_s1 + $0xa8] sm:$0xff] (!%p163_p2)  }
   0xd   : > { %3879 = vmatpush3.bf16.msra.mxu1 %v4324_v7  ;;  %3840 = vmatprep.subr.bf16.mxu0 %v4325_v8  ;;  %s5499_s16 = smov (!%p186_p3, %s3468_s16), 1  ;;  %v4341_v24 = vld [vmem:[%s5488_s1 + $0x70] sm:$0xff]   ;;  %v4345_v28 = vld [vmem:[%s5488_s1 + $0x78] sm:$0xff]   ;;  %v4356_v43 = vld [vmem:[%s5488_s1 + $0x140] sm:$0xff]  }
   0xe   : > { %3880 = vmatprep.subr.bf16.mxu1 %v4326_v9  ;;  %v4342_v25 = vld [vmem:[%s5488_s1 + $0xf0] sm:$0xff]   ;;  %s4304_s25 = smul.u32 288, %s5499_s16  ;;  %v4346_v29 = vld [vmem:[%s5488_s1 + $0xf8] sm:$0xff]   ;;  %v4357_v44 = vld [vmem:[%s5488_s1 + $0x100] sm:$0xff]   ;;  %s193_s7 = scalar_lea.vmem %s5491_s4, %s5499_s16 }
   0xf   : > { %v4343_v26 = vld [vmem:[%s5488_s1 + $0x30] sm:$0xff]   ;;  %v4347_v30 = vld [vmem:[%s5488_s1 + $0x38] sm:$0xff]   ;;  %v4358_v49 = vld [vmem:[%s5488_s1 + $0x1c0] sm:$0xff]  }
  0x10   : > { %3841 = vmatpush3.bf16.msra.mxu0 %v4327_v10  ;;  %v4344_v27 = vld [vmem:[%s5488_s1 + $0xb0] sm:$0xff]   ;;  %v4348_v31 = vld [vmem:[%s5488_s1 + $0xb8] sm:$0xff]   ;;  %s4720_s10 = scalar_lea.vmem %s5487_s0, %s4304_s25  ;;  %v4359_v53 = vld [vmem:[%s5488_s1 + $0x180] sm:$0xff]  }
  0x11   : > { %3881 = vmatpush3.bf16.msra.mxu1 %v4328_v11  ;;  %3842 = vmatprep.subr.bf16.mxu0 %v4329_v12  ;;  %v4349_v32 = vld [vmem:[%s4720_s10 + $0x48] ss:$8 sps:$4 sm:$0xff]   ;;  %v3483_v34 = vld [vmem:[%s4720_s10 + $0x98] sm:$0xf]  ;;  %v195_v36 = vld [vmem:[%s4720_s10] sm:$0xf] }
  0x12   : > { %3882 = vmatprep.subr.bf16.mxu1 %v4330_v13  ;;  %v3482_v33 = vld [vmem:[%s4720_s10 + $0x90] sm:$0xf]  ;;  %1312 = vmatprep.mubr.bf16.mxu0 %v4349_v32  ;;  %v196_v37 = vld [vmem:[%s4720_s10 + $0x8] sm:$0xf]  ;;  %v212_v38 = vld [vmem:[%s4720_s10 + $0x4] sm:$0x1] }
  0x13   : > { %v3557_v35 = vcombine.low %v3482_v33, %v3483_v34  ;;  %v213_v39 = vld [vmem:[%s4720_s10 + $0xc] sm:$0x1]  ;;  %v3554_v40 = vcombine.low %v195_v36, %v196_v37  ;;  %v3530_v41 = vcombine.low %v195_v36, %v212_v38  ;;  %v3498_v50 = vld [vmem:[%s4720_s10 + $0x94] sm:$0x1]  ;;  %v4363_v60 = vld [vmem:[%s4720_s10 + $0x58] ss:$8 sps:$4 sm:$0xff]  }
  0x14   : > { %3843 = vmatpush3.bf16.msra.mxu0 %v4331_v14  ;;  %v3531_v42 = vcombine.low %v196_v37, %v213_v39  ;;  %v4360_v54 = vld [vmem:[%s5488_s1 + $0x148] sm:$0xff]   ;;  %v3499_v61 = vld [vmem:[%s4720_s10 + $0x9c] sm:$0x1]  ;;  %v4753_v62 = vcombine.low %v3482_v33, %v3498_v50  ;;  %v3484_v63 = vld [vmem:[%s4720_s10 + $0xa0] sm:$0xf] }
  0x15   : > { %3883 = vmatpush3.bf16.msra.mxu1 %v4332_v15  ;;  %3844 = vmatprep.subr.bf16.mxu0 %v4333_v16  ;;  %v315_v45 = vshll.u32 %v3530_v41, 16  ;;  %v313_v47 = vshrl.u32 %v3530_v41, 16  ;;  %v4361_v57 = vld [vmem:[%s5488_s1 + $0x108] sm:$0xff]   ;;  %v197_v3 = vld [vmem:[%s4720_s10 + $0x10] sm:$0xf]  ;;  %v4762_v5 = vcombine.low %v3483_v34, %v3499_v61  ;;  %v4377_v32 = vld [vmem:[%s5488_s1 + $0x1d8] sm:$0xff]  }
  0x16   : > { %3884 = vmatprep.subr.bf16.mxu1 %v4334_v17  ;;  %1377 = vmatprep.mubr.bf16.mxu1 %v3557_v35  ;;  %v322_v46 = vshll.u32 %v3531_v42, 16  ;;  %v320_v48 = vshrl.u32 %v3531_v42, 16  ;;  %v4362_v58 = vld [vmem:[%s5488_s1 + $0x1c8] sm:$0xff]   ;;  %v198_v4 = vld [vmem:[%s4720_s10 + $0x18] sm:$0xf]  ;;  %v4371_v9 = vld [vmem:[%s5488_s1 + $0x150] sm:$0xff]  }
  0x17   : > { %v317_v51 = vrot.slane %v315_v45, 1  ;;  %v3485_v0 = vld [vmem:[%s4720_s10 + $0xa8] sm:$0xf]  ;;  %v214_v6 = vld [vmem:[%s4720_s10 + $0x14] sm:$0x1]  ;;  %v3563_v8 = vcombine.low %v197_v3, %v198_v4  ;;  %v411_v10 = vshll.u32 %v4753_v62, 16  ;;  %vm4952_vm2 = vmand %vm1627_vm0, %vm1628_vm1 }
  0x18   : > { %3845 = vmatpush3.bf16.msra.mxu0 %v4335_v18  ;;  %v324_v52 = vrot.slane %v322_v46, 1  ;;  %v3566_v1 = vcombine.low %v3484_v63, %v3485_v0  ;;  %v4367_v2 = vld [vmem:[%s5488_s1 + $0x188] sm:$0xff]   ;;  %v215_v7 = vld [vmem:[%s4720_s10 + $0x1c] sm:$0x1]  ;;  %v3532_v11 = vcombine.low %v197_v3, %v214_v6  ;;  %v4372_v13 = vld [vmem:[%s5488_s1 + $0x110] sm:$0xff]  }
  0x19   : > { %3885 = vmatpush3.bf16.msra.mxu1 %v4336_v19  ;;  %3846 = vmatprep.subr.bf16.mxu0 %v4337_v20  ;;  %v318_v55 = vor.u32 %v317_v51, %v313_v47  ;;  %v3533_v12 = vcombine.low %v198_v4, %v215_v7  ;;  %v3500_v14 = vld [vmem:[%s4720_s10 + $0xa4] sm:$0x1]  ;;  %v418_v19 = vshll.u32 %v4762_v5, 16  ;;  %v4373_v20 = vld [vmem:[%s5488_s1 + $0x1d0] sm:$0xff]   ;;  %v3487_v36 = vld [vmem:[%s4720_s10 + $0xb8] sm:$0xf] }
  0x1a   : > { %3886 = vmatprep.subr.bf16.mxu1 %v4338_v21  ;;  %v325_v56 = vor.u32 %v324_v52, %v320_v48  ;;  %v329_v15 = vshll.u32 %v3532_v11, 16  ;;  %v327_v17 = vshrl.u32 %v3532_v11, 16  ;;  %v3501_v21 = vld [vmem:[%s4720_s10 + $0xac] sm:$0x1]  ;;  %v4378_v34 = vld [vmem:[%s4720_s10 + $0x68] ss:$8 sps:$4 sm:$0xff]   ;;  %vm4959_vm4 = vmand %vm1627_vm0, %vm1654_vm3 }
  0x1b   : > { %v336_v16 = vshll.u32 %v3533_v12, 16  ;;  %v334_v18 = vshrl.u32 %v3533_v12, 16  ;;  %v3486_v35 = vld [vmem:[%s4720_s10 + $0xb0] sm:$0xf]  ;;  %v413_v37 = vrot.slane %v411_v10, 1  ;;  %v420_v38 = vrot.slane %v418_v19, 1  ;;  %vm5093_vm6 = vmand %vm1784_vm5, %vm1654_vm3 }
  0x1c   : > { %3847 = vmatpush3.bf16.msra.mxu0 %v4339_v22  ;;  %v3556_v59 = vcombine.low %v318_v55, %v325_v56  ;;  %v331_v22 = vrot.slane %v329_v15, 1  ;;  %v4798_v39 = vcombine.low %v3485_v0, %v3501_v21  ;;  %v4382_v42 = vld [vmem:[%s5488_s1 + $0x198] sm:$0xff]   ;;  %v216_v45 = vld [vmem:[%s4720_s10 + $0x24] sm:$0x1]  ;;  %v217_v46 = vld [vmem:[%s4720_s10 + $0x2c] sm:$0x1] }
  0x1d   : > { %3887 = vmatpush3.bf16.msra.mxu1 %v4340_v23  ;;  %3848 = vmatprep.subr.bf16.mxu0 %v4341_v24  ;;  %v338_v23 = vrot.slane %v336_v16, 1  ;;  %v4374_v24 = vld [vmem:[%s5488_s1 + $0x190] sm:$0xff]   ;;  %v3503_v48 = vld [vmem:[%s4720_s10 + $0xbc] sm:$0x1]  ;;  %v4391_v4 = vld [vmem:[%s5488_s1 + $0x128] sm:$0xff]  }
  0x1e   : > { %3888 = vmatprep.subr.bf16.mxu1 %v4342_v25  ;;  %v4375_v25 = vld [vmem:[%s5488_s1 + $0x158] sm:$0xff]   ;;  %v3502_v47 = vld [vmem:[%s4720_s10 + $0xb4] sm:$0x1]  ;;  %v432_v51 = vshll.u32 %v4798_v39, 16  ;;  %v4392_v6 = vld [vmem:[%s5488_s1 + $0x1e8] sm:$0xff]   ;;  %v430_v16 = vshrl.u32 %v4798_v39, 16 }
  0x1f   : > { %v4826_v0 = vcombine.low %v3486_v35, %v3502_v47  ;;  %v4393_v11 = vld [vmem:[%s4720_s10 + $0x78] ss:$8 sps:$4 sm:$0xff]   ;;  %v3489_v15 = vld [vmem:[%s4720_s10 + $0xc8] sm:$0xf]  ;;  %v201_v21 = vld [vmem:[%s4720_s10 + $0x30] sm:$0xf] }
  0x20   : > { %3849 = vmatpush3.bf16.msra.mxu0 %v4343_v26  ;;  %v409_v26 = vshrl.u32 %v4753_v62, 16  ;;  %v4389_v62 = vld [vmem:[%s5488_s1 + $0x1a0] sm:$0xff]   ;;  %v4397_v19 = vld [vmem:[%s5488_s1 + $0x1a8] sm:$0xff]  }
  0x21   : > { %3889 = vmatpush3.bf16.msra.mxu1 %v4344_v27  ;;  %3850 = vmatprep.subr.bf16.mxu0 %v4345_v28  ;;  %v4786_v27 = vcombine.low %v3484_v63, %v3500_v14  ;;  %v332_v28 = vor.u32 %v331_v22, %v327_v17  ;;  %v4390_v63 = vld [vmem:[%s5488_s1 + $0x168] sm:$0xff]   ;;  %v3488_v12 = vld [vmem:[%s4720_s10 + $0xc0] sm:$0xf]  ;;  %v434_v17 = vrot.slane %v432_v51, 1  ;;  %v202_v22 = vld [vmem:[%s4720_s10 + $0x38] sm:$0xf] }
  0x22   : > { %3890 = vmatprep.subr.bf16.mxu1 %v4346_v29  ;;  %v339_v29 = vor.u32 %v338_v23, %v334_v18  ;;  %v414_v7 = vor.u32 %v413_v37, %v409_v26  ;;  %v3584_v18 = vcombine.low %v3488_v12, %v3489_v15  ;;  %v218_v23 = vld [vmem:[%s4720_s10 + $0x34] sm:$0x1]  ;;  %v219_v26 = vld [vmem:[%s4720_s10 + $0x3c] sm:$0x1] }
  0x23   : > { %v425_v41 = vshll.u32 %v4786_v27, 16  ;;  %v4407_v51 = vld [vmem:[%s5488_s1 + $0x1f8] sm:$0xff]  }
  0x24   : > { %3851 = vmatpush3.bf16.msra.mxu0 %v4347_v30  ;;  %v4376_v30 = vld [vmem:[%s5488_s1 + $0x118] sm:$0xff]   ;;  %v3565_v33 = vcombine.low %v332_v28, %v339_v29  ;;  %v3581_v28 = vcombine.low %v201_v21, %v202_v22  ;;  %v3505_v29 = vld [vmem:[%s4720_s10 + $0xcc] sm:$0x1] }
  0x25   : > { %3891 = vmatpush3.bf16.msra.mxu1 %v4348_v31  ;;  %3916 = vmatprep.subr.bf16.mxu0 %v4356_v43  ;;  %v416_v31 = vshrl.u32 %v4762_v5, 16  ;;  %v199_v43 = vld [vmem:[%s4720_s10 + $0x20] sm:$0xf]  ;;  %v423_v5 = vshrl.u32 %v4786_v27, 16  ;;  %v3536_v27 = vcombine.low %v201_v21, %v218_v23  ;;  %v4423_v23 = vld [vmem:[%s4720_s10 + $0x70] ss:$8 sps:$4 sm:$0xff]  }
  0x26   : > { %3956 = vmatprep.subr.bf16.mxu1 %v4358_v49  ;;  %v3534_v49 = vcombine.low %v199_v43, %v216_v45  ;;  %v4405_v45 = vld [vmem:[%s5488_s1 + $0x178] sm:$0xff]  }
  0x27   : > { %1313 = vmatmul.mubr.bf16.vlgmr.msra.gmra.mrb[0].mxu0 %v3554_v40  ;;  %v3575_v40 = vcombine.low %v3486_v35, %v3487_v36  ;;  %v4402_v35 = vld [vmem:[%s5488_s1 + $0x130] sm:$0xff]  }
  0x28   : > { %3917 = vmatpush3.bf16.msra.mxu0 %v4357_v44  ;;  %1378 = vmatmul.mubr.bf16.vlgmr.msra.gmra.mrb[0].mxu1 %v3556_v59  ;;  %v200_v44 = vld [vmem:[%s4720_s10 + $0x28] sm:$0xf]  ;;  %v341_v56 = vshrl.u32 %v3534_v49, 16  ;;  %v4388_v59 = vld [vmem:[%s5488_s1 + $0x1e0] sm:$0xff]  }
  0x29   : > { %3918 = vmatprep.subr.bf16.mxu0 %v4360_v54  ;;  %1320 = vmatprep.mubr.bf16.mxu0 %v4363_v60  ;;  %v3535_v50 = vcombine.low %v200_v44, %v217_v46  ;;  %v3572_v52 = vcombine.low %v199_v43, %v200_v44  ;;  %v343_v54 = vshll.u32 %v3534_v49, 16  ;;  %v435_v43 = vor.u32 %v434_v17, %v430_v16  ;;  %v3509_v16 = vld [vmem:[%s4720_s10 + $0x20] sm:$0xf] }
  0x2a   : > { %3957 = vmatpush3.bf16.msra.mxu1 %v4359_v53  ;;  %1385 = vmatprep.mubr.bf16.mxu1 %v3566_v1  ;;  %v4386_v53 = vld [vmem:[%s5488_s1 + $0x160] sm:$0xff]   ;;  %v4828_v1 = vcombine.low %v3487_v36, %v3503_v48  ;;  %v4403_v36 = vld [vmem:[%s5488_s1 + $0x1f0] sm:$0xff]   ;;  %v3545_v46 = vcombine.low %v3489_v15, %v3505_v29  ;;  %v4406_v48 = vld [vmem:[%s5488_s1 + $0x138] sm:$0xff]  }
  0x2b   : > { %3958 = vmatprep.subr.bf16.mxu1 %v4362_v58  ;;  %v350_v55 = vshll.u32 %v3535_v50, 16  ;;  %v4387_v58 = vld [vmem:[%s5488_s1 + $0x120] sm:$0xff]   ;;  %v345_v60 = vrot.slane %v343_v54, 1  ;;  %v4408_v54 = vld [vmem:[%s5488_s1 + $0x1b8] sm:$0xff]  }
  0x2c   : > { %3919 = vmatpush3.bf16.msra.mxu0 %v4361_v57  ;;  %v348_v57 = vshrl.u32 %v3535_v50, 16  ;;  %v446_v14 = vshll.u32 %v4828_v1, 16  ;;  %v444_v49 = vshrl.u32 %v4828_v1, 16  ;;  %v4413_v1 = vld [vmem:[%s5488_s1 + $0x208] sm:$0xff]   ;;  %v3525_v15 = vld [vmem:[%s4720_s10 + $0x24] sm:$0x1] }
  0x2d   : > { %3920 = vmatprep.subr.bf16.mxu0 %v4371_v9  ;;  %v352_v61 = vrot.slane %v350_v55, 1  ;;  %v427_v9 = vrot.slane %v425_v41, 1  ;;  %v4404_v41 = vld [vmem:[%s5488_s1 + $0x1b0] sm:$0xff]  }
  0x2e   : > { %3959 = vmatpush3.bf16.msra.mxu1 %v4367_v2  ;;  %v346_v2 = vor.u32 %v345_v60, %v341_v56  ;;  %v4411_v60 = vld [vmem:[%s4720_s10 + $0x50] ss:$8 sps:$4 sm:$0xff]  }
  0x2f   : > { %1321 = vmatmul.mubr.bf16.gmra.mrb[4].mxu0 %v3563_v8  ;;  %3960 = vmatprep.subr.bf16.mxu1 %v4373_v20  ;;  %v353_v3 = vor.u32 %v352_v61, %v348_v57  ;;  %v421_v8 = vor.u32 %v420_v38, %v416_v31  ;;  %v437_v20 = vshrl.u32 %v4826_v0, 16  ;;  %v4401_v31 = vld [vmem:[%s5488_s1 + $0x170] sm:$0xff]   ;;  %v4409_v57 = vld [vmem:[%s4720_s10 + $0xd8] ss:$8 sps:$4 sm:$0xff]   ;;  %v4887_v61 = vld [vmem:[%s4720_s10 + $0x8] sm:$0xf] }
  0x30   : > { %3921 = vmatpush3.bf16.msra.mxu0 %v4372_v13  ;;  %1386 = vmatmul.mubr.bf16.gmra.mrb[4].mxu1 %v3565_v33  ;;  %v439_v13 = vshll.u32 %v4826_v0, 16  ;;  %v357_v33 = vshll.u32 %v3536_v27, 16 }
  0x31   : > { %3922 = vmatprep.subr.bf16.mxu0 %v4375_v25  ;;  %1328 = vmatprep.mubr.bf16.mxu0 %v4378_v34  ;;  %v3574_v10 = vcombine.low %v346_v2, %v353_v3  ;;  %v3504_v25 = vld [vmem:[%s4720_s10 + $0xc4] sm:$0x1]  ;;  %v355_v34 = vshrl.u32 %v3536_v27, 16  ;;  %v4414_v3 = vld [vmem:[%s4720_s10 + $0xe8] ss:$8 sps:$4 sm:$0xff]  }
  0x32   : > { %3961 = vmatpush3.bf16.msra.mxu1 %v4374_v24  ;;  %1393 = vmatprep.mubr.bf16.mxu1 %v3575_v40  ;;  %v3559_v24 = vcombine.low %v414_v7, %v421_v8  ;;  %v4862_v39 = vcombine.low %v3488_v12, %v3504_v25  ;;  %v359_v40 = vrot.slane %v357_v33, 1  ;;  %v4416_v7 = vld [vmem:[%s4720_s10 + $0x60] ss:$8 sps:$4 sm:$0xff]   ;;  %v3524_v12 = vld [vmem:[%s4720_s10 + $0x1c] sm:$0x1] }
  0x33   : > { %3962 = vmatprep.subr.bf16.mxu1 %v4377_v32  ;;  %v441_v32 = vrot.slane %v439_v13, 1  ;;  %v3510_v25 = vld [vmem:[%s4720_s10 + $0x28] sm:$0xf]  ;;  %v3526_v27 = vld [vmem:[%s4720_s10 + $0x2c] sm:$0x1] }
  0x34   : > { %3923 = vmatpush3.bf16.msra.mxu0 %v4376_v30  ;;  %v3537_v30 = vcombine.low %v202_v22, %v219_v26  ;;  %v360_v47 = vor.u32 %v359_v40, %v355_v34  ;;  %v451_v2 = vshrl.u32 %v4862_v39, 16  ;;  %v4422_v22 = vld [vmem:[%s5488_s1 + $0x220] sm:$0xff]   ;;  %v3511_v26 = vld [vmem:[%s4720_s10 + $0x30] sm:$0xf]  ;;  %v3550_v29 = vcombine.low %v3510_v25, %v3526_v27  ;;  %v3512_v40 = vld [vmem:[%s4720_s10 + $0x38] sm:$0xf] }
  0x35   : > { %3924 = vmatprep.subr.bf16.mxu0 %v4386_v53  ;;  %v453_v53 = vshll.u32 %v4862_v39, 16  ;;  %v4429_v39 = vld [vmem:[%s5488_s1 + $0x230] sm:$0xff]  }
  0x36   : > { %3963 = vmatpush3.bf16.msra.mxu1 %v4382_v42  ;;  %v364_v37 = vshll.u32 %v3537_v30, 16  ;;  %v362_v38 = vshrl.u32 %v3537_v30, 16  ;;  %v428_v42 = vor.u32 %v427_v9, %v423_v5  ;;  %v4415_v5 = vld [vmem:[%s5488_s1 + $0x210] sm:$0xff]   ;;  %v458_v9 = vshrl.u32 %v3545_v46, 16 }
  0x37   : > { %1329 = vmatmul.mubr.bf16.gmra.mrb[8].mxu0 %v3572_v52  ;;  %3964 = vmatprep.subr.bf16.mxu1 %v4388_v59  ;;  %v448_v52 = vrot.slane %v446_v14, 1  ;;  %v4410_v59 = vld [vmem:[%s5488_s1 + $0x200] sm:$0xff]   ;;  %v4420_v14 = vld [vmem:[%s5488_s1 + $0x218] sm:$0xff]  }
  0x38   : > { %3925 = vmatpush3.bf16.msra.mxu0 %v4387_v58  ;;  %1394 = vmatmul.mubr.bf16.gmra.mrb[8].mxu1 %v3574_v10  ;;  %v366_v44 = vrot.slane %v364_v37, 1  ;;  %v3568_v55 = vcombine.low %v428_v42, %v435_v43  ;;  %v460_v58 = vshll.u32 %v3545_v46, 16  ;;  %v535_v37 = vshll.u32 %v3550_v29, 16  ;;  %v3513_v42 = vld [vmem:[%s4720_s10 + $0x40] sm:$0xf] }
  0x39   : > { %3926 = vmatprep.subr.bf16.mxu0 %v4390_v63  ;;  %1336 = vmatprep.mubr.bf16.mxu0 %v4393_v11  ;;  %v442_v63 = vor.u32 %v441_v32, %v437_v20  ;;  %v449_v0 = vor.u32 %v448_v52, %v444_v49  ;;  %v3508_v11 = vld [vmem:[%s4720_s10 + $0x18] sm:$0xf]  ;;  %v4913_v20 = vcombine.low %v3509_v16, %v3525_v15  ;;  %v3528_v43 = vld [vmem:[%s4720_s10 + $0x3c] sm:$0x1] }
  0x3a   : > { %3965 = vmatpush3.bf16.msra.mxu1 %v4389_v62  ;;  %1401 = vmatprep.mubr.bf16.mxu1 %v3584_v18  ;;  %v367_v50 = vor.u32 %v366_v44, %v362_v38  ;;  %v4890_v62 = vld [vmem:[%s4720_s10 + $0x10] sm:$0xf]  ;;  %v462_v10 = vrot.slane %v460_v58, 1  ;;  %v4905_v13 = vcombine.low %v3508_v11, %v3524_v12  ;;  %v3529_v44 = vld [vmem:[%s4720_s10 + $0x44] sm:$0x1]  ;;  %v3578_v49 = vcombine.low %v3510_v25, %v3511_v26 }
  0x3b   : > { %3966 = vmatprep.subr.bf16.mxu1 %v4392_v6  ;;  %v455_v6 = vrot.slane %v453_v53, 1  ;;  %v3577_v8 = vcombine.low %v442_v63, %v449_v0  ;;  %v526_v33 = vshrl.u32 %v4913_v20, 16  ;;  %v528_v34 = vshll.u32 %v4913_v20, 16  ;;  %v4434_v0 = vld [vmem:[%s5488_s1 + $0x238] sm:$0xff]   ;;  %v4437_v20 = vld [vmem:[%s5489_s2 + $0xc0] sm:$0xff]  }
  0x3c   : > { %3927 = vmatpush3.bf16.msra.mxu0 %v4391_v4  ;;  %v3583_v56 = vcombine.low %v360_v47, %v367_v50  ;;  %v3560_v4 = vcombine.low %v4887_v61, %v4890_v62  ;;  %v463_v18 = vor.u32 %v462_v10, %v458_v9  ;;  %v521_v21 = vshll.u32 %v4905_v13, 16  ;;  %v3522_v47 = vld [vmem:[%s4720_s10 + $0xc] sm:$0x1]  ;;  %v4430_v50 = vld [vmem:[%s4720_s10 + $0x80] ss:$8 sps:$4 sm:$0xff]  }
  0x3d   : > { %3928 = vmatprep.subr.bf16.mxu0 %v4401_v31  ;;  %v456_v17 = vor.u32 %v455_v6, %v451_v2  ;;  %v519_v32 = vshrl.u32 %v4905_v13, 16  ;;  %v3553_v46 = vcombine.low %v3513_v42, %v3529_v44  ;;  %v3546_v52 = vcombine.low %v4887_v61, %v3522_v47  ;;  %v1659_v44 = vld [vmem:[#allocation2 + $0x14] sm:$0x1]  ;;  %v4446_v47 = vld [vmem:[%s5489_s2 + $0x8] sm:$0xff]  }
  0x3e   : > { %3967 = vmatpush3.bf16.msra.mxu1 %v4397_v19  ;;  %v4421_v19 = vld [vmem:[%s4720_s10 + $0xf8] ss:$8 sps:$4 sm:$0xff]   ;;  %v533_v53 = vshrl.u32 %v3550_v29, 16  ;;  %v3587_v13 = vcombine.low %v3512_v40, %v3513_v42  ;;  %v1633_v42 = vld [vmem:[#allocation2 + $0x10] sm:$0x1] }
  0x3f   : > { %1337 = vmatmul.mubr.bf16.gmra.mrb[12].mxu0 %v3581_v28  ;;  %3968 = vmatprep.subr.bf16.mxu1 %v4403_v36  ;;  %v3527_v28 = vld [vmem:[%s4720_s10 + $0x34] sm:$0x1]  ;;  %v3586_v30 = vcombine.low %v456_v17, %v463_v18  ;;  %v523_v36 = vrot.slane %v521_v21, 1  ;;  %v505_v58 = vshrl.u32 %v3546_v52, 16  ;;  %v4438_v21 = vld [vmem:[%s5489_s2 + $0x80] sm:$0xff]  }
  0x40   : > { %1442 = vmatprep.mubr.bf16.mxu0 %v3559_v24  ;;  %3929 = vmatpush3.bf16.msra.mxu0 %v4402_v35  ;;  %v3569_v24 = vcombine.low %v3508_v11, %v3509_v16  ;;  %v3551_v31 = vcombine.low %v3511_v26, %v3527_v28  ;;  %v4427_v35 = vld [vmem:[%s5488_s1 + $0x228] sm:$0xff]   ;;  %v4440_v29 = vld [vmem:[%s5489_s2 + $0x40] sm:$0xff]  }
  0x41   : > { %3930 = vmatprep.subr.bf16.mxu0 %v4405_v45  ;;  %1402 = vmatmul.mubr.bf16.gmra.mrb[12].mxu1 %v3583_v56  ;;  %v3552_v45 = vcombine.low %v3512_v40, %v3528_v43  ;;  %v4439_v28 = vld [vmem:[%s5489_s2 + $0xc8] sm:$0xff]   ;;  %v1634_v43 = vsel %vm4952_vm2, 0, %v1633_v42 }
  0x42   : > { %3969 = vmatpush3.bf16.msra.mxu1 %v4404_v41  ;;  %1507 = vmatprep.mubr.bf16.mxu1 %v4411_v60  ;;  %v542_v38 = vshll.u32 %v3551_v31, 16  ;;  %v4428_v41 = vld [vmem:[%s4720_s10 + $0x108] ss:$8 sps:$4 sm:$0xff]   ;;  %v540_v60 = vshrl.u32 %v3551_v31, 16  ;;  %v4442_v31 = vld [vmem:[%s5489_s2] sm:$0xff]  }
  0x43   : > { %3970 = vmatprep.subr.bf16.mxu1 %v4407_v51  ;;  %v3523_v51 = vld [vmem:[%s4720_s10 + $0x14] sm:$0x1]  ;;  %1635 = vst [vmem:[#allocation2 + $0x10] sm:$0x1] %v1634_v43 }
  0x44   : > { %3931 = vmatpush3.bf16.msra.mxu0 %v4406_v48  ;;  %v530_v48 = vrot.slane %v528_v34, 1  ;;  %v3547_v56 = vcombine.low %v4890_v62, %v3523_v51  ;;  %v544_v63 = vrot.slane %v542_v38, 1  ;;  %v524_v62 = vor.u32 %v523_v36, %v519_v32  ;;  %v4443_v32 = vld [vmem:[%s5489_s2 + $0xd0] sm:$0xff]   ;;  %v1656_v34 = vld [vmem:[#allocation2 + $0xc] sm:$0x1] }
  0x45   : > { %4197 = vmatprep.subr.bf16.mxu0 %v4410_v59  ;;  %v1639_v38 = vld [vmem:[#allocation2 + $0x20] sm:$0x1]  ;;  %v1648_v51 = vld [vmem:[#allocation2 + $0x38] sm:$0x1] }
  0x46   : > { %3971 = vmatpush3.bf16.msra.mxu1 %v4408_v54  ;;  %v549_v54 = vshll.u32 %v3552_v45, 16  ;;  %v514_v2 = vshll.u32 %v3547_v56, 16  ;;  %v531_v6 = vor.u32 %v530_v48, %v526_v33  ;;  %v545_v11 = vor.u32 %v544_v63, %v540_v60  ;;  %v1630_v33 = vld [vmem:[#allocation2 + $0x8] sm:$0x1]  ;;  %v4447_v48 = vld [vmem:[%s5489_s2 + $0xd8] sm:$0xff]  }
  0x47   : > { %1443 = vmatmul.mubr.bf16.vlgmr.msra.gmra.mrb[16].mxu0 %v4409_v57  ;;  %v537_v57 = vrot.slane %v535_v37, 1  ;;  %4008 = vmatprep.subr.bf16.mxu1 %v4440_v29  ;;  %v1631_v36 = vsel %vm4952_vm2, 0, %v1630_v33  ;;  %v1657_v37 = vsel %vm4959_vm4, 0, %v1656_v34  ;;  %v1640_v40 = vsel %vm4952_vm2, 0, %v1639_v38 }
  0x48   : > { %1450 = vmatprep.mubr.bf16.mxu0 %v3568_v55  ;;  %4198 = vmatpush3.bf16.msra.mxu0 %v4410_v59  ;;  %v556_v55 = vshll.u32 %v3553_v46, 16  ;;  %v507_v59 = vshll.u32 %v3546_v52, 16  ;;  %v3571_v15 = vcombine.low %v524_v62, %v531_v6  ;;  %1632 = vst [vmem:[#allocation2 + $0x8] sm:$0x1] %v1631_v36  ;;  %1658 = vst [vmem:[#allocation2 + $0xc] sm:$0x1] %v1657_v37 }
  0x49   : > { %4199 = vmatprep.subr.bf16.mxu0 %v4413_v1  ;;  %1508 = vmatmul.mubr.bf16.vlgmr.msra.gmra.mrb[16].mxu1 %v3560_v4  ;;  %v551_v4 = vrot.slane %v549_v54, 1  ;;  %v538_v10 = vor.u32 %v537_v57, %v533_v53  ;;  %1641 = vst [vmem:[#allocation2 + $0x20] sm:$0x1] %v1640_v40  ;;  %v1674_v52 = vld [vmem:[#allocation2 + $0x3c] sm:$0x1]  ;;  %v4450_v53 = vld [vmem:[%s5489_s2 + $0x10] sm:$0xff]  }
  0x4a   : > { %1515 = vmatprep.mubr.bf16.mxu1 %v4416_v7  ;;  %v509_v61 = vrot.slane %v507_v59, 1  ;;  %v516_v7 = vrot.slane %v514_v2, 1  ;;  %4009 = vmatpush3.bf16.msra.mxu1 %v4442_v31  ;;  %v1649_v54 = vsel %vm4952_vm2, 0, %v1648_v51  ;;  %v1642_v57 = vld [vmem:[#allocation2 + $0x28] sm:$0x1]  ;;  %v4452_v59 = vld [vmem:[%s5489_s2 + $0x58] sm:$0xff]  }
  0x4b   : > { %v3580_v16 = vcombine.low %v538_v10, %v545_v11  ;;  %1650 = vst [vmem:[#allocation2 + $0x38] sm:$0x1] %v1649_v54  ;;  %v1643_v60 = vsel %vm4952_vm2, 0, %v1642_v57  ;;  %v1677_v2 = vld [vmem:[#allocation2 + $0x44] sm:$0x1]  ;;  %v4457_v10 = vld [vmem:[%s5489_s2 + $0xa8] sm:$0xff]  }
  0x4c   : > { %4200 = vmatpush3.bf16.msra.mxu0 %v4413_v1  ;;  %v512_v1 = vshrl.u32 %v3547_v56, 16  ;;  %v510_v9 = vor.u32 %v509_v61, %v505_v58  ;;  %v4451_v56 = vld [vmem:[%s5489_s2 + $0xe0] sm:$0xff]   ;;  %v1668_v58 = vld [vmem:[#allocation2 + $0x2c] sm:$0x1]  ;;  %1644 = vst [vmem:[#allocation2 + $0x28] sm:$0x1] %v1643_v60 }
  0x4d   : > { %4201 = vmatprep.subr.bf16.mxu0 %v4415_v5  ;;  %v1669_v63 = vsel %vm4959_vm4, 0, %v1668_v58  ;;  %v4453_v61 = vld [vmem:[%s5489_s2 + $0xa0] sm:$0xff]   ;;  %v1671_v6 = vld [vmem:[#allocation2 + $0x34] sm:$0x1] }
  0x4e   : > { %v517_v12 = vor.u32 %v516_v7, %v512_v1  ;;  %1670 = vst [vmem:[#allocation2 + $0x2c] sm:$0x1] %v1669_v63  ;;  %v4455_v7 = vld [vmem:[%s5489_s2 + $0xe8] sm:$0xff]   ;;  %v4458_v11 = vld [vmem:[%s5489_s2 + $0x20] sm:$0xff]  }
  0x4f   : > { %1451 = vmatmul.mubr.bf16.gmra.mrb[20].mxu0 %v4414_v3  ;;  %v547_v3 = vshrl.u32 %v3552_v45, 16  ;;  %v4445_v45 = vld [vmem:[%s5489_s2 + $0x90] sm:$0xff]  }
  0x50   : > { %1458 = vmatprep.mubr.bf16.mxu0 %v3577_v8  ;;  %4202 = vmatpush3.bf16.msra.mxu0 %v4415_v5  ;;  %v554_v5 = vshrl.u32 %v3553_v46, 16  ;;  %v558_v8 = vrot.slane %v556_v55, 1  ;;  %v1660_v46 = vsel %vm4959_vm4, 0, %v1659_v44  ;;  %v1675_v55 = vsel %vm4959_vm4, 0, %v1674_v52 }
  0x51   : > { %4203 = vmatprep.subr.bf16.mxu0 %v4420_v14  ;;  %1516 = vmatmul.mubr.bf16.gmra.mrb[20].mxu1 %v3569_v24  ;;  %v552_v17 = vor.u32 %v551_v4, %v547_v3  ;;  %v1662_v24 = vld [vmem:[#allocation2 + $0x1c] sm:$0x1]  ;;  %1661 = vst [vmem:[#allocation2 + $0x14] sm:$0x1] %v1660_v46  ;;  %1676 = vst [vmem:[#allocation2 + $0x3c] sm:$0x1] %v1675_v55 }
  0x52   : > { %1523 = vmatprep.mubr.bf16.mxu1 %v4423_v23  ;;  %v559_v18 = vor.u32 %v558_v8, %v554_v5  ;;  %v1663_v27 = vsel %vm4959_vm4, 0, %v1662_v24  ;;  %v1678_v3 = vsel %vm4959_vm4, 0, %v1677_v2  ;;  %v1645_v4 = vld [vmem:[#allocation2 + $0x30] sm:$0x1]  ;;  %v4454_v5 = vld [vmem:[%s5489_s2 + $0x18] sm:$0xff]   ;;  %v4456_v8 = vld [vmem:[%s5489_s2 + $0x60] sm:$0xff]  }
  0x53   : > { %1664 = vst [vmem:[#allocation2 + $0x1c] sm:$0x1] %v1663_v27  ;;  %1679 = vst [vmem:[#allocation2 + $0x44] sm:$0x1] %v1678_v3  ;;  %v1646_v62 = vsel %vm4952_vm2, 0, %v1645_v4  ;;  %v4478_v24 = vld [vmem:[%s5489_s2 + $0x38] sm:$0xff]  }
  0x54   : > { %4204 = vmatpush3.bf16.msra.mxu0 %v4420_v14  ;;  %v3562_v14 = vcombine.low %v510_v9, %v517_v12  ;;  %1647 = vst [vmem:[#allocation2 + $0x30] sm:$0x1] %v1646_v62  ;;  %v1672_v9 = vsel %vm4959_vm4, 0, %v1671_v6  ;;  %v4577_v12 = vmov 0  }
  0x55   : > { %4205 = vmatprep.subr.bf16.mxu0 %v4422_v22  ;;  %1621 = vst [vmem:[#allocation2] sm:$0xf] %v4577_v12  ;;  %1622 = vst [vmem:[#allocation2 + $0x4] sm:$0x1] %v4577_v12 }
  0x56   : > { %1624 = vst [vmem:[#allocation2 + $0x48] sm:$0xf] %v4577_v12  ;;  %1625 = vst [vmem:[#allocation2 + $0x4c] sm:$0x1] %v4577_v12 }
  0x57   : > { %1459 = vmatmul.mubr.bf16.gmra.mrb[24].mxu0 %v4421_v19  ;;  %v3589_v19 = vcombine.low %v552_v17, %v559_v18  ;;  %1673 = vst [vmem:[#allocation2 + $0x34] sm:$0x1] %v1672_v9  ;;  %v4463_v17 = vld [vmem:[%s5489_s2 + $0xf8] sm:$0xff]   ;;  %v4464_v18 = vld [vmem:[%s5489_s2 + $0x70] sm:$0xff]  }
  0x58   : > { %1466 = vmatprep.mubr.bf16.mxu0 %v3586_v30  ;;  %4206 = vmatpush3.bf16.msra.mxu0 %v4422_v22  ;;  %v1636_v22 = vld [vmem:[#allocation2 + $0x18] sm:$0x1]  ;;  %v4441_v30 = vld [vmem:[%s5489_s2 + $0x88] sm:$0xff]  }
  0x59   : > { %4207 = vmatprep.subr.bf16.mxu0 %v4427_v35  ;;  %1524 = vmatmul.mubr.bf16.gmra.mrb[24].mxu1 %v3578_v49  ;;  %v1637_v25 = vsel %vm4952_vm2, 0, %v1636_v22  ;;  %v4448_v49 = vld [vmem:[%s5489_s2 + $0x50] sm:$0xff]   ;;  %v4473_v22 = vld [vmem:[%s5489_s2 + $0x78] sm:$0xff]  }
  0x5a   : > { %1531 = vmatprep.mubr.bf16.mxu1 %v4430_v50  ;;  %1638 = vst [vmem:[#allocation2 + $0x18] sm:$0x1] %v1637_v25  ;;  %v4449_v50 = vld [vmem:[%s5489_s2 + $0x98] sm:$0xff]   ;;  %v4483_v25 = vld [vmem:[%s5489_s2 + $0x140] sm:$0xff]  }
  0x5c   : > { %4208 = vmatpush3.bf16.msra.mxu0 %v4427_v35  ;;  %v4444_v35 = vld [vmem:[%s5489_s2 + $0x48] sm:$0xff]  }
  0x5d   : > { %4209 = vmatprep.subr.bf16.mxu0 %v4429_v39  ;;  %4010 = vmatprep.subr.bf16.mxu1 %v4444_v35 }
  0x5e   : > { %4011 = vmatpush3.bf16.msra.mxu1 %v4446_v47 }
  0x5f   : > { %1467 = vmatmul.mubr.bf16.gmra.mrb[28].mxu0 %v4428_v41  ;;  %4012 = vmatprep.subr.bf16.mxu1 %v4448_v49 }
  0x60   : > { %4210 = vmatpush3.bf16.msra.mxu0 %v4429_v39  ;;  %4213 = vmatprep.mubr.bf16.mxu0 %v3562_v14  ;;  %v1665_v39 = vld [vmem:[#allocation2 + $0x24] sm:$0x1]  ;;  %v4460_v14 = vld [vmem:[%s5489_s2 + $0x68] sm:$0xff]  }
  0x61   : > { %4211 = vmatprep.subr.bf16.mxu0 %v4434_v0  ;;  %1532 = vmatmul.mubr.bf16.gmra.mrb[28].mxu1 %v3587_v13  ;;  %v1666_v41 = vsel %vm4959_vm4, 0, %v1665_v39  ;;  %v4459_v13 = vld [vmem:[%s5489_s2 + $0xf0] sm:$0xff]  }
  0x62   : > { %1667 = vst [vmem:[#allocation2 + $0x24] sm:$0x1] %v1666_v41  ;;  %4013 = vmatpush3.bf16.msra.mxu1 %v4450_v53 }
  0x63   : > { %4014 = vmatprep.subr.bf16.mxu1 %v4452_v59 }
  0x64   : > { %4212 = vmatpush3.bf16.msra.mxu0 %v4434_v0  ;;  %v1651_v0 = vld [vmem:[#allocation2 + $0x40] sm:$0x1] }
  0x65   : > { %4048 = vmatprep.subr.bf16.mxu0 %v4437_v20  ;;  %v1652_v1 = vsel %vm4952_vm2, 0, %v1651_v0  ;;  %v4466_v20 = vld [vmem:[%s5489_s2 + $0x30] sm:$0xff]  }
  0x66   : > { %1653 = vst [vmem:[#allocation2 + $0x40] sm:$0x1] %v1652_v1  ;;  %4015 = vmatpush3.bf16.msra.mxu1 %v4454_v5 }
  0x67   : > { %4214 = vmatmul.mubr.bf16.vlgmr.msra.gmra.mrb[32].mxu0 %v3571_v15  ;;  %4016 = vmatprep.subr.bf16.mxu1 %v4456_v8  ;;  %v4461_v15 = vld [vmem:[%s5489_s2 + $0xb0] sm:$0xff]  }
  0x68   : > { %4217 = vmatprep.mubr.bf16.mxu0 %v3580_v16  ;;  %4049 = vmatpush3.bf16.msra.mxu0 %v4438_v21  ;;  %v4462_v16 = vld [vmem:[%s5489_s2 + $0x28] sm:$0xff]   ;;  %v4472_v21 = vld [vmem:[%s5489_s2 + $0x1c0] sm:$0xff]  }
  0x69   : > { %4050 = vmatprep.subr.bf16.mxu0 %v4439_v28 }
  0x6a   : > { %4017 = vmatpush3.bf16.msra.mxu1 %v4458_v11 }
  0x6b   : > { %4018 = vmatprep.subr.bf16.mxu1 %v4460_v14 }
  0x6c   : > { %4051 = vmatpush3.bf16.msra.mxu0 %v4441_v30 }
  0x6d   : > { %4052 = vmatprep.subr.bf16.mxu0 %v4443_v32 }
  0x6e   : > { %4019 = vmatpush3.bf16.msra.mxu1 %v4462_v16 }
  0x6f   : > { %4218 = vmatmul.mubr.bf16.gmra.mrb[36].mxu0 %v3589_v19  ;;  %v4465_v19 = vld [vmem:[%s5489_s2 + $0xb8] sm:$0xff]   ;;  %4020 = vmatprep.subr.bf16.mxu1 %v4464_v18 }
  0x70   : > { %4053 = vmatpush3.bf16.msra.mxu0 %v4445_v45 }
  0x71   : > { %4054 = vmatprep.subr.bf16.mxu0 %v4447_v48 }
  0x72   : > { %4021 = vmatpush3.bf16.msra.mxu1 %v4466_v20 }
  0x73   : > { %4022 = vmatprep.subr.bf16.mxu1 %v4473_v22 }
  0x74   : > { %4055 = vmatpush3.bf16.msra.mxu0 %v4449_v50 }
  0x75   : > { %4056 = vmatprep.subr.bf16.mxu0 %v4451_v56 }
  0x76   : > { %4023 = vmatpush3.bf16.msra.mxu1 %v4478_v24 }
  0x77   : > { %4088 = vmatprep.subr.bf16.mxu1 %v4483_v25 }
  0x78   : > { %4057 = vmatpush3.bf16.msra.mxu0 %v4453_v61 }
  0x79   : > { %4058 = vmatprep.subr.bf16.mxu0 %v4455_v7 }
  0x7c   : > { %4059 = vmatpush3.bf16.msra.mxu0 %v4457_v10 }
  0x7d   : > { %4060 = vmatprep.subr.bf16.mxu0 %v4459_v13 }
  0x80   : > { %4061 = vmatpush3.bf16.msra.mxu0 %v4461_v15 }
  0x81   : > { %4062 = vmatprep.subr.bf16.mxu0 %v4463_v17 }
  0x84   : > { %4063 = vmatpush3.bf16.msra.mxu0 %v4465_v19 }
  0x85   : > { %4128 = vmatprep.subr.bf16.mxu0 %v4472_v21 }
  0xfa   : > { %v3852_v26 = vpop.f32.mrb[0].mxu0 }
  0xfb   : > { %v3853_v27 = vpop.f32.mrb[1].mxu0  ;;  %v3892_v32 = vpop.f32.mrb[0].mxu1 }
  0xfc   : > { %v3854_v28 = vadd.f32 %v3853_v27, %v3852_v26  ;;  %v3855_v29 = vpop.f32.mrb[2].mxu0  ;;  %v3893_v33 = vpop.f32.mrb[1].mxu1 }
  0xfd   : > { %v3856_v30 = vpop.f32.mrb[3].mxu0  ;;  %v3894_v34 = vadd.f32 %v3893_v33, %v3892_v32  ;;  %v3895_v35 = vpop.f32.mrb[2].mxu1 }
  0xfe   : > { %v3857_v31 = vadd.f32 %v3856_v30, %v3855_v29  ;;  %v3896_v36 = vpop.f32.mrb[3].mxu1 }
  0xff   : > { %v1380_v37 = vadd.f32 %v3894_v34, %v3854_v28  ;;  %v3897_v38 = vadd.f32 %v3896_v36, %v3895_v35 }
 0x101   : > { %v1383_v41 = vadd.f32 %v3897_v38, %v3857_v31 }
 0x102   : > { %v3858_v39 = vpop.f32.mrb[4].mxu0 }
 0x103   : > { %v3859_v40 = vpop.f32.mrb[5].mxu0  ;;  %v3898_v46 = vpop.f32.mrb[4].mxu1 }
 0x104   : > { %v3860_v42 = vadd.f32 %v3859_v40, %v3858_v39  ;;  %v3861_v43 = vpop.f32.mrb[6].mxu0  ;;  %v3899_v47 = vpop.f32.mrb[5].mxu1 }
 0x105   : > { %v3862_v44 = vpop.f32.mrb[7].mxu0  ;;  %v3900_v48 = vadd.f32 %v3899_v47, %v3898_v46  ;;  %v3901_v49 = vpop.f32.mrb[6].mxu1 }
 0x106   : > { %v3863_v45 = vadd.f32 %v3862_v44, %v3861_v43  ;;  %v3902_v50 = vpop.f32.mrb[7].mxu1 }
 0x107   : > { %v1388_v51 = vadd.f32 %v3900_v48, %v3860_v42  ;;  %v3903_v52 = vadd.f32 %v3902_v50, %v3901_v49 }
 0x109   : > { %v1391_v54 = vadd.f32 %v3903_v52, %v3863_v45 }
 0x10a   : > { %v3864_v53 = vpop.f32.mrb[8].mxu0 }
 0x10b   : > { %v3865_v55 = vpop.f32.mrb[9].mxu0  ;;  %v3904_v60 = vpop.f32.mrb[8].mxu1 }
 0x10c   : > { %v3866_v56 = vadd.f32 %v3865_v55, %v3864_v53  ;;  %v3867_v57 = vpop.f32.mrb[10].mxu0  ;;  %v3905_v63 = vpop.f32.mrb[9].mxu1 }
 0x10d   : > { %v3868_v58 = vpop.f32.mrb[11].mxu0  ;;  %v3906_v0 = vadd.f32 %v3905_v63, %v3904_v60  ;;  %v3907_v1 = vpop.f32.mrb[10].mxu1 }
 0x10e   : > { %v3869_v59 = vadd.f32 %v3868_v58, %v3867_v57  ;;  %v3908_v2 = vpop.f32.mrb[11].mxu1 }
 0x10f   : > { %v1396_v61 = vadd.f32 %v3906_v0, %v3866_v56  ;;  %v3909_v3 = vadd.f32 %v3908_v2, %v3907_v1 }
 0x111   : > { %v1399_v62 = vadd.f32 %v3909_v3, %v3869_v59 }
 0x112   : > { %v3870_v4 = vpop.f32.mrb[12].mxu0 }
 0x113   : > { %v3871_v5 = vpop.f32.mrb[13].mxu0 }
 0x114   : > { %v3872_v6 = vadd.f32 %v3871_v5, %v3870_v4  ;;  %v3873_v7 = vpop.f32.mrb[14].mxu0  ;;  %v3910_v10 = vpop.f32.mrb[12].mxu1 }
 0x115   : > { %v3874_v8 = vpop.f32.mrb[15].mxu0  ;;  %v3911_v12 = vpop.f32.mrb[13].mxu1 }
 0x116   : > { %v3875_v9 = vadd.f32 %v3874_v8, %v3873_v7  ;;  %v3912_v14 = vadd.f32 %v3911_v12, %v3910_v10  ;;  %v3913_v15 = vpop.f32.mrb[14].mxu1 }
 0x117   : > { %v3914_v18 = vpop.f32.mrb[15].mxu1 }
 0x118   : > { %v1404_v20 = vadd.f32 %v3912_v14, %v3872_v6  ;;  %v3915_v21 = vadd.f32 %v3914_v18, %v3913_v15 }
 0x11a   : > { %v3932_v11 = vpop.f32.mrb[16].mxu0  ;;  %v1407_v25 = vadd.f32 %v3915_v21, %v3875_v9 }
 0x11b   : > { %v3933_v13 = vpop.f32.mrb[17].mxu0 }
 0x11c   : > { %v3934_v16 = vadd.f32 %v3933_v13, %v3932_v11  ;;  %v3935_v17 = vpop.f32.mrb[18].mxu0  ;;  %v3972_v27 = vpop.f32.mrb[16].mxu1 }
 0x11d   : > { %v3936_v19 = vpop.f32.mrb[19].mxu0  ;;  %v3973_v29 = vpop.f32.mrb[17].mxu1 }
 0x11e   : > { %v1445_v22 = vadd.f32 %v3934_v16, %v1380_v37  ;;  %v3937_v24 = vadd.f32 %v3936_v19, %v3935_v17  ;;  %v3974_v31 = vadd.f32 %v3973_v29, %v3972_v27  ;;  %v3975_v32 = vpop.f32.mrb[18].mxu1 }
 0x11f   : > { %v3976_v35 = vpop.f32.mrb[19].mxu1 }
 0x120   : > { %v1448_v26 = vadd.f32 %v3937_v24, %v1383_v41  ;;  %v3977_v38 = vadd.f32 %v3976_v35, %v3975_v32  ;;  %v1510_v42 = vadd.f32 %v3974_v31, %v1445_v22 }
 0x122   : > { %v3938_v28 = vpop.f32.mrb[20].mxu0  ;;  %v1513_v44 = vadd.f32 %v3977_v38, %v1448_v26  ;;  %v1798_v38 = vld [vmem:[#allocation2 + $0x18] sm:$0xf] }
 0x123   : > { %v3939_v30 = vpop.f32.mrb[21].mxu0 }
 0x124   : > { %v3940_v33 = vadd.f32 %v3939_v30, %v3938_v28  ;;  %v3941_v34 = vpop.f32.mrb[22].mxu0  ;;  %v3978_v37 = vpop.f32.mrb[20].mxu1 }
 0x125   : > { %v3942_v36 = vpop.f32.mrb[23].mxu0  ;;  %v3979_v46 = vpop.f32.mrb[21].mxu1 }
 0x126   : > { %v1453_v39 = vadd.f32 %v3940_v33, %v1388_v51  ;;  %v3943_v40 = vadd.f32 %v3942_v36, %v3941_v34  ;;  %v3980_v47 = vadd.f32 %v3979_v46, %v3978_v37  ;;  %v3981_v48 = vpop.f32.mrb[22].mxu1  ;;  %v1786_v46 = vld [vmem:[#allocation2 + $0x8] sm:$0xf] }
 0x127   : > { %v3982_v52 = vpop.f32.mrb[23].mxu1 }
 0x128   : > { %v1456_v43 = vadd.f32 %v3943_v40, %v1391_v54  ;;  %v3983_v55 = vadd.f32 %v3982_v52, %v3981_v48  ;;  %v1518_v58 = vadd.f32 %v3980_v47, %v1453_v39  ;;  %v1801_v39 = vld [vmem:[#allocation2 + $0x1c] sm:$0x1]  ;;  %v1789_v52 = vld [vmem:[#allocation2 + $0xc] sm:$0x1] }
 0x12a   : > { %v3944_v45 = vpop.f32.mrb[24].mxu0  ;;  %v1521_v51 = vadd.f32 %v3983_v55, %v1456_v43 }
 0x12b   : > { %v3945_v41 = vpop.f32.mrb[25].mxu0 }
 0x12c   : > { %v3946_v49 = vadd.f32 %v3945_v41, %v3944_v45  ;;  %v3947_v50 = vpop.f32.mrb[26].mxu0  ;;  %v3984_v60 = vpop.f32.mrb[24].mxu1 }
 0x12d   : > { %v3948_v53 = vpop.f32.mrb[27].mxu0  ;;  %v3985_v54 = vpop.f32.mrb[25].mxu1 }
 0x12e   : > { %v1461_v56 = vadd.f32 %v3946_v49, %v1396_v61  ;;  %v3949_v57 = vadd.f32 %v3948_v53, %v3947_v50  ;;  %v3986_v1 = vadd.f32 %v3985_v54, %v3984_v60  ;;  %v3987_v2 = vpop.f32.mrb[26].mxu1  ;;  %v1804_v60 = vld [vmem:[#allocation2 + $0x20] sm:$0xf] }
 0x12f   : > { %v3988_v5 = vpop.f32.mrb[27].mxu1 }
 0x130   : > { %v1464_v59 = vadd.f32 %v3949_v57, %v1399_v62  ;;  %v3989_v7 = vadd.f32 %v3988_v5, %v3987_v2  ;;  %v1526_v10 = vadd.f32 %v3986_v1, %v1461_v56  ;;  %v1807_v2 = vld [vmem:[#allocation2 + $0x24] sm:$0x1] }
 0x132   : > { %v3950_v63 = vpop.f32.mrb[28].mxu0  ;;  %v5089_v61 = vadd.f32 %v3989_v7, %v1464_v59 }
 0x133   : > { %v3951_v0 = vpop.f32.mrb[29].mxu0 }
 0x134   : > { %v3952_v3 = vadd.f32 %v3951_v0, %v3950_v63  ;;  %v3953_v4 = vpop.f32.mrb[30].mxu0  ;;  %v3990_v12 = vpop.f32.mrb[28].mxu1 }
 0x135   : > { %v3954_v6 = vpop.f32.mrb[31].mxu0  ;;  %v3991_v62 = vpop.f32.mrb[29].mxu1 }
 0x136   : > { %v1469_v8 = vadd.f32 %v3952_v3, %v1404_v20  ;;  %v3955_v9 = vadd.f32 %v3954_v6, %v3953_v4  ;;  %v3992_v14 = vadd.f32 %v3991_v62, %v3990_v12  ;;  %v3993_v15 = vpop.f32.mrb[30].mxu1 }
 0x137   : > { %v3994_v18 = vpop.f32.mrb[31].mxu1 }
 0x138   : > { %v1472_v11 = vadd.f32 %v3955_v9, %v1407_v25  ;;  %v3995_v22 = vadd.f32 %v3994_v18, %v3993_v15  ;;  %v1534_v20 = vadd.f32 %v3992_v14, %v1469_v8  ;;  %v1792_v9 = vld [vmem:[#allocation2 + $0x10] sm:$0xf] }
 0x13a   : > { %v4215_v13 = vpop.f32.mrb[32].mxu0  ;;  %v1537_v31 = vadd.f32 %v3995_v22, %v1472_v11 }
 0x13b   : > { %v1583_v16 = vadd.f32 %v4215_v13, %v1518_v58  ;;  %v1574_v17 = vpop.f32.mrb[33].mxu0 }
 0x13c   : > { %v1575_v19 = vadd.f32 %v1574_v17, %v1510_v42  ;;  %v4216_v21 = vpop.f32.mrb[34].mxu0 }
 0x13d   : > { %v1607_v24 = vmax.f32 %v1583_v16, 0.0  ;;  %v1586_v26 = vadd.f32 %v4216_v21, %v1521_v51  ;;  %v1577_v27 = vpop.f32.mrb[35].mxu0 }
 0x13e   : > { %v1605_v28 = vmax.f32 %v1575_v19, 0.0  ;;  %v1578_v29 = vadd.f32 %v1577_v27, %v1513_v44 }
 0x13f   : > { %v3830_v25 = vpack.c.bf16 %v1607_v24, %v1607_v24  ;;  %v1608_v30 = vmax.f32 %v1586_v26, 0.0  ;;  %v1842_v24 = vld [vmem:[#allocation2 + $0x4] sm:$0x1] }
 0x140   : > { %v3828_v32 = vpack.c.bf16 %v1605_v28, %v1605_v28  ;;  %v1606_v33 = vmax.f32 %v1578_v29, 0.0  ;;  %v5114_v28 = vld [vmem:[#allocation2] sm:$0xf] }
 0x141   : > { %v1721_v34 = vshrl.u32 %v3830_v25, 16  ;;  %v3831_v35 = vpack.c.bf16 %v1608_v30, %v1608_v30  ;;  %v1724_v36 = vshll.u32 %v3830_v25, 16 }
 0x142   : > { %v1705_v40 = vshrl.u32 %v3828_v32, 16  ;;  %v1708_v42 = vshll.u32 %v3828_v32, 16  ;;  %v3829_v43 = vpack.c.bf16 %v1606_v33, %v1606_v33  ;;  %v4219_v37 = vpop.f32.mrb[36].mxu0  ;;  %v1822_v33 = vld [vmem:[#allocation2 + $0x38] sm:$0xf] }
 0x143   : > { %v1723_v45 = vrot.slane %v1721_v34, 7  ;;  %v1729_v41 = vshrl.u32 %v3831_v35, 16  ;;  %v1732_v47 = vshll.u32 %v3831_v35, 16  ;;  %v1599_v44 = vadd.f32 %v4219_v37, %v1534_v20  ;;  %v1590_v48 = vpop.f32.mrb[37].mxu0  ;;  %v1850_v20 = vld [vmem:[#allocation2] sm:$0xe] }
 0x144   : > { %v1707_v50 = vrot.slane %v1705_v40, 7  ;;  %v1713_v53 = vshrl.u32 %v3829_v43, 16  ;;  %v1716_v55 = vshll.u32 %v3829_v43, 16  ;;  %v1591_v56 = vadd.f32 %v1590_v48, %v1526_v10  ;;  %v4220_v57 = vpop.f32.mrb[38].mxu0  ;;  %v1795_v10 = vld [vmem:[#allocation2 + $0x14] sm:$0x1] }
 0x145   : > { %v1726_v58 = vor.u32 %v1724_v36, %v1723_v45  ;;  %v1727_v59 = vrot.slane %v1723_v45, 4  ;;  %v1731_v51 = vrot.slane %v1729_v41, 7  ;;  %v1611_v63 = vmax.f32 %v1599_v44, 0.0  ;;  %v1593_v54 = vpop.f32.mrb[39].mxu0  ;;  %v1825_v36 = vld [vmem:[#allocation2 + $0x3c] sm:$0x1] }
 0x146   : > { %v1710_v0 = vor.u32 %v1708_v42, %v1707_v50  ;;  %v1711_v1 = vrot.slane %v1707_v50, 4  ;;  %v1715_v3 = vrot.slane %v1713_v53, 7  ;;  %v1609_v4 = vmax.f32 %v1591_v56, 0.0  ;;  %v1828_v56 = vld [vmem:[#allocation2 + $0x40] sm:$0xf] }
 0x147   : > { %v1799_v5 = vsel %vm5093_vm6, %v1726_v58, %v1798_v38  ;;  %v1802_v6 = vsel %vm4952_vm2, %v1727_v59, %v1801_v39  ;;  %v1734_v7 = vor.u32 %v1732_v47, %v1731_v51  ;;  %v1735_v8 = vrot.slane %v1731_v51, 4  ;;  %v1810_v38 = vld [vmem:[#allocation2 + $0x28] sm:$0xf] }
 0x148   : > { %1800 = vst [vmem:[#allocation2 + $0x18] sm:$0xf] %v1799_v5  ;;  %1803 = vst [vmem:[#allocation2 + $0x1c] sm:$0x1] %v1802_v6  ;;  %v1787_v11 = vsel %vm5093_vm6, %v1710_v0, %v1786_v46  ;;  %v1790_v12 = vsel %vm4952_vm2, %v1711_v1, %v1789_v52  ;;  %v1718_v62 = vor.u32 %v1716_v55, %v1715_v3  ;;  %v1719_v13 = vrot.slane %v1715_v3, 4 }
 0x149   : > { %1788 = vst [vmem:[#allocation2 + $0x8] sm:$0xf] %v1787_v11  ;;  %1791 = vst [vmem:[#allocation2 + $0xc] sm:$0x1] %v1790_v12  ;;  %v1805_v14 = vsel %vm5093_vm6, %v1734_v7, %v1804_v60  ;;  %v1808_v15 = vsel %vm4952_vm2, %v1735_v8, %v1807_v2  ;;  %v3834_v16 = vpack.c.bf16 %v1611_v63, %v1611_v63  ;;  %v1816_v0 = vld [vmem:[#allocation2 + $0x30] sm:$0xf] }
 0x14a   : > { %v3832_v17 = vpack.c.bf16 %v1609_v4, %v1609_v4  ;;  %1806 = vst [vmem:[#allocation2 + $0x20] sm:$0xf] %v1805_v14  ;;  %1809 = vst [vmem:[#allocation2 + $0x24] sm:$0x1] %v1808_v15  ;;  %v1793_v18 = vsel %vm5093_vm6, %v1718_v62, %v1792_v9  ;;  %v1796_v19 = vsel %vm4952_vm2, %v1719_v13, %v1795_v10  ;;  %v1819_v1 = vld [vmem:[#allocation2 + $0x34] sm:$0x1] }
 0x14b   : > { %v1602_v21 = vadd.f32 %v4220_v57, %v1537_v31  ;;  %v1594_v22 = vadd.f32 %v1593_v54, %v5089_v61  ;;  %1794 = vst [vmem:[#allocation2 + $0x10] sm:$0xf] %v1793_v18  ;;  %1797 = vst [vmem:[#allocation2 + $0x14] sm:$0x1] %v1796_v19  ;;  %v1753_v26 = vshrl.u32 %v3834_v16, 16  ;;  %v1756_v32 = vshll.u32 %v3834_v16, 16 }
 0x14c   : > { %v1737_v27 = vshrl.u32 %v3832_v17, 16  ;;  %v1740_v35 = vshll.u32 %v3832_v17, 16  ;;  %v1813_v31 = vld [vmem:[#allocation2 + $0x2c] sm:$0x1]  ;;  %v3678_v40 = vcombine.low %v1850_v20, %v1842_v24  ;;  %v5117_v42 = vcombine.low %v5114_v28, %v1842_v24  ;;  %v1831_v57 = vld [vmem:[#allocation2 + $0x44] sm:$0x1] }
 0x14d   : > { %v1612_v29 = vmax.f32 %v1602_v21, 0.0  ;;  %v1610_v25 = vmax.f32 %v1594_v22, 0.0  ;;  %v1755_v30 = vrot.slane %v1753_v26, 7  ;;  %v4477_v18 = vld [vmem:[%s5489_s2 + $0x180] sm:$0xff]  }
 0x14e   : > { %v1739_v34 = vrot.slane %v1737_v27, 7  ;;  %v1950_v4 = vshll.u32 %v5117_v42, 16  ;;  %v2027_v9 = vrot.slane %v3678_v40, 1  ;;  %v1948_v21 = vshrl.u32 %v5117_v42, 16 }
 0x14f   : > { %v3835_v39 = vpack.c.bf16 %v1612_v29, %v1612_v29  ;;  %v3833_v61 = vpack.c.bf16 %v1610_v25, %v1610_v25  ;;  %v1758_v43 = vor.u32 %v1756_v32, %v1755_v30  ;;  %v1759_v37 = vrot.slane %v1755_v30, 4  ;;  %v5148_v16 = vld [vmem:[#allocation2 + $0x18] sm:$0xf]  ;;  %v1845_v19 = vld [vmem:[#allocation2 + $0x1c] sm:$0x1]  ;;  %v4481_v29 = vld [vmem:[%s5489_s2 + $0x1c8] sm:$0xff]  }
 0x150   : > { %v1742_v45 = vor.u32 %v1740_v35, %v1739_v34  ;;  %v1743_v46 = vrot.slane %v1739_v34, 4  ;;  %v1843_v58 = vld [vmem:[#allocation2 + $0xc] sm:$0x1]  ;;  %v1851_v59 = vld [vmem:[#allocation2 + $0x8] sm:$0xe]  ;;  %v1952_v22 = vrot.slane %v1950_v4, 1 }
 0x151   : > { %v1761_v41 = vshrl.u32 %v3835_v39, 16  ;;  %v1764_v47 = vshll.u32 %v3835_v39, 16  ;;  %v1745_v44 = vshrl.u32 %v3833_v61, 16  ;;  %v1748_v48 = vshll.u32 %v3833_v61, 16  ;;  %v5127_v63 = vld [vmem:[#allocation2 + $0x8] sm:$0xf] }
 0x152   : > { %v1823_v50 = vsel %vm5093_vm6, %v1758_v43, %v1822_v33  ;;  %v1826_v52 = vsel %vm4952_vm2, %v1759_v37, %v1825_v36  ;;  %v1811_v53 = vsel %vm5093_vm6, %v1742_v45, %v1810_v38  ;;  %v1814_v55 = vsel %vm4952_vm2, %v1743_v46, %v1813_v31  ;;  %v5129_v54 = vld [vmem:[#allocation2 + $0x10] sm:$0xf]  ;;  %v5134_v10 = vld [vmem:[#allocation2 + $0x8] sm:$0xf]  ;;  %v5144_v14 = vld [vmem:[#allocation2 + $0x20] sm:$0xf] }
 0x153   : > { %1824 = vst [vmem:[#allocation2 + $0x38] sm:$0xf] %v1823_v50  ;;  %1827 = vst [vmem:[#allocation2 + $0x3c] sm:$0x1] %v1826_v52  ;;  %v1763_v51 = vrot.slane %v1761_v41, 7  ;;  %v1747_v60 = vrot.slane %v1745_v44, 7  ;;  %v3721_v2 = vcombine.low %v5127_v63, %v5129_v54  ;;  %v3679_v3 = vcombine.low %v1851_v59, %v1843_v58 }
 0x154   : > { %1812 = vst [vmem:[#allocation2 + $0x28] sm:$0xf] %v1811_v53  ;;  %1815 = vst [vmem:[#allocation2 + $0x2c] sm:$0x1] %v1814_v55  ;;  %v5146_v15 = vld [vmem:[#allocation2 + $0x10] sm:$0xf]  ;;  %v3671_v23 = vcombine.low %v5134_v10, %v1843_v58  ;;  %v3673_v33 = vcombine.low %v5148_v16, %v1845_v19  ;;  %v1953_v61 = vor.u32 %v1952_v22, %v1948_v21 }
 0x155   : > { %v1766_v5 = vor.u32 %v1764_v47, %v1763_v51  ;;  %v1767_v6 = vrot.slane %v1763_v51, 4  ;;  %v1750_v7 = vor.u32 %v1748_v48, %v1747_v60  ;;  %v1751_v8 = vrot.slane %v1747_v60, 4  ;;  %3084 = vmatprep.mubr.bf16.mxu0 %v3721_v2  ;;  %v1844_v49 = vld [vmem:[#allocation2 + $0x14] sm:$0x1]  ;;  %v1852_v24 = vld [vmem:[#allocation2 + $0x10] sm:$0xe] }
 0x156   : > { %v2028_v17 = vrot.slane %v3679_v3, 1  ;;  %v1853_v26 = vld [vmem:[#allocation2 + $0x18] sm:$0xe]  ;;  %v1957_v30 = vshll.u32 %v3671_v23, 16  ;;  %v3672_v32 = vcombine.low %v5146_v15, %v1844_v49  ;;  %v5164_v34 = vld [vmem:[#allocation2 + $0x20] sm:$0xf]  ;;  %v3680_v35 = vcombine.low %v1852_v24, %v1844_v49 }
 0x157   : > { %v1829_v11 = vsel %vm5093_vm6, %v1766_v5, %v1828_v56  ;;  %v1832_v12 = vsel %vm4952_vm2, %v1767_v6, %v1831_v57  ;;  %v1817_v62 = vsel %vm5093_vm6, %v1750_v7, %v1816_v0  ;;  %v1820_v13 = vsel %vm4952_vm2, %v1751_v8, %v1819_v1  ;;  %v5155_v20 = vld [vmem:[#allocation2 + $0x18] sm:$0xf]  ;;  %v5168_v31 = vld [vmem:[#allocation2 + $0x24] sm:$0x1]  ;;  %v4484_v43 = vld [vmem:[%s5489_s2 + $0x188] sm:$0xff]  }
 0x158   : > { %1830 = vst [vmem:[#allocation2 + $0x40] sm:$0xf] %v1829_v11  ;;  %1833 = vst [vmem:[#allocation2 + $0x44] sm:$0x1] %v1832_v12  ;;  %v3720_v27 = vcombine.low %v2027_v9, %v2028_v17  ;;  %v3730_v25 = vcombine.low %v5155_v20, %v5144_v14  ;;  %v3681_v36 = vcombine.low %v1853_v26, %v1845_v19  ;;  %v1955_v40 = vshrl.u32 %v3671_v23, 16  ;;  %v4490_v47 = vld [vmem:[%s5489_s2 + $0x1d0] sm:$0xff]  }
 0x159   : > { %1818 = vst [vmem:[#allocation2 + $0x30] sm:$0xf] %v1817_v62  ;;  %1821 = vst [vmem:[#allocation2 + $0x34] sm:$0x1] %v1820_v13  ;;  %v1959_v42 = vrot.slane %v1957_v30, 1  ;;  %v1964_v37 = vshll.u32 %v3672_v32, 16  ;;  %v3674_v50 = vcombine.low %v5164_v34, %v5168_v31  ;;  %v3718_v2 = vcombine.low %v5114_v28, %v5134_v10 }
 0x15a   : > { %3085 = vmatmul.mubr.bf16.vlgmr.msra.gmra.mrb[40].mxu0 %v3720_v27  ;;  %v1962_v45 = vshrl.u32 %v3672_v32, 16  ;;  %v1971_v46 = vshll.u32 %v3673_v33, 16  ;;  %v2029_v41 = vrot.slane %v3680_v35, 1  ;;  %v1969_v55 = vshrl.u32 %v3673_v33, 16  ;;  %v4487_v60 = vld [vmem:[%s5489_s2 + $0x100] sm:$0xff]   ;;  %v4494_v6 = vld [vmem:[%s5489_s2 + $0x148] sm:$0xff]  }
 0x15b   : > { %v5166_v38 = vld [vmem:[#allocation2 + $0x28] sm:$0xf]  ;;  %v1847_v39 = vld [vmem:[#allocation2 + $0x2c] sm:$0x1]  ;;  %3092 = vmatprep.mubr.bf16.mxu0 %v3730_v25  ;;  %4129 = vmatpush3.bf16.msra.mxu0 %v4477_v18  ;;  %v1960_v44 = vor.u32 %v1959_v42, %v1955_v40  ;;  %v1966_v48 = vrot.slane %v1964_v37, 1  ;;  %v2030_v57 = vrot.slane %v3681_v36, 1  ;;  %v3727_v42 = vcombine.low %v5146_v15, %v5148_v16 }
 0x15c   : > { %4130 = vmatprep.subr.bf16.mxu0 %v4481_v29  ;;  %v3675_v52 = vcombine.low %v5166_v38, %v1847_v39  ;;  %v1855_v53 = vld [vmem:[#allocation2 + $0x28] sm:$0xe]  ;;  %v1973_v56 = vrot.slane %v1971_v46, 1  ;;  %v1978_v0 = vshll.u32 %v3674_v50, 16  ;;  %v1854_v1 = vld [vmem:[#allocation2 + $0x20] sm:$0xe] }
 0x15d   : > { %v3719_v59 = vcombine.low %v1953_v61, %v1960_v44  ;;  %v1967_v51 = vor.u32 %v1966_v48, %v1962_v45  ;;  %v3729_v4 = vcombine.low %v2029_v41, %v2030_v57  ;;  %v5186_v5 = vld [vmem:[#allocation2 + $0x28] sm:$0xf]  ;;  %v4495_v7 = vld [vmem:[%s5489_s2 + $0x190] sm:$0xff]   ;;  %v3683_v10 = vcombine.low %v1855_v53, %v1847_v39  ;;  %v4497_v13 = vld [vmem:[%s5489_s2 + $0x1d8] sm:$0xff]  }
 0x15e   : > { %v1974_v3 = vor.u32 %v1973_v56, %v1969_v55  ;;  %v1985_v8 = vshll.u32 %v3675_v52, 16  ;;  %v4496_v28 = vld [vmem:[%s5489_s2 + $0x108] sm:$0xff]   ;;  %v3682_v18 = vcombine.low %v1854_v1, %v5168_v31  ;;  %v5207_v49 = vld [vmem:[#allocation2 + $0x38] sm:$0xf]  ;;  %v5209_v19 = vld [vmem:[#allocation2 + $0x3c] sm:$0x1] }
 0x15f   : > { %4131 = vmatpush3.bf16.msra.mxu0 %v4484_v43  ;;  %3019 = vmatprep.mubr.bf16.mxu1 %v3719_v59  ;;  %v1980_v23 = vrot.slane %v1978_v0, 1  ;;  %v1983_v21 = vshrl.u32 %v3675_v52, 16  ;;  %v5211_v22 = vld [vmem:[#allocation2 + $0x10] sm:$0xf]  ;;  %v5213_v24 = vld [vmem:[#allocation2 + $0x14] sm:$0x1]  ;;  %v5225_v33 = vcombine.low %v5207_v49, %v5209_v19 }
 0x160   : > { %v5179_v58 = vld [vmem:[#allocation2 + $0x30] sm:$0xf]  ;;  %4132 = vmatprep.subr.bf16.mxu0 %v4490_v47  ;;  %v5201_v12 = vld [vmem:[#allocation2 + $0x34] sm:$0x1]  ;;  %3020 = vmatmul.mubr.bf16.vlgmr.msra.gmra.mrb[32].mxu1 %v3718_v2  ;;  %v3728_v62 = vcombine.low %v1967_v51, %v1974_v3  ;;  %v1987_v17 = vrot.slane %v1985_v8, 1  ;;  %v4500_v27 = vld [vmem:[%s5489_s2 + $0x198] sm:$0xff]   ;;  %v3702_v40 = vcombine.low %v5211_v22, %v5213_v24 }
 0x161   : > { %v3739_v9 = vcombine.low %v5186_v5, %v5179_v58  ;;  %v5199_v11 = vld [vmem:[#allocation2 + $0x30] sm:$0xf]  ;;  %4089 = vmatpush3.bf16.msra.mxu1 %v4487_v60  ;;  %v1976_v29 = vshrl.u32 %v3674_v50, 16  ;;  %v2032_v25 = vrot.slane %v3683_v10, 1  ;;  %v5227_v36 = vld [vmem:[#allocation2 + $0x18] sm:$0xf] }
 0x162   : > { %3093 = vmatmul.mubr.bf16.gmra.mrb[44].mxu0 %v3729_v4  ;;  %3027 = vmatprep.mubr.bf16.mxu1 %v3728_v62  ;;  %v4499_v26 = vld [vmem:[%s5489_s2 + $0x150] sm:$0xff]   ;;  %v3676_v30 = vcombine.low %v5199_v11, %v5201_v12  ;;  %v1988_v32 = vor.u32 %v1987_v17, %v1983_v21  ;;  %v5229_v31 = vld [vmem:[#allocation2 + $0x1c] sm:$0x1]  ;;  %v2031_v39 = vrot.slane %v3682_v18, 1  ;;  %v5238_v45 = vld [vmem:[#allocation2 + $0x40] sm:$0xf] }
 0x163   : > { %3100 = vmatprep.mubr.bf16.mxu0 %v3739_v9  ;;  %4090 = vmatprep.subr.bf16.mxu1 %v4494_v6  ;;  %v1856_v35 = vld [vmem:[#allocation2 + $0x30] sm:$0xe]  ;;  %v1981_v43 = vor.u32 %v1980_v23, %v1976_v29  ;;  %v1999_v46 = vshll.u32 %v5225_v33, 16  ;;  %v1857_v41 = vld [vmem:[#allocation2 + $0x38] sm:$0xe]  ;;  %v4506_v44 = vld [vmem:[%s5489_s2 + $0x1e0] sm:$0xff]   ;;  %v3703_v50 = vcombine.low %v5227_v36, %v5229_v31 }
 0x164   : > { %4133 = vmatpush3.bf16.msra.mxu0 %v4495_v7  ;;  %v1992_v61 = vshll.u32 %v3676_v30, 16  ;;  %v4503_v37 = vld [vmem:[%s5489_s2 + $0x110] sm:$0xff]   ;;  %v3738_v47 = vcombine.low %v2031_v39, %v2032_v25  ;;  %v5244_v48 = vld [vmem:[#allocation2 + $0x38] sm:$0xf]  ;;  %v3684_v16 = vcombine.low %v1856_v35, %v5201_v12  ;;  %v2206_v52 = vshll.u32 %v3702_v40, 16  ;;  %v4511_v55 = vld [vmem:[%s5489_s2 + $0x1a0] sm:$0xff]  }
 0x165   : > { %4134 = vmatprep.subr.bf16.mxu0 %v4497_v13  ;;  %4091 = vmatpush3.bf16.msra.mxu1 %v4496_v28  ;;  %v4510_v15 = vld [vmem:[%s5489_s2 + $0x158] sm:$0xff]   ;;  %v3737_v53 = vcombine.low %v1981_v43, %v1988_v32  ;;  %v5255_v57 = vld [vmem:[#allocation2 + $0x28] sm:$0xf]  ;;  %v5257_v59 = vld [vmem:[#allocation2 + $0x2c] sm:$0x1]  ;;  %v3748_v51 = vcombine.low %v5244_v48, %v5238_v45  ;;  %v3685_v0 = vcombine.low %v1857_v41, %v5209_v19  ;;  %v2213_v1 = vshll.u32 %v3703_v50, 16 }
 0x166   : > { %4092 = vmatprep.subr.bf16.mxu1 %v4499_v26  ;;  %v1994_v56 = vrot.slane %v1992_v61, 1  ;;  %v4513_v60 = vld [vmem:[%s5489_s2 + $0x1e8] sm:$0xff]   ;;  %v5265_v2 = vld [vmem:[#allocation2 + $0x20] sm:$0xf]  ;;  %v5267_v3 = vld [vmem:[#allocation2 + $0x24] sm:$0x1]  ;;  %v5280_v62 = vcombine.low %v5255_v57, %v5257_v59  ;;  %v3736_v61 = vcombine.low %v5164_v34, %v5166_v38 }
 0x167   : > { %v5269_v4 = vld [vmem:[#allocation2 + $0x14] sm:$0x1]  ;;  %v4512_v6 = vld [vmem:[%s5489_s2 + $0x118] sm:$0xff]   ;;  %v1990_v7 = vshrl.u32 %v3676_v30, 16  ;;  %v2001_v8 = vrot.slane %v1999_v46, 1  ;;  %v2208_v9 = vrot.slane %v2206_v52, 1  ;;  %v5287_v23 = vcombine.low %v5265_v2, %v5267_v3 }
 0x168   : > { %4135 = vmatpush3.bf16.msra.mxu0 %v4500_v27  ;;  %3028 = vmatmul.mubr.bf16.gmra.mrb[36].mxu1 %v3727_v42  ;;  %v4515_v28 = vld [vmem:[%s5489_s2 + $0x160] sm:$0xff]   ;;  %v1997_v10 = vshrl.u32 %v5225_v33, 16  ;;  %v2033_v12 = vrot.slane %v3684_v16, 1  ;;  %v4516_v13 = vld [vmem:[%s5489_s2 + $0x1a8] sm:$0xff]   ;;  %v2204_v18 = vshrl.u32 %v3702_v40, 16  ;;  %v2215_v19 = vrot.slane %v2213_v1, 1 }
 0x169   : > { %3035 = vmatprep.mubr.bf16.mxu1 %v3737_v53  ;;  %4093 = vmatpush3.bf16.msra.mxu1 %v4503_v37  ;;  %v1995_v17 = vor.u32 %v1994_v56, %v1990_v7  ;;  %v5291_v21 = vcombine.low %v5129_v54, %v5269_v4  ;;  %v4519_v26 = vld [vmem:[%s5489_s2 + $0x120] sm:$0xff]   ;;  %v2034_v27 = vrot.slane %v3685_v0, 1  ;;  %v1875_v29 = vld [vmem:[#allocation2 + $0x10] sm:$0xe]  ;;  %v1866_v25 = vld [vmem:[#allocation2 + $0xc] sm:$0x1] }
 0x16a   : > { %3101 = vmatmul.mubr.bf16.gmra.mrb[48].mxu0 %v3738_v47  ;;  %4136 = vmatprep.subr.bf16.mxu0 %v4506_v44  ;;  %v2002_v30 = vor.u32 %v2001_v8, %v1997_v10  ;;  %v4522_v32 = vld [vmem:[%s5489_s2 + $0x1f0] sm:$0xff]   ;;  %v4523_v33 = vld [vmem:[%s5489_s2 + $0x168] sm:$0xff]   ;;  %v2209_v54 = vor.u32 %v2208_v9, %v2204_v18  ;;  %v2211_v35 = vshrl.u32 %v3703_v50, 16  ;;  %v2227_v39 = vshll.u32 %v5280_v62, 16  ;;  %v4528_v16 = vld [vmem:[%s5489_s2 + $0x1f8] sm:$0xff]  }
 0x16b   : > { %3108 = vmatprep.mubr.bf16.mxu0 %v3748_v51  ;;  %4094 = vmatprep.subr.bf16.mxu1 %v4510_v15  ;;  %v3747_v40 = vcombine.low %v2033_v12, %v2034_v27  ;;  %v1874_v42 = vld [vmem:[#allocation2 + $0x8] sm:$0xe]  ;;  %v5305_v43 = vld [vmem:[#allocation2 + $0x30] sm:$0xf]  ;;  %v5307_v37 = vld [vmem:[#allocation2 + $0x34] sm:$0x1]  ;;  %v3695_v44 = vcombine.low %v1875_v29, %v5269_v4  ;;  %v5315_v34 = vcombine.low %v5127_v63, %v1866_v25 }
 0x16c   : > { %4137 = vmatpush3.bf16.msra.mxu0 %v4511_v55  ;;  %v3746_v46 = vcombine.low %v1995_v17, %v2002_v30  ;;  %v4524_v41 = vld [vmem:[%s5489_s2 + $0x1b0] sm:$0xff]   ;;  %v2216_v47 = vor.u32 %v2215_v19, %v2211_v35  ;;  %v2220_v15 = vshll.u32 %v5287_v23, 16  ;;  %v2085_v38 = vshll.u32 %v5291_v21, 16  ;;  %v5321_v50 = vld [vmem:[#allocation2 + $0x38] sm:$0xf]  ;;  %v4527_v63 = vld [vmem:[%s5489_s2 + $0x128] sm:$0xff]  }
 0x16d   : > { %4138 = vmatprep.subr.bf16.mxu0 %v4513_v60  ;;  %4095 = vmatpush3.bf16.msra.mxu1 %v4512_v6  ;;  %v5323_v52 = vld [vmem:[#allocation2 + $0x3c] sm:$0x1]  ;;  %v3694_v55 = vcombine.low %v1874_v42, %v1866_v25  ;;  %v2229_v56 = vrot.slane %v2227_v39, 1  ;;  %v5330_v51 = vcombine.low %v5305_v43, %v5307_v37  ;;  %v4530_v60 = vld [vmem:[%s5489_s2 + $0x170] sm:$0xff]   ;;  %v5335_v0 = vld [vmem:[#allocation2 + $0x48] sm:$0xf]  ;;  %v3745_v30 = vcombine.low %v5199_v11, %v5207_v49 }
 0x16e   : > { %4096 = vmatprep.subr.bf16.mxu1 %v4515_v28  ;;  %v3725_v53 = vcombine.low %v2209_v54, %v2216_v47  ;;  %v5337_v1 = vld [vmem:[#allocation2 + $0x4c] sm:$0x1]  ;;  %v1869_v4 = vld [vmem:[#allocation2 + $0x24] sm:$0x1]  ;;  %v4531_v6 = vld [vmem:[%s5489_s2 + $0x1b8] sm:$0xff]   ;;  %v2156_v7 = vrot.slane %v3695_v44, 1  ;;  %v5345_v28 = vcombine.low %v5321_v50, %v5323_v52  ;;  %v3724_v49 = vcombine.low %v5211_v22, %v5227_v36 }
 0x16f   : > { %v2222_v8 = vrot.slane %v2220_v15, 1  ;;  %v2225_v9 = vshrl.u32 %v5280_v62, 16  ;;  %v2078_v10 = vshll.u32 %v5315_v34, 16  ;;  %v2087_v12 = vrot.slane %v2085_v38, 1  ;;  %v1877_v17 = vld [vmem:[#allocation2 + $0x20] sm:$0xe] }
 0x170   : > { %4139 = vmatpush3.bf16.msra.mxu0 %v4516_v13  ;;  %3036 = vmatmul.mubr.bf16.gmra.mrb[40].mxu1 %v3736_v61  ;;  %v4532_v13 = vld [vmem:[%s5489_s2 + $0x130] sm:$0xff]   ;;  %v1868_v18 = vld [vmem:[#allocation2 + $0x1c] sm:$0x1]  ;;  %v2155_v19 = vrot.slane %v3694_v55, 1  ;;  %v2234_v29 = vshll.u32 %v5330_v51, 16  ;;  %v5357_v25 = vcombine.low %v5144_v14, %v1869_v4  ;;  %v5367_v35 = vcombine.low %v5335_v0, %v5337_v1  ;;  %v4542_v22 = vld [vmem:[%s5489_s2 + $0x200] sm:$0xff]  }
 0x171   : > { %3043 = vmatprep.mubr.bf16.mxu1 %v3746_v46  ;;  %4097 = vmatpush3.bf16.msra.mxu1 %v4519_v26  ;;  %v4536_v62 = vld [vmem:[%s5489_s2 + $0x178] sm:$0xff]   ;;  %v2218_v26 = vshrl.u32 %v5287_v23, 16  ;;  %v2230_v27 = vor.u32 %v2229_v56, %v2225_v9  ;;  %v5363_v54 = vld [vmem:[#allocation2 + $0x44] sm:$0x1]  ;;  %v3697_v61 = vcombine.low %v1877_v17, %v1869_v4  ;;  %v2241_v14 = vshll.u32 %v5345_v28, 16 }
 0x172   : > { %3109 = vmatmul.mubr.bf16.gmra.mrb[52].mxu0 %v3747_v40  ;;  %4140 = vmatprep.subr.bf16.mxu0 %v4522_v32  ;;  %v1876_v32 = vld [vmem:[#allocation2 + $0x18] sm:$0xe]  ;;  %v3723_v23 = vcombine.low %v2155_v19, %v2156_v7  ;;  %v2080_v40 = vrot.slane %v2078_v10, 1  ;;  %v2083_v42 = vshrl.u32 %v5291_v21, 16  ;;  %v5372_v11 = vcombine.low %v5155_v20, %v1868_v18  ;;  %v1871_v36 = vld [vmem:[#allocation2 + $0x34] sm:$0x1] }
 0x173   : > { %4098 = vmatprep.subr.bf16.mxu1 %v4523_v33  ;;  %3214 = vmatprep.mubr.bf16.mxu0 %v3725_v53  ;;  %v5361_v33 = vld [vmem:[#allocation2 + $0x40] sm:$0xf]  ;;  %v2223_v39 = vor.u32 %v2222_v8, %v2218_v26  ;;  %v3696_v47 = vcombine.low %v1876_v32, %v1868_v18  ;;  %v2236_v44 = vrot.slane %v2234_v29, 1  ;;  %v2076_v21 = vshrl.u32 %v5315_v34, 16  ;;  %v1870_v4 = vld [vmem:[#allocation2 + $0x2c] sm:$0x1] }
 0x174   : > { %4141 = vmatpush3.bf16.msra.mxu0 %v4524_v41  ;;  %v4541_v41 = vld [vmem:[%s5489_s2 + $0x138] sm:$0xff]   ;;  %v3708_v15 = vcombine.low %v5361_v33, %v5363_v54  ;;  %v2088_v20 = vor.u32 %v2087_v12, %v2083_v42  ;;  %v2099_v38 = vshll.u32 %v5357_v25, 16  ;;  %v2232_v53 = vshrl.u32 %v5330_v51, 16  ;;  %v4548_v51 = vld [vmem:[%s5489_s2 + $0x208] sm:$0xff]  }
 0x175   : > { %4142 = vmatprep.subr.bf16.mxu0 %v4528_v16  ;;  %4099 = vmatpush3.bf16.msra.mxu1 %v4527_v63  ;;  %v3734_v46 = vcombine.low %v2223_v39, %v2230_v27  ;;  %v2158_v16 = vrot.slane %v3697_v61, 1  ;;  %v2243_v63 = vrot.slane %v2241_v14, 1  ;;  %v2081_v55 = vor.u32 %v2080_v40, %v2076_v21  ;;  %v1878_v17 = vld [vmem:[#allocation2 + $0x28] sm:$0xe] }
 0x176   : > { %4100 = vmatprep.subr.bf16.mxu1 %v4530_v60  ;;  %v2092_v56 = vshll.u32 %v5372_v11, 16  ;;  %v1879_v60 = vld [vmem:[#allocation2 + $0x30] sm:$0xe]  ;;  %v2255_v34 = vshll.u32 %v5367_v35, 16  ;;  %v2237_v7 = vor.u32 %v2236_v44, %v2232_v53  ;;  %v2239_v8 = vshrl.u32 %v5345_v28, 16 }
 0x177   : > { %v2248_v9 = vshll.u32 %v3708_v15, 16  ;;  %v3691_v10 = vcombine.low %v5179_v58, %v1871_v36  ;;  %v3722_v12 = vcombine.low %v2081_v55, %v2088_v20  ;;  %v2253_v26 = vshrl.u32 %v5367_v35, 16  ;;  %v4555_v20 = vld [vmem:[%s5489_s2 + $0x218] sm:$0xff]  }
 0x178   : > { %4143 = vmatpush3.bf16.msra.mxu0 %v4531_v6  ;;  %3044 = vmatmul.mubr.bf16.gmra.mrb[44].mxu1 %v3745_v30  ;;  %v2157_v6 = vrot.slane %v3696_v47, 1  ;;  %v2244_v19 = vor.u32 %v2243_v63, %v2239_v8  ;;  %v3690_v27 = vcombine.low %v5186_v5, %v1870_v4  ;;  %v3733_v28 = vcombine.low %v5265_v2, %v5255_v57  ;;  %v4549_v5 = vld [vmem:[%s5489_s2 + $0x210] sm:$0xff]   ;;  %v1873_v57 = vld [vmem:[#allocation2 + $0x44] sm:$0x1] }
 0x179   : > { %4101 = vmatpush3.bf16.msra.mxu1 %v4532_v13  ;;  %3149 = vmatprep.mubr.bf16.mxu1 %v3723_v23  ;;  %v2101_v13 = vrot.slane %v2099_v38, 1  ;;  %v2094_v58 = vrot.slane %v2092_v56, 1  ;;  %v2097_v29 = vshrl.u32 %v5357_v25, 16  ;;  %v3698_v32 = vcombine.low %v1878_v17, %v1870_v4 }
 0x17a   : > { %4102 = vmatprep.subr.bf16.mxu1 %v4536_v62  ;;  %v3732_v18 = vcombine.low %v2157_v6, %v2158_v16  ;;  %v3699_v62 = vcombine.low %v1879_v60, %v1871_v36  ;;  %v3743_v30 = vcombine.low %v2237_v7, %v2244_v19  ;;  %v2250_v23 = vrot.slane %v2248_v9, 1  ;;  %v4556_v6 = vld [vmem:[%s5489_s2 + $0x220] sm:$0xff]  }
 0x17b   : > { %3215 = vmatmul.mubr.bf16.vlgmr.msra.gmra.mrb[56].mxu0 %v3724_v49  ;;  %v2257_v39 = vrot.slane %v2255_v34, 1  ;;  %v2113_v61 = vshll.u32 %v3691_v10, 16  ;;  %v2090_v35 = vshrl.u32 %v5372_v11, 16  ;;  %v2102_v14 = vor.u32 %v2101_v13, %v2097_v29  ;;  %v1881_v49 = vld [vmem:[#allocation2 + $0x40] sm:$0xe] }
 0x17c   : > { %3222 = vmatprep.mubr.bf16.mxu0 %v3734_v46  ;;  %v2160_v2 = vrot.slane %v3699_v62, 1  ;;  %v2246_v25 = vshrl.u32 %v3708_v15, 16  ;;  %v2106_v40 = vshll.u32 %v3690_v27, 16  ;;  %v1872_v46 = vld [vmem:[#allocation2 + $0x3c] sm:$0x1]  ;;  %v3693_v21 = vcombine.low %v5238_v45, %v1873_v57 }
 0x17d   : > { %4103 = vmatpush3.bf16.msra.mxu1 %v4541_v41  ;;  %v2095_v42 = vor.u32 %v2094_v58, %v2090_v35  ;;  %v2159_v41 = vrot.slane %v3698_v32, 1  ;;  %v2258_v44 = vor.u32 %v2257_v39, %v2253_v26  ;;  %v2115_v38 = vrot.slane %v2113_v61, 1  ;;  %v4561_v58 = vld [vmem:[%s5489_s2 + $0x230] sm:$0xff]   ;;  %v1902_v29 = vld [vmem:[#allocation2 + $0x28] sm:$0xe] }
 0x17e   : > { %4221 = vmatprep.subr.bf16.mxu1 %v4542_v22  ;;  %v2251_v47 = vor.u32 %v2250_v23, %v2246_v25  ;;  %v3701_v15 = vcombine.low %v1881_v49, %v1873_v57  ;;  %v3692_v16 = vcombine.low %v5244_v48, %v1872_v46  ;;  %v3742_v53 = vcombine.low %v5305_v43, %v5321_v50  ;;  %v1899_v43 = vld [vmem:[#allocation2 + $0x10] sm:$0xe]  ;;  %v1901_v23 = vld [vmem:[#allocation2 + $0x20] sm:$0xe]  ;;  %v1904_v61 = vld [vmem:[#allocation2 + $0x38] sm:$0xe] }
 0x17f   : > { %v3731_v11 = vcombine.low %v2095_v42, %v2102_v14  ;;  %v3741_v36 = vcombine.low %v2159_v41, %v2160_v2  ;;  %v2108_v63 = vrot.slane %v2106_v40, 1  ;;  %v2111_v55 = vshrl.u32 %v3691_v10, 16  ;;  %v4560_v10 = vld [vmem:[%s5489_s2 + $0x228] sm:$0xff]   ;;  %v1903_v32 = vld [vmem:[#allocation2 + $0x30] sm:$0xe] }
 0x180   : > { %3150 = vmatmul.mubr.bf16.vlgmr.msra.gmra.mrb[48].mxu1 %v3722_v12  ;;  %v3752_v45 = vcombine.low %v2251_v47, %v2258_v44  ;;  %v2127_v60 = vshll.u32 %v3693_v21, 16  ;;  %v2104_v34 = vshrl.u32 %v3690_v27, 16  ;;  %v2162_v48 = vrot.slane %v3701_v15, 1  ;;  %v1905_v25 = vld [vmem:[#allocation2 + $0x40] sm:$0xe]  ;;  %v3339_v15 = vld [vmem:[%s5490_s3 + $0x28] sm:$0xff] }
 0x181   : > { %3157 = vmatprep.mubr.bf16.mxu1 %v3732_v18  ;;  %4222 = vmatpush3.bf16.msra.mxu1 %v4542_v22  ;;  %v1880_v22 = vld [vmem:[#allocation2 + $0x38] sm:$0xe]  ;;  %v2116_v4 = vor.u32 %v2115_v38, %v2111_v55  ;;  %v2120_v7 = vshll.u32 %v3692_v16, 16  ;;  %v3710_v17 = vcombine.low %v1899_v43, %v5213_v24  ;;  %v3751_v18 = vcombine.low %v5361_v33, %v5335_v0  ;;  %v1906_v40 = vld [vmem:[#allocation2 + $0x48] sm:$0xe] }
 0x182   : > { %4223 = vmatprep.subr.bf16.mxu1 %v4548_v51  ;;  %v3700_v56 = vcombine.low %v1880_v22, %v1872_v46  ;;  %v2109_v8 = vor.u32 %v2108_v63, %v2104_v34  ;;  %v2129_v12 = vrot.slane %v2127_v60, 1  ;;  %v2125_v62 = vshrl.u32 %v3693_v21, 16  ;;  %v3337_v38 = vld [vmem:[%s5490_s3 + $0x18] sm:$0xff]  ;;  %v3343_v60 = vld [vmem:[%s5490_s3 + $0x48] sm:$0xff] }
 0x183   : > { %3223 = vmatmul.mubr.bf16.gmra.mrb[60].mxu0 %v3733_v28  ;;  %v2122_v19 = vrot.slane %v2120_v7, 1  ;;  %v2118_v27 = vshrl.u32 %v3692_v16, 16  ;;  %v2283_v24 = vrot.slane %v3710_v17, 1  ;;  %v3713_v33 = vcombine.low %v1902_v29, %v5257_v59  ;;  %v3340_v16 = vld [vmem:[%s5490_s3 + $0x30] sm:$0xff]  ;;  %v3341_v63 = vld [vmem:[%s5490_s3 + $0x38] sm:$0xff]  ;;  %v3346_v7 = vld [vmem:[%s5490_s3 + $0x60] sm:$0xff] }
 0x184   : > { %3230 = vmatprep.mubr.bf16.mxu0 %v3743_v30  ;;  %v2161_v50 = vrot.slane %v3700_v56, 1  ;;  %v3740_v9 = vcombine.low %v2109_v8, %v2116_v4  ;;  %v2130_v28 = vor.u32 %v2129_v12, %v2125_v62  ;;  %v3714_v14 = vcombine.low %v1903_v32, %v5307_v37  ;;  %v3342_v56 = vld [vmem:[%s5490_s3 + $0x40] sm:$0xff]  ;;  %v3344_v4 = vld [vmem:[%s5490_s3 + $0x50] sm:$0xff]  ;;  %v3347_v8 = vld [vmem:[%s5490_s3 + $0x68] sm:$0xff] }
 0x185   : > { %4224 = vmatpush3.bf16.msra.mxu1 %v4548_v51  ;;  %v1900_v51 = vld [vmem:[#allocation2 + $0x18] sm:$0xe]  ;;  %v2123_v30 = vor.u32 %v2122_v19, %v2118_v27  ;;  %v3715_v57 = vcombine.low %v1904_v61, %v5323_v52  ;;  %v2286_v2 = vrot.slane %v3713_v33, 1  ;;  %v3716_v41 = vcombine.low %v1905_v25, %v5363_v54  ;;  %v3334_v52 = vld [vmem:[%s5490_s3] sm:$0xff] }
 0x186   : > { %4225 = vmatprep.subr.bf16.mxu1 %v4549_v5  ;;  %v3750_v13 = vcombine.low %v2161_v50, %v2162_v48  ;;  %v3711_v26 = vcombine.low %v1900_v51, %v5229_v31  ;;  %v4564_v31 = vld [vmem:[%s5489_s2 + $0x238] sm:$0xff]   ;;  %v2287_v59 = vrot.slane %v3714_v14, 1  ;;  %v3717_v37 = vcombine.low %v1906_v40, %v5337_v1  ;;  %v3336_v1 = vld [vmem:[%s5490_s3 + $0x10] sm:$0xff] }
 0x187   : > { %v3749_v39 = vcombine.low %v2123_v30, %v2130_v28  ;;  %v2288_v49 = vrot.slane %v3715_v57, 1  ;;  %v4284_v22 = vpack.c.bf16 %v3337_v38, %v3336_v1  ;;  %v4580_v55 = vmov 0.0   ;;  %v3348_v50 = vld [vmem:[%s5490_s3 + $0x70] sm:$0xff] }
 0x188   : > { %3158 = vmatmul.mubr.bf16.gmra.mrb[52].mxu1 %v3731_v11  ;;  %v2284_v0 = vrot.slane %v3711_v26, 1  ;;  %v2290_v44 = vrot.slane %v3717_v37, 1  ;;  %v3335_v11 = vld [vmem:[%s5490_s3 + $0x8] sm:$0xff]  ;;  %v4293_v34 = vpack.c.bf16 %v3343_v60, %v3342_v56  ;;  %v4299_v43 = vpack.c.bf16 %v3347_v8, %v3346_v7 }
 0x189   : > { %3165 = vmatprep.mubr.bf16.mxu1 %v3741_v36  ;;  %4226 = vmatpush3.bf16.msra.mxu1 %v4549_v5  ;;  %v3712_v5 = vcombine.low %v1901_v23, %v5267_v3  ;;  %v3744_v47 = vcombine.low %v2287_v59, %v2288_v49  ;;  %v2289_v3 = vrot.slane %v3716_v41, 1  ;;  %v4281_v54 = vpack.c.bf16 %v3335_v11, %v3334_v52  ;;  %v3338_v36 = vld [vmem:[%s5490_s3 + $0x20] sm:$0xff] }
 0x18a   : > { %4227 = vmatprep.subr.bf16.mxu1 %v4555_v20  ;;  %v3726_v35 = vcombine.low %v2283_v24, %v2284_v0 }
 0x18b   : > { %3231 = vmatmul.mubr.bf16.gmra.mrb[64].mxu0 %v3742_v53  ;;  %v2285_v42 = vrot.slane %v3712_v5, 1  ;;  %v3753_v21 = vcombine.low %v2289_v3, %v2290_v44  ;;  %v4287_v53 = vpack.c.bf16 %v3339_v15, %v3338_v36 }
 0x18c   : > { %3238 = vmatprep.mubr.bf16.mxu0 %v3752_v45  ;;  %v4290_v45 = vpack.c.bf16 %v3341_v63, %v3340_v16 }
 0x18d   : > { %4228 = vmatpush3.bf16.msra.mxu1 %v4555_v20  ;;  %v3735_v46 = vcombine.low %v2285_v42, %v2286_v2  ;;  %v4578_v20 = vmov 0.0|0.0  }
 0x18e   : > { %4229 = vmatprep.subr.bf16.mxu1 %v4556_v6  ;;  %4280 = vmatprep.subr.bf16.mxu0 %v4578_v20 }
 0x18f   : > { %4282 = vmatpush3.bf16.msra.mxu0 %v4281_v54 }
 0x190   : > { %3166 = vmatmul.mubr.bf16.gmra.mrb[56].mxu1 %v3740_v9  ;;  %4283 = vmatprep.subr.bf16.mxu0 %v4578_v20  ;;  %v3349_v9 = vld [vmem:[%s5490_s3 + $0x78] sm:$0xff] }
 0x191   : > { %3173 = vmatprep.mubr.bf16.mxu1 %v3750_v13  ;;  %4230 = vmatpush3.bf16.msra.mxu1 %v4556_v6  ;;  %v3345_v6 = vld [vmem:[%s5490_s3 + $0x58] sm:$0xff] }
 0x192   : > { %4231 = vmatprep.subr.bf16.mxu1 %v4560_v10  ;;  %v4296_v48 = vpack.c.bf16 %v3345_v6, %v3344_v4 }
 0x193   : > { %3239 = vmatmul.mubr.bf16.gmra.mrb[68].mxu0 %v3751_v18 }
 0x194   : > { %4285 = vmatpush3.bf16.msra.mxu0 %v4284_v22  ;;  %4277 = vmatprep.mubr.msk.f32.mxu0 %vm4579_vm7, %v4580_v55 }
 0x195   : > { %4232 = vmatpush3.bf16.msra.mxu1 %v4560_v10  ;;  %4286 = vmatprep.subr.bf16.mxu0 %v4578_v20  ;;  %v4302_v10 = vpack.c.bf16 %v3349_v9, %v3348_v50 }
 0x196   : > { %4233 = vmatprep.subr.bf16.mxu1 %v4561_v58 }
 0x198   : > { %3174 = vmatmul.mubr.bf16.gmra.mrb[60].mxu1 %v3749_v39  ;;  %4288 = vmatpush3.bf16.msra.mxu0 %v4287_v53 }
 0x199   : > { %4234 = vmatpush3.bf16.msra.mxu1 %v4561_v58  ;;  %4237 = vmatprep.mubr.bf16.mxu1 %v3726_v35 }
 0x19a   : > { %4235 = vmatprep.subr.bf16.mxu1 %v4564_v31  ;;  %4289 = vmatprep.subr.bf16.mxu0 %v4578_v20 }
 0x19c   : > { %4291 = vmatpush3.bf16.msra.mxu0 %v4290_v45 }
 0x19d   : > { %4236 = vmatpush3.bf16.msra.mxu1 %v4564_v31  ;;  %4292 = vmatprep.subr.bf16.mxu0 %v4578_v20 }
 0x1a0   : > { %4238 = vmatmul.mubr.bf16.vlgmr.msra.gmra.mrb[64].mxu1 %v3735_v46  ;;  %4294 = vmatpush3.bf16.msra.mxu0 %v4293_v34 }
 0x1a1   : > { %4241 = vmatprep.mubr.bf16.mxu1 %v3744_v47  ;;  %4295 = vmatprep.subr.bf16.mxu0 %v4578_v20 }
 0x1a4   : > { %4297 = vmatpush3.bf16.msra.mxu0 %v4296_v48 }
 0x1a5   : > { %4298 = vmatprep.subr.bf16.mxu0 %v4578_v20 }
 0x1a8   : > { %4242 = vmatmul.mubr.bf16.gmra.mrb[68].mxu1 %v3753_v21  ;;  %4300 = vmatpush3.bf16.msra.mxu0 %v4299_v43 }
 0x1a9   : > { %4301 = vmatprep.subr.bf16.mxu0 %v4578_v20 }
 0x1ac   : > { %4303 = vmatpush3.bf16.msra.mxu0 %v4302_v10 }
 0x22d   : > { %v4064_v12 = vpop.f32.mrb[40].mxu0 }
 0x22e   : > { %v4065_v51 = vpop.f32.mrb[41].mxu0 }
 0x22f   : > { %v4066_v13 = vadd.f32 %v4065_v51, %v4064_v12  ;;  %v4067_v17 = vpop.f32.mrb[42].mxu0 }
 0x230   : > { %v4068_v18 = vpop.f32.mrb[43].mxu0 }
 0x231   : > { %v4069_v19 = vadd.f32 %v4068_v18, %v4067_v17 }
 0x233   : > { %v4024_v62 = vpop.f32.mrb[32].mxu1 }
 0x234   : > { %v4025_v27 = vpop.f32.mrb[33].mxu1 }
 0x235   : > { %v4070_v26 = vpop.f32.mrb[44].mxu0  ;;  %v4026_v58 = vadd.f32 %v4025_v27, %v4024_v62  ;;  %v4027_v29 = vpop.f32.mrb[34].mxu1 }
 0x236   : > { %v4071_v28 = vpop.f32.mrb[45].mxu0  ;;  %v4028_v32 = vpop.f32.mrb[35].mxu1 }
 0x237   : > { %v4072_v24 = vadd.f32 %v4071_v28, %v4070_v26  ;;  %v4073_v30 = vpop.f32.mrb[46].mxu0  ;;  %v3087_v0 = vadd.f32 %v4066_v13, %v4026_v58  ;;  %v4029_v33 = vadd.f32 %v4028_v32, %v4027_v29 }
 0x238   : > { %v4074_v23 = vpop.f32.mrb[47].mxu0 }
 0x239   : > { %v4075_v39 = vadd.f32 %v4074_v23, %v4073_v30  ;;  %v3090_v31 = vadd.f32 %v4069_v19, %v4029_v33 }
 0x23b   : > { %v4030_v61 = vpop.f32.mrb[36].mxu1 }
 0x23c   : > { %v4031_v14 = vpop.f32.mrb[37].mxu1 }
 0x23d   : > { %v4076_v35 = vpop.f32.mrb[48].mxu0  ;;  %v4032_v57 = vadd.f32 %v4031_v14, %v4030_v61  ;;  %v4033_v2 = vpop.f32.mrb[38].mxu1 }
 0x23e   : > { %v4077_v5 = vpop.f32.mrb[49].mxu0  ;;  %v4034_v40 = vpop.f32.mrb[39].mxu1 }
 0x23f   : > { %v4078_v59 = vadd.f32 %v4077_v5, %v4076_v35  ;;  %v4079_v25 = vpop.f32.mrb[50].mxu0  ;;  %v3095_v49 = vadd.f32 %v4072_v24, %v4032_v57  ;;  %v4035_v46 = vadd.f32 %v4034_v40, %v4033_v2 }
 0x240   : > { %v4080_v42 = vpop.f32.mrb[51].mxu0 }
 0x241   : > { %v4081_v41 = vadd.f32 %v4080_v42, %v4079_v25  ;;  %v3098_v37 = vadd.f32 %v4075_v39, %v4035_v46 }
 0x243   : > { %v4036_v47 = vpop.f32.mrb[40].mxu1 }
 0x244   : > { %v4037_v44 = vpop.f32.mrb[41].mxu1 }
 0x245   : > { %v4082_v3 = vpop.f32.mrb[52].mxu0  ;;  %v4038_v52 = vadd.f32 %v4037_v44, %v4036_v47  ;;  %v4039_v11 = vpop.f32.mrb[42].mxu1 }
 0x246   : > { %v4083_v21 = vpop.f32.mrb[53].mxu0  ;;  %v4040_v1 = vpop.f32.mrb[43].mxu1 }
 0x247   : > { %v4084_v20 = vadd.f32 %v4083_v21, %v4082_v3  ;;  %v4085_v54 = vpop.f32.mrb[54].mxu0  ;;  %v3103_v22 = vadd.f32 %v4078_v59, %v4038_v52  ;;  %v4041_v36 = vadd.f32 %v4040_v1, %v4039_v11 }
 0x248   : > { %v4086_v38 = vpop.f32.mrb[55].mxu0 }
 0x249   : > { %v4087_v15 = vadd.f32 %v4086_v38, %v4085_v54  ;;  %v3106_v16 = vadd.f32 %v4081_v41, %v4041_v36 }
 0x24b   : > { %v4042_v53 = vpop.f32.mrb[44].mxu1 }
 0x24c   : > { %v4043_v63 = vpop.f32.mrb[45].mxu1 }
 0x24d   : > { %v4044_v55 = vadd.f32 %v4043_v63, %v4042_v53  ;;  %v4045_v45 = vpop.f32.mrb[46].mxu1 }
 0x24e   : > { %v4144_v56 = vpop.f32.mrb[56].mxu0  ;;  %v4046_v60 = vpop.f32.mrb[47].mxu1 }
 0x24f   : > { %v4145_v34 = vpop.f32.mrb[57].mxu0  ;;  %v3111_v4 = vadd.f32 %v4084_v20, %v4044_v55  ;;  %v4047_v6 = vadd.f32 %v4046_v60, %v4045_v45 }
 0x250   : > { %v4146_v48 = vadd.f32 %v4145_v34, %v4144_v56  ;;  %v4147_v7 = vpop.f32.mrb[58].mxu0 }
 0x251   : > { %v4148_v8 = vpop.f32.mrb[59].mxu0  ;;  %v3114_v43 = vadd.f32 %v4087_v15, %v4047_v6 }
 0x252   : > { %v4149_v50 = vadd.f32 %v4148_v8, %v4147_v7 }
 0x253   : > { %v4104_v9 = vpop.f32.mrb[48].mxu1 }
 0x254   : > { %v4105_v10 = vpop.f32.mrb[49].mxu1 }
 0x255   : > { %v4106_v12 = vadd.f32 %v4105_v10, %v4104_v9  ;;  %v4107_v51 = vpop.f32.mrb[50].mxu1 }
 0x256   : > { %v4150_v13 = vpop.f32.mrb[60].mxu0  ;;  %v4108_v17 = vpop.f32.mrb[51].mxu1 }
 0x257   : > { %v4151_v18 = vpop.f32.mrb[61].mxu0  ;;  %v3152_v19 = vadd.f32 %v4106_v12, %v3087_v0  ;;  %v4109_v62 = vadd.f32 %v4108_v17, %v4107_v51 }
 0x258   : > { %v4152_v26 = vadd.f32 %v4151_v18, %v4150_v13  ;;  %v4153_v27 = vpop.f32.mrb[62].mxu0 }
 0x259   : > { %v4154_v28 = vpop.f32.mrb[63].mxu0  ;;  %v3155_v58 = vadd.f32 %v4109_v62, %v3090_v31  ;;  %v3217_v24 = vadd.f32 %v4146_v48, %v3152_v19 }
 0x25a   : > { %v4155_v29 = vadd.f32 %v4154_v28, %v4153_v27 }
 0x25b   : > { %v4110_v30 = vpop.f32.mrb[52].mxu1  ;;  %v3220_v32 = vadd.f32 %v4149_v50, %v3155_v58 }
 0x25c   : > { %v4111_v23 = vpop.f32.mrb[53].mxu1 }
 0x25d   : > { %v4112_v33 = vadd.f32 %v4111_v23, %v4110_v30  ;;  %v4113_v39 = vpop.f32.mrb[54].mxu1 }
 0x25e   : > { %v4156_v61 = vpop.f32.mrb[64].mxu0  ;;  %v4114_v35 = vpop.f32.mrb[55].mxu1 }
 0x25f   : > { %v4157_v14 = vpop.f32.mrb[65].mxu0  ;;  %v3160_v5 = vadd.f32 %v4112_v33, %v3095_v49  ;;  %v4115_v57 = vadd.f32 %v4114_v35, %v4113_v39 }
 0x260   : > { %v4158_v2 = vadd.f32 %v4157_v14, %v4156_v61  ;;  %v4159_v59 = vpop.f32.mrb[66].mxu0 }
 0x261   : > { %v4160_v0 = vpop.f32.mrb[67].mxu0  ;;  %v3163_v25 = vadd.f32 %v4115_v57, %v3098_v37  ;;  %v3225_v42 = vadd.f32 %v4152_v26, %v3160_v5 }
 0x262   : > { %v4161_v40 = vadd.f32 %v4160_v0, %v4159_v59 }
 0x263   : > { %v4116_v46 = vpop.f32.mrb[56].mxu1  ;;  %v3228_v31 = vadd.f32 %v4155_v29, %v3163_v25 }
 0x264   : > { %v4117_v41 = vpop.f32.mrb[57].mxu1 }
 0x265   : > { %v4118_v47 = vadd.f32 %v4117_v41, %v4116_v46  ;;  %v4119_v3 = vpop.f32.mrb[58].mxu1 }
 0x266   : > { %v4162_v44 = vpop.f32.mrb[68].mxu0  ;;  %v4120_v21 = vpop.f32.mrb[59].mxu1 }
 0x267   : > { %v4163_v52 = vpop.f32.mrb[69].mxu0  ;;  %v3168_v11 = vadd.f32 %v4118_v47, %v3103_v22  ;;  %v4121_v20 = vadd.f32 %v4120_v21, %v4119_v3 }
 0x268   : > { %v4164_v54 = vadd.f32 %v4163_v52, %v4162_v44  ;;  %v4165_v1 = vpop.f32.mrb[70].mxu0 }
 0x269   : > { %v4166_v49 = vpop.f32.mrb[71].mxu0  ;;  %v3171_v38 = vadd.f32 %v4121_v20, %v3106_v16  ;;  %v3233_v15 = vadd.f32 %v4158_v2, %v3168_v11 }
 0x26a   : > { %v4167_v36 = vadd.f32 %v4166_v49, %v4165_v1 }
 0x26b   : > { %v4122_v53 = vpop.f32.mrb[60].mxu1  ;;  %v3236_v37 = vadd.f32 %v4161_v40, %v3171_v38 }
 0x26c   : > { %v4123_v63 = vpop.f32.mrb[61].mxu1 }
 0x26d   : > { %v4124_v55 = vadd.f32 %v4123_v63, %v4122_v53  ;;  %v4125_v45 = vpop.f32.mrb[62].mxu1 }
 0x26e   : > { %v4126_v56 = vpop.f32.mrb[63].mxu1 }
 0x26f   : > { %v3176_v60 = vadd.f32 %v4124_v55, %v3111_v4  ;;  %v4127_v34 = vadd.f32 %v4126_v56, %v4125_v45 }
 0x271   : > { %v3179_v6 = vadd.f32 %v4127_v34, %v3114_v43  ;;  %v3241_v48 = vadd.f32 %v4164_v54, %v3176_v60 }
 0x273   : > { %v4239_v7 = vpop.f32.mrb[64].mxu1  ;;  %v3244_v8 = vadd.f32 %v4167_v36, %v3179_v6 }
 0x274   : > { %v3290_v22 = vadd.f32 %v4239_v7, %v3225_v42  ;;  %v3281_v50 = vpop.f32.mrb[65].mxu1 }
 0x275   : > { %v3282_v9 = vadd.f32 %v3281_v50, %v3217_v24  ;;  %v4240_v10 = vpop.f32.mrb[66].mxu1 }
 0x276   : > { %v3293_v12 = vadd.f32 %v4240_v10, %v3228_v31  ;;  %v3284_v16 = vpop.f32.mrb[67].mxu1  ;;  %v3314_v18 = vmax.f32 %v3290_v22, 0.0 }
 0x277   : > { %v3285_v51 = vadd.f32 %v3284_v16, %v3220_v32  ;;  %v3312_v13 = vmax.f32 %v3282_v9, 0.0 }
 0x278   : > { %v3315_v4 = vmax.f32 %v3293_v12, 0.0 }
 0x279   : > { %v3313_v17 = vmax.f32 %v3285_v51, 0.0 }
 0x27b   : > { %v3320_v19 = vadd.f32 %v3313_v17, %v3312_v13  ;;  %v4243_v62 = vpop.f32.mrb[68].mxu1 }
 0x27c   : > { %v3306_v26 = vadd.f32 %v4243_v62, %v3241_v48  ;;  %v3297_v27 = vpop.f32.mrb[69].mxu1 }
 0x27d   : > { %v3321_v28 = vadd.f32 %v3320_v19, %v3314_v18  ;;  %v3298_v43 = vadd.f32 %v3297_v27, %v3233_v15  ;;  %v4244_v58 = vpop.f32.mrb[70].mxu1 }
 0x27e   : > { %v3309_v29 = vadd.f32 %v4244_v58, %v3244_v8  ;;  %v3300_v30 = vpop.f32.mrb[71].mxu1  ;;  %v3318_v32 = vmax.f32 %v3306_v26, 0.0 }
 0x27f   : > { %v3316_v23 = vmax.f32 %v3298_v43, 0.0  ;;  %v3322_v33 = vadd.f32 %v3321_v28, %v3315_v4  ;;  %v3301_v24 = vadd.f32 %v3300_v30, %v3236_v37 }
 0x280   : > { %v3319_v14 = vmax.f32 %v3309_v29, 0.0 }
 0x281   : > { %v3323_v39 = vadd.f32 %v3322_v33, %v3316_v23  ;;  %v3317_v61 = vmax.f32 %v3301_v24, 0.0 }
 0x283   : > { %v3324_v35 = vadd.f32 %v3323_v39, %v3317_v61 }
 0x285   : > { %v3325_v5 = vadd.f32 %v3324_v35, %v3318_v32 }
 0x287   : > { %v3326_v57 = vadd.f32 %v3325_v5, %v3319_v14 }
 0x289   : > { %v3327_v2 = vrot.slane %v3326_v57, 4 }
 0x28b   : > { %v3328_v59 = vadd.f32 %v3327_v2, %v3326_v57 }
 0x28d   : > { %v3329_v0 = vrot.slane %v3328_v59, 2 }
 0x28f   : > { %v3330_v25 = vadd.f32 %v3329_v0, %v3328_v59 }
 0x291   : > { %v3331_v40 = vrot.slane %v3330_v25, 1 }
 0x293   : > { %v3332_v42 = vadd.f32 %v3331_v40, %v3330_v25 }
 0x295   : > { %v3333_v46 = vmul.f32 0.015625, %v3332_v42 }
 0x297   : > { %4278 = vmatmul.mubr.f32.vlgmr.msra.gmra.mrb[72].mxu0 %v3333_v46 }
 0x36a   : > { %v3416_v31 = vpop.f32.mrb[72].mxu0 }
 0x36b   : > { %3420 = vst [vmem:[%s193_s7] sm:$0x1] %v3416_v31  ;;  %v4279_v41 = vpop.f32.mrb[73].mxu0 }
 0x36c PF: > { %s14_s15 = sadd.s32 1, %s4575_s15  }
 0x36d   : > { %p11_p4 = scmp.ge.s32.totalorder %s14_s15, 4  }
 0x36f   :  { %13 = sbr.rel (!%p11_p4) target bundleno = 1 (0x1), region = 74 }

// kernel: cv_forward.2
= control target key start
LH: loop header
LB: loop body
LE: loop exit
PB: predicated region body
PF: predicated region fallthrough
CT: control target
= control target key end

     0   :  { %s9354_s12 = smov 0   ;;  %s12297_s0 = inlined_call_operand.vmem [shape: bf16[2,18,18,128], index: 0, kind: input, shape index: {}]   ;;  %s12298_s1 = inlined_call_operand.vmem [shape: bf16[1152,128], index: 1, kind: input, shape index: {}]   ;;  %s12299_s2 = inlined_call_operand.vmem [shape: bf16[1152,128], index: 2, kind: input, shape index: {}]   ;;  %s12300_s3 = inlined_call_operand.vmem [shape: bf16[2,16,16,128], index: 3, kind: output, shape index: {}]  }
   0x1 LB: > { %s7027_s13 = sadd.s32 4294967295, %s9331_s12   ;;  %p7031_p0 = scmp.ge.s32.totalorder %s9331_s12, 1  ;;  %s9331_s12 = sphi %s9354_s12, %s13_s12  }
   0x2   : > { %p137_p1 = scmp.lt.s32.totalorder %s9331_s12, 3 }
   0x4   : > { %p138_p2 = pnand %p7031_p0, %p137_p1 }
   0x6   : > { %141 = sbr.rel (%p138_p2) target bundleno = 1106 (0x452), region = 32 }
   0xd   : > { %v8871_v0 = vld [vmem:[%s12298_s1 + $0x40] sm:$0xff]   ;;  %v8875_v4 = vld [vmem:[%s12298_s1 + $0x48] sm:$0xff]   ;;  %v8879_v8 = vld [vmem:[%s12298_s1 + $0x50] sm:$0xff]   ;;  %p161_p3 = scmp.lt.s32.totalorder %s7027_s13, 1  ;;  %vm767_vm0 = vcmask 1046528   ;;  %vm3197_vm2 = vcmask 1040384  }
   0xe   : > { %v8872_v1 = vld [vmem:[%s12298_s1 + $0xc0] sm:$0xff]   ;;  %7821 = vmatprep.subr.bf16.mxu0 %v8871_v0  ;;  %v8876_v5 = vld [vmem:[%s12298_s1 + $0xc8] sm:$0xff]   ;;  %v8880_v9 = vld [vmem:[%s12298_s1 + $0xd0] sm:$0xff]   ;;  %vm510_vm1 = vsmask.f32 7424  ;;  %vm3700_vm7 = vcmask 1043456  }
   0xf   : > { %v8873_v2 = vld [vmem:[%s12298_s1] sm:$0xff]   ;;  %7933 = vmatprep.subr.bf16.mxu1 %v8872_v1  ;;  %v8877_v6 = vld [vmem:[%s12298_s1 + $0x8] sm:$0xff]   ;;  %v8881_v10 = vld [vmem:[%s12298_s1 + $0x10] sm:$0xff]   ;;  %s12485_s13 = smov (!%p161_p3, %s7027_s13), 1  ;;  %vm3198_vm3 = vsmask.f32 256 }
  0x10   : > { %v8874_v3 = vld [vmem:[%s12298_s1 + $0x80] sm:$0xff]   ;;  %7822 = vmatpush3.bf16.msra.mxu0 %v8873_v2  ;;  %v8878_v7 = vld [vmem:[%s12298_s1 + $0x88] sm:$0xff]   ;;  %v8882_v11 = vld [vmem:[%s12298_s1 + $0x90] sm:$0xff]   ;;  %s8861_s16 = smul.u32 216, %s12485_s13  ;;  %vm3248_vm5 = vsmask.f32 7938 }
  0x11   : > { %7934 = vmatpush3.bf16.msra.mxu1 %v8874_v3  ;;  %7823 = vmatprep.subr.bf16.mxu0 %v8875_v4  ;;  %v8883_v12 = vld [vmem:[%s12298_s1 + $0x58] sm:$0xff]   ;;  %v8887_v16 = vld [vmem:[%s12298_s1 + $0x60] sm:$0xff]   ;;  %v8891_v20 = vld [vmem:[%s12298_s1 + $0x68] sm:$0xff]   ;;  %vm3378_vm8 = vsmask.f32 4368  ;;  %s7661_s7 = sshll.u32 %s12485_s13, 7 }
  0x12   : > { %7935 = vmatprep.subr.bf16.mxu1 %v8876_v5  ;;  %v8884_v13 = vld [vmem:[%s12298_s1 + $0xd8] sm:$0xff]   ;;  %v8888_v17 = vld [vmem:[%s12298_s1 + $0xe0] sm:$0xff]   ;;  %v8892_v21 = vld [vmem:[%s12298_s1 + $0xe8] sm:$0xff]   ;;  %s9462_s27 = scalar_lea.vmem %s12297_s0, %s8861_s16  ;;  %s12248_s10 = scalar_lea.vmem %s12300_s3, %s7661_s7 }
  0x13   : > { %v8885_v14 = vld [vmem:[%s12298_s1 + $0x18] sm:$0xff]   ;;  %v8889_v18 = vld [vmem:[%s12298_s1 + $0x20] sm:$0xff]   ;;  %v8893_v22 = vld [vmem:[%s12298_s1 + $0x28] sm:$0xff]  }
  0x14   : > { %7824 = vmatpush3.bf16.msra.mxu0 %v8877_v6  ;;  %v8886_v15 = vld [vmem:[%s12298_s1 + $0x98] sm:$0xff]   ;;  %v8890_v19 = vld [vmem:[%s12298_s1 + $0xa0] sm:$0xff]   ;;  %v8894_v23 = vld [vmem:[%s12298_s1 + $0xa8] sm:$0xff]  }
  0x15   : > { %7936 = vmatpush3.bf16.msra.mxu1 %v8878_v7  ;;  %7825 = vmatprep.subr.bf16.mxu0 %v8879_v8  ;;  %v8895_v24 = vld [vmem:[%s12298_s1 + $0x70] sm:$0xff]   ;;  %v8899_v28 = vld [vmem:[%s12298_s1 + $0x78] sm:$0xff]   ;;  %v172_v32 = vld [vmem:[%s9462_s27] sm:$0xf] }
  0x16   : > { %7937 = vmatprep.subr.bf16.mxu1 %v8880_v9  ;;  %v8896_v25 = vld [vmem:[%s12298_s1 + $0xf0] sm:$0xff]   ;;  %v8900_v29 = vld [vmem:[%s12298_s1 + $0xf8] sm:$0xff]   ;;  %v173_v33 = vld [vmem:[%s9462_s27 + $0x4] sm:$0xf] }
  0x17   : > { %v8897_v26 = vld [vmem:[%s12298_s1 + $0x30] sm:$0xff]   ;;  %v8901_v30 = vld [vmem:[%s12298_s1 + $0x38] sm:$0xff]   ;;  %v7163_v34 = vcombine.low %v172_v32, %v173_v33  ;;  %v8904_v35 = vld [vmem:[%s9462_s27 + $0x8] ss:$0 sps:$4 sm:$0x11]  }
  0x18   : > { %7826 = vmatpush3.bf16.msra.mxu0 %v8881_v10  ;;  %v8898_v27 = vld [vmem:[%s12298_s1 + $0xb0] sm:$0xff]   ;;  %v8902_v31 = vld [vmem:[%s12298_s1 + $0xb8] sm:$0xff]   ;;  %v8908_v36 = vld [vmem:[%s12298_s1 + $0x140] sm:$0xff]   ;;  %v519_v41 = vshll.u32 %v8904_v35, 16  ;;  %v769_v45 = vrot.slane %v8904_v35, 1 }
  0x19   : > { %7938 = vmatpush3.bf16.msra.mxu1 %v8882_v11  ;;  %7827 = vmatprep.subr.bf16.mxu0 %v8883_v12  ;;  %v7035_v37 = vld [vmem:[%s9462_s27 + $0xc] sm:$0xf]  ;;  %v9478_v38 = vld [vmem:[%s9462_s27 + $0x10] sm:$0xf]  ;;  %v512_v39 = vshrl.u32 %v7163_v34, 16  ;;  %v514_v40 = vshll.u32 %v7163_v34, 16  ;;  %vm10874_vm4 = vmand %vm3197_vm2, %vm3198_vm3 }
  0x1a   : > { %7939 = vmatprep.subr.bf16.mxu1 %v8884_v13  ;;  %v9481_v42 = vcombine.low %v7035_v37, %v9478_v38  ;;  %v220_v43 = vld [vmem:[%s9462_s27] sm:$0xe]  ;;  %v521_v47 = vrot.slane %v519_v41, 1  ;;  %v174_v49 = vld [vmem:[%s9462_s27 + $0xc] sm:$0xf]  ;;  %v8945_v35 = vld [vmem:[%s12298_s1 + $0x118] sm:$0xff]  }
  0x1b   : > { %v7195_v44 = vcombine.low %v220_v43, %v173_v33  ;;  %v516_v46 = vrot.slane %v514_v40, 1  ;;  %v175_v51 = vld [vmem:[%s9462_s27 + $0x10] sm:$0xf]  ;;  %v8909_v53 = vld [vmem:[%s12298_s1 + $0x100] sm:$0xff]   ;;  %v7037_v56 = vld [vmem:[%s9462_s27 + $0x18] sm:$0xf] }
  0x1c   : > { %7828 = vmatpush3.bf16.msra.mxu0 %v8885_v14  ;;  %2529 = vmatprep.mubr.bf16.mxu1 %v9481_v42  ;;  %v7164_v54 = vcombine.low %v174_v49, %v175_v51  ;;  %v8911_v55 = vld [vmem:[%s9462_s27 + $0x14] ss:$0 sps:$4 sm:$0x11]   ;;  %v9495_v58 = vld [vmem:[%s9462_s27 + $0x1c] sm:$0xf]  ;;  %v8920_v60 = vld [vmem:[%s12298_s1 + $0x148] sm:$0xff]  }
  0x1d   : > { %7940 = vmatpush3.bf16.msra.mxu1 %v8886_v15  ;;  %7829 = vmatprep.subr.bf16.mxu0 %v8887_v16  ;;  %v768_v48 = vrot.slane %v7195_v44, 1  ;;  %v517_v50 = vor.u32 %v516_v46, %v512_v39  ;;  %v221_v59 = vld [vmem:[%s9462_s27 + $0xc] sm:$0xe]  ;;  %v531_v63 = vshll.u32 %v8911_v55, 16  ;;  %v9502_v0 = vcombine.low %v7037_v56, %v9495_v58  ;;  %v176_v1 = vld [vmem:[%s9462_s27 + $0x18] sm:$0xf]  ;;  %vm10885_vm6 = vmand %vm3197_vm2, %vm3248_vm5 }
  0x1e   : > { %7941 = vmatprep.subr.bf16.mxu1 %v8888_v17  ;;  %v524_v61 = vshrl.u32 %v7164_v54, 16  ;;  %v526_v62 = vshll.u32 %v7164_v54, 16  ;;  %v7196_v2 = vcombine.low %v221_v59, %v175_v51  ;;  %v772_v3 = vrot.slane %v8911_v55, 1  ;;  %v177_v4 = vld [vmem:[%s9462_s27 + $0x1c] sm:$0xf]  ;;  %v8921_v9 = vld [vmem:[%s12298_s1 + $0x108] sm:$0xff]   ;;  %vm11133_vm9 = vmand %vm3700_vm7, %vm3248_vm5 }
  0x1f   : > { %v770_v52 = vsel %vm767_vm0, %v768_v48, %v769_v45  ;;  %v522_v57 = vsel %vm510_vm1, %v517_v50, %v521_v47  ;;  %v533_v6 = vrot.slane %v531_v63, 1  ;;  %v9507_v7 = vcombine.low %v176_v1, %v177_v4  ;;  %v8916_v8 = vld [vmem:[%s9462_s27 + $0x20] ss:$0 sps:$4 sm:$0x11]   ;;  %v7039_v11 = vld [vmem:[%s9462_s27 + $0x24] sm:$0xf]  ;;  %vm11140_vm10 = vmor %vm3198_vm3, %vm3378_vm8 }
  0x20   : > { %7830 = vmatpush3.bf16.msra.mxu0 %v8889_v18  ;;  %2368 = vmatprep.mubr.bf16.mxu0 %v522_v57  ;;  %v528_v5 = vrot.slane %v526_v62, 1  ;;  %v771_v10 = vrot.slane %v7196_v2, 1  ;;  %v9515_v12 = vld [vmem:[%s9462_s27 + $0x28] sm:$0xf]  ;;  %v543_v16 = vshll.u32 %v8916_v8, 16  ;;  %v8932_v17 = vld [vmem:[%s12298_s1 + $0x150] sm:$0xff]  }
  0x21   : > { %7942 = vmatpush3.bf16.msra.mxu1 %v8890_v19  ;;  %7831 = vmatprep.subr.bf16.mxu0 %v8891_v20  ;;  %v536_v14 = vshrl.u32 %v9507_v7, 16  ;;  %v538_v15 = vshll.u32 %v9507_v7, 16  ;;  %v9524_v19 = vcombine.low %v7039_v11, %v9515_v12  ;;  %v222_v20 = vld [vmem:[%s9462_s27 + $0x18] sm:$0xe]  ;;  %v9546_v37 = vld [vmem:[%s9462_s27 + $0x34] sm:$0xf] }
  0x22   : > { %7943 = vmatprep.subr.bf16.mxu1 %v8892_v21  ;;  %v529_v13 = vor.u32 %v528_v5, %v524_v61  ;;  %v773_v18 = vsel %vm767_vm0, %v771_v10, %v772_v3  ;;  %v8933_v21 = vld [vmem:[%s12298_s1 + $0x110] sm:$0xff]   ;;  %v8923_v33 = vld [vmem:[%s9462_s27 + $0x2c] ss:$0 sps:$4 sm:$0x11]   ;;  %v223_v39 = vld [vmem:[%s9462_s27 + $0x24] sm:$0xe] }
  0x23   : > { %v8956_v40 = vld [vmem:[%s12298_s1 + $0x160] sm:$0xff]   ;;  %v555_v44 = vshll.u32 %v8923_v33, 16  ;;  %v180_v45 = vld [vmem:[%s9462_s27 + $0x30] sm:$0xf]  ;;  %v181_v50 = vld [vmem:[%s9462_s27 + $0x34] sm:$0xf] }
  0x24   : > { %7832 = vmatpush3.bf16.msra.mxu0 %v8893_v22  ;;  %v534_v22 = vsel %vm510_vm1, %v529_v13, %v533_v6  ;;  %v8982_v46 = vld [vmem:[%s12298_s1 + $0x1c0] sm:$0xff]   ;;  %v9569_v55 = vld [vmem:[%s9462_s27 + $0x38] ss:$0 sps:$4 sm:$0x11]   ;;  %v778_v56 = vrot.slane %v8923_v33, 1  ;;  %v8968_v59 = vld [vmem:[%s12298_s1 + $0x168] sm:$0xff]  }
  0x25   : > { %7944 = vmatpush3.bf16.msra.mxu1 %v8894_v23  ;;  %7833 = vmatprep.subr.bf16.mxu0 %v8895_v24  ;;  %v540_v23 = vrot.slane %v538_v15, 1  ;;  %v545_v24 = vrot.slane %v543_v16, 1  ;;  %v8983_v51 = vld [vmem:[%s12298_s1 + $0x180] sm:$0xff]   ;;  %v567_v1 = vshll.u32 %v9569_v55, 16  ;;  %v7043_v2 = vld [vmem:[%s9462_s27 + $0x3c] sm:$0xf] }
  0x26   : > { %7945 = vmatprep.subr.bf16.mxu1 %v8896_v25  ;;  %v7197_v25 = vcombine.low %v222_v20, %v177_v4  ;;  %v8957_v57 = vld [vmem:[%s12298_s1 + $0x120] sm:$0xff]   ;;  %v8989_v4 = vld [vmem:[%s12298_s1 + $0x188] sm:$0xff]   ;;  %v224_v6 = vld [vmem:[%s9462_s27 + $0x30] sm:$0xe] }
  0x27   : > { %v9585_v3 = vld [vmem:[%s9462_s27 + $0x40] sm:$0xf]  ;;  %v182_v11 = vld [vmem:[%s9462_s27 + $0x3c] sm:$0xf]  ;;  %v8969_v13 = vld [vmem:[%s12298_s1 + $0x128] sm:$0xff]   ;;  %v569_v15 = vrot.slane %v567_v1, 1  ;;  %v7199_v20 = vcombine.low %v224_v6, %v181_v50 }
  0x28   : > { %7834 = vmatpush3.bf16.msra.mxu0 %v8897_v26  ;;  %v178_v26 = vld [vmem:[%s9462_s27 + $0x24] sm:$0xf]  ;;  %v183_v16 = vld [vmem:[%s9462_s27 + $0x40] sm:$0xf]  ;;  %v9000_v33 = vld [vmem:[%s12298_s1 + $0x178] sm:$0xff]  }
  0x29   : > { %7946 = vmatpush3.bf16.msra.mxu1 %v8898_v27  ;;  %7835 = vmatprep.subr.bf16.mxu0 %v8899_v28  ;;  %v8944_v27 = vld [vmem:[%s12298_s1 + $0x158] sm:$0xff]   ;;  %v541_v28 = vor.u32 %v540_v23, %v536_v14  ;;  %v8992_v23 = vld [vmem:[%s12298_s1 + $0x190] sm:$0xff]   ;;  %v9009_v6 = vld [vmem:[%s12298_s1 + $0x1a8] sm:$0xff]  }
  0x2a   : > { %7947 = vmatprep.subr.bf16.mxu1 %v8900_v29  ;;  %v774_v29 = vrot.slane %v7197_v25, 1 }
  0x2c   : > { %7836 = vmatpush3.bf16.msra.mxu0 %v8901_v30  ;;  %v775_v30 = vrot.slane %v8916_v8, 1  ;;  %v8991_v8 = vld [vmem:[%s12298_s1 + $0x1d0] sm:$0xff]  }
  0x2d   : > { %7948 = vmatpush3.bf16.msra.mxu1 %v8902_v31  ;;  %8045 = vmatprep.subr.bf16.mxu0 %v8908_v36  ;;  %v179_v31 = vld [vmem:[%s9462_s27 + $0x28] sm:$0xf]  ;;  %v546_v36 = vsel %vm510_vm1, %v541_v28, %v545_v24  ;;  %v8993_v24 = vld [vmem:[%s12298_s1 + $0x1d8] sm:$0xff]   ;;  %v8981_v28 = vld [vmem:[%s12298_s1 + $0x130] sm:$0xff]  }
  0x2e   : > { %v9537_v32 = vcombine.low %v178_v26, %v179_v31  ;;  %v776_v47 = vsel %vm767_vm0, %v774_v29, %v775_v30  ;;  %v7198_v49 = vcombine.low %v223_v39, %v179_v31  ;;  %8157 = vmatprep.subr.bf16.mxu1 %v8982_v46  ;;  %v9629_v31 = vld [vmem:[%s9462_s27 + $0x4c] sm:$0xf]  ;;  %v7045_v39 = vld [vmem:[%s9462_s27 + $0x48] sm:$0xf] }
  0x2f   : > { %2369 = vmatmul.mubr.bf16.vlgmr.msra.gmra.mrb[0].mxu0 %v7163_v34  ;;  %v7041_v34 = vld [vmem:[%s9462_s27 + $0x30] sm:$0xf] }
  0x30   : > { %2530 = vmatmul.mubr.bf16.vlgmr.msra.gmra.mrb[0].mxu1 %v770_v52  ;;  %8046 = vmatpush3.bf16.msra.mxu0 %v8909_v53  ;;  %v548_v41 = vshrl.u32 %v9537_v32, 16  ;;  %v550_v43 = vshll.u32 %v9537_v32, 16  ;;  %v9560_v48 = vcombine.low %v7041_v34, %v9546_v37  ;;  %v557_v53 = vrot.slane %v555_v44, 1  ;;  %v225_v44 = vld [vmem:[%s9462_s27 + $0x3c] sm:$0xe] }
  0x31   : > { %2537 = vmatprep.mubr.bf16.mxu1 %v9502_v0  ;;  %8047 = vmatprep.subr.bf16.mxu0 %v8920_v60  ;;  %v8984_v60 = vld [vmem:[%s12298_s1 + $0x1c8] sm:$0xff]   ;;  %v777_v5 = vrot.slane %v7198_v49, 1  ;;  %v780_v34 = vrot.slane %v7199_v20, 1 }
  0x32   : > { %2376 = vmatprep.mubr.bf16.mxu0 %v534_v22  ;;  %v552_v52 = vrot.slane %v550_v43, 1  ;;  %8158 = vmatpush3.bf16.msra.mxu1 %v8983_v51  ;;  %v9612_v22 = vld [vmem:[%s9462_s27 + $0x44] ss:$0 sps:$4 sm:$0x11]   ;;  %v9645_v43 = vld [vmem:[%s9462_s27 + $0x4c] sm:$0xf] }
  0x33   : > { %8159 = vmatprep.subr.bf16.mxu1 %v8984_v60  ;;  %v579_v26 = vshll.u32 %v9612_v22, 16  ;;  %v9671_v60 = vld [vmem:[%s9462_s27 + $0x58] sm:$0xf] }
  0x34   : > { %8048 = vmatpush3.bf16.msra.mxu0 %v8921_v9  ;;  %v553_v61 = vor.u32 %v552_v52, %v548_v41  ;;  %v8998_v41 = vld [vmem:[%s12298_s1 + $0x198] sm:$0xff]   ;;  %v9660_v52 = vcombine.low %v7045_v39, %v9645_v43  ;;  %v8952_v39 = vld [vmem:[%s9462_s27 + $0x68] ss:$0 sps:$4 sm:$0x11]  }
  0x35   : > { %8049 = vmatprep.subr.bf16.mxu0 %v8932_v17  ;;  %v779_v17 = vsel %vm767_vm0, %v777_v5, %v778_v56  ;;  %v581_v46 = vrot.slane %v579_v26, 1  ;;  %v186_v56 = vld [vmem:[%s9462_s27 + $0x54] sm:$0xf] }
  0x36   : > { %v558_v9 = vsel %vm510_vm1, %v553_v61, %v557_v53  ;;  %8160 = vmatpush3.bf16.msra.mxu1 %v8989_v4  ;;  %v7200_v53 = vcombine.low %v225_v44, %v183_v16  ;;  %v9676_v1 = vcombine.low %v186_v56, %v9671_v60  ;;  %v784_v4 = vrot.slane %v9612_v22, 1  ;;  %v7047_v5 = vld [vmem:[%s9462_s27 + $0x54] sm:$0xf] }
  0x37   : > { %2377 = vmatmul.mubr.bf16.gmra.mrb[4].mxu0 %v7164_v54  ;;  %v9566_v54 = vcombine.low %v180_v45, %v181_v50  ;;  %8161 = vmatprep.subr.bf16.mxu1 %v8991_v8  ;;  %v9002_v45 = vld [vmem:[%s12298_s1 + $0x1e0] sm:$0xff]   ;;  %v9655_v50 = vld [vmem:[%s9462_s27 + $0x50] ss:$0 sps:$4 sm:$0x11]   ;;  %v9686_v8 = vld [vmem:[%s9462_s27 + $0x58] sm:$0xf] }
  0x38   : > { %2538 = vmatmul.mubr.bf16.gmra.mrb[4].mxu1 %v773_v18  ;;  %8050 = vmatpush3.bf16.msra.mxu0 %v8933_v21  ;;  %v9607_v18 = vcombine.low %v7043_v2, %v9585_v3  ;;  %v9609_v21 = vcombine.low %v182_v11, %v183_v16  ;;  %v783_v2 = vrot.slane %v7200_v53, 1  ;;  %v8947_v11 = vld [vmem:[%s9462_s27 + $0x5c] ss:$0 sps:$4 sm:$0x11]   ;;  %v188_v16 = vld [vmem:[%s9462_s27 + $0x60] sm:$0xf] }
  0x39   : > { %2545 = vmatprep.mubr.bf16.mxu1 %v9524_v19  ;;  %2384 = vmatprep.mubr.bf16.mxu0 %v546_v36  ;;  %v560_v62 = vshrl.u32 %v9566_v54, 16  ;;  %v562_v63 = vshll.u32 %v9566_v54, 16  ;;  %v9012_v22 = vld [vmem:[%s12298_s1 + $0x1b0] sm:$0xff]   ;;  %v596_v26 = vshrl.u32 %v9676_v1, 16  ;;  %v615_v53 = vshll.u32 %v8952_v39, 16 }
  0x3a   : > { %8051 = vmatprep.subr.bf16.mxu0 %v8944_v27  ;;  %v574_v25 = vshll.u32 %v9609_v21, 16  ;;  %v184_v27 = vld [vmem:[%s9462_s27 + $0x48] sm:$0xf]  ;;  %v572_v30 = vshrl.u32 %v9609_v21, 16  ;;  %8162 = vmatpush3.bf16.msra.mxu1 %v8992_v23  ;;  %v9013_v23 = vld [vmem:[%s12298_s1 + $0x1f8] sm:$0xff]  }
  0x3b   : > { %v564_v10 = vrot.slane %v562_v63, 1  ;;  %8163 = vmatprep.subr.bf16.mxu1 %v8993_v24  ;;  %v591_v63 = vshll.u32 %v9655_v50, 16  ;;  %v9712_v24 = vld [vmem:[%s12298_s1 + $0x200] sm:$0xff]  }
  0x3c   : > { %8052 = vmatpush3.bf16.msra.mxu0 %v8945_v35  ;;  %v781_v35 = vrot.slane %v9569_v55, 1  ;;  %v576_v36 = vrot.slane %v574_v25, 1  ;;  %v9003_v55 = vld [vmem:[%s12298_s1 + $0x1a0] sm:$0xff]   ;;  %v787_v25 = vrot.slane %v9655_v50, 1  ;;  %v191_v50 = vld [vmem:[%s9462_s27 + $0x70] sm:$0xf] }
  0x3d   : > { %8053 = vmatprep.subr.bf16.mxu0 %v8956_v40  ;;  %v565_v14 = vor.u32 %v564_v10, %v560_v62  ;;  %v9638_v40 = vcombine.low %v184_v27, %v9629_v31  ;;  %v9011_v10 = vld [vmem:[%s12298_s1 + $0x1f0] sm:$0xff]  }
  0x3e   : > { %v577_v49 = vor.u32 %v576_v36, %v572_v30  ;;  %v782_v51 = vsel %vm767_vm0, %v780_v34, %v781_v35  ;;  %8164 = vmatpush3.bf16.msra.mxu1 %v8998_v41  ;;  %v603_v30 = vshll.u32 %v8947_v11, 16  ;;  %v9015_v34 = vld [vmem:[%s12298_s1 + $0x1b8] sm:$0xff]   ;;  %v9728_v35 = vld [vmem:[%s9462_s27 + $0x64] sm:$0xf]  ;;  %v227_v36 = vld [vmem:[%s9462_s27 + $0x54] sm:$0xe] }
  0x3f   : > { %2385 = vmatmul.mubr.bf16.gmra.mrb[8].mxu0 %v9507_v7  ;;  %v8980_v7 = vld [vmem:[%s12298_s1 + $0x170] sm:$0xff]   ;;  %v570_v29 = vsel %vm510_vm1, %v565_v14, %v569_v15  ;;  %8165 = vmatprep.subr.bf16.mxu1 %v9002_v45  ;;  %v593_v14 = vrot.slane %v591_v63, 1  ;;  %v598_v15 = vshll.u32 %v9676_v1, 16 }
  0x40   : > { %2546 = vmatmul.mubr.bf16.gmra.mrb[8].mxu1 %v776_v47  ;;  %2392 = vmatprep.mubr.bf16.mxu0 %v558_v9  ;;  %v9001_v47 = vld [vmem:[%s12298_s1 + $0x138] sm:$0xff]   ;;  %v582_v61 = vsel %vm510_vm1, %v577_v49, %v581_v46  ;;  %v226_v9 = vld [vmem:[%s9462_s27 + $0x48] sm:$0xe]  ;;  %v605_v45 = vrot.slane %v603_v30, 1  ;;  %v7202_v49 = vcombine.low %v227_v36, %v9671_v60  ;;  %v7051_v60 = vld [vmem:[%s9462_s27 + $0x6c] sm:$0xf] }
  0x41   : > { %2553 = vmatprep.mubr.bf16.mxu1 %v9560_v48  ;;  %8054 = vmatpush3.bf16.msra.mxu0 %v8957_v57  ;;  %v9004_v57 = vld [vmem:[%s12298_s1 + $0x1e8] sm:$0xff]   ;;  %v7201_v20 = vcombine.low %v226_v9, %v9629_v31 }
  0x42   : > { %8055 = vmatprep.subr.bf16.mxu0 %v8968_v59  ;;  %v584_v59 = vshrl.u32 %v9638_v40, 16  ;;  %8166 = vmatpush3.bf16.msra.mxu1 %v9003_v55  ;;  %v9784_v36 = vld [vmem:[%s9462_s27 + $0x88] sm:$0xf] }
  0x43   : > { %8167 = vmatprep.subr.bf16.mxu1 %v9004_v57  ;;  %v786_v31 = vrot.slane %v7201_v20, 1  ;;  %v789_v57 = vrot.slane %v7202_v49, 1 }
  0x45   : > { %8056 = vmatpush3.bf16.msra.mxu0 %v8969_v13  ;;  %v788_v46 = vsel %vm767_vm0, %v786_v31, %v787_v25  ;;  %v7053_v25 = vld [vmem:[%s9462_s27 + $0x78] sm:$0xf] }
  0x46   : > { %8057 = vmatprep.subr.bf16.mxu0 %v8980_v7  ;;  %v9696_v7 = vld [vmem:[%s9462_s27 + $0x64] sm:$0xf]  ;;  %8168 = vmatpush3.bf16.msra.mxu1 %v9009_v6 }
  0x47   : > { %2393 = vmatmul.mubr.bf16.gmra.mrb[12].mxu0 %v9537_v32  ;;  %v586_v32 = vshll.u32 %v9638_v40, 16  ;;  %8169 = vmatprep.subr.bf16.mxu1 %v9011_v10  ;;  %v9717_v27 = vcombine.low %v188_v16, %v9696_v7 }
  0x48   : > { %2554 = vmatmul.mubr.bf16.gmra.mrb[12].mxu1 %v779_v17  ;;  %2400 = vmatprep.mubr.bf16.mxu0 %v570_v29  ;;  %v785_v17 = vsel %vm767_vm0, %v783_v2, %v784_v4  ;;  %v600_v29 = vrot.slane %v598_v15, 1  ;;  %v617_v2 = vrot.slane %v615_v53, 1  ;;  %v9752_v4 = vld [vmem:[%s9462_s27 + $0x74] ss:$0 sps:$4 sm:$0x11]  }
  0x49   : > { %2561 = vmatprep.mubr.bf16.mxu1 %v9607_v18  ;;  %8058 = vmatpush3.bf16.msra.mxu0 %v8981_v28  ;;  %v588_v62 = vrot.slane %v586_v32, 1  ;;  %v610_v41 = vshll.u32 %v9717_v27, 16  ;;  %v608_v32 = vshrl.u32 %v9717_v27, 16  ;;  %v627_v16 = vshll.u32 %v9752_v4, 16 }
  0x4a   : > { %8059 = vmatprep.subr.bf16.mxu0 %v9000_v33  ;;  %v7049_v33 = vld [vmem:[%s9462_s27 + $0x60] sm:$0xf]  ;;  %8170 = vmatpush3.bf16.msra.mxu1 %v9012_v22  ;;  %v601_v44 = vor.u32 %v600_v29, %v596_v26  ;;  %v9776_v26 = vld [vmem:[%s9462_s27 + $0x7c] sm:$0xf]  ;;  %v796_v49 = vrot.slane %v9752_v4, 1  ;;  %v1015_v4 = vshll.u32 %v9560_v48, 16 }
  0x4b   : > { %v589_v13 = vor.u32 %v588_v62, %v584_v59  ;;  %8171 = vmatprep.subr.bf16.mxu1 %v9013_v23  ;;  %v790_v59 = vrot.slane %v8947_v11, 1  ;;  %v228_v62 = vld [vmem:[%s9462_s27 + $0x60] sm:$0xe]  ;;  %v9762_v11 = vld [vmem:[%s9462_s27 + $0x7c] sm:$0xf]  ;;  %v793_v23 = vrot.slane %v8952_v39, 1 }
  0x4c   : > { %v606_v55 = vsel %vm510_vm1, %v601_v44, %v605_v45  ;;  %v7203_v10 = vcombine.low %v228_v62, %v9696_v7  ;;  %v979_v7 = vshll.u32 %v9481_v42, 16  ;;  %v9779_v29 = vld [vmem:[%s9462_s27 + $0x80] ss:$0 sps:$4 sm:$0x11]   ;;  %v629_v31 = vrot.slane %v627_v16, 1 }
  0x4d   : > { %8060 = vmatpush3.bf16.msra.mxu0 %v9001_v47  ;;  %v594_v28 = vsel %vm510_vm1, %v589_v13, %v593_v14  ;;  %v9735_v47 = vcombine.low %v7049_v33, %v9728_v35  ;;  %v791_v6 = vsel %vm767_vm0, %v789_v57, %v790_v59  ;;  %v9792_v45 = vcombine.low %v7053_v25, %v9776_v26  ;;  %v7055_v57 = vld [vmem:[%s9462_s27 + $0x84] sm:$0xf]  ;;  %v9804_v59 = vld [vmem:[%s9462_s27 + $0x88] sm:$0xf] }
  0x4e   : > { %8765 = vmatprep.subr.bf16.mxu0 %v9712_v24  ;;  %8172 = vmatpush3.bf16.msra.mxu1 %v9015_v34  ;;  %v792_v22 = vrot.slane %v7203_v10, 1  ;;  %v194_v34 = vld [vmem:[%s9462_s27 + $0x84] sm:$0xf]  ;;  %v9788_v39 = vrot.slane %v979_v7, 1  ;;  %v9825_v16 = vcombine.low %v7055_v57, %v9804_v59  ;;  %v198_v57 = vld [vmem:[%s9462_s27 + $0x9c] sm:$0xf] }
  0x4f   : > { %2401 = vmatmul.mubr.bf16.gmra.mrb[16].mxu0 %v9566_v54  ;;  %v9700_v54 = vcombine.low %v7047_v5, %v9686_v8  ;;  %12336 = vst [vmem:[#allocation3_spill] sm:$0xff] %v9735_v47  ;;  %12338 = vst [vmem:[#allocation5_spill] sm:$0xff] %v9792_v45 }
  0x50   : > { %2562 = vmatmul.mubr.bf16.gmra.mrb[16].mxu1 %v782_v51  ;;  %2408 = vmatprep.mubr.bf16.mxu0 %v582_v61  ;;  %v612_v51 = vrot.slane %v610_v41, 1  ;;  %v9748_v61 = vld [vmem:[%s9462_s27 + $0x70] sm:$0xf]  ;;  %v7083_v41 = vld [vmem:[%s9462_s27 + $0xc] sm:$0xe]  ;;  %v794_v44 = vsel %vm767_vm0, %v792_v22, %v793_v23  ;;  %12339 = vst [vmem:[#allocation6_spill] sm:$0xff] %v9825_v16 }
  0x51   : > { %2569 = vmatprep.mubr.bf16.mxu1 %v9660_v52  ;;  %v9757_v9 = vcombine.low %v7051_v60, %v9748_v61  ;;  %v230_v60 = vld [vmem:[%s9462_s27 + $0x78] sm:$0xe]  ;;  %v7243_v62 = vcombine.low %v7083_v41, %v9478_v38  ;;  %v7065_v22 = vld [vmem:[%s9462_s27 + $0xc0] sm:$0xf] }
  0x52   : > { %v613_v63 = vor.u32 %v612_v51, %v608_v32  ;;  %v9798_v32 = vcombine.low %v194_v34, %v9784_v36  ;;  %v7084_v38 = vld [vmem:[%s9462_s27 + $0x18] sm:$0xe] }
  0x53   : > { %12337 = vst [vmem:[#allocation4_spill] sm:$0xff] %v9757_v9  ;;  %v9831_v25 = vrot.slane %v7243_v62, 1  ;;  %v7244_v34 = vcombine.low %v7084_v38, %v9495_v58  ;;  %v9855_v62 = vld [vmem:[%s9462_s27 + $0xa0] sm:$0xf]  ;;  %v232_v38 = vld [vmem:[%s9462_s27 + $0x90] sm:$0xe] }
  0x54   : > { %v618_v13 = vsel %vm510_vm1, %v613_v63, %v617_v2  ;;  %v1003_v63 = vshll.u32 %v9524_v19, 16  ;;  %v9812_v2 = vld [vmem:[%s9462_s27 + $0x8c] ss:$0 sps:$4 sm:$0x11]   ;;  %v646_v10 = vshll.u32 %v9798_v32, 16 }
  0x55   : > { %v651_v23 = vshll.u32 %v9812_v2, 16 }
  0x57   : > { %2409 = vmatmul.mubr.bf16.gmra.mrb[20].mxu0 %v9609_v21  ;;  %v190_v21 = vld [vmem:[%s9462_s27 + $0x6c] sm:$0xf] }
  0x58   : > { %2570 = vmatmul.mubr.bf16.gmra.mrb[20].mxu1 %v785_v17  ;;  %2416 = vmatprep.mubr.bf16.mxu0 %v594_v28  ;;  %v9742_v56 = vcombine.low %v190_v21, %v191_v50  ;;  %v229_v17 = vld [vmem:[%s9462_s27 + $0x6c] sm:$0xe] }
  0x59   : > { %2577 = vmatprep.mubr.bf16.mxu1 %v9700_v54  ;;  %v7204_v28 = vcombine.low %v229_v17, %v191_v50  ;;  %v639_v50 = vshll.u32 %v9779_v29, 16  ;;  %v7205_v17 = vcombine.low %v230_v60, %v9762_v11 }
  0x5a   : > { %v622_v5 = vshll.u32 %v9742_v56, 16  ;;  %v620_v14 = vshrl.u32 %v9742_v56, 16 }
  0x5b   : > { %v795_v21 = vrot.slane %v7204_v28, 1  ;;  %v644_v28 = vshrl.u32 %v9798_v32, 16  ;;  %v798_v41 = vrot.slane %v7205_v17, 1 }
  0x5c   : > { %v624_v15 = vrot.slane %v622_v5, 1  ;;  %v1027_v5 = vshll.u32 %v9607_v18, 16 }
  0x5e   : > { %v625_v30 = vor.u32 %v624_v15, %v620_v14  ;;  %v9819_v14 = vld [vmem:[%s9462_s27 + $0x94] sm:$0xf]  ;;  %v1039_v15 = vshll.u32 %v9660_v52, 16 }
  0x5f   : > { %2417 = vmatmul.mubr.bf16.gmra.mrb[24].mxu0 %v9638_v40  ;;  %v192_v40 = vld [vmem:[%s9462_s27 + $0x78] sm:$0xf] }
  0x60   : > { %2578 = vmatmul.mubr.bf16.gmra.mrb[24].mxu1 %v788_v46  ;;  %2424 = vmatprep.mubr.bf16.mxu0 %v606_v55  ;;  %v9769_v20 = vcombine.low %v192_v40, %v9762_v11  ;;  %v991_v46 = vshll.u32 %v9502_v0, 16  ;;  %v630_v51 = vsel %vm510_vm1, %v625_v30, %v629_v31  ;;  %v648_v30 = vrot.slane %v646_v10, 1  ;;  %v231_v31 = vld [vmem:[%s9462_s27 + $0x84] sm:$0xe] }
  0x61   : > { %2585 = vmatprep.mubr.bf16.mxu1 %v9735_v47  ;;  %v802_v10 = vrot.slane %v9812_v2, 1 }
  0x62   : > { %v634_v33 = vshll.u32 %v9769_v20, 16  ;;  %v632_v53 = vshrl.u32 %v9769_v20, 16  ;;  %v649_v60 = vor.u32 %v648_v30, %v644_v28  ;;  %v7059_v30 = vld [vmem:[%s9462_s27 + $0x9c] sm:$0xf] }
  0x64   : > { %v636_v55 = vrot.slane %v634_v33, 1 }
  0x66   : > { %v637_v40 = vor.u32 %v636_v55, %v632_v53  ;;  %v7206_v53 = vcombine.low %v231_v31, %v9784_v36  ;;  %v9850_v55 = vld [vmem:[%s9462_s27 + $0x98] ss:$0 sps:$4 sm:$0x11]   ;;  %v9863_v36 = vrot.slane %v7244_v34, 1  ;;  %v9877_v31 = vld [vmem:[%s9462_s27 + $0xa0] sm:$0xf] }
  0x67   : > { %2425 = vmatmul.mubr.bf16.gmra.mrb[28].mxu0 %v9676_v1  ;;  %v663_v28 = vshll.u32 %v9850_v55, 16  ;;  %v9881_v34 = vld [vmem:[%s9462_s27 + $0xa4] ss:$0 sps:$4 sm:$0x11]  }
  0x68   : > { %2586 = vmatmul.mubr.bf16.gmra.mrb[28].mxu1 %v791_v6  ;;  %2432 = vmatprep.mubr.bf16.mxu0 %v618_v13  ;;  %v641_v6 = vrot.slane %v639_v50, 1  ;;  %v196_v13 = vld [vmem:[%s9462_s27 + $0x90] sm:$0xf]  ;;  %v653_v50 = vrot.slane %v651_v23, 1 }
  0x69   : > { %2593 = vmatprep.mubr.bf16.mxu1 %v9757_v9  ;;  %v9836_v33 = vcombine.low %v196_v13, %v9819_v14 }
  0x6a   : > { %v642_v11 = vsel %vm510_vm1, %v637_v40, %v641_v6  ;;  %v801_v40 = vrot.slane %v7206_v53, 1  ;;  %v654_v17 = vsel %vm510_vm1, %v649_v60, %v653_v50  ;;  %v7087_v60 = vld [vmem:[%s9462_s27 + $0x3c] sm:$0xe]  ;;  %v202_v50 = vld [vmem:[%s9462_s27 + $0xb4] sm:$0xf] }
  0x6b   : > { %v658_v58 = vshll.u32 %v9836_v33, 16  ;;  %v656_v13 = vshrl.u32 %v9836_v33, 16 }
  0x6c   : > { %v803_v53 = vsel %vm767_vm0, %v801_v40, %v802_v10 }
  0x6d   : > { %v660_v23 = vrot.slane %v658_v58, 1  ;;  %v9892_v58 = vcombine.low %v7059_v30, %v9877_v31  ;;  %v7061_v30 = vld [vmem:[%s9462_s27 + $0xa8] sm:$0xf] }
  0x6f   : > { %2433 = vmatmul.mubr.bf16.gmra.mrb[32].mxu0 %v9717_v27  ;;  %v797_v27 = vsel %vm767_vm0, %v795_v21, %v796_v49  ;;  %v7057_v49 = vld [vmem:[%s9462_s27 + $0x90] sm:$0xf]  ;;  %12341 = vst [vmem:[#allocation8_spill] sm:$0xff] %v9892_v58 }
  0x70   : > { %2594 = vmatmul.mubr.bf16.gmra.mrb[32].mxu1 %v794_v44  ;;  %2440 = vmatprep.mubr.bf16.mxu0 %v630_v51  ;;  %v799_v44 = vrot.slane %v9779_v29, 1  ;;  %v9846_v51 = vld [vmem:[%s9462_s27 + $0x94] sm:$0xf]  ;;  %v7085_v29 = vld [vmem:[%s9462_s27 + $0x24] sm:$0xe] }
  0x71   : > { %2601 = vmatprep.mubr.bf16.mxu1 %v9792_v45  ;;  %v7245_v2 = vcombine.low %v7085_v29, %v9515_v12  ;;  %v9887_v12 = vrot.slane %v991_v46, 1  ;;  %v805_v46 = vrot.slane %v9850_v55, 1  ;;  %v9910_v29 = vld [vmem:[%s9462_s27 + $0xac] sm:$0xf]  ;;  %v233_v55 = vld [vmem:[%s9462_s27 + $0x9c] sm:$0xe] }
  0x72   : > { %v800_v6 = vsel %vm767_vm0, %v798_v41, %v799_v44  ;;  %v661_v44 = vor.u32 %v660_v23, %v656_v13  ;;  %v7088_v23 = vld [vmem:[%s9462_s27 + $0x48] sm:$0xe] }
  0x73   : > { %v9902_v13 = vrot.slane %v7245_v2, 1  ;;  %v7248_v21 = vcombine.low %v7088_v23, %v9645_v43  ;;  %v7090_v43 = vld [vmem:[%s9462_s27 + $0x60] sm:$0xe] }
  0x77   : > { %2441 = vmatmul.mubr.bf16.gmra.mrb[36].mxu0 %v9742_v56  ;;  %v9860_v56 = vcombine.low %v7057_v49, %v9846_v51  ;;  %v665_v49 = vrot.slane %v663_v28, 1 }
  0x78   : > { %2602 = vmatmul.mubr.bf16.gmra.mrb[36].mxu1 %v797_v27  ;;  %2448 = vmatprep.mubr.bf16.mxu0 %v642_v11  ;;  %v9868_v27 = vcombine.low %v198_v57, %v9855_v62  ;;  %v7207_v11 = vcombine.low %v232_v38, %v9819_v14  ;;  %v200_v14 = vld [vmem:[%s9462_s27 + $0xa8] sm:$0xf]  ;;  %v9896_v57 = vld [vmem:[%s9462_s27 + $0xac] sm:$0xf] }
  0x79   : > { %2609 = vmatprep.mubr.bf16.mxu1 %v9825_v16  ;;  %12340 = vst [vmem:[#allocation7_spill] sm:$0xff] %v9860_v56  ;;  %v666_v28 = vsel %vm510_vm1, %v661_v44, %v665_v49  ;;  %v7247_v44 = vcombine.low %v7087_v60, %v9585_v3  ;;  %v9938_v60 = vrot.slane %v1003_v63, 1 }
  0x7a   : > { %v670_v41 = vshll.u32 %v9868_v27, 16  ;;  %v804_v10 = vrot.slane %v7207_v11, 1  ;;  %v668_v40 = vshrl.u32 %v9868_v27, 16  ;;  %v9920_v11 = vld [vmem:[%s9462_s27 + $0xb0] ss:$0 sps:$4 sm:$0x11]  }
  0x7c   : > { %v672_v38 = vrot.slane %v670_v41, 1  ;;  %v806_v1 = vsel %vm767_vm0, %v804_v10, %v805_v46  ;;  %v687_v10 = vshll.u32 %v9920_v11, 16  ;;  %v7099_v46 = vld [vmem:[%s9462_s27 + $0x18] sm:$0xf] }
  0x7e   : > { %v673_v49 = vor.u32 %v672_v38, %v668_v40  ;;  %v234_v38 = vld [vmem:[%s9462_s27 + $0xa8] sm:$0xe] }
  0x7f   : > { %2449 = vmatmul.mubr.bf16.gmra.mrb[40].mxu0 %v9769_v20  ;;  %v7086_v20 = vld [vmem:[%s9462_s27 + $0x30] sm:$0xe] }
  0x80   : > { %2610 = vmatmul.mubr.bf16.gmra.mrb[40].mxu1 %v800_v6  ;;  %2456 = vmatprep.mubr.bf16.mxu0 %v654_v17  ;;  %v675_v17 = vshll.u32 %v9881_v34, 16  ;;  %v9913_v6 = vcombine.low %v200_v14, %v9896_v57  ;;  %v7246_v2 = vcombine.low %v7086_v20, %v9546_v37  ;;  %v9929_v37 = vcombine.low %v7061_v30, %v9910_v29  ;;  %v9933_v20 = vld [vmem:[%s9462_s27 + $0xb8] sm:$0xf] }
  0x81   : > { %2617 = vmatprep.mubr.bf16.mxu1 %v9860_v56  ;;  %v9955_v30 = vcombine.low %v202_v50, %v9933_v20  ;;  %v7209_v50 = vcombine.low %v234_v38, %v9896_v57 }
  0x82   : > { %v682_v14 = vshll.u32 %v9913_v6, 16  ;;  %12342 = vst [vmem:[#allocation9_spill] sm:$0xff] %v9929_v37  ;;  %v9940_v40 = vrot.slane %v7246_v2, 1  ;;  %v680_v23 = vshrl.u32 %v9913_v6, 16 }
  0x87   : > { %2457 = vmatmul.mubr.bf16.gmra.mrb[44].mxu0 %v9798_v32  ;;  %v7208_v32 = vcombine.low %v233_v55, %v9855_v62  ;;  %v9948_v62 = vrot.slane %v1015_v4, 1  ;;  %v7089_v55 = vld [vmem:[%s9462_s27 + $0x54] sm:$0xe]  ;;  %v808_v4 = vrot.slane %v9881_v34, 1  ;;  %v9971_v34 = vrot.slane %v7248_v21, 1 }
  0x88   : > { %2618 = vmatmul.mubr.bf16.gmra.mrb[44].mxu1 %v803_v53  ;;  %2464 = vmatprep.mubr.bf16.mxu0 %v666_v28  ;;  %v677_v53 = vrot.slane %v675_v17, 1  ;;  %v9950_v17 = vrot.slane %v7247_v44, 1  ;;  %v684_v28 = vrot.slane %v682_v14, 1  ;;  %v7063_v44 = vld [vmem:[%s9462_s27 + $0xb4] sm:$0xf]  ;;  %v689_v14 = vrot.slane %v687_v10, 1 }
  0x89   : > { %2625 = vmatprep.mubr.bf16.mxu1 %v9892_v58  ;;  %v807_v2 = vrot.slane %v7208_v32, 1  ;;  %v7100_v32 = vld [vmem:[%s9462_s27 + $0x1c] sm:$0xf]  ;;  %v810_v21 = vrot.slane %v7209_v50, 1  ;;  %v7250_v50 = vcombine.low %v7090_v43, %v9728_v35  ;;  %v7091_v35 = vld [vmem:[%s9462_s27 + $0x6c] sm:$0xe] }
  0x8a   : > { %v678_v63 = vsel %vm510_vm1, %v673_v49, %v677_v53  ;;  %v9964_v49 = vrot.slane %v1027_v5, 1  ;;  %v7064_v53 = vld [vmem:[%s9462_s27 + $0xb8] sm:$0xf]  ;;  %v685_v3 = vor.u32 %v684_v28, %v680_v23  ;;  %v694_v5 = vshll.u32 %v9955_v30, 16  ;;  %v235_v28 = vld [vmem:[%s9462_s27 + $0xb4] sm:$0xe] }
  0x8b   : > { %v809_v57 = vsel %vm767_vm0, %v807_v2, %v808_v4  ;;  %v9980_v38 = vcombine.low %v7063_v44, %v7064_v53  ;;  %v811_v23 = vrot.slane %v9920_v11, 1  ;;  %v9986_v41 = vcombine.low %v7099_v46, %v7100_v32  ;;  %v7101_v46 = vld [vmem:[%s9462_s27 + $0x24] sm:$0xf]  ;;  %v10012_v10 = vld [vmem:[%s9462_s27 + $0x20] ss:$0 sps:$4 sm:$0x11]  }
  0x8c   : > { %v690_v2 = vsel %vm510_vm1, %v685_v3, %v689_v14  ;;  %v692_v4 = vshrl.u32 %v9955_v30, 16  ;;  %v696_v44 = vrot.slane %v694_v5, 1  ;;  %v7210_v11 = vcombine.low %v235_v28, %v9933_v20  ;;  %v9018_v3 = vld [vmem:[%s9462_s27 + $0x20] ss:$0 sps:$4 sm:$0x11]  }
  0x8d   : > { %12343 = vst [vmem:[#allocation10_spill] sm:$0xff] %v9980_v38  ;;  %v1443_v14 = vshll.u32 %v9986_v41, 16  ;;  %v10006_v32 = vrot.slane %v1039_v15, 1  ;;  %v1441_v20 = vshrl.u32 %v9986_v41, 16 }
  0x8e   : > { %v697_v43 = vor.u32 %v696_v44, %v692_v4  ;;  %v813_v15 = vrot.slane %v7210_v11, 1  ;;  %v1448_v44 = vshll.u32 %v9018_v3, 16  ;;  %v7251_v11 = vcombine.low %v7091_v35, %v9748_v61 }
  0x8f   : > { %2465 = vmatmul.mubr.bf16.gmra.mrb[48].mxu0 %v9836_v33  ;;  %v7066_v33 = vld [vmem:[%s9462_s27 + $0xc4] sm:$0xf]  ;;  %v1445_v4 = vrot.slane %v1443_v14, 1  ;;  %v10042_v14 = vld [vmem:[%s9462_s27 + $0x2c] ss:$0 sps:$4 sm:$0x11]  }
  0x90   : > { %2626 = vmatmul.mubr.bf16.gmra.mrb[48].mxu1 %v806_v1  ;;  %2472 = vmatprep.mubr.bf16.mxu0 %v678_v63  ;;  %v9974_v1 = vld [vmem:[%s9462_s27 + $0xbc] ss:$0 sps:$4 sm:$0x11]   ;;  %v7249_v63 = vcombine.low %v7089_v55, %v9686_v8  ;;  %v9994_v8 = vld [vmem:[%s9462_s27 + $0x14] ss:$0 sps:$4 sm:$0x11]   ;;  %v10016_v28 = vcombine.low %v7065_v22, %v7066_v33 }
  0x91   : > { %2633 = vmatprep.mubr.bf16.mxu1 %v9929_v37  ;;  %v699_v53 = vshll.u32 %v9974_v1, 16  ;;  %v7102_v55 = vld [vmem:[%s9462_s27 + $0x28] sm:$0xf]  ;;  %v10027_v22 = vrot.slane %v7250_v50, 1  ;;  %v996_v33 = vshll.u32 %v10012_v10, 16  ;;  %v1233_v50 = vrot.slane %v9994_v8, 1 }
  0x92   : > { %v10008_v5 = vrot.slane %v7249_v63, 1  ;;  %12344 = vst [vmem:[#allocation11_spill] sm:$0xff] %v10016_v28  ;;  %v10018_v7 = vcombine.low %v7101_v46, %v7102_v55  ;;  %v814_v63 = vrot.slane %v9974_v1, 1  ;;  %v7103_v55 = vld [vmem:[%s9462_s27 + $0x30] sm:$0xf]  ;;  %v12348_v61 = vshll.u32 %v9735_v47, 16 }
  0x93   : > { %12346 = vst [vmem:[#allocation12_spill] sm:$0xff] %v10027_v22  ;;  %v1446_v35 = vor.u32 %v1445_v4, %v1441_v20  ;;  %v10061_v20 = vld [vmem:[%s9462_s27 + $0x40] sm:$0xf]  ;;  %v10117_v37 = vld [vmem:[%s9462_s27 + $0x50] ss:$0 sps:$4 sm:$0x11]  }
  0x94   : > { %v1455_v46 = vshll.u32 %v10018_v7, 16  ;;  %12351 = vst [vmem:[#allocation16_spill] sm:$0xff] %v10061_v20  ;;  %v815_v4 = vsel %vm767_vm0, %v813_v15, %v814_v63  ;;  %v1234_v15 = vsel %vm767_vm0, %v9831_v25, %v1233_v50  ;;  %v12354_v63 = vshrl.u32 %v9481_v42, 16  ;;  %v7109_v42 = vld [vmem:[%s9462_s27 + $0x54] sm:$0xf] }
  0x97   : > { %2473 = vmatmul.mubr.bf16.gmra.mrb[52].mxu0 %v9868_v27  ;;  %v701_v27 = vrot.slane %v699_v53, 1  ;;  %v9021_v53 = vld [vmem:[%s9462_s27 + $0x2c] ss:$0 sps:$4 sm:$0x11]  }
  0x98   : > { %2634 = vmatmul.mubr.bf16.gmra.mrb[52].mxu1 %v809_v57  ;;  %2480 = vmatprep.mubr.bf16.mxu0 %v690_v2  ;;  %v812_v57 = vsel %vm767_vm0, %v810_v21, %v811_v23  ;;  %v984_v2 = vshll.u32 %v9994_v8, 16  ;;  %v12345_v21 = vshll.u32 %v9700_v54, 16  ;;  %v1453_v8 = vshrl.u32 %v10018_v7, 16 }
  0x99   : > { %2641 = vmatprep.mubr.bf16.mxu1 %v9980_v38  ;;  %v702_v1 = vsel %vm510_vm1, %v697_v43, %v701_v27  ;;  %v1450_v43 = vrot.slane %v1448_v44, 1  ;;  %v1236_v27 = vrot.slane %v10012_v10, 1  ;;  %v10050_v38 = vrot.slane %v996_v33, 1 }
  0x9a   : > { %v10024_v23 = vrot.slane %v12345_v21, 1  ;;  %v10036_v21 = vld [vmem:[%s9462_s27 + $0x34] sm:$0xf]  ;;  %v986_v3 = vrot.slane %v984_v2, 1  ;;  %v1460_v2 = vshll.u32 %v9021_v53, 16  ;;  %v10063_v10 = vrot.slane %v7251_v11, 1 }
  0x9b   : > { %12347 = vst [vmem:[#allocation13_spill] sm:$0xff] %v10036_v21  ;;  %v1008_v33 = vshll.u32 %v10042_v14, 16  ;;  %v1451_v53 = vsel %vm510_vm1, %v1446_v35, %v1450_v43  ;;  %v982_v11 = vor.u32 %v9788_v39, %v12354_v63  ;;  %v7107_v35 = vld [vmem:[%s9462_s27 + $0x48] sm:$0xf]  ;;  %v10089_v43 = vld [vmem:[%s9462_s27 + $0x4c] sm:$0xf] }
  0x9c   : > { %12352 = vst [vmem:[#allocation17_spill] sm:$0xff] %v10063_v10  ;;  %12355 = vst [vmem:[#allocation19_spill] sm:$0xff] %v10089_v43  ;;  %v1462_v10 = vrot.slane %v1460_v2, 1  ;;  %v10107_v63 = vld [vmem:[%s9462_s27 + $0x50] ss:$0 sps:$4 sm:$0x11]  }
  0x9d   : > { %v987_v50 = vsel %vm510_vm1, %v982_v11, %v986_v3  ;;  %v1496_v11 = vshll.u32 %v10107_v63, 16 }
  0x9f   : > { %2481 = vmatmul.mubr.bf16.gmra.mrb[56].mxu0 %v9913_v6  ;;  %v7105_v6 = vld [vmem:[%s9462_s27 + $0x3c] sm:$0xf] }
  0xa0   : > { %2642 = vmatmul.mubr.bf16.gmra.mrb[56].mxu1 %v812_v57  ;;  %v10046_v57 = vrot.slane %v12348_v61, 1  ;;  %2488 = vmatprep.mubr.bf16.mxu0 %v702_v1  ;;  %v1457_v61 = vrot.slane %v1455_v46, 1  ;;  %v10070_v1 = vld [vmem:[%s9462_s27 + $0x38] ss:$0 sps:$4 sm:$0x11]   ;;  %v10077_v47 = vcombine.low %v7105_v6, %v10061_v20  ;;  %v10091_v6 = vrot.slane %v1008_v33, 1 }
  0xa1   : > { %2649 = vmatprep.mubr.bf16.mxu1 %v10016_v28  ;;  %v10054_v28 = vcombine.low %v7103_v55, %v10036_v21  ;;  %v10073_v46 = vld [vmem:[%s9462_s27 + $0x44] ss:$0 sps:$4 sm:$0x11]   ;;  %v1020_v39 = vshll.u32 %v10070_v1, 16  ;;  %v10111_v20 = vld [vmem:[%s9462_s27 + $0x58] sm:$0xf] }
  0xa2   : > { %12349 = vst [vmem:[#allocation14_spill] sm:$0xff] %v10046_v57  ;;  %v10057_v57 = vld [vmem:[%s9462_s27 + $0x38] ss:$0 sps:$4 sm:$0x11]   ;;  %12353 = vst [vmem:[#allocation18_spill] sm:$0xff] %v10073_v46  ;;  %v1458_v44 = vor.u32 %v1457_v61, %v1453_v8  ;;  %v1479_v61 = vshll.u32 %v10077_v47, 16 }
  0xa3   : > { %12350 = vst [vmem:[#allocation15_spill] sm:$0xff] %v10057_v57  ;;  %v1467_v55 = vshll.u32 %v10054_v28, 16  ;;  %v10080_v21 = vld [vmem:[%s9462_s27 + $0x44] ss:$0 sps:$4 sm:$0x11]   ;;  %v1472_v25 = vshll.u32 %v10057_v57, 16 }
  0xa4   : > { %v7092_v8 = vld [vmem:[%s9462_s27 + $0x78] sm:$0xe]  ;;  %v1484_v33 = vshll.u32 %v10073_v46, 16  ;;  %v1477_v46 = vshrl.u32 %v10077_v47, 16 }
  0xa5   : > { %v1469_v2 = vrot.slane %v1467_v55, 1  ;;  %v7252_v57 = vcombine.low %v7092_v8, %v9776_v26  ;;  %v1463_v55 = vsel %vm510_vm1, %v1458_v44, %v1462_v10  ;;  %v12356_v26 = vshll.u32 %v9757_v9, 16  ;;  %v10168_v44 = vld [vmem:[%s9462_s27 + $0x64] sm:$0xf] }
  0xa6   : > { %v1237_v10 = vsel %vm767_vm0, %v9863_v36, %v1236_v27  ;;  %v1481_v8 = vrot.slane %v1479_v61, 1  ;;  %v10138_v58 = vrot.slane %v1484_v33, 1  ;;  %v9030_v36 = vld [vmem:[%s12298_s1 + $0x210] sm:$0xff]   ;;  %v12360_v61 = vshrl.u32 %v9502_v0, 16  ;;  %v7113_v27 = vld [vmem:[%s9462_s27 + $0x6c] sm:$0xf] }
  0xa7   : > { %2489 = vmatmul.mubr.bf16.gmra.mrb[60].mxu0 %v9955_v30  ;;  %v1032_v30 = vshll.u32 %v10080_v21, 16  ;;  %v10128_v3 = vrot.slane %v12356_v26, 1  ;;  %v10172_v0 = vld [vmem:[%s9462_s27 + $0x68] ss:$0 sps:$4 sm:$0x11]  }
  0xa8   : > { %2650 = vmatmul.mubr.bf16.gmra.mrb[60].mxu1 %v815_v4  ;;  %v1465_v4 = vshrl.u32 %v10054_v28, 16  ;;  %2690 = vmatprep.mubr.bf16.mxu0 %v1234_v15  ;;  %v1474_v15 = vrot.slane %v1472_v25, 1  ;;  %v10136_v25 = vcombine.low %v7109_v42, %v10111_v20  ;;  %v1044_v42 = vshll.u32 %v10117_v37, 16 }
  0xa9   : > { %2851 = vmatprep.mubr.bf16.mxu1 %v1451_v53  ;;  %v10103_v53 = vcombine.low %v7107_v35, %v10089_v43  ;;  %v9023_v35 = vld [vmem:[%s12298_s1 + $0x208] sm:$0xff]   ;;  %v10122_v43 = vrot.slane %v1020_v39, 1  ;;  %12357 = vst [vmem:[#allocation20_spill] sm:$0xff] %v10128_v3  ;;  %v10140_v26 = vrot.slane %v1032_v30, 1 }
  0xaa   : > { %v1470_v39 = vor.u32 %v1469_v2, %v1465_v4  ;;  %v10143_v3 = vld [vmem:[%s9462_s27 + $0x5c] ss:$0 sps:$4 sm:$0x11]   ;;  %v10152_v2 = vrot.slane %v7252_v57, 1  ;;  %v1503_v4 = vshll.u32 %v10136_v25, 16 }
  0xab   : > { %v1491_v22 = vshll.u32 %v10103_v53, 16  ;;  %12358 = vst [vmem:[#allocation21_spill] sm:$0xff] %v10143_v3  ;;  %v10161_v30 = vld [vmem:[%s9462_s27 + $0x5c] ss:$0 sps:$4 sm:$0x11]  }
  0xac   : > { %12359 = vst [vmem:[#allocation22_spill] sm:$0xff] %v10152_v2  ;;  %v7111_v57 = vld [vmem:[%s9462_s27 + $0x60] sm:$0xf]  ;;  %v10184_v2 = vld [vmem:[%s9462_s27 + $0x70] sm:$0xf] }
  0xad   : > { %v10158_v33 = vrot.slane %v1491_v22, 1  ;;  %v1475_v22 = vsel %vm510_vm1, %v1470_v39, %v1474_v15  ;;  %12361 = vst [vmem:[#allocation23_spill] sm:$0xff] %v10184_v2  ;;  %v10190_v15 = vcombine.low %v7111_v57, %v10168_v44  ;;  %v10193_v39 = vld [vmem:[%s9462_s27 + $0x68] ss:$0 sps:$4 sm:$0x11]  }
  0xae   : > { %v7094_v57 = vld [vmem:[%s9462_s27 + $0x90] sm:$0xe] }
  0xaf   : > { %2691 = vmatmul.mubr.bf16.vlgmr.msra.gmra.mrb[64].mxu0 %v987_v50  ;;  %v994_v50 = vor.u32 %v9887_v12, %v12360_v61 }
  0xb0   : > { %2852 = vmatmul.mubr.bf16.vlgmr.msra.gmra.mrb[64].mxu1 %v9986_v41  ;;  %v7093_v41 = vld [vmem:[%s9462_s27 + $0x84] sm:$0xe]  ;;  %8766 = vmatpush3.bf16.msra.mxu0 %v9712_v24  ;;  %v1508_v24 = vshll.u32 %v10143_v3, 16  ;;  %v12364_v3 = vrot.slane %v10042_v14, 1 }
  0xb1   : > { %2859 = vmatprep.mubr.bf16.mxu1 %v1463_v55  ;;  %2698 = vmatprep.mubr.bf16.mxu0 %v1237_v10  ;;  %v10163_v55 = vrot.slane %v1496_v11, 1  ;;  %v10176_v10 = vrot.slane %v1044_v42, 1  ;;  %v9037_v11 = vld [vmem:[%s12298_s1 + $0x218] sm:$0xff]   ;;  %v7253_v9 = vcombine.low %v7093_v41, %v9804_v59  ;;  %v999_v12 = vsel %vm510_vm1, %v994_v50, %v10050_v38  ;;  %v10209_v50 = vld [vmem:[%s9462_s27 + $0x74] ss:$0 sps:$4 sm:$0x11]  }
  0xb2   : > { %8767 = vmatprep.subr.bf16.mxu0 %v9023_v35  ;;  %v12362_v42 = vshll.u32 %v9792_v45, 16  ;;  %v1240_v59 = vsel %vm767_vm0, %v9902_v13, %v12364_v3  ;;  %v10204_v38 = vrot.slane %v1503_v4, 1  ;;  %v1056_v41 = vshll.u32 %v10161_v30, 16  ;;  %12365 = vst [vmem:[#allocation25_spill] sm:$0xff] %v10209_v50 }
  0xb3   : > { %v10218_v14 = vld [vmem:[%s9462_s27 + $0x74] ss:$0 sps:$4 sm:$0x11]   ;;  %v12367_v13 = vshrl.u32 %v9524_v19, 16  ;;  %v1482_v4 = vor.u32 %v1481_v8, %v1477_v46  ;;  %v9044_v19 = vld [vmem:[%s12298_s1 + $0x220] sm:$0xff]  }
  0xb4   : > { %8768 = vmatpush3.bf16.msra.mxu0 %v9023_v35  ;;  %v10197_v61 = vrot.slane %v12362_v42, 1  ;;  %v10212_v42 = vrot.slane %v1508_v24, 1  ;;  %12366 = vst [vmem:[#allocation26_spill] sm:$0xff] %v10218_v14  ;;  %v7115_v35 = vld [vmem:[%s9462_s27 + $0x78] sm:$0xf]  ;;  %v1515_v24 = vshll.u32 %v10190_v15, 16 }
  0xb5   : > { %8769 = vmatprep.subr.bf16.mxu0 %v9030_v36  ;;  %v1006_v3 = vor.u32 %v9938_v60, %v12367_v13  ;;  %v10233_v60 = vrot.slane %v7253_v9, 1  ;;  %v10235_v46 = vrot.slane %v1056_v41, 1  ;;  %v1532_v13 = vshll.u32 %v10209_v50, 16  ;;  %v10247_v9 = vld [vmem:[%s9462_s27 + $0x80] ss:$0 sps:$4 sm:$0x11]  }
  0xb6   : > { %12363 = vst [vmem:[#allocation24_spill] sm:$0xff] %v10197_v61  ;;  %v10225_v61 = vld [vmem:[%s9462_s27 + $0x7c] sm:$0xf]  ;;  %v1080_v45 = vshll.u32 %v10218_v14, 16  ;;  %v7254_v41 = vcombine.low %v7094_v57, %v9846_v51  ;;  %v9051_v50 = vld [vmem:[%s12298_s1 + $0x228] sm:$0xff]  }
  0xb7   : > { %2699 = vmatmul.mubr.bf16.gmra.mrb[68].mxu0 %v999_v12  ;;  %12368 = vst [vmem:[#allocation27_spill] sm:$0xff] %v10225_v61  ;;  %12369 = vst [vmem:[#allocation28_spill] sm:$0xff] %v10233_v60  ;;  %v1011_v8 = vsel %vm510_vm1, %v1006_v3, %v10091_v6  ;;  %v1487_v12 = vsel %vm510_vm1, %v1482_v4, %v10138_v58  ;;  %v10256_v60 = vld [vmem:[%s9462_s27 + $0x88] sm:$0xf]  ;;  %v12370_v58 = vrot.slane %v10070_v1, 1  ;;  %v12371_v3 = vshrl.u32 %v10103_v53, 16 }
  0xb8   : > { %2860 = vmatmul.mubr.bf16.gmra.mrb[68].mxu1 %v10018_v7  ;;  %v10215_v7 = vcombine.low %v7113_v27, %v10184_v2  ;;  %2706 = vmatprep.mubr.bf16.mxu0 %v1240_v59  ;;  %v1068_v27 = vshll.u32 %v10193_v39, 16  ;;  %v10244_v2 = vcombine.low %v7115_v35, %v10225_v61  ;;  %v10261_v35 = vrot.slane %v1515_v24, 1  ;;  %v7119_v24 = vld [vmem:[%s9462_s27 + $0x90] sm:$0xf]  ;;  %v10311_v57 = vld [vmem:[%s9462_s27 + $0x94] sm:$0xf] }
  0xb9   : > { %2867 = vmatprep.mubr.bf16.mxu1 %v1475_v22  ;;  %8770 = vmatpush3.bf16.msra.mxu0 %v9030_v36  ;;  %v1520_v22 = vshll.u32 %v10172_v0, 16  ;;  %v7117_v36 = vld [vmem:[%s9462_s27 + $0x84] sm:$0xf]  ;;  %v1243_v6 = vsel %vm767_vm0, %v9940_v40, %v12370_v58  ;;  %v1494_v4 = vor.u32 %v10158_v33, %v12371_v3  ;;  %v12373_v40 = vshll.u32 %v9825_v16, 16 }
  0xba   : > { %8771 = vmatprep.subr.bf16.mxu0 %v9037_v11  ;;  %v1527_v59 = vshll.u32 %v10215_v7, 16  ;;  %v10265_v51 = vrot.slane %v1068_v27, 1  ;;  %v10283_v1 = vcombine.low %v7117_v36, %v10256_v60  ;;  %v10291_v58 = vrot.slane %v1532_v13, 1  ;;  %v9058_v36 = vld [vmem:[%s12298_s1 + $0x230] sm:$0xff]  }
  0xbb   : > { %v10263_v61 = vrot.slane %v1520_v22, 1  ;;  %v10278_v22 = vld [vmem:[%s9462_s27 + $0x80] ss:$0 sps:$4 sm:$0x11]   ;;  %v10287_v27 = vrot.slane %v12373_v40, 1  ;;  %v10295_v3 = vrot.slane %v7254_v41, 1 }
  0xbc   : > { %12372 = vst [vmem:[#allocation29_spill] sm:$0xff] %v10278_v22  ;;  %v10289_v33 = vrot.slane %v1527_v59, 1  ;;  %v12377_v40 = vshrl.u32 %v9560_v48, 16  ;;  %v10305_v13 = vld [vmem:[%s9462_s27 + $0x8c] ss:$0 sps:$4 sm:$0x11]  }
  0xbd   : > { %8772 = vmatpush3.bf16.msra.mxu0 %v9037_v11  ;;  %v1539_v11 = vshll.u32 %v10244_v2, 16  ;;  %12374 = vst [vmem:[#allocation30_spill] sm:$0xff] %v10287_v27  ;;  %12376 = vst [vmem:[#allocation32_spill] sm:$0xff] %v10295_v3  ;;  %v1092_v41 = vshll.u32 %v10278_v22, 16  ;;  %v10317_v48 = vld [vmem:[%s9462_s27 + $0xa8] sm:$0xe]  ;;  %v1499_v27 = vsel %vm510_vm1, %v1494_v4, %v10163_v55 }
  0xbe   : > { %8773 = vmatprep.subr.bf16.mxu0 %v9044_v19  ;;  %v10325_v59 = vld [vmem:[%s9462_s27 + $0x8c] ss:$0 sps:$4 sm:$0x11]   ;;  %v12379_v16 = vshrl.u32 %v9660_v52, 16  ;;  %v12381_v52 = vshrl.u32 %v10136_v25, 16 }
  0xbf   : > { %2707 = vmatmul.mubr.bf16.gmra.mrb[72].mxu0 %v1011_v8  ;;  %v1018_v8 = vor.u32 %v9948_v62, %v12377_v40  ;;  %v10319_v62 = vrot.slane %v1539_v11, 1  ;;  %v1551_v40 = vshll.u32 %v10283_v1, 16  ;;  %v7121_v11 = vld [vmem:[%s9462_s27 + $0x9c] sm:$0xf] }
  0xc0   : > { %2868 = vmatmul.mubr.bf16.gmra.mrb[72].mxu1 %v10054_v28  ;;  %v1544_v28 = vshll.u32 %v10247_v9, 16  ;;  %2714 = vmatprep.mubr.bf16.mxu0 %v1243_v6  ;;  %v10314_v6 = vld [vmem:[%s9462_s27 + $0x9c] sm:$0xe]  ;;  %v1042_v22 = vor.u32 %v10006_v32, %v12379_v16  ;;  %v1506_v16 = vor.u32 %v10204_v38, %v12381_v52  ;;  %v10352_v32 = vcombine.low %v7119_v24, %v10311_v57  ;;  %v10355_v55 = vld [vmem:[%s9462_s27 + $0x98] ss:$0 sps:$4 sm:$0x11]  }
  0xc1   : > { %2875 = vmatprep.mubr.bf16.mxu1 %v1487_v12  ;;  %v10293_v12 = vrot.slane %v1080_v45, 1  ;;  %8774 = vmatpush3.bf16.msra.mxu0 %v9044_v19  ;;  %v12378_v45 = vshrl.u32 %v9607_v18, 16  ;;  %v1023_v14 = vsel %vm510_vm1, %v1018_v8, %v10122_v43  ;;  %v12380_v18 = vrot.slane %v10080_v21, 1  ;;  %v10358_v4 = vld [vmem:[%s9462_s27 + $0x98] ss:$0 sps:$4 sm:$0x11]  }
  0xc2   : > { %8775 = vmatprep.subr.bf16.mxu0 %v9051_v50  ;;  %v10321_v19 = vrot.slane %v1544_v28, 1  ;;  %v9065_v28 = vld [vmem:[%s12298_s1 + $0x238] sm:$0xff]   ;;  %v10361_v21 = vrot.slane %v1092_v41, 1  ;;  %v1556_v43 = vshll.u32 %v10305_v13, 16  ;;  %v1104_v24 = vshll.u32 %v10325_v59, 16 }
  0xc3   : > { %12375 = vst [vmem:[#allocation31_spill] sm:$0xff] %v10293_v12  ;;  %v1030_v3 = vor.u32 %v9964_v49, %v12378_v45  ;;  %v10337_v12 = vld [vmem:[%s9462_s27 + $0xa0] sm:$0xf]  ;;  %v1246_v49 = vsel %vm767_vm0, %v9950_v17, %v12380_v18  ;;  %v10371_v8 = vld [vmem:[%s9462_s27 + $0xa4] ss:$0 sps:$4 sm:$0x11]   ;;  %v7256_v45 = vcombine.low %v10317_v48, %v9910_v29 }
  0xc4   : > { %v7123_v52 = vld [vmem:[%s9462_s27 + $0xa8] sm:$0xf]  ;;  %v10386_v38 = vrot.slane %v1551_v40, 1  ;;  %v1116_v29 = vshll.u32 %v10358_v4, 16  ;;  %v10405_v40 = vrot.slane %v1556_v43, 1  ;;  %v1580_v43 = vshll.u32 %v10371_v8, 16 }
  0xc5   : > { %8776 = vmatpush3.bf16.msra.mxu0 %v9051_v50  ;;  %v10368_v50 = vcombine.low %v7121_v11, %v10337_v12  ;;  %v1035_v41 = vsel %vm510_vm1, %v1030_v3, %v10140_v26  ;;  %v10384_v11 = vld [vmem:[%s9462_s27 + $0xac] sm:$0xf]  ;;  %v12383_v26 = vrot.slane %v10117_v37, 1  ;;  %v10403_v48 = vld [vmem:[%s9462_s27 + $0xa4] ss:$0 sps:$4 sm:$0x11]  }
  0xc6   : > { %8777 = vmatprep.subr.bf16.mxu0 %v9058_v36  ;;  %12384 = vst [vmem:[#allocation33_spill] sm:$0xff] %v10403_v48  ;;  %v10430_v3 = vrot.slane %v1116_v29, 1  ;;  %v12398_v17 = vshrl.u32 %v10215_v7, 16 }
  0xc7   : > { %2715 = vmatmul.mubr.bf16.gmra.mrb[76].mxu0 %v1023_v14  ;;  %v1511_v14 = vsel %vm510_vm1, %v1506_v16, %v10212_v42  ;;  %v1575_v37 = vshll.u32 %v10368_v50, 16  ;;  %v1128_v42 = vshll.u32 %v10403_v48, 16  ;;  %v12404_v48 = vld [vmem:[#allocation15_spill] sm:$0xff] }
  0xc8   : > { %2876 = vmatmul.mubr.bf16.gmra.mrb[76].mxu1 %v10077_v47  ;;  %v7255_v47 = vcombine.low %v10314_v6, %v9877_v31  ;;  %2722 = vmatprep.mubr.bf16.mxu0 %v1246_v49  ;;  %v1563_v31 = vshll.u32 %v10352_v32, 16  ;;  %v1568_v6 = vshll.u32 %v10355_v55, 16  ;;  %v12386_v49 = vshll.u32 %v9860_v56, 16  ;;  %12388 = vst [vmem:[#allocation35_spill] sm:$0xff] %v10430_v3  ;;  %v7153_v3 = vld [vmem:[%s9462_s27 + $0x60] sm:$0xe] }
  0xc9   : > { %2883 = vmatprep.mubr.bf16.mxu1 %v1499_v27  ;;  %v12382_v27 = vshrl.u32 %v9700_v54, 16  ;;  %8778 = vmatpush3.bf16.msra.mxu0 %v9058_v36  ;;  %v1249_v54 = vsel %vm767_vm0, %v9971_v34, %v12383_v26  ;;  %v10407_v36 = vrot.slane %v1104_v24, 1  ;;  %v10411_v34 = vcombine.low %v7123_v52, %v10384_v11  ;;  %v10447_v52 = vld [vmem:[%s9462_s27 + $0xb0] ss:$0 sps:$4 sm:$0x11]  }
  0xca   : > { %8779 = vmatprep.subr.bf16.mxu0 %v9065_v28  ;;  %v10419_v16 = vrot.slane %v12386_v49, 1  ;;  %v10425_v24 = vrot.slane %v1563_v31, 1  ;;  %v10427_v26 = vrot.slane %v1568_v6, 1  ;;  %v12390_v31 = vrot.slane %v10161_v30, 1  ;;  %12392 = vst [vmem:[#allocation37_spill] sm:$0xff] %v10447_v52 }
  0xcb   : > { %v1054_v18 = vor.u32 %v10024_v23, %v12382_v27  ;;  %v10397_v23 = vsel %vm510_vm1, %v1042_v22, %v10176_v10  ;;  %v12385_v10 = vshrl.u32 %v10190_v15, 16  ;;  %v10423_v27 = vld [vmem:[%s9462_s27 + $0xb0] ss:$0 sps:$4 sm:$0x11]   ;;  %v10442_v29 = vrot.slane %v1575_v37, 1 }
  0xcc   : > { %12387 = vst [vmem:[#allocation34_spill] sm:$0xff] %v10419_v16  ;;  %v1252_v6 = vsel %vm767_vm0, %v10008_v5, %v12390_v31  ;;  %v10449_v49 = vrot.slane %v1580_v43, 1  ;;  %v1592_v5 = vshll.u32 %v10423_v27, 16  ;;  %v10456_v37 = vrot.slane %v7256_v45, 1  ;;  %v7125_v31 = vld [vmem:[%s9462_s27 + $0xb4] sm:$0xf] }
  0xcd   : > { %v1518_v22 = vor.u32 %v10261_v35, %v12385_v10  ;;  %8780 = vmatpush3.bf16.msra.mxu0 %v9065_v28  ;;  %v10434_v10 = vrot.slane %v7255_v47, 1  ;;  %v12391_v28 = vld [vmem:[#allocation8_spill] sm:$0xff]  ;;  %v1587_v47 = vshll.u32 %v10411_v34, 16  ;;  %v12396_v43 = vrot.slane %v10193_v39, 1  ;;  %v7154_v16 = vld [vmem:[%s9462_s27 + $0x6c] sm:$0xe] }
  0xce   : > { %12395 = vst [vmem:[#allocation39_spill] sm:$0xff] %v10456_v37  ;;  %v12397_v35 = vld [vmem:[#allocation12_spill] sm:$0xff]  ;;  %v1530_v45 = vor.u32 %v10289_v33, %v12398_v17  ;;  %v10475_v37 = vld [vmem:[%s9462_s27 + $0xb8] sm:$0xf]  ;;  %v10503_v33 = vrot.slane %v1592_v5, 1  ;;  %v1709_v52 = vrot.slane %v10107_v63, 1  ;;  %v7297_v63 = vcombine.low %v7153_v3, %v10168_v44 }
  0xcf   : > { %12389 = vst [vmem:[#allocation36_spill] sm:$0xff] %v10434_v10  ;;  %2723 = vmatmul.mubr.bf16.gmra.mrb[80].mxu0 %v1035_v41  ;;  %v1523_v41 = vsel %vm510_vm1, %v1518_v22, %v10263_v61  ;;  %v10489_v17 = vrot.slane %v1587_v47, 1  ;;  %v10495_v61 = vcombine.low %v7125_v31, %v10475_v37  ;;  %v12407_v10 = vld [vmem:[#allocation19_spill] sm:$0xff]  ;;  %v7156_v56 = vld [vmem:[%s9462_s27 + $0x84] sm:$0xe] }
  0xd0   : > { %2884 = vmatmul.mubr.bf16.gmra.mrb[80].mxu1 %v10103_v53  ;;  %2730 = vmatprep.mubr.bf16.mxu0 %v1249_v54  ;;  %v10461_v53 = vsel %vm510_vm1, %v1054_v18, %v10235_v46  ;;  %v7149_v54 = vld [vmem:[%s9462_s27 + $0x30] sm:$0xe]  ;;  %v7150_v46 = vld [vmem:[%s9462_s27 + $0x3c] sm:$0xe]  ;;  %v10479_v18 = vrot.slane %v1128_v42, 1  ;;  %v1703_v42 = vrot.slane %v12404_v48, 1  ;;  %v1535_v47 = vsel %vm510_vm1, %v1530_v45, %v10291_v58 }
  0xd1   : > { %2891 = vmatprep.mubr.bf16.mxu1 %v1511_v14  ;;  %v12393_v14 = vshll.u32 %v12391_v28, 16  ;;  %v7151_v28 = vld [vmem:[%s9462_s27 + $0x48] sm:$0xe]  ;;  %v7155_v31 = vld [vmem:[%s9462_s27 + $0x78] sm:$0xe] }
  0xd2   : > { %12399 = vst [vmem:[#allocation12_spill] sm:$0xff] %v10479_v18  ;;  %v7152_v18 = vld [vmem:[%s9462_s27 + $0x54] sm:$0xe]  ;;  %v7295_v48 = vcombine.low %v7151_v28, %v12407_v10  ;;  %v7157_v58 = vld [vmem:[%s9462_s27 + $0x90] sm:$0xe]  ;;  %v12408_v45 = vld [vmem:[#allocation21_spill] sm:$0xff] }
  0xd3   : > { %v10453_v30 = vrot.slane %v12393_v14, 1  ;;  %v10469_v14 = vsel %vm767_vm0, %v12397_v35, %v12396_v43  ;;  %v12403_v35 = vld [vmem:[#allocation13_spill] sm:$0xff]  ;;  %v1712_v10 = vrot.slane %v12408_v45, 1  ;;  %v1715_v28 = vrot.slane %v10172_v0, 1  ;;  %v12411_v44 = vld [vmem:[#allocation27_spill] sm:$0xff] }
  0xd4   : > { %v7293_v43 = vcombine.low %v7149_v54, %v12403_v35  ;;  %v12406_v54 = vld [vmem:[#allocation18_spill] sm:$0xff]  ;;  %v1708_v5 = vrot.slane %v7295_v48, 1  ;;  %v1714_v45 = vrot.slane %v7297_v63, 1  ;;  %v7299_v3 = vcombine.low %v7155_v31, %v12411_v44 }
  0xd5   : > { %12394 = vst [vmem:[#allocation38_spill] sm:$0xff] %v10453_v30  ;;  %v12400_v30 = vld [vmem:[#allocation9_spill] sm:$0xff]  ;;  %v1706_v35 = vrot.slane %v12406_v54, 1  ;;  %v7296_v54 = vcombine.low %v7152_v18, %v10111_v20  ;;  %v12409_v20 = vld [vmem:[#allocation23_spill] sm:$0xff]  ;;  %v1721_v0 = vrot.slane %v10247_v9, 1  ;;  %v7301_v31 = vcombine.low %v7157_v58, %v10311_v57 }
  0xd6   : > { %v12401_v39 = vshll.u32 %v12400_v30, 16  ;;  %v1702_v30 = vrot.slane %v7293_v43, 1  ;;  %v7298_v18 = vcombine.low %v7154_v16, %v12409_v20  ;;  %v10527_v48 = vsel %vm767_vm0, %v1708_v5, %v1709_v52  ;;  %v10564_v20 = vld [vmem:[%s9462_s27 + $0xc4] sm:$0xf] }
  0xd7   : > { %2731 = vmatmul.mubr.bf16.gmra.mrb[84].mxu0 %v10397_v23  ;;  %v10533_v23 = vld [vmem:[%s9462_s27 + $0xbc] ss:$0 sps:$4 sm:$0x11]   ;;  %v7300_v16 = vcombine.low %v7156_v56, %v10256_v60  ;;  %v10542_v52 = vsel %vm767_vm0, %v1714_v45, %v1715_v28  ;;  %v1720_v5 = vrot.slane %v7299_v3, 1  ;;  %v1727_v9 = vrot.slane %v10355_v55, 1  ;;  %v12415_v3 = vld [vmem:[#allocation14_spill] sm:$0xff] }
  0xd8   : > { %v10484_v22 = vrot.slane %v12401_v39, 1  ;;  %v12405_v39 = vld [vmem:[#allocation16_spill] sm:$0xff]  ;;  %2892 = vmatmul.mubr.bf16.gmra.mrb[84].mxu1 %v10136_v25  ;;  %v10512_v43 = vsel %vm767_vm0, %v1702_v30, %v1703_v42  ;;  %v7158_v25 = vld [vmem:[%s9462_s27 + $0x9c] sm:$0xe]  ;;  %2738 = vmatprep.mubr.bf16.mxu0 %v1252_v6  ;;  %v7160_v6 = vld [vmem:[%s9462_s27 + $0xb4] sm:$0xe] }
  0xd9   : > { %2899 = vmatprep.mubr.bf16.mxu1 %v1523_v41  ;;  %v12410_v41 = vld [vmem:[#allocation25_spill] sm:$0xff]  ;;  %v1730_v56 = vrot.slane %v10371_v8, 1  ;;  %v10552_v60 = vsel %vm767_vm0, %v1720_v5, %v1721_v0  ;;  %v1733_v57 = vrot.slane %v10423_v27, 1  ;;  %v1736_v8 = vrot.slane %v10533_v23, 1  ;;  %v12413_v45 = vld [vmem:[#allocation3_spill] sm:$0xff] }
  0xda   : > { %12402 = vst [vmem:[#allocation40_spill] sm:$0xff] %v10484_v22  ;;  %v7294_v22 = vcombine.low %v7150_v46, %v12405_v39  ;;  %v1718_v42 = vrot.slane %v12410_v41, 1  ;;  %v7159_v46 = vld [vmem:[%s9462_s27 + $0xa8] sm:$0xe]  ;;  %v12412_v27 = vshrl.u32 %v10244_v2, 16  ;;  %v12414_v44 = vshrl.u32 %v12413_v45, 16 }
  0xdb   : > { %v7303_v28 = vcombine.low %v7159_v46, %v10384_v11  ;;  %v1604_v46 = vshll.u32 %v10533_v23, 16  ;;  %v10588_v0 = vld [vmem:[%s9462_s27 + $0xd4] ss:$0 sps:$4 sm:$0x11]   ;;  %v7161_v23 = vld [vmem:[%s9462_s27 + $0xc0] sm:$0xe] }
  0xdc   : > { %v1705_v39 = vrot.slane %v7294_v22, 1  ;;  %v1711_v22 = vrot.slane %v7296_v54, 1  ;;  %v1724_v54 = vrot.slane %v10305_v13, 1  ;;  %v1726_v13 = vrot.slane %v7301_v31, 1 }
  0xde   : > { %v10522_v30 = vsel %vm767_vm0, %v1705_v39, %v1706_v35  ;;  %v10536_v35 = vsel %vm767_vm0, %v1711_v22, %v1712_v10  ;;  %v1717_v39 = vrot.slane %v7298_v18, 1  ;;  %v1723_v10 = vrot.slane %v7300_v16, 1  ;;  %v10575_v18 = vld [vmem:[%s9462_s27 + $0xc8] ss:$0 sps:$4 sm:$0x11]  }
  0xdf   : > { %v7302_v22 = vcombine.low %v7158_v25, %v10337_v12  ;;  %v7304_v12 = vcombine.low %v7160_v6, %v10475_v37  ;;  %v1599_v25 = vshll.u32 %v10495_v61, 16  ;;  %v10567_v11 = vsel %vm767_vm0, %v1726_v13, %v1727_v9  ;;  %2739 = vmatmul.mubr.bf16.gmra.mrb[88].mxu0 %v10461_v53 }
  0xe0   : > { %v10547_v63 = vsel %vm767_vm0, %v1717_v39, %v1718_v42  ;;  %2900 = vmatmul.mubr.bf16.gmra.mrb[88].mxu1 %v10190_v15  ;;  %v10558_v55 = vsel %vm767_vm0, %v1723_v10, %v1724_v54  ;;  %v1732_v15 = vrot.slane %v7303_v28, 1  ;;  %v1542_v37 = vor.u32 %v10319_v62, %v12412_v27  ;;  %2746 = vmatprep.mubr.bf16.mxu0 %v10469_v14  ;;  %v7162_v54 = vld [vmem:[%s9462_s27 + $0xcc] sm:$0xe] }
  0xe1   : > { %v1729_v58 = vrot.slane %v7302_v22, 1  ;;  %2907 = vmatprep.mubr.bf16.mxu1 %v1535_v47  ;;  %v10578_v47 = vld [vmem:[%s9462_s27 + $0xd0] sm:$0xf]  ;;  %v1735_v42 = vrot.slane %v7304_v12, 1  ;;  %v1066_v53 = vor.u32 %v12415_v3, %v12414_v44  ;;  %v7305_v16 = vcombine.low %v7161_v23, %v10564_v20  ;;  %v12418_v28 = vld [vmem:[#allocation17_spill] sm:$0xff] }
  0xe2   : > { %v10591_v62 = vsel %vm767_vm0, %v1732_v15, %v1733_v57  ;;  %v7306_v6 = vcombine.low %v7162_v54, %v10578_v47  ;;  %v1547_v14 = vsel %vm510_vm1, %v1542_v37, %v10321_v19  ;;  %v1739_v31 = vrot.slane %v10575_v18, 1  ;;  %v12422_v15 = vld [vmem:[#allocation20_spill] sm:$0xff]  ;;  %v12424_v44 = vld [vmem:[#allocation29_spill] sm:$0xff] }
  0xe3   : > { %v10581_v41 = vsel %vm767_vm0, %v1729_v58, %v1730_v56  ;;  %v10595_v39 = vsel %vm767_vm0, %v1735_v42, %v1736_v8  ;;  %v1738_v5 = vrot.slane %v7305_v16, 1  ;;  %v1071_v9 = vsel %vm510_vm1, %v1066_v53, %v10265_v51  ;;  %v12416_v56 = vld [vmem:[#allocation26_spill] sm:$0xff]  ;;  %v12420_v8 = vld [vmem:[#allocation4_spill] sm:$0xff]  ;;  %v12423_v42 = vld [vmem:[#allocation31_spill] sm:$0xff] }
  0xe4   : > { %v1741_v10 = vrot.slane %v7306_v6, 1  ;;  %v1742_v22 = vrot.slane %v10588_v0, 1  ;;  %v12417_v13 = vrot.slane %v12416_v56, 1  ;;  %v12419_v51 = vshrl.u32 %v10283_v1, 16  ;;  %v12426_v53 = vld [vmem:[#allocation22_spill] sm:$0xff]  ;;  %v12428_v54 = vld [vmem:[#allocation5_spill] sm:$0xff] }
  0xe5   : > { %v10612_v58 = vsel %vm767_vm0, %v1738_v5, %v1739_v31  ;;  %v12425_v3 = vrot.slane %v12424_v44, 1  ;;  %v12430_v6 = vld [vmem:[#allocation24_spill] sm:$0xff]  ;;  %v12431_v31 = vrot.slane %v10325_v59, 1  ;;  %v12434_v56 = vld [vmem:[#allocation6_spill] sm:$0xff] }
  0xe6   : > { %v1258_v57 = vsel %vm767_vm0, %v12418_v28, %v12417_v13  ;;  %v10615_v19 = vsel %vm767_vm0, %v1741_v10, %v1742_v22  ;;  %v1554_v12 = vor.u32 %v10386_v38, %v12419_v51  ;;  %v12427_v38 = vshrl.u32 %v10352_v32, 16  ;;  %v7127_v59 = vld [vmem:[%s9462_s27 + $0xc0] sm:$0xf] }
  0xe7   : > { %2747 = vmatmul.mubr.bf16.gmra.mrb[92].mxu0 %v1071_v9  ;;  %v1261_v23 = vsel %vm767_vm0, %v12426_v53, %v12425_v3  ;;  %v12432_v9 = vld [vmem:[#allocation28_spill] sm:$0xff]  ;;  %v12435_v13 = vshrl.u32 %v12434_v56, 16  ;;  %v7097_v56 = vld [vmem:[%s9462_s27 + $0xb4] sm:$0xe] }
  0xe8   : > { %2908 = vmatmul.mubr.bf16.gmra.mrb[92].mxu1 %v10215_v7  ;;  %2754 = vmatprep.mubr.bf16.mxu0 %v1258_v57  ;;  %v12421_v7 = vshrl.u32 %v12420_v8, 16  ;;  %v1559_v37 = vsel %vm510_vm1, %v1554_v12, %v10405_v40  ;;  %v1566_v16 = vor.u32 %v10425_v24, %v12427_v38  ;;  %v12429_v40 = vshrl.u32 %v12428_v54, 16  ;;  %v12438_v51 = vld [vmem:[#allocation32_spill] sm:$0xff] }
  0xe9   : > { %2915 = vmatprep.mubr.bf16.mxu1 %v1547_v14  ;;  %v1264_v10 = vsel %vm767_vm0, %v12432_v9, %v12431_v31  ;;  %v12433_v24 = vshrl.u32 %v10368_v50, 16  ;;  %v12437_v57 = vrot.slane %v10358_v4, 1  ;;  %v1606_v4 = vrot.slane %v1604_v46, 1  ;;  %v7129_v9 = vld [vmem:[%s9462_s27 + $0xcc] sm:$0xf] }
  0xea   : > { %v1078_v27 = vor.u32 %v12422_v15, %v12421_v7  ;;  %v1090_v14 = vor.u32 %v12430_v6, %v12429_v40  ;;  %v12443_v40 = vld [vmem:[#allocation35_spill] sm:$0xff]  ;;  %v12444_v6 = vld [vmem:[#allocation33_spill] sm:$0xff] }
  0xeb   : > { %v1578_v22 = vor.u32 %v10442_v29, %v12433_v24  ;;  %v1267_v12 = vsel %vm767_vm0, %v12438_v51, %v12437_v57  ;;  %v12439_v29 = vshrl.u32 %v10411_v34, 16  ;;  %v12447_v24 = vshrl.u32 %v10495_v61, 16 }
  0xec   : > { %v1083_v45 = vsel %vm510_vm1, %v1078_v27, %v12423_v42  ;;  %v1095_v5 = vsel %vm510_vm1, %v1090_v14, %v10361_v21  ;;  %v12442_v27 = vld [vmem:[#allocation34_spill] sm:$0xff]  ;;  %v10672_v42 = vcombine.low %v7127_v59, %v10564_v20  ;;  %v12445_v14 = vrot.slane %v12444_v6, 1 }
  0xed   : > { %v1583_v21 = vsel %vm510_vm1, %v1578_v22, %v10449_v49  ;;  %v1590_v8 = vor.u32 %v10489_v17, %v12439_v29  ;;  %v12440_v49 = vld [vmem:[#allocation7_spill] sm:$0xff] }
  0xee   : > { %v12441_v15 = vshrl.u32 %v12440_v49, 16  ;;  %v1609_v46 = vshrl.u32 %v10672_v42, 16  ;;  %v1611_v31 = vshll.u32 %v10672_v42, 16 }
  0xef   : > { %2755 = vmatmul.mubr.bf16.gmra.mrb[96].mxu0 %v1083_v45 }
  0xf0   : > { %2916 = vmatmul.mubr.bf16.gmra.mrb[96].mxu1 %v10244_v2  ;;  %2762 = vmatprep.mubr.bf16.mxu0 %v1261_v23  ;;  %v1571_v2 = vsel %vm510_vm1, %v1566_v16, %v10427_v26  ;;  %v12436_v26 = vld [vmem:[#allocation30_spill] sm:$0xff]  ;;  %v1595_v23 = vsel %vm510_vm1, %v1590_v8, %v10503_v33  ;;  %v1613_v51 = vrot.slane %v1611_v31, 1  ;;  %v12456_v31 = vld [vmem:[#allocation9_spill] sm:$0xff] }
  0xf1   : > { %2923 = vmatprep.mubr.bf16.mxu1 %v1559_v37  ;;  %v1102_v28 = vor.u32 %v12436_v26, %v12435_v13 }
  0xf2   : > { %v1614_v6 = vor.u32 %v1613_v51, %v1609_v46 }
  0xf7   : > { %2763 = vmatmul.mubr.bf16.gmra.mrb[100].mxu0 %v1095_v5 }
  0xf8   : > { %2924 = vmatmul.mubr.bf16.gmra.mrb[100].mxu1 %v10283_v1  ;;  %2770 = vmatprep.mubr.bf16.mxu0 %v1264_v10  ;;  %v1107_v1 = vsel %vm510_vm1, %v1102_v28, %v10407_v36  ;;  %v1114_v36 = vor.u32 %v12442_v27, %v12441_v15  ;;  %v12450_v28 = vld [vmem:[#allocation38_spill] sm:$0xff]  ;;  %v9064_v27 = vld [vmem:[%s9462_s27 + $0xbc] ss:$0 sps:$4 sm:$0x11]  }
  0xf9   : > { %2931 = vmatprep.mubr.bf16.mxu1 %v1571_v2  ;;  %v12446_v2 = vld [vmem:[#allocation36_spill] sm:$0xff]  ;;  %v1152_v51 = vshll.u32 %v9064_v27, 16 }
  0xfa   : > { %v1270_v5 = vsel %vm767_vm0, %v12446_v2, %v12445_v14 }
  0xff   : > { %2771 = vmatmul.mubr.bf16.gmra.mrb[104].mxu0 %v1107_v1  ;;  %v1616_v1 = vshll.u32 %v10575_v18, 16  ;;  %v12451_v18 = vld [vmem:[#allocation12_spill] sm:$0xff] }
 0x100   : > { %2932 = vmatmul.mubr.bf16.gmra.mrb[104].mxu1 %v10352_v32  ;;  %2778 = vmatprep.mubr.bf16.mxu0 %v1267_v12  ;;  %v1601_v32 = vrot.slane %v1599_v25, 1  ;;  %v1119_v25 = vsel %vm510_vm1, %v1114_v36, %v12443_v40  ;;  %v10700_v36 = vcombine.low %v7129_v9, %v10578_v47  ;;  %v12455_v47 = vld [vmem:[#allocation39_spill] sm:$0xff]  ;;  %v12458_v9 = vld [vmem:[#allocation40_spill] sm:$0xff] }
 0x101   : > { %2939 = vmatprep.mubr.bf16.mxu1 %v1583_v21  ;;  %v1618_v14 = vrot.slane %v1616_v1, 1 }
 0x102   : > { %v7837_v45 = vpop.f32.mrb[0].mxu0  ;;  %v1602_v22 = vor.u32 %v1601_v32, %v12447_v24  ;;  %v1623_v2 = vshll.u32 %v10700_v36, 16 }
 0x103   : > { %v7949_v7 = vpop.f32.mrb[0].mxu1  ;;  %v7838_v53 = vpop.f32.mrb[1].mxu0 }
 0x104   : > { %v7950_v37 = vpop.f32.mrb[1].mxu1  ;;  %v7839_v38 = vadd.f32 %v7838_v53, %v7837_v45  ;;  %v7840_v16 = vpop.f32.mrb[2].mxu0  ;;  %v1607_v15 = vsel %vm510_vm1, %v1602_v22, %v1606_v4 }
 0x105   : > { %v7951_v44 = vadd.f32 %v7950_v37, %v7949_v7  ;;  %v7952_v3 = vpop.f32.mrb[2].mxu1  ;;  %v7841_v20 = vpop.f32.mrb[3].mxu0 }
 0x106   : > { %v7953_v17 = vpop.f32.mrb[3].mxu1  ;;  %v7842_v33 = vadd.f32 %v7841_v20, %v7840_v16 }
 0x107   : > { %v7954_v54 = vadd.f32 %v7953_v17, %v7952_v3  ;;  %v10686_v10 = vadd.f32 %v7951_v44, %v7839_v38  ;;  %2779 = vmatmul.mubr.bf16.gmra.mrb[108].mxu0 %v1119_v25  ;;  %v12452_v3 = vld [vmem:[#allocation37_spill] sm:$0xff]  ;;  %v12453_v17 = vld [vmem:[#allocation10_spill] sm:$0xff]  ;;  %v9303_v38 = vld [vmem:[%s9462_s27 + $0xb8] sm:$0xf] }
 0x108   : > { %2940 = vmatmul.mubr.bf16.gmra.mrb[108].mxu1 %v10368_v50  ;;  %2786 = vmatprep.mubr.bf16.mxu0 %v1270_v5  ;;  %v12448_v50 = vld [vmem:[#allocation8_spill] sm:$0xff]  ;;  %v1140_v53 = vshll.u32 %v12452_v3, 16  ;;  %v7257_v16 = vcombine.low %v7097_v56, %v9303_v38  ;;  %v12454_v4 = vrot.slane %v12452_v3, 1  ;;  %v1145_v1 = vshrl.u32 %v12453_v17, 16 }
 0x109   : > { %2947 = vmatprep.mubr.bf16.mxu1 %v1595_v23  ;;  %v12449_v26 = vshrl.u32 %v12448_v50, 16  ;;  %v10695_v59 = vadd.f32 %v7954_v54, %v7842_v33  ;;  %v1147_v23 = vshll.u32 %v12453_v17, 16  ;;  %v12457_v33 = vshrl.u32 %v12456_v31, 16  ;;  %v7098_v56 = vld [vmem:[%s9462_s27 + $0xc0] sm:$0xe] }
 0x10a   : > { %v7843_v12 = vpop.f32.mrb[4].mxu0  ;;  %v1273_v40 = vsel %vm767_vm0, %v12455_v47, %v12454_v4  ;;  %v1142_v24 = vrot.slane %v1140_v53, 1  ;;  %v1274_v50 = vrot.slane %v7257_v16, 1  ;;  %v9068_v17 = vld [vmem:[%s9462_s27 + $0xc8] ss:$0 sps:$4 sm:$0x11]  }
 0x10b   : > { %v7955_v13 = vpop.f32.mrb[4].mxu1  ;;  %v1126_v21 = vor.u32 %v12450_v28, %v12449_v26  ;;  %v7844_v7 = vpop.f32.mrb[5].mxu0  ;;  %v1275_v26 = vrot.slane %v9064_v27, 1  ;;  %v1154_v16 = vrot.slane %v1152_v51, 1  ;;  %v12459_v47 = vld [vmem:[#allocation11_spill] sm:$0xff] }
 0x10c   : > { %v7956_v57 = vpop.f32.mrb[5].mxu1  ;;  %v7845_v32 = vadd.f32 %v7844_v7, %v7843_v12  ;;  %v7846_v37 = vpop.f32.mrb[6].mxu0  ;;  %v1621_v7 = vshrl.u32 %v10700_v36, 16 }
 0x10d   : > { %v7957_v29 = vadd.f32 %v7956_v57, %v7955_v13  ;;  %v7958_v8 = vpop.f32.mrb[6].mxu1  ;;  %v1131_v44 = vsel %vm510_vm1, %v1126_v21, %v12451_v18  ;;  %v7847_v54 = vpop.f32.mrb[7].mxu0  ;;  %v1149_v57 = vrot.slane %v1147_v23, 1  ;;  %v1276_v27 = vsel %vm767_vm0, %v1274_v50, %v1275_v26 }
 0x10e   : > { %v7959_v49 = vpop.f32.mrb[7].mxu1  ;;  %v7848_v25 = vadd.f32 %v7847_v54, %v7846_v37 }
 0x10f   : > { %v7960_v45 = vadd.f32 %v7959_v49, %v7958_v8  ;;  %v10712_v20 = vadd.f32 %v7957_v29, %v7845_v32  ;;  %2787 = vmatmul.mubr.bf16.gmra.mrb[112].mxu0 %v1131_v44  ;;  %v1619_v8 = vsel %vm510_vm1, %v1614_v6, %v1618_v14  ;;  %v1625_v49 = vrot.slane %v1623_v2, 1  ;;  %v9304_v44 = vld [vmem:[%s9462_s27 + $0xc4] sm:$0xf] }
 0x110   : > { %2948 = vmatmul.mubr.bf16.gmra.mrb[112].mxu1 %v10411_v34  ;;  %2794 = vmatprep.mubr.bf16.mxu0 %v1273_v40  ;;  %v1138_v34 = vor.u32 %v12458_v9, %v12457_v33  ;;  %v7258_v3 = vcombine.low %v7098_v56, %v9304_v44  ;;  %v1159_v40 = vshll.u32 %v12459_v47, 16  ;;  %v1278_v2 = vrot.slane %v9068_v17, 1  ;;  %v7147_v9 = vld [vmem:[%s9462_s27 + $0x18] sm:$0xe] }
 0x111   : > { %2955 = vmatprep.mubr.bf16.mxu1 %v1607_v15  ;;  %v10718_v22 = vadd.f32 %v7960_v45, %v7848_v25  ;;  %v1628_v15 = vshll.u32 %v10588_v0, 16  ;;  %v1150_v0 = vor.u32 %v1149_v57, %v1145_v1  ;;  %v1626_v54 = vor.u32 %v1625_v49, %v1621_v7 }
 0x112   : > { %v7849_v28 = vpop.f32.mrb[8].mxu0  ;;  %v1143_v18 = vsel %vm510_vm1, %v1138_v34, %v1142_v24  ;;  %v1277_v14 = vrot.slane %v7258_v3, 1  ;;  %v1164_v1 = vshll.u32 %v9068_v17, 16  ;;  %v9306_v3 = vld [vmem:[%s9462_s27 + $0x20] ss:$0 sps:$4 sm:$0x11]  }
 0x113   : > { %v7961_v5 = vpop.f32.mrb[8].mxu1  ;;  %v7850_v12 = vpop.f32.mrb[9].mxu0  ;;  %v1630_v4 = vrot.slane %v1628_v15, 1  ;;  %v1155_v56 = vsel %vm510_vm1, %v1150_v0, %v1154_v16 }
 0x114   : > { %v7962_v13 = vpop.f32.mrb[9].mxu1  ;;  %v7851_v32 = vadd.f32 %v7850_v12, %v7849_v28  ;;  %v7852_v37 = vpop.f32.mrb[10].mxu0  ;;  %v1279_v51 = vsel %vm767_vm0, %v1277_v14, %v1278_v2  ;;  %v9305_v12 = vld [vmem:[%s9462_s27 + $0x1c] sm:$0xf] }
 0x115   : > { %v7963_v21 = vadd.f32 %v7962_v13, %v7961_v5  ;;  %v7964_v46 = vpop.f32.mrb[10].mxu1  ;;  %v7853_v53 = vpop.f32.mrb[11].mxu0  ;;  %v1157_v13 = vshrl.u32 %v12459_v47, 16  ;;  %v1631_v50 = vsel %vm510_vm1, %v1626_v54, %v1630_v4 }
 0x116   : > { %v7965_v29 = vpop.f32.mrb[11].mxu1  ;;  %v7854_v23 = vadd.f32 %v7853_v53, %v7852_v37  ;;  %v1697_v53 = vrot.slane %v9306_v3, 1 }
 0x117   : > { %v7966_v45 = vadd.f32 %v7965_v29, %v7964_v46  ;;  %v10730_v38 = vadd.f32 %v7963_v21, %v7851_v32  ;;  %2795 = vmatmul.mubr.bf16.gmra.mrb[116].mxu0 %v1143_v18  ;;  %v1161_v46 = vrot.slane %v1159_v40, 1  ;;  %v7291_v29 = vcombine.low %v7147_v9, %v9305_v12 }
 0x118   : > { %2956 = vmatmul.mubr.bf16.gmra.mrb[116].mxu1 %v10495_v61  ;;  %2802 = vmatprep.mubr.bf16.mxu0 %v1276_v27  ;;  %v1166_v32 = vrot.slane %v1164_v1, 1  ;;  %v7148_v27 = vld [vmem:[%s9462_s27 + $0x24] sm:$0xe] }
 0x119   : > { %2963 = vmatprep.mubr.bf16.mxu1 %v1619_v8  ;;  %v10733_v6 = vadd.f32 %v7966_v45, %v7854_v23  ;;  %v1162_v15 = vor.u32 %v1161_v46, %v1157_v13  ;;  %v9088_v45 = vld [vmem:[%s12299_s2] sm:$0xff]   ;;  %v1696_v44 = vrot.slane %v7291_v29, 1 }
 0x11a   : > { %v7855_v5 = vpop.f32.mrb[12].mxu0 }
 0x11b   : > { %v7967_v25 = vpop.f32.mrb[12].mxu1  ;;  %v7856_v34 = vpop.f32.mrb[13].mxu0 }
 0x11c   : > { %v7968_v61 = vpop.f32.mrb[13].mxu1  ;;  %v7857_v26 = vadd.f32 %v7856_v34, %v7855_v5  ;;  %v7858_v28 = vpop.f32.mrb[14].mxu0  ;;  %v1698_v5 = vsel %vm767_vm0, %v1696_v44, %v1697_v53 }
 0x11d   : > { %v7969_v31 = vadd.f32 %v7968_v61, %v7967_v25  ;;  %v7970_v33 = vpop.f32.mrb[14].mxu1  ;;  %v7859_v57 = vpop.f32.mrb[15].mxu0  ;;  %v1167_v25 = vsel %vm510_vm1, %v1162_v15, %v1166_v32  ;;  %v9307_v61 = vld [vmem:[%s9462_s27 + $0x28] sm:$0xf] }
 0x11e   : > { %v7971_v24 = vpop.f32.mrb[15].mxu1  ;;  %v7860_v8 = vadd.f32 %v7859_v57, %v7858_v28  ;;  %v7292_v14 = vcombine.low %v7148_v27, %v9307_v61 }
 0x11f   : > { %v7972_v21 = vadd.f32 %v7971_v24, %v7970_v33  ;;  %v10742_v7 = vadd.f32 %v7969_v31, %v7857_v26  ;;  %2803 = vmatmul.mubr.bf16.gmra.mrb[120].mxu0 %v1155_v56  ;;  %v9308_v24 = vld [vmem:[%s9462_s27 + $0x2c] ss:$0 sps:$4 sm:$0x11]  }
 0x120   : > { %2964 = vmatmul.mubr.bf16.gmra.mrb[120].mxu1 %v10672_v42  ;;  %2810 = vmatprep.mubr.bf16.mxu0 %v1279_v51  ;;  %v9087_v42 = vld [vmem:[%s12299_s2 + $0x40] sm:$0xff]   ;;  %v1699_v34 = vrot.slane %v7292_v14, 1  ;;  %v1700_v56 = vrot.slane %v9308_v24, 1 }
 0x121   : > { %2971 = vmatprep.mubr.bf16.mxu1 %v1631_v50  ;;  %v10744_v37 = vadd.f32 %v7972_v21, %v7860_v8  ;;  %8293 = vmatprep.subr.bf16.mxu1 %v9087_v42  ;;  %v9089_v42 = vld [vmem:[%s12299_s2 + $0x48] sm:$0xff]  }
 0x122   : > { %v7861_v17 = vpop.f32.mrb[16].mxu0  ;;  %8294 = vmatpush3.bf16.msra.mxu1 %v9088_v45  ;;  %v1701_v12 = vsel %vm767_vm0, %v1699_v34, %v1700_v56  ;;  %v9090_v45 = vld [vmem:[%s12299_s2 + $0x8] sm:$0xff]  }
 0x123   : > { %v7973_v49 = vpop.f32.mrb[16].mxu1  ;;  %v7862_v16 = vpop.f32.mrb[17].mxu0  ;;  %8295 = vmatprep.subr.bf16.mxu1 %v9089_v42 }
 0x124   : > { %v7974_v18 = vpop.f32.mrb[17].mxu1  ;;  %v7863_v4 = vadd.f32 %v7862_v16, %v7861_v17  ;;  %v7864_v47 = vpop.f32.mrb[18].mxu0 }
 0x125   : > { %v7975_v23 = vadd.f32 %v7974_v18, %v7973_v49  ;;  %v7976_v0 = vpop.f32.mrb[18].mxu1  ;;  %v7865_v2 = vpop.f32.mrb[19].mxu0 }
 0x126   : > { %v7977_v54 = vpop.f32.mrb[19].mxu1  ;;  %v7866_v31 = vadd.f32 %v7865_v2, %v7864_v47  ;;  %8296 = vmatpush3.bf16.msra.mxu1 %v9090_v45 }
 0x127   : > { %v7978_v40 = vadd.f32 %v7977_v54, %v7976_v0  ;;  %v10758_v33 = vadd.f32 %v7975_v23, %v7863_v4  ;;  %2811 = vmatmul.mubr.bf16.gmra.mrb[124].mxu0 %v1167_v25 }
 0x128   : > { %2972 = vmatmul.mubr.bf16.gmra.mrb[124].mxu1 %v10700_v36  ;;  %8781 = vmatprep.mubr.bf16.mxu0 %v1698_v5 }
 0x129   : > { %v10761_v13 = vadd.f32 %v7978_v40, %v7866_v31 }
 0x12a   : > { %v7867_v26 = vpop.f32.mrb[20].mxu0 }
 0x12b   : > { %v7979_v9 = vpop.f32.mrb[20].mxu1  ;;  %v7868_v46 = vpop.f32.mrb[21].mxu0 }
 0x12c   : > { %v7980_v50 = vpop.f32.mrb[21].mxu1  ;;  %v7869_v36 = vadd.f32 %v7868_v46, %v7867_v26  ;;  %v7870_v57 = vpop.f32.mrb[22].mxu0 }
 0x12d   : > { %v7981_v28 = vadd.f32 %v7980_v50, %v7979_v9  ;;  %v7982_v21 = vpop.f32.mrb[22].mxu1  ;;  %v7871_v29 = vpop.f32.mrb[23].mxu0 }
 0x12e   : > { %v7983_v1 = vpop.f32.mrb[23].mxu1  ;;  %v7872_v8 = vadd.f32 %v7871_v29, %v7870_v57 }
 0x12f   : > { %v7984_v51 = vadd.f32 %v7983_v1, %v7982_v21  ;;  %v10764_v49 = vadd.f32 %v7981_v28, %v7869_v36  ;;  %8782 = vmatmul.mubr.bf16.vlgmr.msra.gmra.mrb[128].mxu0 %v1701_v12  ;;  %v9091_v28 = vld [vmem:[%s12299_s2 + $0x50] sm:$0xff]  }
 0x130   : > { %8785 = vmatprep.mubr.bf16.mxu0 %v10512_v43  ;;  %v9092_v21 = vld [vmem:[%s12299_s2 + $0x10] sm:$0xff]   ;;  %8297 = vmatprep.subr.bf16.mxu1 %v9091_v28 }
 0x131   : > { %v10767_v32 = vadd.f32 %v7984_v51, %v7872_v8  ;;  %8298 = vmatpush3.bf16.msra.mxu1 %v9092_v21 }
 0x132   : > { %v7873_v44 = vpop.f32.mrb[24].mxu0 }
 0x133   : > { %v7985_v15 = vpop.f32.mrb[24].mxu1  ;;  %v7874_v27 = vpop.f32.mrb[25].mxu0 }
 0x134   : > { %v7986_v18 = vpop.f32.mrb[25].mxu1  ;;  %v7875_v23 = vadd.f32 %v7874_v27, %v7873_v44  ;;  %v7876_v43 = vpop.f32.mrb[26].mxu0 }
 0x135   : > { %v7987_v3 = vadd.f32 %v7986_v18, %v7985_v15  ;;  %v7988_v53 = vpop.f32.mrb[26].mxu1  ;;  %v7877_v16 = vpop.f32.mrb[27].mxu0 }
 0x136   : > { %v7989_v17 = vpop.f32.mrb[27].mxu1  ;;  %v7878_v54 = vadd.f32 %v7877_v16, %v7876_v43 }
 0x137   : > { %v7990_v0 = vadd.f32 %v7989_v17, %v7988_v53  ;;  %v10775_v4 = vadd.f32 %v7987_v3, %v7875_v23  ;;  %8786 = vmatmul.mubr.bf16.gmra.mrb[132].mxu0 %v10522_v30 }
 0x138   : > { %8789 = vmatprep.mubr.bf16.mxu0 %v10527_v48 }
 0x139   : > { %v10779_v40 = vadd.f32 %v7990_v0, %v7878_v54 }
 0x13a   : > { %v7879_v61 = vpop.f32.mrb[28].mxu0 }
 0x13b   : > { %v7991_v47 = vpop.f32.mrb[28].mxu1  ;;  %v7880_v5 = vpop.f32.mrb[29].mxu0 }
 0x13c   : > { %v7992_v25 = vpop.f32.mrb[29].mxu1  ;;  %v7881_v9 = vadd.f32 %v7880_v5, %v7879_v61  ;;  %v7882_v34 = vpop.f32.mrb[30].mxu0 }
 0x13d   : > { %v7993_v14 = vadd.f32 %v7992_v25, %v7991_v47  ;;  %v7994_v2 = vpop.f32.mrb[30].mxu1  ;;  %v7883_v56 = vpop.f32.mrb[31].mxu0 }
 0x13e   : > { %v7995_v31 = vpop.f32.mrb[31].mxu1  ;;  %v7884_v50 = vadd.f32 %v7883_v56, %v7882_v34 }
 0x13f   : > { %v7996_v24 = vadd.f32 %v7995_v31, %v7994_v2  ;;  %v10781_v26 = vadd.f32 %v7993_v14, %v7881_v9  ;;  %8790 = vmatmul.mubr.bf16.gmra.mrb[136].mxu0 %v10536_v35  ;;  %v9094_v14 = vld [vmem:[%s12299_s2 + $0x18] sm:$0xff]  }
 0x140   : > { %8793 = vmatprep.mubr.bf16.mxu0 %v10542_v52 }
 0x141   : > { %v10785_v48 = vadd.f32 %v7996_v24, %v7884_v50 }
 0x142   : > { %v7885_v1 = vpop.f32.mrb[32].mxu0 }
 0x143   : > { %v7997_v30 = vpop.f32.mrb[32].mxu1  ;;  %v7886_v51 = vpop.f32.mrb[33].mxu0 }
 0x144   : > { %v7998_v46 = vpop.f32.mrb[33].mxu1  ;;  %v7887_v12 = vadd.f32 %v7886_v51, %v7885_v1  ;;  %v7888_v52 = vpop.f32.mrb[34].mxu0 }
 0x145   : > { %v7999_v36 = vadd.f32 %v7998_v46, %v7997_v30  ;;  %v8000_v57 = vpop.f32.mrb[34].mxu1  ;;  %v7889_v8 = vpop.f32.mrb[35].mxu0 }
 0x146   : > { %v8001_v35 = vpop.f32.mrb[35].mxu1  ;;  %v7890_v42 = vadd.f32 %v7889_v8, %v7888_v52 }
 0x147   : > { %v8002_v29 = vadd.f32 %v8001_v35, %v8000_v57  ;;  %v10793_v15 = vadd.f32 %v7999_v36, %v7887_v12  ;;  %8794 = vmatmul.mubr.bf16.gmra.mrb[140].mxu0 %v10547_v63 }
 0x148   : > { %8797 = vmatprep.mubr.bf16.mxu0 %v10552_v60  ;;  %v9093_v60 = vld [vmem:[%s12299_s2 + $0x58] sm:$0xff]  }
 0x149   : > { %v10796_v45 = vadd.f32 %v8002_v29, %v7890_v42  ;;  %8299 = vmatprep.subr.bf16.mxu1 %v9093_v60 }
 0x14a   : > { %v7891_v3 = vpop.f32.mrb[36].mxu0  ;;  %8300 = vmatpush3.bf16.msra.mxu1 %v9094_v14 }
 0x14b   : > { %v8003_v18 = vpop.f32.mrb[36].mxu1  ;;  %v7892_v17 = vpop.f32.mrb[37].mxu0 }
 0x14c   : > { %v8004_v44 = vpop.f32.mrb[37].mxu1  ;;  %v7893_v43 = vadd.f32 %v7892_v17, %v7891_v3  ;;  %v7894_v0 = vpop.f32.mrb[38].mxu0 }
 0x14d   : > { %v8005_v53 = vadd.f32 %v8004_v44, %v8003_v18  ;;  %v8006_v27 = vpop.f32.mrb[38].mxu1  ;;  %v7895_v54 = vpop.f32.mrb[39].mxu0 }
 0x14e   : > { %v8007_v23 = vpop.f32.mrb[39].mxu1  ;;  %v7896_v25 = vadd.f32 %v7895_v54, %v7894_v0 }
 0x14f   : > { %v8008_v16 = vadd.f32 %v8007_v23, %v8006_v27  ;;  %v10799_v47 = vadd.f32 %v8005_v53, %v7893_v43  ;;  %8798 = vmatmul.mubr.bf16.gmra.mrb[144].mxu0 %v10558_v55  ;;  %v9096_v53 = vld [vmem:[%s12299_s2 + $0x20] sm:$0xff]  }
 0x150   : > { %8801 = vmatprep.mubr.bf16.mxu0 %v10567_v11 }
 0x151   : > { %v10802_v63 = vadd.f32 %v8008_v16, %v7896_v25 }
 0x152   : > { %v7897_v5 = vpop.f32.mrb[40].mxu0 }
 0x153   : > { %v8009_v61 = vpop.f32.mrb[40].mxu1  ;;  %v7898_v34 = vpop.f32.mrb[41].mxu0 }
 0x154   : > { %v8010_v2 = vpop.f32.mrb[41].mxu1  ;;  %v7899_v24 = vadd.f32 %v7898_v34, %v7897_v5  ;;  %v7900_v56 = vpop.f32.mrb[42].mxu0 }
 0x155   : > { %v8011_v31 = vadd.f32 %v8010_v2, %v8009_v61  ;;  %v8012_v9 = vpop.f32.mrb[42].mxu1  ;;  %v7901_v11 = vpop.f32.mrb[43].mxu0 }
 0x156   : > { %v8013_v55 = vpop.f32.mrb[43].mxu1  ;;  %v7902_v28 = vadd.f32 %v7901_v11, %v7900_v56 }
 0x157   : > { %v8014_v50 = vadd.f32 %v8013_v55, %v8012_v9  ;;  %v10811_v30 = vadd.f32 %v8011_v31, %v7899_v24  ;;  %8802 = vmatmul.mubr.bf16.gmra.mrb[148].mxu0 %v10581_v41 }
 0x158   : > { %8805 = vmatprep.mubr.bf16.mxu0 %v10591_v62  ;;  %v9095_v62 = vld [vmem:[%s12299_s2 + $0x60] sm:$0xff]  }
 0x159   : > { %v10814_v21 = vadd.f32 %v8014_v50, %v7902_v28  ;;  %8301 = vmatprep.subr.bf16.mxu1 %v9095_v62 }
 0x15a   : > { %v7903_v36 = vpop.f32.mrb[44].mxu0  ;;  %8302 = vmatpush3.bf16.msra.mxu1 %v9096_v53 }
 0x15b   : > { %v8015_v46 = vpop.f32.mrb[44].mxu1  ;;  %v7904_v35 = vpop.f32.mrb[45].mxu0 }
 0x15c   : > { %v8016_v1 = vpop.f32.mrb[45].mxu1  ;;  %v7905_v52 = vadd.f32 %v7904_v35, %v7903_v36  ;;  %v7906_v29 = vpop.f32.mrb[46].mxu0 }
 0x15d   : > { %v8017_v57 = vadd.f32 %v8016_v1, %v8015_v46  ;;  %v8018_v51 = vpop.f32.mrb[46].mxu1  ;;  %v7907_v42 = vpop.f32.mrb[47].mxu0 }
 0x15e   : > { %v8019_v12 = vpop.f32.mrb[47].mxu1  ;;  %v7908_v44 = vadd.f32 %v7907_v42, %v7906_v29 }
 0x15f   : > { %v8020_v8 = vadd.f32 %v8019_v12, %v8018_v51  ;;  %v10817_v18 = vadd.f32 %v8017_v57, %v7905_v52  ;;  %8806 = vmatmul.mubr.bf16.gmra.mrb[152].mxu0 %v10595_v39  ;;  %v9098_v51 = vld [vmem:[%s12299_s2 + $0x28] sm:$0xff]  }
 0x160   : > { %8809 = vmatprep.mubr.bf16.mxu0 %v10612_v58 }
 0x161   : > { %v10820_v41 = vadd.f32 %v8020_v8, %v7908_v44 }
 0x162   : > { %v7909_v17 = vpop.f32.mrb[48].mxu0 }
 0x163   : > { %v8021_v3 = vpop.f32.mrb[48].mxu1  ;;  %v7910_v0 = vpop.f32.mrb[49].mxu0 }
 0x164   : > { %v8022_v27 = vpop.f32.mrb[49].mxu1  ;;  %v7911_v16 = vadd.f32 %v7910_v0, %v7909_v17  ;;  %v7912_v54 = vpop.f32.mrb[50].mxu0 }
 0x165   : > { %v8023_v23 = vadd.f32 %v8022_v27, %v8021_v3  ;;  %v8024_v43 = vpop.f32.mrb[50].mxu1  ;;  %v7913_v58 = vpop.f32.mrb[51].mxu0 }
 0x166   : > { %v8025_v39 = vpop.f32.mrb[51].mxu1  ;;  %v7914_v60 = vadd.f32 %v7913_v58, %v7912_v54 }
 0x167   : > { %v8026_v25 = vadd.f32 %v8025_v39, %v8024_v43  ;;  %v10829_v61 = vadd.f32 %v8023_v23, %v7911_v16  ;;  %8810 = vmatmul.mubr.bf16.gmra.mrb[156].mxu0 %v10615_v19  ;;  %v9097_v19 = vld [vmem:[%s12299_s2 + $0x68] sm:$0xff]  }
 0x168   : > { %8303 = vmatprep.subr.bf16.mxu1 %v9097_v19  ;;  %v9104_v19 = vld [vmem:[%s12299_s2 + $0x88] sm:$0xff]  }
 0x169   : > { %v10832_v14 = vadd.f32 %v8026_v25, %v7914_v60  ;;  %8304 = vmatpush3.bf16.msra.mxu1 %v9098_v51 }
 0x16a   : > { %v7915_v31 = vpop.f32.mrb[52].mxu0 }
 0x16b   : > { %v8027_v2 = vpop.f32.mrb[52].mxu1  ;;  %v7916_v55 = vpop.f32.mrb[53].mxu0 }
 0x16c   : > { %v8028_v5 = vpop.f32.mrb[53].mxu1  ;;  %v7917_v56 = vadd.f32 %v7916_v55, %v7915_v31  ;;  %v7918_v50 = vpop.f32.mrb[54].mxu0  ;;  %v9101_v31 = vld [vmem:[%s12299_s2 + $0xc0] sm:$0xff]  }
 0x16d   : > { %v8029_v9 = vadd.f32 %v8028_v5, %v8027_v2  ;;  %v8030_v34 = vpop.f32.mrb[54].mxu1  ;;  %v7919_v28 = vpop.f32.mrb[55].mxu0  ;;  %8405 = vmatprep.subr.bf16.mxu0 %v9101_v31 }
 0x16e   : > { %v8031_v24 = vpop.f32.mrb[55].mxu1  ;;  %v7920_v1 = vadd.f32 %v7919_v28, %v7918_v50  ;;  %v9100_v28 = vld [vmem:[%s12299_s2 + $0x30] sm:$0xff]  }
 0x16f   : > { %v8032_v11 = vadd.f32 %v8031_v24, %v8030_v34  ;;  %v10834_v46 = vadd.f32 %v8029_v9, %v7917_v56  ;;  %v9102_v34 = vld [vmem:[%s12299_s2 + $0x80] sm:$0xff]  }
 0x170   : > { %8406 = vmatpush3.bf16.msra.mxu0 %v9102_v34  ;;  %v9107_v34 = vld [vmem:[%s12299_s2 + $0xd8] sm:$0xff]  }
 0x171   : > { %v10836_v36 = vadd.f32 %v8032_v11, %v7920_v1  ;;  %v9099_v11 = vld [vmem:[%s12299_s2 + $0x70] sm:$0xff]   ;;  %v9103_v1 = vld [vmem:[%s12299_s2 + $0xc8] sm:$0xff]  }
 0x172   : > { %v7921_v12 = vpop.f32.mrb[56].mxu0  ;;  %8305 = vmatprep.subr.bf16.mxu1 %v9099_v11  ;;  %8407 = vmatprep.subr.bf16.mxu0 %v9103_v1 }
 0x173   : > { %v8033_v57 = vpop.f32.mrb[56].mxu1  ;;  %v7922_v8 = vpop.f32.mrb[57].mxu0  ;;  %8306 = vmatpush3.bf16.msra.mxu1 %v9100_v28 }
 0x174   : > { %v8034_v35 = vpop.f32.mrb[57].mxu1  ;;  %v7923_v44 = vadd.f32 %v7922_v8, %v7921_v12  ;;  %v7924_v3 = vpop.f32.mrb[58].mxu0  ;;  %8408 = vmatpush3.bf16.msra.mxu0 %v9104_v19 }
 0x175   : > { %v8035_v52 = vadd.f32 %v8034_v35, %v8033_v57  ;;  %v8036_v29 = vpop.f32.mrb[58].mxu1  ;;  %v7925_v53 = vpop.f32.mrb[59].mxu0 }
 0x176   : > { %v8037_v42 = vpop.f32.mrb[59].mxu1  ;;  %v7926_v17 = vadd.f32 %v7925_v53, %v7924_v3  ;;  %v9105_v3 = vld [vmem:[%s12299_s2 + $0xd0] sm:$0xff]  }
 0x177   : > { %v8038_v62 = vadd.f32 %v8037_v42, %v8036_v29  ;;  %v10844_v27 = vadd.f32 %v8035_v52, %v7923_v44  ;;  %8409 = vmatprep.subr.bf16.mxu0 %v9105_v3 }
 0x179   : > { %v10846_v23 = vadd.f32 %v8038_v62, %v7926_v17  ;;  %v3203_v17 = vld [vmem:[#allocation2 + $0x18] sm:$0x1] }
 0x17a   : > { %v7927_v39 = vpop.f32.mrb[60].mxu0 }
 0x17b   : > { %v8039_v43 = vpop.f32.mrb[60].mxu1  ;;  %v7928_v25 = vpop.f32.mrb[61].mxu0 }
 0x17c   : > { %v8040_v0 = vpop.f32.mrb[61].mxu1  ;;  %v7929_v60 = vadd.f32 %v7928_v25, %v7927_v39  ;;  %v7930_v2 = vpop.f32.mrb[62].mxu0  ;;  %v3200_v25 = vld [vmem:[#allocation2 + $0xc] sm:$0x1] }
 0x17d   : > { %v8041_v16 = vadd.f32 %v8040_v0, %v8039_v43  ;;  %v8042_v54 = vpop.f32.mrb[62].mxu1  ;;  %v7931_v9 = vpop.f32.mrb[63].mxu0  ;;  %v9106_v43 = vld [vmem:[%s12299_s2 + $0x90] sm:$0xff]  }
 0x17e   : > { %v8043_v58 = vpop.f32.mrb[63].mxu1  ;;  %v7932_v24 = vadd.f32 %v7931_v9, %v7930_v2  ;;  %8410 = vmatpush3.bf16.msra.mxu0 %v9106_v43  ;;  %v3250_v9 = vld [vmem:[#allocation2 + $0x14] sm:$0x1]  ;;  %v9333_v43 = vmov 0  }
 0x17f   : > { %v8044_v5 = vadd.f32 %v8043_v58, %v8042_v54  ;;  %v10854_v55 = vadd.f32 %v8041_v16, %v7929_v60  ;;  %v3204_v16 = vsel %vm10874_vm4, 0, %v3203_v17  ;;  %v3201_v58 = vsel %vm10874_vm4, 0, %v3200_v25  ;;  %v3253_v60 = vld [vmem:[#allocation2 + $0x20] sm:$0x1]  ;;  %8411 = vmatprep.subr.bf16.mxu0 %v9107_v34  ;;  %v3206_v17 = vld [vmem:[#allocation2 + $0x24] sm:$0x1] }
 0x180   : > { %3205 = vst [vmem:[#allocation2 + $0x18] sm:$0x1] %v3204_v16  ;;  %3202 = vst [vmem:[#allocation2 + $0xc] sm:$0x1] %v3201_v58  ;;  %v3254_v31 = vsel %vm10885_vm6, 0, %v3253_v60  ;;  %v9159_v54 = vld [vmem:[%s12299_s2 + $0x158] sm:$0xff]  }
 0x181   : > { %v10856_v56 = vadd.f32 %v8044_v5, %v7932_v24  ;;  %3255 = vst [vmem:[#allocation2 + $0x20] sm:$0x1] %v3254_v31  ;;  %3189 = vst [vmem:[#allocation2] sm:$0xf] %v9333_v43 }
 0x182   : > { %v8061_v51 = vpop.f32.mrb[64].mxu0  ;;  %3190 = vst [vmem:[#allocation2 + $0x4] sm:$0xf] %v9333_v43  ;;  %3191 = vst [vmem:[#allocation2 + $0x8] sm:$0x1] %v9333_v43 }
 0x183   : > { %v8173_v50 = vpop.f32.mrb[64].mxu1  ;;  %v8062_v52 = vpop.f32.mrb[65].mxu0  ;;  %3193 = vst [vmem:[#allocation2 + $0xcc] sm:$0xf] %v9333_v43  ;;  %3194 = vst [vmem:[#allocation2 + $0xd0] sm:$0xf] %v9333_v43 }
 0x184   : > { %v8174_v57 = vpop.f32.mrb[65].mxu1  ;;  %v8063_v8 = vadd.f32 %v8062_v52, %v8061_v51  ;;  %v8064_v42 = vpop.f32.mrb[66].mxu0  ;;  %3195 = vst [vmem:[#allocation2 + $0xd4] sm:$0x1] %v9333_v43 }
 0x185   : > { %v8175_v35 = vadd.f32 %v8174_v57, %v8173_v50  ;;  %v8176_v12 = vpop.f32.mrb[66].mxu1  ;;  %v8065_v62 = vpop.f32.mrb[67].mxu0  ;;  %v3251_v50 = vsel %vm10885_vm6, 0, %v3250_v9 }
 0x186   : > { %v8177_v29 = vpop.f32.mrb[67].mxu1  ;;  %v2693_v0 = vadd.f32 %v8063_v8, %v10686_v10  ;;  %v8066_v39 = vadd.f32 %v8065_v62, %v8064_v42  ;;  %3252 = vst [vmem:[#allocation2 + $0x14] sm:$0x1] %v3251_v50  ;;  %v3209_v8 = vld [vmem:[#allocation2 + $0x30] sm:$0x1] }
 0x187   : > { %v8178_v44 = vadd.f32 %v8177_v29, %v8176_v12  ;;  %v3210_v62 = vsel %vm10874_vm4, 0, %v3209_v8 }
 0x188   : > { %v2696_v2 = vadd.f32 %v8066_v39, %v10695_v59  ;;  %v10892_v5 = vadd.f32 %v8175_v35, %v2693_v0  ;;  %v9108_v59 = vld [vmem:[%s12299_s2 + $0x98] sm:$0xff]   ;;  %3211 = vst [vmem:[#allocation2 + $0x30] sm:$0x1] %v3210_v62 }
 0x189   : > { %8412 = vmatpush3.bf16.msra.mxu0 %v9108_v59 }
 0x18a   : > { %v8067_v11 = vpop.f32.mrb[68].mxu0  ;;  %v10904_v57 = vadd.f32 %v8178_v44, %v2696_v2  ;;  %v3207_v44 = vsel %vm10874_vm4, 0, %v3206_v17 }
 0x18b   : > { %v8179_v10 = vpop.f32.mrb[68].mxu1  ;;  %v8068_v19 = vpop.f32.mrb[69].mxu0  ;;  %3208 = vst [vmem:[#allocation2 + $0x24] sm:$0x1] %v3207_v44 }
 0x18c   : > { %v8180_v24 = vpop.f32.mrb[69].mxu1  ;;  %v8069_v35 = vadd.f32 %v8068_v19, %v8067_v11  ;;  %v8070_v12 = vpop.f32.mrb[70].mxu0  ;;  %v3259_v11 = vld [vmem:[#allocation2 + $0x38] sm:$0x1] }
 0x18d   : > { %v8181_v28 = vadd.f32 %v8180_v24, %v8179_v10  ;;  %v8182_v1 = vpop.f32.mrb[70].mxu1  ;;  %v8071_v29 = vpop.f32.mrb[71].mxu0  ;;  %v9111_v10 = vld [vmem:[%s12299_s2 + $0xe0] sm:$0xff]   ;;  %v3260_v19 = vsel %vm10885_vm6, 0, %v3259_v11 }
 0x18e   : > { %v8183_v51 = vpop.f32.mrb[71].mxu1  ;;  %v2701_v42 = vadd.f32 %v8069_v35, %v10712_v20  ;;  %v8072_v3 = vadd.f32 %v8071_v29, %v8070_v12  ;;  %8413 = vmatprep.subr.bf16.mxu0 %v9111_v10  ;;  %v9113_v35 = vld [vmem:[%s12299_s2 + $0xe8] sm:$0xff]   ;;  %3261 = vst [vmem:[#allocation2 + $0x38] sm:$0x1] %v3260_v19  ;;  %v3814_v29 = vld [vmem:[#allocation2] sm:$0xf] }
 0x18f   : > { %v8184_v52 = vadd.f32 %v8183_v51, %v8182_v1  ;;  %v3256_v51 = vld [vmem:[#allocation2 + $0x2c] sm:$0x1]  ;;  %v10939_v44 = vld [vmem:[#allocation2 + $0x8] ss:$0 sps:$4 sm:$0x11]  }
 0x190   : > { %v2704_v0 = vadd.f32 %v8072_v3, %v10718_v22  ;;  %v10912_v20 = vadd.f32 %v8181_v28, %v2701_v42  ;;  %v9112_v22 = vld [vmem:[%s12299_s2 + $0xa0] sm:$0xff]   ;;  %v3257_v12 = vsel %vm10885_vm6, 0, %v3256_v51  ;;  %v3215_v10 = vld [vmem:[#allocation2 + $0x48] sm:$0x1]  ;;  %v3265_v19 = vld [vmem:[#allocation2 + $0x50] sm:$0x1] }
 0x191   : > { %8414 = vmatpush3.bf16.msra.mxu0 %v9112_v22  ;;  %3258 = vst [vmem:[#allocation2 + $0x2c] sm:$0x1] %v3257_v12  ;;  %v10936_v3 = vld [vmem:[#allocation2 + $0x4] sm:$0xf] }
 0x192   : > { %v8073_v25 = vpop.f32.mrb[72].mxu0  ;;  %v10914_v2 = vadd.f32 %v8184_v52, %v2704_v0  ;;  %v9114_v52 = vld [vmem:[%s12299_s2 + $0xa8] sm:$0xff]   ;;  %8415 = vmatprep.subr.bf16.mxu0 %v9113_v35  ;;  %v7411_v17 = vcombine.low %v3814_v29, %v10936_v3  ;;  %v4159_v35 = vshll.u32 %v10939_v44, 16  ;;  %v3266_v29 = vsel %vm10885_vm6, 0, %v3265_v19  ;;  %v3221_v19 = vld [vmem:[#allocation2 + $0x60] sm:$0x1] }
 0x193   : > { %v8185_v39 = vpop.f32.mrb[72].mxu1  ;;  %v8074_v31 = vpop.f32.mrb[73].mxu0  ;;  %3267 = vst [vmem:[#allocation2 + $0x50] sm:$0x1] %v3266_v29  ;;  %v3271_v29 = vld [vmem:[#allocation2 + $0x68] sm:$0x1] }
 0x194   : > { %v8186_v16 = vpop.f32.mrb[73].mxu1  ;;  %v8075_v34 = vadd.f32 %v8074_v31, %v8073_v25  ;;  %v8076_v24 = vpop.f32.mrb[74].mxu0  ;;  %v9115_v31 = vld [vmem:[%s12299_s2 + $0xf0] sm:$0xff]   ;;  %v4152_v11 = vshrl.u32 %v7411_v17, 16  ;;  %v4154_v51 = vshll.u32 %v7411_v17, 16 }
 0x195   : > { %v8187_v58 = vadd.f32 %v8186_v16, %v8185_v39  ;;  %v8188_v60 = vpop.f32.mrb[74].mxu1  ;;  %v8077_v59 = vpop.f32.mrb[75].mxu0  ;;  %8416 = vmatpush3.bf16.msra.mxu0 %v9114_v52 }
 0x196   : > { %v8189_v9 = vpop.f32.mrb[75].mxu1  ;;  %v2709_v28 = vadd.f32 %v8075_v34, %v10730_v38  ;;  %v8078_v1 = vadd.f32 %v8077_v59, %v8076_v24  ;;  %v3216_v24 = vsel %vm10874_vm4, 0, %v3215_v10  ;;  %v9116_v59 = vld [vmem:[%s12299_s2 + $0xb0] sm:$0xff]   ;;  %8417 = vmatprep.subr.bf16.mxu0 %v9115_v31 }
 0x197   : > { %v8190_v50 = vadd.f32 %v8189_v9, %v8188_v60  ;;  %v9110_v60 = vld [vmem:[%s12299_s2 + $0x38] sm:$0xff]   ;;  %3217 = vst [vmem:[#allocation2 + $0x48] sm:$0x1] %v3216_v24 }
 0x198   : > { %v2712_v38 = vadd.f32 %v8078_v1, %v10733_v6  ;;  %v10934_v42 = vadd.f32 %v8187_v58, %v2709_v28  ;;  %v9109_v6 = vld [vmem:[%s12299_s2 + $0x78] sm:$0xff]  }
 0x199   : > { %8307 = vmatprep.subr.bf16.mxu1 %v9109_v6  ;;  %8418 = vmatpush3.bf16.msra.mxu0 %v9116_v59 }
 0x19a   : > { %v8079_v43 = vpop.f32.mrb[76].mxu0  ;;  %v10941_v16 = vadd.f32 %v8190_v50, %v2712_v38  ;;  %v3212_v50 = vld [vmem:[#allocation2 + $0x3c] sm:$0x1]  ;;  %8308 = vmatpush3.bf16.msra.mxu1 %v9110_v60  ;;  %v3262_v38 = vld [vmem:[#allocation2 + $0x44] sm:$0x1] }
 0x19b   : > { %v8191_v8 = vpop.f32.mrb[76].mxu1  ;;  %v8080_v25 = vpop.f32.mrb[77].mxu0  ;;  %v3213_v1 = vsel %vm10874_vm4, 0, %v3212_v50 }
 0x19c   : > { %v8192_v62 = vpop.f32.mrb[77].mxu1  ;;  %v8081_v9 = vadd.f32 %v8080_v25, %v8079_v43  ;;  %v8082_v22 = vpop.f32.mrb[78].mxu0  ;;  %3214 = vst [vmem:[#allocation2 + $0x3c] sm:$0x1] %v3213_v1  ;;  %v3263_v25 = vsel %vm10885_vm6, 0, %v3262_v38 }
 0x19d   : > { %v8193_v0 = vadd.f32 %v8192_v62, %v8191_v8  ;;  %v8194_v39 = vpop.f32.mrb[78].mxu1  ;;  %v8083_v28 = vpop.f32.mrb[79].mxu0  ;;  %v4156_v8 = vrot.slane %v4154_v51, 1  ;;  %v4161_v62 = vrot.slane %v4159_v35, 1  ;;  %3264 = vst [vmem:[#allocation2 + $0x44] sm:$0x1] %v3263_v25 }
 0x19e   : > { %v8195_v58 = vpop.f32.mrb[79].mxu1  ;;  %v2717_v12 = vadd.f32 %v8081_v9, %v10742_v7  ;;  %v8084_v52 = vadd.f32 %v8083_v28, %v8082_v22  ;;  %v9119_v7 = vld [vmem:[%s12299_s2 + $0xf8] sm:$0xff]   ;;  %v3218_v35 = vld [vmem:[#allocation2 + $0x54] sm:$0x1]  ;;  %v3862_v38 = vld [vmem:[#allocation2] sm:$0xe] }
 0x19f   : > { %v8196_v34 = vadd.f32 %v8195_v58, %v8194_v39  ;;  %v9120_v58 = vld [vmem:[%s12299_s2 + $0xb8] sm:$0xff]   ;;  %v4157_v10 = vor.u32 %v4156_v8, %v4152_v11  ;;  %8419 = vmatprep.subr.bf16.mxu0 %v9119_v7  ;;  %v3222_v11 = vsel %vm10874_vm4, 0, %v3221_v19  ;;  %v3272_v8 = vsel %vm10885_vm6, 0, %v3271_v29 }
 0x1a0   : > { %v2720_v43 = vadd.f32 %v8084_v52, %v10744_v37  ;;  %v10964_v6 = vadd.f32 %v8193_v0, %v2717_v12  ;;  %8420 = vmatpush3.bf16.msra.mxu0 %v9120_v58  ;;  %3223 = vst [vmem:[#allocation2 + $0x60] sm:$0x1] %v3222_v11  ;;  %v3219_v52 = vsel %vm10874_vm4, 0, %v3218_v35  ;;  %3273 = vst [vmem:[#allocation2 + $0x68] sm:$0x1] %v3272_v8 }
 0x1a1   : > { %v4162_v50 = vsel %vm510_vm1, %v4157_v10, %v4161_v62  ;;  %3220 = vst [vmem:[#allocation2 + $0x54] sm:$0x1] %v3219_v52  ;;  %v3268_v62 = vld [vmem:[#allocation2 + $0x5c] sm:$0x1]  ;;  %v3227_v52 = vld [vmem:[#allocation2 + $0x78] sm:$0x1] }
 0x1a2   : > { %v8085_v31 = vpop.f32.mrb[80].mxu0  ;;  %v10974_v22 = vadd.f32 %v8196_v34, %v2720_v43  ;;  %6007 = vmatprep.mubr.bf16.mxu1 %v4162_v50  ;;  %v7443_v43 = vcombine.low %v3862_v38, %v10936_v3 }
 0x1a3   : > { %v8197_v39 = vpop.f32.mrb[80].mxu1  ;;  %v8086_v0 = vpop.f32.mrb[81].mxu0  ;;  %6008 = vmatmul.mubr.bf16.vlgmr.msra.gmra.mrb[128].mxu1 %v7411_v17 }
 0x1a4   : > { %v8198_v60 = vpop.f32.mrb[81].mxu1  ;;  %v8087_v59 = vadd.f32 %v8086_v0, %v8085_v31  ;;  %v8088_v28 = vpop.f32.mrb[82].mxu0  ;;  %v4407_v58 = vrot.slane %v7443_v43, 1 }
 0x1a5   : > { %v8199_v9 = vadd.f32 %v8198_v60, %v8197_v39  ;;  %v8200_v37 = vpop.f32.mrb[82].mxu1  ;;  %v8089_v51 = vpop.f32.mrb[83].mxu0  ;;  %v4408_v60 = vrot.slane %v10939_v44, 1 }
 0x1a6   : > { %v8201_v24 = vpop.f32.mrb[83].mxu1  ;;  %v2725_v34 = vadd.f32 %v8087_v59, %v10758_v33  ;;  %v8090_v12 = vadd.f32 %v8089_v51, %v8088_v28  ;;  %v3269_v33 = vsel %vm10885_vm6, 0, %v3268_v62 }
 0x1a7   : > { %v8202_v1 = vadd.f32 %v8201_v24, %v8200_v37  ;;  %3270 = vst [vmem:[#allocation2 + $0x5c] sm:$0x1] %v3269_v33 }
 0x1a8   : > { %v2728_v39 = vadd.f32 %v8090_v12, %v10761_v13  ;;  %v10986_v17 = vadd.f32 %v8199_v9, %v2725_v34  ;;  %v10994_v13 = vsel %vm767_vm0, %v4407_v58, %v4408_v60  ;;  %v9125_v12 = vld [vmem:[%s12299_s2 + $0x100] sm:$0xff]  }
 0x1aa   : > { %v8091_v10 = vpop.f32.mrb[84].mxu0  ;;  %v10991_v0 = vadd.f32 %v8202_v1, %v2728_v39  ;;  %v9123_v1 = vld [vmem:[%s12299_s2 + $0x140] sm:$0xff]  }
 0x1ab   : > { %v8203_v25 = vpop.f32.mrb[84].mxu1  ;;  %v8092_v3 = vpop.f32.mrb[85].mxu0  ;;  %8517 = vmatprep.subr.bf16.mxu1 %v9123_v1 }
 0x1ac   : > { %v8204_v7 = vpop.f32.mrb[85].mxu1  ;;  %v8093_v9 = vadd.f32 %v8092_v3, %v8091_v10  ;;  %v8094_v50 = vpop.f32.mrb[86].mxu0  ;;  %8518 = vmatpush3.bf16.msra.mxu1 %v9125_v12 }
 0x1ad   : > { %v8205_v31 = vadd.f32 %v8204_v7, %v8203_v25  ;;  %v8206_v37 = vpop.f32.mrb[86].mxu1  ;;  %v8095_v28 = vpop.f32.mrb[87].mxu0 }
 0x1ae   : > { %v8207_v24 = vpop.f32.mrb[87].mxu1  ;;  %v2733_v19 = vadd.f32 %v8093_v9, %v10764_v49  ;;  %v8096_v51 = vadd.f32 %v8095_v28, %v8094_v50 }
 0x1af   : > { %v8208_v59 = vadd.f32 %v8207_v24, %v8206_v37  ;;  %v3224_v24 = vld [vmem:[#allocation2 + $0x6c] sm:$0x1] }
 0x1b0   : > { %v2736_v11 = vadd.f32 %v8096_v51, %v10767_v32  ;;  %v10998_v35 = vadd.f32 %v8205_v31, %v2733_v19  ;;  %v3228_v32 = vsel %vm10874_vm4, 0, %v3227_v52  ;;  %v3225_v19 = vsel %vm10874_vm4, 0, %v3224_v24 }
 0x1b1   : > { %3229 = vst [vmem:[#allocation2 + $0x78] sm:$0x1] %v3228_v32  ;;  %3226 = vst [vmem:[#allocation2 + $0x6c] sm:$0x1] %v3225_v19 }
 0x1b2   : > { %v8097_v29 = vpop.f32.mrb[88].mxu0  ;;  %v11006_v49 = vadd.f32 %v8208_v59, %v2736_v11 }
 0x1b3   : > { %v8209_v44 = vpop.f32.mrb[88].mxu1  ;;  %v8098_v62 = vpop.f32.mrb[89].mxu0 }
 0x1b4   : > { %v8210_v34 = vpop.f32.mrb[89].mxu1  ;;  %v8099_v39 = vadd.f32 %v8098_v62, %v8097_v29  ;;  %v8100_v25 = vpop.f32.mrb[90].mxu0 }
 0x1b5   : > { %v8211_v38 = vadd.f32 %v8210_v34, %v8209_v44  ;;  %v8212_v8 = vpop.f32.mrb[90].mxu1  ;;  %v8101_v7 = vpop.f32.mrb[91].mxu0  ;;  %v3274_v44 = vld [vmem:[#allocation2 + $0x74] sm:$0x1] }
 0x1b6   : > { %v8213_v43 = vpop.f32.mrb[91].mxu1  ;;  %v2741_v58 = vadd.f32 %v8099_v39, %v10775_v4  ;;  %v8102_v60 = vadd.f32 %v8101_v7, %v8100_v25  ;;  %v3277_v4 = vld [vmem:[#allocation2 + $0x80] sm:$0x1]  ;;  %v3275_v52 = vsel %vm10885_vm6, 0, %v3274_v44  ;;  %v3233_v25 = vld [vmem:[#allocation2 + $0x90] sm:$0x1] }
 0x1b7   : > { %v8214_v33 = vadd.f32 %v8213_v43, %v8212_v8  ;;  %v3278_v12 = vsel %vm10885_vm6, 0, %v3277_v4  ;;  %3276 = vst [vmem:[#allocation2 + $0x74] sm:$0x1] %v3275_v52  ;;  %v3230_v44 = vld [vmem:[#allocation2 + $0x84] sm:$0x1] }
 0x1b8   : > { %v2744_v10 = vadd.f32 %v8102_v60, %v10779_v40  ;;  %v11012_v37 = vadd.f32 %v8211_v38, %v2741_v58  ;;  %3279 = vst [vmem:[#allocation2 + $0x80] sm:$0x1] %v3278_v12  ;;  %v3231_v52 = vsel %vm10874_vm4, 0, %v3230_v44 }
 0x1b9   : > { %3232 = vst [vmem:[#allocation2 + $0x84] sm:$0x1] %v3231_v52 }
 0x1ba   : > { %v8103_v9 = vpop.f32.mrb[92].mxu0  ;;  %v11014_v28 = vadd.f32 %v8214_v33, %v2744_v10  ;;  %v3234_v10 = vsel %vm10874_vm4, 0, %v3233_v25 }
 0x1bb   : > { %v8215_v31 = vpop.f32.mrb[92].mxu1  ;;  %v8104_v51 = vpop.f32.mrb[93].mxu0  ;;  %3235 = vst [vmem:[#allocation2 + $0x90] sm:$0x1] %v3234_v10  ;;  %v3239_v10 = vld [vmem:[#allocation2 + $0xa8] sm:$0x1] }
 0x1bc   : > { %v8216_v3 = vpop.f32.mrb[93].mxu1  ;;  %v8105_v34 = vadd.f32 %v8104_v51, %v8103_v9  ;;  %v8106_v40 = vpop.f32.mrb[94].mxu0 }
 0x1bd   : > { %v8217_v50 = vadd.f32 %v8216_v3, %v8215_v31  ;;  %v8218_v59 = vpop.f32.mrb[94].mxu1  ;;  %v8107_v29 = vpop.f32.mrb[95].mxu0 }
 0x1be   : > { %v8219_v11 = vpop.f32.mrb[95].mxu1  ;;  %v2749_v38 = vadd.f32 %v8105_v34, %v10781_v26  ;;  %v8108_v8 = vadd.f32 %v8107_v29, %v8106_v40 }
 0x1bf   : > { %v8220_v1 = vadd.f32 %v8219_v11, %v8218_v59 }
 0x1c0   : > { %v2752_v32 = vadd.f32 %v8108_v8, %v10785_v48  ;;  %v11024_v43 = vadd.f32 %v8217_v50, %v2749_v38  ;;  %v3280_v8 = vld [vmem:[#allocation2 + $0x8c] sm:$0x1] }
 0x1c1   : > { %v3281_v25 = vsel %vm10885_vm6, 0, %v3280_v8 }
 0x1c2   : > { %v8109_v33 = vpop.f32.mrb[96].mxu0  ;;  %v11026_v60 = vadd.f32 %v8220_v1, %v2752_v32  ;;  %3282 = vst [vmem:[#allocation2 + $0x8c] sm:$0x1] %v3281_v25 }
 0x1c3   : > { %v8221_v62 = vpop.f32.mrb[96].mxu1  ;;  %v8110_v31 = vpop.f32.mrb[97].mxu0 }
 0x1c4   : > { %v8222_v39 = vpop.f32.mrb[97].mxu1  ;;  %v8111_v26 = vadd.f32 %v8110_v31, %v8109_v33  ;;  %v8112_v24 = vpop.f32.mrb[98].mxu0 }
 0x1c5   : > { %v8223_v7 = vadd.f32 %v8222_v39, %v8221_v62  ;;  %v8224_v58 = vpop.f32.mrb[98].mxu1  ;;  %v8113_v48 = vpop.f32.mrb[99].mxu0 }
 0x1c6   : > { %v8225_v3 = vpop.f32.mrb[99].mxu1  ;;  %v2757_v50 = vadd.f32 %v8111_v26, %v10793_v15  ;;  %v8114_v59 = vadd.f32 %v8113_v48, %v8112_v24  ;;  %v3283_v15 = vld [vmem:[#allocation2 + $0x98] sm:$0x1]  ;;  %v3240_v26 = vsel %vm10874_vm4, 0, %v3239_v10 }
 0x1c7   : > { %v8226_v9 = vadd.f32 %v8225_v3, %v8224_v58  ;;  %v3284_v39 = vsel %vm10885_vm6, 0, %v3283_v15  ;;  %v9139_v58 = vld [vmem:[%s12299_s2 + $0x108] sm:$0xff]   ;;  %3241 = vst [vmem:[#allocation2 + $0xa8] sm:$0x1] %v3240_v26  ;;  %v3245_v26 = vld [vmem:[#allocation2 + $0xc0] sm:$0x1] }
 0x1c8   : > { %v2760_v19 = vadd.f32 %v8114_v59, %v10796_v45  ;;  %v11032_v11 = vadd.f32 %v8223_v7, %v2757_v50  ;;  %3285 = vst [vmem:[#allocation2 + $0x98] sm:$0x1] %v3284_v39  ;;  %v9135_v7 = vld [vmem:[%s12299_s2 + $0x148] sm:$0xff]  }
 0x1c9   : > { %8519 = vmatprep.subr.bf16.mxu1 %v9135_v7 }
 0x1ca   : > { %v8115_v34 = vpop.f32.mrb[100].mxu0  ;;  %v11034_v12 = vadd.f32 %v8226_v9, %v2760_v19  ;;  %8520 = vmatpush3.bf16.msra.mxu1 %v9139_v58 }
 0x1cb   : > { %v8227_v51 = vpop.f32.mrb[100].mxu1  ;;  %v8116_v29 = vpop.f32.mrb[101].mxu0 }
 0x1cc   : > { %v8228_v4 = vpop.f32.mrb[101].mxu1  ;;  %v8117_v32 = vadd.f32 %v8116_v29, %v8115_v34  ;;  %v8118_v45 = vpop.f32.mrb[102].mxu0 }
 0x1cd   : > { %v8229_v40 = vadd.f32 %v8228_v4, %v8227_v51  ;;  %v8230_v1 = vpop.f32.mrb[102].mxu1  ;;  %v8119_v33 = vpop.f32.mrb[103].mxu0 }
 0x1ce   : > { %v8231_v38 = vpop.f32.mrb[103].mxu1  ;;  %v2765_v31 = vadd.f32 %v8117_v32, %v10799_v47  ;;  %v8120_v3 = vadd.f32 %v8119_v33, %v8118_v45  ;;  %v3236_v32 = vld [vmem:[#allocation2 + $0x9c] sm:$0x1]  ;;  %v3289_v45 = vld [vmem:[#allocation2 + $0xb0] sm:$0x1] }
 0x1cf   : > { %v8232_v62 = vadd.f32 %v8231_v38, %v8230_v1  ;;  %v3290_v25 = vsel %vm10885_vm6, 0, %v3289_v45  ;;  %v3286_v33 = vld [vmem:[#allocation2 + $0xa4] sm:$0x1] }
 0x1d0   : > { %v2768_v24 = vadd.f32 %v8120_v3, %v10802_v63  ;;  %v11052_v48 = vadd.f32 %v8229_v40, %v2765_v31  ;;  %3291 = vst [vmem:[#allocation2 + $0xb0] sm:$0x1] %v3290_v25 }
 0x1d2   : > { %v8121_v59 = vpop.f32.mrb[104].mxu0  ;;  %v11054_v4 = vadd.f32 %v8232_v62, %v2768_v24  ;;  %v3237_v62 = vsel %vm10874_vm4, 0, %v3236_v32 }
 0x1d3   : > { %v8233_v9 = vpop.f32.mrb[104].mxu1  ;;  %v8122_v44 = vpop.f32.mrb[105].mxu0  ;;  %3238 = vst [vmem:[#allocation2 + $0x9c] sm:$0x1] %v3237_v62 }
 0x1d4   : > { %v8234_v50 = vpop.f32.mrb[105].mxu1  ;;  %v8123_v34 = vadd.f32 %v8122_v44, %v8121_v59  ;;  %v8124_v1 = vpop.f32.mrb[106].mxu0  ;;  %v3246_v59 = vsel %vm10874_vm4, 0, %v3245_v26 }
 0x1d5   : > { %v8235_v19 = vadd.f32 %v8234_v50, %v8233_v9  ;;  %v8236_v51 = vpop.f32.mrb[106].mxu1  ;;  %v8125_v29 = vpop.f32.mrb[107].mxu0  ;;  %3247 = vst [vmem:[#allocation2 + $0xc0] sm:$0x1] %v3246_v59 }
 0x1d6   : > { %v8237_v47 = vpop.f32.mrb[107].mxu1  ;;  %v2773_v38 = vadd.f32 %v8123_v34, %v10811_v30  ;;  %v8126_v15 = vadd.f32 %v8125_v29, %v8124_v1 }
 0x1d7   : > { %v8238_v52 = vadd.f32 %v8237_v47, %v8236_v51 }
 0x1d8   : > { %v2776_v63 = vadd.f32 %v8126_v15, %v10814_v21  ;;  %v11058_v8 = vadd.f32 %v8235_v19, %v2773_v38  ;;  %v3287_v21 = vsel %vm10885_vm6, 0, %v3286_v33 }
 0x1d9   : > { %3288 = vst [vmem:[#allocation2 + $0xa4] sm:$0x1] %v3287_v21  ;;  %v3292_v21 = vld [vmem:[#allocation2 + $0xbc] sm:$0x1] }
 0x1da   : > { %v8127_v7 = vpop.f32.mrb[108].mxu0  ;;  %v11064_v30 = vadd.f32 %v8238_v52, %v2776_v63 }
 0x1db   : > { %v8239_v40 = vpop.f32.mrb[108].mxu1  ;;  %v8128_v31 = vpop.f32.mrb[109].mxu0 }
 0x1dc   : > { %v8240_v39 = vpop.f32.mrb[109].mxu1  ;;  %v8129_v24 = vadd.f32 %v8128_v31, %v8127_v7  ;;  %v8130_v9 = vpop.f32.mrb[110].mxu0  ;;  %v3242_v7 = vld [vmem:[#allocation2 + $0xb4] sm:$0x1] }
 0x1dd   : > { %v8241_v58 = vadd.f32 %v8240_v39, %v8239_v40  ;;  %v8242_v10 = vpop.f32.mrb[110].mxu1  ;;  %v8131_v19 = vpop.f32.mrb[111].mxu0  ;;  %v9147_v31 = vld [vmem:[%s12299_s2 + $0x150] sm:$0xff]  }
 0x1de   : > { %v8243_v3 = vpop.f32.mrb[111].mxu1  ;;  %v2781_v51 = vadd.f32 %v8129_v24, %v10817_v18  ;;  %v8132_v44 = vadd.f32 %v8131_v19, %v8130_v9  ;;  %v3293_v9 = vsel %vm10885_vm6, 0, %v3292_v21  ;;  %8521 = vmatprep.subr.bf16.mxu1 %v9147_v31  ;;  %v9163_v31 = vld [vmem:[%s12299_s2 + $0x118] sm:$0xff]  }
 0x1df   : > { %v8244_v50 = vadd.f32 %v8243_v3, %v8242_v10  ;;  %v9151_v3 = vld [vmem:[%s12299_s2 + $0x110] sm:$0xff]   ;;  %3294 = vst [vmem:[#allocation2 + $0xbc] sm:$0x1] %v3293_v9 }
 0x1e0   : > { %v2784_v47 = vadd.f32 %v8132_v44, %v10820_v41  ;;  %v11072_v1 = vadd.f32 %v8241_v58, %v2781_v51  ;;  %v3295_v41 = vld [vmem:[#allocation2 + $0xc8] sm:$0x1]  ;;  %v3243_v58 = vsel %vm10874_vm4, 0, %v3242_v7  ;;  %8522 = vmatpush3.bf16.msra.mxu1 %v9151_v3 }
 0x1e1   : > { %v3296_v10 = vsel %vm10885_vm6, 0, %v3295_v41  ;;  %3244 = vst [vmem:[#allocation2 + $0xb4] sm:$0x1] %v3243_v58  ;;  %8523 = vmatprep.subr.bf16.mxu1 %v9159_v54 }
 0x1e2   : > { %v8133_v29 = vpop.f32.mrb[112].mxu0  ;;  %v11074_v63 = vadd.f32 %v8244_v50, %v2784_v47  ;;  %3297 = vst [vmem:[#allocation2 + $0xc8] sm:$0x1] %v3296_v10 }
 0x1e3   : > { %v8245_v34 = vpop.f32.mrb[112].mxu1  ;;  %v8134_v40 = vpop.f32.mrb[113].mxu0 }
 0x1e4   : > { %v8246_v52 = vpop.f32.mrb[113].mxu1  ;;  %v8135_v45 = vadd.f32 %v8134_v40, %v8133_v29  ;;  %v8136_v39 = vpop.f32.mrb[114].mxu0  ;;  %8524 = vmatpush3.bf16.msra.mxu1 %v9163_v31 }
 0x1e5   : > { %v8247_v38 = vadd.f32 %v8246_v52, %v8245_v34  ;;  %v8248_v15 = vpop.f32.mrb[114].mxu1  ;;  %v8137_v25 = vpop.f32.mrb[115].mxu0 }
 0x1e6   : > { %v8249_v32 = vpop.f32.mrb[115].mxu1  ;;  %v2789_v18 = vadd.f32 %v8135_v45, %v10829_v61  ;;  %v8138_v33 = vadd.f32 %v8137_v25, %v8136_v39 }
 0x1e7   : > { %v8250_v62 = vadd.f32 %v8249_v32, %v8248_v15 }
 0x1e8   : > { %v2792_v61 = vadd.f32 %v8138_v33, %v10832_v14  ;;  %v11088_v24 = vadd.f32 %v8247_v38, %v2789_v18 }
 0x1ea   : > { %v8139_v59 = vpop.f32.mrb[116].mxu0  ;;  %v11092_v44 = vadd.f32 %v8250_v62, %v2792_v61 }
 0x1eb   : > { %v8251_v26 = vpop.f32.mrb[116].mxu1  ;;  %v8140_v47 = vpop.f32.mrb[117].mxu0 }
 0x1ec   : > { %v8252_v50 = vpop.f32.mrb[117].mxu1  ;;  %v8141_v14 = vadd.f32 %v8140_v47, %v8139_v59  ;;  %v8142_v52 = vpop.f32.mrb[118].mxu0 }
 0x1ed   : > { %v8253_v19 = vadd.f32 %v8252_v50, %v8251_v26  ;;  %v8254_v51 = vpop.f32.mrb[118].mxu1  ;;  %v8143_v38 = vpop.f32.mrb[119].mxu0 }
 0x1ee   : > { %v8255_v34 = vpop.f32.mrb[119].mxu1  ;;  %v2797_v15 = vadd.f32 %v8141_v14, %v10834_v46  ;;  %v8144_v40 = vadd.f32 %v8143_v38, %v8142_v52 }
 0x1ef   : > { %v8256_v29 = vadd.f32 %v8255_v34, %v8254_v51 }
 0x1f0   : > { %v2800_v32 = vadd.f32 %v8144_v40, %v10836_v36  ;;  %v11099_v39 = vadd.f32 %v8253_v19, %v2797_v15 }
 0x1f2   : > { %v8145_v25 = vpop.f32.mrb[120].mxu0  ;;  %v11101_v7 = vadd.f32 %v8256_v29, %v2800_v32  ;;  %v9173_v32 = vld [vmem:[%s12299_s2 + $0x160] sm:$0xff]  }
 0x1f3   : > { %v8257_v45 = vpop.f32.mrb[120].mxu1  ;;  %v8146_v41 = vpop.f32.mrb[121].mxu0  ;;  %8525 = vmatprep.subr.bf16.mxu1 %v9173_v32 }
 0x1f4   : > { %v8258_v62 = vpop.f32.mrb[121].mxu1  ;;  %v8147_v46 = vadd.f32 %v8146_v41, %v8145_v25  ;;  %v8148_v10 = vpop.f32.mrb[122].mxu0 }
 0x1f5   : > { %v8259_v18 = vadd.f32 %v8258_v62, %v8257_v45  ;;  %v8260_v33 = vpop.f32.mrb[122].mxu1  ;;  %v8149_v36 = vpop.f32.mrb[123].mxu0 }
 0x1f6   : > { %v8261_v58 = vpop.f32.mrb[123].mxu1  ;;  %v2805_v3 = vadd.f32 %v8147_v46, %v10844_v27  ;;  %v8150_v61 = vadd.f32 %v8149_v36, %v8148_v10  ;;  %v9171_v27 = vld [vmem:[%s12299_s2 + $0x1c0] sm:$0xff]  }
 0x1f7   : > { %v8262_v21 = vadd.f32 %v8261_v58, %v8260_v33  ;;  %8629 = vmatprep.subr.bf16.mxu0 %v9171_v27  ;;  %v9177_v46 = vld [vmem:[%s12299_s2 + $0x120] sm:$0xff]  }
 0x1f8   : > { %v2808_v26 = vadd.f32 %v8150_v61, %v10846_v23  ;;  %v11108_v50 = vadd.f32 %v8259_v18, %v2805_v3  ;;  %8526 = vmatpush3.bf16.msra.mxu1 %v9177_v46 }
 0x1fa   : > { %v8151_v19 = vpop.f32.mrb[124].mxu0  ;;  %v11110_v34 = vadd.f32 %v8262_v21, %v2808_v26 }
 0x1fb   : > { %v8263_v9 = vpop.f32.mrb[124].mxu1  ;;  %v8152_v14 = vpop.f32.mrb[125].mxu0 }
 0x1fc   : > { %v8264_v59 = vpop.f32.mrb[125].mxu1  ;;  %v8153_v29 = vadd.f32 %v8152_v14, %v8151_v19  ;;  %v8154_v38 = vpop.f32.mrb[126].mxu0 }
 0x1fd   : > { %v8265_v51 = vadd.f32 %v8264_v59, %v8263_v9  ;;  %v8266_v47 = vpop.f32.mrb[126].mxu1  ;;  %v8155_v40 = vpop.f32.mrb[127].mxu0 }
 0x1fe   : > { %v8267_v52 = vpop.f32.mrb[127].mxu1  ;;  %v2813_v23 = vadd.f32 %v8153_v29, %v10854_v55  ;;  %v8156_v54 = vadd.f32 %v8155_v40, %v8154_v38  ;;  %v3709_v40 = vld [vmem:[#allocation2 + $0x18] sm:$0xf] }
 0x1ff   : > { %v8268_v15 = vadd.f32 %v8267_v52, %v8266_v47 }
 0x200   : > { %v2816_v45 = vadd.f32 %v8156_v54, %v10856_v56  ;;  %v11120_v62 = vadd.f32 %v8265_v51, %v2813_v23 }
 0x202   : > { %v8783_v25 = vpop.f32.mrb[128].mxu0  ;;  %v11122_v18 = vadd.f32 %v8268_v15, %v2816_v45 }
 0x203   : > { %v3023_v33 = vadd.f32 %v8783_v25, %v10912_v20  ;;  %v3014_v41 = vpop.f32.mrb[129].mxu0 }
 0x204   : > { %v3015_v58 = vadd.f32 %v3014_v41, %v10892_v5  ;;  %v8784_v55 = vpop.f32.mrb[130].mxu0  ;;  %v3702_v41 = vld [vmem:[#allocation2 + $0xc] sm:$0xf] }
 0x205   : > { %v3143_v10 = vmax.f32 %v3023_v33, 0.0  ;;  %v3026_v21 = vadd.f32 %v8784_v55, %v10914_v2  ;;  %v3017_v56 = vpop.f32.mrb[131].mxu0 }
 0x206   : > { %v3141_v31 = vmax.f32 %v3015_v58, 0.0  ;;  %v3018_v36 = vadd.f32 %v3017_v56, %v10904_v57  ;;  %v3713_v56 = vld [vmem:[#allocation2 + $0x20] sm:$0x1] }
 0x207   : > { %v7664_v3 = vpack.c.bf16 %v3143_v10, %v3143_v10  ;;  %v3144_v61 = vmax.f32 %v3026_v21, 0.0 }
 0x208   : > { %v7662_v26 = vpack.c.bf16 %v3141_v31, %v3141_v31  ;;  %v3142_v20 = vmax.f32 %v3018_v36, 0.0 }
 0x209   : > { %v3398_v9 = vshrl.u32 %v7664_v3, 16  ;;  %v7665_v5 = vpack.c.bf16 %v3144_v61, %v3144_v61  ;;  %v3401_v59 = vshll.u32 %v7664_v3, 16 }
 0x20a   : > { %v3381_v19 = vshrl.u32 %v7662_v26, 16  ;;  %v3384_v51 = vshll.u32 %v7662_v26, 16  ;;  %v7663_v47 = vpack.c.bf16 %v3142_v20, %v3142_v20  ;;  %v8787_v14 = vpop.f32.mrb[132].mxu0  ;;  %v3706_v26 = vld [vmem:[#allocation2 + $0x14] sm:$0x1] }
 0x20b   : > { %v3400_v52 = vrot.slane %v3398_v9, 7  ;;  %v3406_v2 = vshrl.u32 %v7665_v5, 16  ;;  %v3409_v29 = vshll.u32 %v7665_v5, 16  ;;  %v3039_v38 = vadd.f32 %v8787_v14, %v10964_v6  ;;  %v3030_v57 = vpop.f32.mrb[133].mxu0  ;;  %v9187_v9 = vld [vmem:[%s12299_s2 + $0x168] sm:$0xff]  }
 0x20c   : > { %v3383_v27 = vrot.slane %v3381_v19, 7  ;;  %v3389_v23 = vshrl.u32 %v7663_v47, 16  ;;  %v3392_v54 = vshll.u32 %v7663_v47, 16  ;;  %v3031_v32 = vadd.f32 %v3030_v57, %v10934_v42  ;;  %v8788_v45 = vpop.f32.mrb[134].mxu0  ;;  %8527 = vmatprep.subr.bf16.mxu1 %v9187_v9 }
 0x20d   : > { %v3403_v25 = vor.u32 %v3401_v59, %v3400_v52  ;;  %v3404_v33 = vrot.slane %v3400_v52, 4  ;;  %v3408_v58 = vrot.slane %v3406_v2, 7  ;;  %v3147_v55 = vmax.f32 %v3039_v38, 0.0  ;;  %v3033_v46 = vpop.f32.mrb[135].mxu0 }
 0x20e   : > { %v3386_v6 = vor.u32 %v3384_v51, %v3383_v27  ;;  %v3387_v10 = vrot.slane %v3383_v27, 4  ;;  %v3391_v31 = vrot.slane %v3389_v23, 7  ;;  %v3145_v36 = vmax.f32 %v3031_v32, 0.0 }
 0x20f   : > { %v3710_v42 = vsel %vm11133_vm9, %v3403_v25, %v3709_v40  ;;  %v3411_v3 = vor.u32 %v3409_v29, %v3408_v58  ;;  %v3413_v61 = vrot.slane %v3408_v58, 4  ;;  %v7668_v20 = vpack.c.bf16 %v3147_v55, %v3147_v55 }
 0x210   : > { %3711 = vst [vmem:[#allocation2 + $0x18] sm:$0xf] %v3710_v42  ;;  %v3703_v5 = vsel %vm11133_vm9, %v3386_v6, %v3702_v41  ;;  %v3394_v59 = vor.u32 %v3392_v54, %v3391_v31  ;;  %v3396_v19 = vrot.slane %v3391_v31, 4  ;;  %v7666_v51 = vpack.c.bf16 %v3145_v36, %v3145_v36 }
 0x211   : > { %3704 = vst [vmem:[#allocation2 + $0xc] sm:$0xf] %v3703_v5  ;;  %v3412_v47 = vsel %vm11140_vm10, %v3404_v33, %v3411_v3  ;;  %v3714_v14 = vsel %vm10874_vm4, %v3413_v61, %v3713_v56  ;;  %v3432_v52 = vshrl.u32 %v7668_v20, 16  ;;  %v3435_v38 = vshll.u32 %v7668_v20, 16  ;;  %v3723_v33 = vld [vmem:[#allocation2 + $0x30] sm:$0xf] }
 0x212   : > { %3712 = vst [vmem:[#allocation2 + $0x1c] sm:$0xf] %v3412_v47  ;;  %3715 = vst [vmem:[#allocation2 + $0x20] sm:$0x1] %v3714_v14  ;;  %v3395_v2 = vsel %vm11140_vm10, %v3387_v10, %v3394_v59  ;;  %v3707_v29 = vsel %vm10874_vm4, %v3396_v19, %v3706_v26  ;;  %v3415_v57 = vshrl.u32 %v7666_v51, 16  ;;  %v8791_v40 = vpop.f32.mrb[136].mxu0  ;;  %v3042_v23 = vadd.f32 %v8788_v45, %v10974_v22 }
 0x213   : > { %3705 = vst [vmem:[#allocation2 + $0x10] sm:$0xf] %v3395_v2  ;;  %3708 = vst [vmem:[#allocation2 + $0x14] sm:$0x1] %v3707_v29  ;;  %v11159_v27 = vrot.slane %v3432_v52, 7  ;;  %v3034_v54 = vadd.f32 %v3033_v46, %v10941_v16  ;;  %v3055_v32 = vadd.f32 %v8791_v40, %v10998_v35  ;;  %v3046_v25 = vpop.f32.mrb[137].mxu0 }
 0x214   : > { %v3417_v41 = vrot.slane %v3415_v57, 7  ;;  %v3418_v58 = vshll.u32 %v7666_v51, 16  ;;  %v3047_v55 = vadd.f32 %v3046_v25, %v10986_v17  ;;  %v8792_v6 = vpop.f32.mrb[138].mxu0  ;;  %v9191_v10 = vld [vmem:[%s12299_s2 + $0x128] sm:$0xff]   ;;  %v3716_v22 = vld [vmem:[#allocation2 + $0x24] sm:$0xf] }
 0x215   : > { %v3437_v56 = vor.u32 %v3435_v38, %v11159_v27  ;;  %v3438_v31 = vrot.slane %v11159_v27, 4  ;;  %v3148_v45 = vmax.f32 %v3042_v23, 0.0  ;;  %v3146_v16 = vmax.f32 %v3034_v54, 0.0  ;;  %v3049_v46 = vpop.f32.mrb[139].mxu0  ;;  %8528 = vmatpush3.bf16.msra.mxu1 %v9191_v10  ;;  %v3727_v2 = vld [vmem:[#allocation2 + $0x38] sm:$0x1] }
 0x216   : > { %v3420_v35 = vor.u32 %v3418_v58, %v3417_v41  ;;  %v3421_v36 = vrot.slane %v3417_v41, 4  ;;  %v3151_v42 = vmax.f32 %v3055_v32, 0.0  ;;  %v3149_v3 = vmax.f32 %v3047_v55, 0.0  ;;  %v3720_v29 = vld [vmem:[#allocation2 + $0x2c] sm:$0x1] }
 0x217   : > { %v3724_v17 = vsel %vm11133_vm9, %v3437_v56, %v3723_v33  ;;  %v7669_v61 = vpack.c.bf16 %v3148_v45, %v3148_v45  ;;  %v7667_v26 = vpack.c.bf16 %v3146_v16, %v3146_v16  ;;  %v3058_v20 = vadd.f32 %v8792_v6, %v11006_v49 }
 0x218   : > { %3725 = vst [vmem:[#allocation2 + $0x30] sm:$0xf] %v3724_v17  ;;  %v3717_v9 = vsel %vm11133_vm9, %v3420_v35, %v3716_v22  ;;  %v7672_v5 = vpack.c.bf16 %v3151_v42, %v3151_v42  ;;  %v7670_v59 = vpack.c.bf16 %v3149_v3, %v3149_v3  ;;  %v3050_v19 = vadd.f32 %v3049_v46, %v10991_v0  ;;  %v3737_v0 = vld [vmem:[#allocation2 + $0x48] sm:$0xf]  ;;  %v3730_v46 = vld [vmem:[#allocation2 + $0x3c] sm:$0xf] }
 0x219   : > { %3718 = vst [vmem:[#allocation2 + $0x24] sm:$0xf] %v3717_v9  ;;  %v3440_v51 = vshrl.u32 %v7669_v61, 16  ;;  %v3443_v47 = vshll.u32 %v7669_v61, 16  ;;  %v3423_v14 = vshrl.u32 %v7667_v26, 16  ;;  %v3426_v52 = vshll.u32 %v7667_v26, 16 }
 0x21a   : > { %v3466_v38 = vshrl.u32 %v7672_v5, 16  ;;  %v3469_v57 = vshll.u32 %v7672_v5, 16  ;;  %v3449_v40 = vshrl.u32 %v7670_v59, 16  ;;  %v3452_v27 = vshll.u32 %v7670_v59, 16  ;;  %v8795_v49 = vpop.f32.mrb[140].mxu0  ;;  %v9201_v59 = vld [vmem:[%s12299_s2 + $0x170] sm:$0xff]  }
 0x21b   : > { %v3442_v23 = vrot.slane %v3440_v51, 7  ;;  %v3425_v54 = vrot.slane %v3423_v14, 7  ;;  %v3152_v32 = vmax.f32 %v3058_v20, 0.0  ;;  %v3150_v25 = vmax.f32 %v3050_v19, 0.0  ;;  %v3062_v33 = vpop.f32.mrb[141].mxu0  ;;  %8529 = vmatprep.subr.bf16.mxu1 %v9201_v59 }
 0x21c   : > { %v11176_v41 = vrot.slane %v3466_v38, 7  ;;  %v11178_v58 = vrot.slane %v3449_v40, 7  ;;  %v3071_v55 = vadd.f32 %v8795_v49, %v11024_v43  ;;  %v3063_v6 = vadd.f32 %v3062_v33, %v11012_v37  ;;  %v8796_v10 = vpop.f32.mrb[142].mxu0  ;;  %v3879_v14 = vld [vmem:[#allocation2 + $0x10] sm:$0xf] }
 0x21d   : > { %v3445_v56 = vor.u32 %v3443_v47, %v3442_v23  ;;  %v3447_v22 = vrot.slane %v3442_v23, 4  ;;  %v3428_v45 = vor.u32 %v3426_v52, %v3425_v54  ;;  %v3430_v16 = vrot.slane %v3425_v54, 4  ;;  %v3065_v35 = vpop.f32.mrb[143].mxu0  ;;  %v3741_v40 = vld [vmem:[#allocation2 + $0x50] sm:$0x1] }
 0x21e   : > { %v3471_v42 = vor.u32 %v3469_v57, %v11176_v41  ;;  %v3472_v3 = vrot.slane %v11176_v41, 4  ;;  %v3454_v17 = vor.u32 %v3452_v27, %v11178_v58  ;;  %v7671_v5 = vpack.c.bf16 %v3150_v25, %v3150_v25  ;;  %v3734_v27 = vld [vmem:[#allocation2 + $0x44] sm:$0x1]  ;;  %v3878_v25 = vld [vmem:[#allocation2 + $0xc] sm:$0xf] }
 0x21f   : > { %v3446_v61 = vsel %vm11140_vm10, %v3438_v31, %v3445_v56  ;;  %v3728_v43 = vsel %vm10874_vm4, %v3447_v22, %v3727_v2  ;;  %v3429_v37 = vsel %vm11140_vm10, %v3421_v36, %v3428_v45  ;;  %v3721_v26 = vsel %vm10874_vm4, %v3430_v16, %v3720_v29 }
 0x220   : > { %3726 = vst [vmem:[#allocation2 + $0x34] sm:$0xf] %v3446_v61  ;;  %3729 = vst [vmem:[#allocation2 + $0x38] sm:$0x1] %v3728_v43  ;;  %v3738_v20 = vsel %vm11133_vm9, %v3471_v42, %v3737_v0  ;;  %v3731_v9 = vsel %vm11133_vm9, %v3454_v17, %v3730_v46  ;;  %v7673_v31 = vpack.c.bf16 %v3152_v32, %v3152_v32  ;;  %v3155_v36 = vmax.f32 %v3071_v55, 0.0  ;;  %v9172_v55 = vld [vmem:[%s12299_s2 + $0x180] sm:$0xff]  }
 0x221   : > { %3719 = vst [vmem:[#allocation2 + $0x28] sm:$0xf] %v3429_v37  ;;  %3722 = vst [vmem:[#allocation2 + $0x2c] sm:$0x1] %v3721_v26  ;;  %v3153_v19 = vmax.f32 %v3063_v6, 0.0  ;;  %v3074_v51 = vadd.f32 %v8796_v10, %v11026_v60  ;;  %v3066_v47 = vadd.f32 %v3065_v35, %v11014_v28  ;;  %v3455_v52 = vrot.slane %v11178_v58, 4 }
 0x222   : > { %3739 = vst [vmem:[#allocation2 + $0x48] sm:$0xf] %v3738_v20  ;;  %3732 = vst [vmem:[#allocation2 + $0x3c] sm:$0xf] %v3731_v9  ;;  %v3474_v2 = vshrl.u32 %v7673_v31, 16  ;;  %v3477_v29 = vshll.u32 %v7673_v31, 16  ;;  %v7676_v49 = vpack.c.bf16 %v3155_v36, %v3155_v36  ;;  %v11207_v0 = vcombine.low %v3878_v25, %v3879_v14 }
 0x223   : > { %v3457_v38 = vshrl.u32 %v7671_v5, 16  ;;  %v11203_v57 = vpop.f32.mrb[144].mxu0  ;;  %v7674_v23 = vpack.c.bf16 %v3153_v19, %v3153_v19  ;;  %v3156_v54 = vmax.f32 %v3074_v51, 0.0  ;;  %v3154_v32 = vmax.f32 %v3066_v47, 0.0  ;;  %v9205_v6 = vld [vmem:[%s12299_s2 + $0x130] sm:$0xff]   ;;  %v9185_v46 = vld [vmem:[%s12299_s2 + $0x1c8] sm:$0xff]  }
 0x224   : > { %v11205_v33 = vpop.f32.mrb[145].mxu0  ;;  %v3476_v60 = vrot.slane %v3474_v2, 7  ;;  %v3460_v41 = vshll.u32 %v7671_v5, 16  ;;  %v3500_v10 = vshrl.u32 %v7676_v49, 16  ;;  %v3503_v56 = vshll.u32 %v7676_v49, 16  ;;  %6168 = vmatprep.mubr.bf16.mxu0 %v11207_v0  ;;  %8530 = vmatpush3.bf16.msra.mxu1 %v9205_v6  ;;  %v9186_v51 = vld [vmem:[%s12299_s2 + $0x188] sm:$0xff]  }
 0x225   : > { %v3459_v28 = vrot.slane %v3457_v38, 7  ;;  %v8800_v58 = vpop.f32.mrb[146].mxu0  ;;  %v3483_v22 = vshrl.u32 %v7674_v23, 16  ;;  %v3486_v45 = vshll.u32 %v7674_v23, 16  ;;  %v3751_v37 = vld [vmem:[#allocation2 + $0x60] sm:$0xf]  ;;  %v7677_v20 = vpack.c.bf16 %v3156_v54, %v3156_v54  ;;  %6169 = vmatmul.mubr.bf16.vlgmr.msra.gmra.mrb[160].mxu0 %v10994_v13 }
 0x226   : > { %v11215_v16 = vpop.f32.mrb[147].mxu0  ;;  %v3479_v35 = vor.u32 %v3477_v29, %v3476_v60  ;;  %v3481_v42 = vrot.slane %v3476_v60, 4  ;;  %v11221_v43 = vrot.slane %v3500_v10, 7  ;;  %v7675_v9 = vpack.c.bf16 %v3154_v32, %v3154_v32  ;;  %v3744_v19 = vld [vmem:[#allocation2 + $0x54] sm:$0xf]  ;;  %8630 = vmatpush3.bf16.msra.mxu0 %v9172_v55 }
 0x227   : > { %v3462_v17 = vor.u32 %v3460_v41, %v3459_v28  ;;  %v3464_v61 = vrot.slane %v3459_v28, 4  ;;  %v11223_v26 = vrot.slane %v3483_v22, 7  ;;  %v3881_v47 = vld [vmem:[#allocation2 + $0x1c] sm:$0xf]  ;;  %8631 = vmatprep.subr.bf16.mxu0 %v9185_v46  ;;  %v9199_v14 = vld [vmem:[%s12299_s2 + $0x1d0] sm:$0xff]   ;;  %v3511_v49 = vshll.u32 %v7677_v20, 16 }
 0x228   : > { %v3480_v31 = vsel %vm11140_vm10, %v3472_v3, %v3479_v35  ;;  %v3742_v5 = vsel %vm10874_vm4, %v3481_v42, %v3741_v40  ;;  %v3505_v13 = vor.u32 %v3503_v56, %v11221_v43  ;;  %v3491_v2 = vshrl.u32 %v7675_v9, 16  ;;  %v3755_v23 = vld [vmem:[#allocation2 + $0x68] sm:$0x1]  ;;  %v3748_v54 = vld [vmem:[#allocation2 + $0x5c] sm:$0x1]  ;;  %v9200_v60 = vld [vmem:[%s12299_s2 + $0x190] sm:$0xff]  }
 0x229   : > { %v3463_v59 = vsel %vm11140_vm10, %v3455_v52, %v3462_v17  ;;  %v3735_v36 = vsel %vm10874_vm4, %v3464_v61, %v3734_v27  ;;  %3740 = vst [vmem:[#allocation2 + $0x4c] sm:$0xf] %v3480_v31  ;;  %3743 = vst [vmem:[#allocation2 + $0x50] sm:$0x1] %v3742_v5  ;;  %v3488_v3 = vor.u32 %v3486_v45, %v11223_v26  ;;  %v3508_v52 = vshrl.u32 %v7677_v20, 16  ;;  %v9213_v61 = vld [vmem:[%s12299_s2 + $0x1d8] sm:$0xff]  }
 0x22a   : > { %3733 = vst [vmem:[#allocation2 + $0x40] sm:$0xf] %v3463_v59  ;;  %3736 = vst [vmem:[#allocation2 + $0x44] sm:$0x1] %v3735_v36  ;;  %v11242_v29 = vpop.f32.mrb[148].mxu0  ;;  %v3506_v38 = vrot.slane %v11221_v43, 4  ;;  %v3752_v40 = vsel %vm11133_vm9, %v3505_v13, %v3751_v37  ;;  %8632 = vmatpush3.bf16.msra.mxu0 %v9186_v51  ;;  %v3087_v45 = vadd.f32 %v11203_v57, %v11052_v48 }
 0x22b   : > { %v3745_v27 = vsel %vm11133_vm9, %v3488_v3, %v3744_v19  ;;  %v3880_v32 = vld [vmem:[#allocation2 + $0x18] sm:$0xf]  ;;  %v11249_v25 = vpop.f32.mrb[149].mxu0  ;;  %3753 = vst [vmem:[#allocation2 + $0x60] sm:$0xf] %v3752_v40  ;;  %v3510_v28 = vrot.slane %v3508_v52, 7  ;;  %v3079_v46 = vadd.f32 %v11205_v33, %v11032_v11  ;;  %v3090_v35 = vadd.f32 %v8800_v58, %v11054_v4  ;;  %8633 = vmatprep.subr.bf16.mxu0 %v9199_v14 }
 0x22c   : > { %3746 = vst [vmem:[#allocation2 + $0x54] sm:$0xf] %v3745_v27  ;;  %v3493_v41 = vrot.slane %v3491_v2, 7  ;;  %v3494_v55 = vshll.u32 %v7675_v9, 16  ;;  %v11254_v6 = vcombine.low %v3880_v32, %v3881_v47  ;;  %v11256_v10 = vld [vmem:[#allocation2 + $0x10] sm:$0xf]  ;;  %v3082_v14 = vadd.f32 %v11215_v16, %v11034_v12 }
 0x22d   : > { %v11258_v56 = vpop.f32.mrb[150].mxu0  ;;  %v3489_v22 = vrot.slane %v11223_v26, 4  ;;  %v11266_v42 = vld [vmem:[#allocation2 + $0x1c] sm:$0xf]  ;;  %v3513_v43 = vor.u32 %v3511_v49, %v3510_v28  ;;  %v3515_v37 = vrot.slane %v3510_v28, 4  ;;  %v3159_v11 = vmax.f32 %v3087_v45, 0.0 }
 0x22e   : > { %v11268_v17 = vpop.f32.mrb[151].mxu0  ;;  %v3496_v26 = vor.u32 %v3494_v55, %v3493_v41  ;;  %v3498_v20 = vrot.slane %v3493_v41, 4  ;;  %6176 = vmatprep.mubr.bf16.mxu0 %v11254_v6  ;;  %v11274_v48 = vld [vmem:[#allocation2 + $0x14] ss:$0 sps:$4 sm:$0x11]   ;;  %v3157_v57 = vmax.f32 %v3079_v46, 0.0  ;;  %8634 = vmatpush3.bf16.msra.mxu0 %v9200_v60 }
 0x22f   : > { %v3160_v4 = vmax.f32 %v3090_v35, 0.0  ;;  %v11276_v33 = vld [vmem:[#allocation2 + $0x20] ss:$0 sps:$4 sm:$0x11]   ;;  %v3514_v58 = vsel %vm11140_vm10, %v3506_v38, %v3513_v43  ;;  %v3756_v9 = vsel %vm10874_vm4, %v3515_v37, %v3755_v23  ;;  %v3816_v59 = vld [vmem:[#allocation2 + $0xc] sm:$0xf]  ;;  %v7680_v36 = vpack.c.bf16 %v3159_v11, %v3159_v11  ;;  %8635 = vmatprep.subr.bf16.mxu0 %v9213_v61 }
 0x230   : > { %v3497_v31 = vsel %vm11140_vm10, %v3489_v22, %v3496_v26  ;;  %v3749_v5 = vsel %vm10874_vm4, %v3498_v20, %v3748_v54  ;;  %3754 = vst [vmem:[#allocation2 + $0x64] sm:$0xf] %v3514_v58  ;;  %3757 = vst [vmem:[#allocation2 + $0x68] sm:$0x1] %v3756_v9  ;;  %v7678_v19 = vpack.c.bf16 %v3157_v57, %v3157_v57  ;;  %v3818_v3 = vld [vmem:[#allocation2 + $0x18] sm:$0xf] }
 0x231   : > { %3747 = vst [vmem:[#allocation2 + $0x58] sm:$0xf] %v3497_v31  ;;  %3750 = vst [vmem:[#allocation2 + $0x5c] sm:$0x1] %v3749_v5  ;;  %v7681_v51 = vpack.c.bf16 %v3160_v4, %v3160_v4  ;;  %v11287_v13 = vcombine.low %v3816_v59, %v11256_v10  ;;  %v9214_v47 = vld [vmem:[%s12299_s2 + $0x198] sm:$0xff]   ;;  %v11295_v52 = vcombine.low %v3818_v3, %v11266_v42  ;;  %v3534_v40 = vshrl.u32 %v7680_v36, 16 }
 0x232   : > { %v11297_v2 = vpop.f32.mrb[152].mxu0  ;;  %v9215_v38 = vld [vmem:[%s12299_s2 + $0x178] sm:$0xff]   ;;  %v3517_v27 = vshrl.u32 %v7678_v19, 16  ;;  %v4171_v49 = vshll.u32 %v11274_v48, 16  ;;  %v4183_v23 = vshll.u32 %v11276_v33, 16  ;;  %v3537_v32 = vshll.u32 %v7680_v36, 16  ;;  %8636 = vmatpush3.bf16.msra.mxu0 %v9214_v47 }
 0x233   : > { %v11304_v54 = vpop.f32.mrb[153].mxu0  ;;  %v3765_v60 = vld [vmem:[#allocation2 + $0x78] sm:$0xf]  ;;  %v3520_v12 = vshll.u32 %v7678_v19, 16  ;;  %v3542_v16 = vshrl.u32 %v7681_v51, 16  ;;  %v4166_v28 = vshll.u32 %v11287_v13, 16  ;;  %8531 = vmatprep.subr.bf16.mxu1 %v9215_v38 }
 0x234   : > { %v11307_v41 = vpop.f32.mrb[154].mxu0  ;;  %v9219_v55 = vld [vmem:[%s12299_s2 + $0x138] sm:$0xff]   ;;  %v3536_v22 = vrot.slane %v3534_v40, 7  ;;  %v11312_v45 = vrot.slane %v3517_v27, 7  ;;  %v3545_v46 = vshll.u32 %v7681_v51, 16  ;;  %v3158_v35 = vmax.f32 %v3082_v14, 0.0 }
 0x235   : > { %v11314_v61 = vpop.f32.mrb[155].mxu0  ;;  %v9220_v43 = vld [vmem:[%s12299_s2 + $0x1e0] sm:$0xff]   ;;  %v3758_v37 = vld [vmem:[#allocation2 + $0x6c] sm:$0xf]  ;;  %v3544_v26 = vrot.slane %v3542_v16, 7  ;;  %v4164_v20 = vshrl.u32 %v11287_v13, 16  ;;  %8532 = vmatpush3.bf16.msra.mxu1 %v9219_v55 }
 0x236   : > { %v4168_v11 = vrot.slane %v4166_v28, 1  ;;  %v4178_v57 = vshll.u32 %v11295_v52, 16  ;;  %v3539_v4 = vor.u32 %v3537_v32, %v3536_v22  ;;  %v3540_v58 = vrot.slane %v3536_v22, 4  ;;  %v3769_v31 = vld [vmem:[#allocation2 + $0x80] sm:$0x1]  ;;  %8637 = vmatprep.subr.bf16.mxu0 %v9220_v43 }
 0x237   : > { %v3522_v9 = vor.u32 %v3520_v12, %v11312_v45  ;;  %v4173_v5 = vrot.slane %v4171_v49, 1  ;;  %v3547_v59 = vor.u32 %v3545_v46, %v3544_v26  ;;  %v3549_v36 = vrot.slane %v3544_v26, 4  ;;  %v9223_v3 = vld [vmem:[%s12299_s2 + $0x1a0] sm:$0xff]   ;;  %v3863_v16 = vld [vmem:[#allocation2 + $0xc] sm:$0xe] }
 0x238   : > { %v4169_v19 = vor.u32 %v4168_v11, %v4164_v20  ;;  %v7679_v51 = vpack.c.bf16 %v3158_v35, %v3158_v35  ;;  %v3766_v47 = vsel %vm11133_vm9, %v3539_v4, %v3765_v60  ;;  %v4176_v38 = vshrl.u32 %v11295_v52, 16  ;;  %8638 = vmatpush3.bf16.msra.mxu0 %v9223_v3  ;;  %v9224_v60 = vld [vmem:[%s12299_s2 + $0x1e8] sm:$0xff]   ;;  %v3762_v55 = vld [vmem:[#allocation2 + $0x74] sm:$0x1] }
 0x239   : > { %v3759_v14 = vsel %vm11133_vm9, %v3522_v9, %v3758_v37  ;;  %v4180_v40 = vrot.slane %v4178_v57, 1  ;;  %3767 = vst [vmem:[#allocation2 + $0x78] sm:$0xf] %v3766_v47  ;;  %v3548_v27 = vsel %vm11140_vm10, %v3540_v58, %v3547_v59  ;;  %v3770_v49 = vsel %vm10874_vm4, %v3549_v36, %v3769_v31  ;;  %v3882_v37 = vld [vmem:[#allocation2 + $0x24] sm:$0xf]  ;;  %v9225_v11 = vld [vmem:[%s12299_s2 + $0x1a8] sm:$0xff]   ;;  %8639 = vmatprep.subr.bf16.mxu0 %v9224_v60 }
 0x23a   : > { %3760 = vst [vmem:[#allocation2 + $0x6c] sm:$0xf] %v3759_v14  ;;  %v4174_v32 = vsel %vm510_vm1, %v4169_v19, %v4173_v5  ;;  %v3525_v12 = vshrl.u32 %v7679_v51, 16  ;;  %v11335_v28 = vpop.f32.mrb[156].mxu0  ;;  %3768 = vst [vmem:[#allocation2 + $0x7c] sm:$0xf] %v3548_v27  ;;  %v7444_v35 = vcombine.low %v3863_v16, %v11256_v10  ;;  %v3095_v5 = vadd.f32 %v11249_v25, %v11058_v8 }
 0x23b   : > { %3771 = vst [vmem:[#allocation2 + $0x80] sm:$0x1] %v3770_v49  ;;  %6015 = vmatprep.mubr.bf16.mxu1 %v4174_v32  ;;  %v4181_v22 = vor.u32 %v4180_v40, %v4176_v38  ;;  %v4185_v46 = vrot.slane %v4183_v23, 1  ;;  %v4411_v43 = vrot.slane %v11274_v48, 1  ;;  %v3883_v26 = vld [vmem:[#allocation2 + $0x28] sm:$0xf]  ;;  %v3103_v23 = vadd.f32 %v11242_v29, %v11072_v1 }
 0x23c   : > { %v11342_v20 = vpop.f32.mrb[157].mxu0  ;;  %v3523_v57 = vrot.slane %v11312_v45, 4  ;;  %v3527_v4 = vrot.slane %v3525_v12, 7  ;;  %v3528_v58 = vshll.u32 %v7679_v51, 16  ;;  %6016 = vmatmul.mubr.bf16.gmra.mrb[132].mxu1 %v11287_v13  ;;  %v11351_v10 = vld [vmem:[#allocation2 + $0x28] sm:$0xf]  ;;  %v3106_v45 = vadd.f32 %v11258_v56, %v11074_v63  ;;  %8640 = vmatpush3.bf16.msra.mxu0 %v9225_v11 }
 0x23d   : > { %v11353_v48 = vpop.f32.mrb[158].mxu0  ;;  %v4186_v9 = vsel %vm510_vm1, %v4181_v22, %v4185_v46  ;;  %v4410_v31 = vrot.slane %v7444_v35, 1  ;;  %v11360_v59 = vld [vmem:[#allocation2 + $0x2c] ss:$0 sps:$4 sm:$0x11]   ;;  %v11364_v29 = vcombine.low %v3882_v37, %v3883_v26  ;;  %v3163_v19 = vmax.f32 %v3103_v23, 0.0 }
 0x23e   : > { %v11362_v13 = vpop.f32.mrb[159].mxu0  ;;  %v3530_v36 = vor.u32 %v3528_v58, %v3527_v4  ;;  %v3532_v1 = vrot.slane %v3527_v4, 4  ;;  %6023 = vmatprep.mubr.bf16.mxu1 %v4186_v9  ;;  %v9228_v51 = vld [vmem:[%s12299_s2 + $0x1f0] sm:$0xff]   ;;  %v3161_v25 = vmax.f32 %v3095_v5, 0.0  ;;  %v3164_v3 = vmax.f32 %v3106_v45, 0.0 }
 0x23f   : > { %v4412_v8 = vsel %vm767_vm0, %v4410_v31, %v4411_v43  ;;  %v3098_v63 = vadd.f32 %v11268_v17, %v11064_v30  ;;  %v3820_v56 = vld [vmem:[#allocation2 + $0x24] sm:$0xf]  ;;  %v9229_v47 = vld [vmem:[%s12299_s2 + $0x1b0] sm:$0xff]   ;;  %v7684_v40 = vpack.c.bf16 %v3163_v19, %v3163_v19  ;;  %v4195_v32 = vshll.u32 %v11360_v59, 16  ;;  %8641 = vmatprep.subr.bf16.mxu0 %v9228_v51  ;;  %v3864_v23 = vld [vmem:[#allocation2 + $0x18] sm:$0xe] }
 0x240   : > { %v3531_v14 = vsel %vm11140_vm10, %v3523_v57, %v3530_v36  ;;  %v3763_v38 = vsel %vm10874_vm4, %v3532_v1, %v3762_v55  ;;  %6177 = vmatmul.mubr.bf16.gmra.mrb[164].mxu0 %v4412_v8  ;;  %v11380_v27 = vcombine.low %v3820_v56, %v11351_v10  ;;  %v7682_v30 = vpack.c.bf16 %v3161_v25, %v3161_v25  ;;  %v3779_v22 = vld [vmem:[#allocation2 + $0x90] sm:$0xf]  ;;  %v3772_v11 = vld [vmem:[#allocation2 + $0x84] sm:$0xf]  ;;  %v3783_v5 = vld [vmem:[#allocation2 + $0x98] sm:$0x1] }
 0x241   : > { %3761 = vst [vmem:[#allocation2 + $0x70] sm:$0xf] %v3531_v14  ;;  %3764 = vst [vmem:[#allocation2 + $0x74] sm:$0x1] %v3763_v38  ;;  %6184 = vmatprep.mubr.bf16.mxu0 %v11364_v29  ;;  %v7685_v17 = vpack.c.bf16 %v3164_v3, %v3164_v3  ;;  %v3162_v49 = vmax.f32 %v3098_v63, 0.0  ;;  %v3568_v12 = vshrl.u32 %v7684_v40, 16  ;;  %8642 = vmatpush3.bf16.msra.mxu0 %v9229_v47 }
 0x242   : > { %v3571_v16 = vshll.u32 %v7684_v40, 16  ;;  %v4188_v60 = vshrl.u32 %v11380_v27, 16  ;;  %v4190_v55 = vshll.u32 %v11380_v27, 16  ;;  %v3551_v46 = vshrl.u32 %v7682_v30, 16  ;;  %v9232_v1 = vld [vmem:[%s12299_s2 + $0x1f8] sm:$0xff]  }
 0x243   : > { %v3554_v35 = vshll.u32 %v7682_v30, 16  ;;  %v3576_v43 = vshrl.u32 %v7685_v17, 16  ;;  %v3579_v37 = vshll.u32 %v7685_v17, 16  ;;  %v3570_v26 = vrot.slane %v3568_v12, 7  ;;  %v3885_v3 = vld [vmem:[#allocation2 + $0x34] sm:$0xf]  ;;  %8643 = vmatprep.subr.bf16.mxu0 %v9232_v1 }
 0x244   : > { %v7683_v57 = vpack.c.bf16 %v3162_v49, %v3162_v49  ;;  %6024 = vmatmul.mubr.bf16.gmra.mrb[136].mxu1 %v11295_v52  ;;  %v4192_v4 = vrot.slane %v4190_v55, 1  ;;  %v4197_v58 = vrot.slane %v4195_v32, 1  ;;  %v3553_v9 = vrot.slane %v3551_v46, 7  ;;  %v9233_v52 = vld [vmem:[%s12299_s2 + $0x1b8] sm:$0xff]   ;;  %v3884_v30 = vld [vmem:[#allocation2 + $0x30] sm:$0xf] }
 0x245   : > { %v3578_v31 = vrot.slane %v3576_v43, 7  ;;  %v7445_v45 = vcombine.low %v3864_v23, %v11266_v42  ;;  %v4414_v36 = vrot.slane %v11276_v33, 1  ;;  %v3573_v19 = vor.u32 %v3571_v16, %v3570_v26  ;;  %8644 = vmatpush3.bf16.msra.mxu0 %v9233_v52  ;;  %v3776_v12 = vld [vmem:[#allocation2 + $0x8c] sm:$0x1]  ;;  %v11412_v43 = vld [vmem:[#allocation2 + $0x34] sm:$0xf] }
 0x246   : > { %v3574_v51 = vrot.slane %v3570_v26, 4  ;;  %v3559_v8 = vshrl.u32 %v7683_v57, 16  ;;  %v3562_v25 = vshll.u32 %v7683_v57, 16  ;;  %v3556_v63 = vor.u32 %v3554_v35, %v3553_v9  ;;  %v11439_v52 = vld [vmem:[#allocation2 + $0x40] sm:$0xf] }
 0x247   : > { %v3557_v56 = vrot.slane %v3553_v9, 4  ;;  %v3581_v47 = vor.u32 %v3579_v37, %v3578_v31  ;;  %v3583_v14 = vrot.slane %v3578_v31, 4  ;;  %v3780_v42 = vsel %vm11133_vm9, %v3573_v19, %v3779_v22  ;;  %v11427_v9 = vld [vmem:[#allocation2 + $0x38] ss:$0 sps:$4 sm:$0x11]  }
 0x248   : > { %v3561_v33 = vrot.slane %v3559_v8, 7  ;;  %v4193_v38 = vor.u32 %v4192_v4, %v4188_v60  ;;  %v4413_v40 = vrot.slane %v7445_v45, 1  ;;  %3781 = vst [vmem:[#allocation2 + $0x90] sm:$0xf] %v3780_v42  ;;  %v3773_v17 = vsel %vm11133_vm9, %v3556_v63, %v3772_v11  ;;  %v11408_v60 = vld [vmem:[%s12299_s2 + $0x200] sm:$0xff]  }
 0x249   : > { %v3582_v49 = vsel %vm11140_vm10, %v3574_v51, %v3581_v47  ;;  %v3784_v32 = vsel %vm10874_vm4, %v3583_v14, %v3783_v5  ;;  %v11403_v16 = vcombine.low %v3884_v30, %v3885_v3  ;;  %3774 = vst [vmem:[#allocation2 + $0x84] sm:$0xf] %v3773_v17  ;;  %v3119_v37 = vadd.f32 %v11297_v2, %v11099_v39  ;;  %v3822_v11 = vld [vmem:[#allocation2 + $0x30] sm:$0xf]  ;;  %v3793_v63 = vld [vmem:[#allocation2 + $0xa8] sm:$0xf] }
 0x24a   : > { %3782 = vst [vmem:[#allocation2 + $0x94] sm:$0xf] %v3582_v49  ;;  %3785 = vst [vmem:[#allocation2 + $0x98] sm:$0x1] %v3784_v32  ;;  %v3564_v55 = vor.u32 %v3562_v25, %v3561_v33  ;;  %v3566_v22 = vrot.slane %v3561_v33, 4  ;;  %v4198_v46 = vsel %vm510_vm1, %v4193_v38, %v4197_v58  ;;  %v4415_v35 = vsel %vm767_vm0, %v4413_v40, %v4414_v36 }
 0x24b   : > { %6031 = vmatprep.mubr.bf16.mxu1 %v4198_v46  ;;  %6185 = vmatmul.mubr.bf16.gmra.mrb[168].mxu0 %v4415_v35  ;;  %v3111_v26 = vadd.f32 %v11304_v54, %v11088_v24  ;;  %v3122_v58 = vadd.f32 %v11307_v41, %v11101_v7  ;;  %v3114_v23 = vadd.f32 %v11314_v61, %v11092_v44  ;;  %v3167_v24 = vmax.f32 %v3119_v37, 0.0  ;;  %v3865_v54 = vld [vmem:[#allocation2 + $0x24] sm:$0xe]  ;;  %v3886_v30 = vld [vmem:[#allocation2 + $0x3c] sm:$0xf] }
 0x24c   : > { %v3565_v57 = vsel %vm11140_vm10, %v3557_v56, %v3564_v55  ;;  %v3777_v4 = vsel %vm10874_vm4, %v3566_v22, %v3776_v12  ;;  %6192 = vmatprep.mubr.bf16.mxu0 %v11403_v16  ;;  %6032 = vmatmul.mubr.bf16.gmra.mrb[140].mxu1 %v11380_v27  ;;  %v11431_v2 = vcombine.low %v3822_v11, %v11412_v43  ;;  %v4417_v45 = vrot.slane %v11360_v59, 1  ;;  %v3786_v56 = vld [vmem:[#allocation2 + $0x9c] sm:$0xf]  ;;  %v3797_v49 = vld [vmem:[#allocation2 + $0xb0] sm:$0x1] }
 0x24d   : > { %3775 = vst [vmem:[#allocation2 + $0x88] sm:$0xf] %v3565_v57  ;;  %3778 = vst [vmem:[#allocation2 + $0x8c] sm:$0x1] %v3777_v4  ;;  %v3165_v39 = vmax.f32 %v3111_v26, 0.0  ;;  %8813 = vmatprep.subr.bf16.mxu1 %v11408_v60  ;;  %v3168_v31 = vmax.f32 %v3122_v58, 0.0  ;;  %v7446_v7 = vcombine.low %v3865_v54, %v11351_v10  ;;  %v7688_v41 = vpack.c.bf16 %v3167_v24, %v3167_v24 }
 0x24e   : > { %v3166_v5 = vmax.f32 %v3114_v23, 0.0  ;;  %v4202_v61 = vshll.u32 %v11431_v2, 16  ;;  %v4207_v27 = vshll.u32 %v11427_v9, 16  ;;  %v4200_v3 = vshrl.u32 %v11431_v2, 16  ;;  %v3790_v26 = vld [vmem:[#allocation2 + $0xa4] sm:$0x1] }
 0x24f   : > { %v7686_v44 = vpack.c.bf16 %v3165_v39, %v3165_v39  ;;  %v7689_v36 = vpack.c.bf16 %v3168_v31, %v3168_v31  ;;  %v4416_v19 = vrot.slane %v7446_v7, 1  ;;  %v3602_v51 = vshrl.u32 %v7688_v41, 16  ;;  %v11446_v23 = vld [vmem:[#allocation2 + $0x44] ss:$0 sps:$4 sm:$0x11]  }
 0x250   : > { %v7687_v1 = vpack.c.bf16 %v3166_v5, %v3166_v5  ;;  %v3605_v8 = vshll.u32 %v7688_v41, 16  ;;  %v4204_v38 = vrot.slane %v4202_v61, 1  ;;  %v11443_v55 = vcombine.low %v3886_v30, %v11439_v52  ;;  %v11452_v5 = vld [vmem:[#allocation2 + $0x40] sm:$0xf] }
 0x251   : > { %v3585_v25 = vshrl.u32 %v7686_v44, 16  ;;  %v3588_v10 = vshll.u32 %v7686_v44, 16  ;;  %v3610_v47 = vshrl.u32 %v7689_v36, 16  ;;  %v3613_v14 = vshll.u32 %v7689_v36, 16 }
 0x252   : > { %v3593_v42 = vshrl.u32 %v7687_v1, 16  ;;  %v3604_v33 = vrot.slane %v3602_v51, 7  ;;  %v4418_v40 = vsel %vm767_vm0, %v4416_v19, %v4417_v45  ;;  %v3596_v12 = vshll.u32 %v7687_v1, 16  ;;  %v3824_v19 = vld [vmem:[#allocation2 + $0x3c] sm:$0xf] }
 0x253   : > { %v3587_v59 = vrot.slane %v3585_v25, 7  ;;  %v3612_v17 = vrot.slane %v3610_v47, 7  ;;  %6193 = vmatmul.mubr.bf16.gmra.mrb[172].mxu0 %v4418_v40  ;;  %v4205_v54 = vor.u32 %v4204_v38, %v4200_v3  ;;  %v4209_v31 = vrot.slane %v4207_v27, 1  ;;  %v3866_v51 = vld [vmem:[#allocation2 + $0x30] sm:$0xe] }
 0x254   : > { %v3595_v32 = vrot.slane %v3593_v42, 7  ;;  %v3607_v22 = vor.u32 %v3605_v8, %v3604_v33  ;;  %v3608_v46 = vrot.slane %v3604_v33, 4  ;;  %6200 = vmatprep.mubr.bf16.mxu0 %v11443_v55  ;;  %v3135_v36 = vadd.f32 %v11335_v28, %v11120_v62  ;;  %v11476_v62 = vld [vmem:[#allocation2 + $0x4c] sm:$0xf] }
 0x255   : > { %v3590_v35 = vor.u32 %v3588_v10, %v3587_v59  ;;  %v3591_v37 = vrot.slane %v3587_v59, 4  ;;  %v3615_v11 = vor.u32 %v3613_v14, %v3612_v17  ;;  %v3617_v57 = vrot.slane %v3612_v17, 4  ;;  %v3888_v59 = vld [vmem:[#allocation2 + $0x48] sm:$0xf]  ;;  %v11485_v17 = vld [vmem:[#allocation2 + $0x4c] sm:$0xf] }
 0x256   : > { %v3598_v4 = vor.u32 %v3596_v12, %v3595_v32  ;;  %v3600_v58 = vrot.slane %v3595_v32, 4  ;;  %v3794_v24 = vsel %vm11133_vm9, %v3607_v22, %v3793_v63  ;;  %v4210_v45 = vsel %vm510_vm1, %v4205_v54, %v4209_v31  ;;  %v3800_v32 = vld [vmem:[#allocation2 + $0xb4] sm:$0xf]  ;;  %v11489_v31 = vld [vmem:[#allocation2 + $0x50] ss:$0 sps:$4 sm:$0x11]  }
 0x257   : > { %v3787_v39 = vsel %vm11133_vm9, %v3590_v35, %v3786_v56  ;;  %3795 = vst [vmem:[#allocation2 + $0xa8] sm:$0xf] %v3794_v24  ;;  %v3616_v7 = vsel %vm11140_vm10, %v3608_v46, %v3615_v11  ;;  %v3798_v41 = vsel %vm10874_vm4, %v3617_v57, %v3797_v49  ;;  %v3127_v1 = vadd.f32 %v11342_v20, %v11108_v50  ;;  %v3807_v49 = vld [vmem:[#allocation2 + $0xc0] sm:$0xf] }
 0x258   : > { %3788 = vst [vmem:[#allocation2 + $0x9c] sm:$0xf] %v3787_v39  ;;  %v3599_v44 = vsel %vm11140_vm10, %v3591_v37, %v3598_v4  ;;  %v3791_v61 = vsel %vm10874_vm4, %v3600_v58, %v3790_v26  ;;  %3796 = vst [vmem:[#allocation2 + $0xac] sm:$0xf] %v3616_v7  ;;  %v3138_v27 = vadd.f32 %v11353_v48, %v11122_v18  ;;  %6039 = vmatprep.mubr.bf16.mxu1 %v4210_v45  ;;  %v3811_v26 = vld [vmem:[#allocation2 + $0xc8] sm:$0x1] }
 0x259   : > { %3799 = vst [vmem:[#allocation2 + $0xb0] sm:$0x1] %v3798_v41  ;;  %3789 = vst [vmem:[#allocation2 + $0xa0] sm:$0xf] %v3599_v44  ;;  %v3130_v8 = vadd.f32 %v11362_v13, %v11110_v34  ;;  %v11472_v25 = vcombine.low %v3824_v19, %v11452_v5  ;;  %v4219_v3 = vshll.u32 %v11446_v23, 16  ;;  %v7447_v63 = vcombine.low %v3866_v51, %v11412_v43 }
 0x25a   : > { %3792 = vst [vmem:[#allocation2 + $0xa4] sm:$0x1] %v3791_v61  ;;  %v3171_v28 = vmax.f32 %v3135_v36, 0.0  ;;  %v3169_v50 = vmax.f32 %v3127_v1, 0.0  ;;  %v3172_v20 = vmax.f32 %v3138_v27, 0.0  ;;  %6040 = vmatmul.mubr.bf16.gmra.mrb[144].mxu1 %v11431_v2  ;;  %v4420_v10 = vrot.slane %v11427_v9, 1 }
 0x25b   : > { %v3170_v18 = vmax.f32 %v3130_v8, 0.0  ;;  %v4214_v48 = vshll.u32 %v11472_v25, 16  ;;  %v4419_v47 = vrot.slane %v7447_v63, 1  ;;  %v4212_v42 = vshrl.u32 %v11472_v25, 16  ;;  %v3826_v4 = vld [vmem:[#allocation2 + $0x48] sm:$0xf] }
 0x25c   : > { %v7692_v34 = vpack.c.bf16 %v3171_v28, %v3171_v28  ;;  %v7690_v13 = vpack.c.bf16 %v3169_v50, %v3169_v50  ;;  %v7693_v56 = vpack.c.bf16 %v3172_v20, %v3172_v20  ;;  %v4221_v33 = vrot.slane %v4219_v3, 1  ;;  %v3804_v45 = vld [vmem:[#allocation2 + $0xbc] sm:$0x1]  ;;  %v3867_v63 = vld [vmem:[#allocation2 + $0x3c] sm:$0xe] }
 0x25d   : > { %v7691_v14 = vpack.c.bf16 %v3170_v18, %v3170_v18  ;;  %v4216_v43 = vrot.slane %v4214_v48, 1  ;;  %v11483_v2 = vcombine.low %v3888_v59, %v11476_v62  ;;  %v4421_v57 = vsel %vm767_vm0, %v4419_v47, %v4420_v10  ;;  %v11497_v28 = vld [vmem:[#allocation2 + $0x58] sm:$0xf]  ;;  %v11509_v10 = vld [vmem:[#allocation2 + $0x5c] ss:$0 sps:$4 sm:$0x11]  }
 0x25e   : > { %v3636_v38 = vshrl.u32 %v7692_v34, 16  ;;  %v3639_v40 = vshll.u32 %v7692_v34, 16  ;;  %v3619_v30 = vshrl.u32 %v7690_v13, 16  ;;  %v3622_v9 = vshll.u32 %v7690_v13, 16  ;;  %6201 = vmatmul.mubr.bf16.gmra.mrb[176].mxu0 %v4421_v57  ;;  %v11499_v50 = vld [vmem:[#allocation2 + $0x58] sm:$0xf] }
 0x25f   : > { %v3644_v12 = vshrl.u32 %v7693_v56, 16  ;;  %v3647_v22 = vshll.u32 %v7693_v56, 16  ;;  %v3627_v46 = vshrl.u32 %v7691_v14, 16  ;;  %v4217_v11 = vor.u32 %v4216_v43, %v4212_v42  ;;  %6208 = vmatprep.mubr.bf16.mxu0 %v11483_v2  ;;  %v3828_v47 = vld [vmem:[#allocation2 + $0x54] sm:$0xf] }
 0x260   : > { %v3638_v35 = vrot.slane %v3636_v38, 7  ;;  %v3621_v37 = vrot.slane %v3619_v30, 7  ;;  %v3630_v39 = vshll.u32 %v7691_v14, 16  ;;  %v7417_v54 = vcombine.low %v3826_v4, %v11485_v17  ;;  %v3890_v14 = vld [vmem:[#allocation2 + $0x54] sm:$0xf] }
 0x261   : > { %v3646_v58 = vrot.slane %v3644_v12, 7  ;;  %v3629_v24 = vrot.slane %v3627_v46, 7  ;;  %v4222_v3 = vsel %vm510_vm1, %v4217_v11, %v4221_v33  ;;  %v4231_v13 = vshll.u32 %v11489_v31, 16  ;;  %v11516_v42 = vld [vmem:[#allocation2 + $0x64] sm:$0xf] }
 0x262   : > { %v3641_v7 = vor.u32 %v3639_v40, %v3638_v35  ;;  %v3642_v41 = vrot.slane %v3638_v35, 4  ;;  %v3624_v44 = vor.u32 %v3622_v9, %v3621_v37  ;;  %v3625_v61 = vrot.slane %v3621_v37, 4  ;;  %6047 = vmatprep.mubr.bf16.mxu1 %v4222_v3  ;;  %v3868_v30 = vld [vmem:[#allocation2 + $0x48] sm:$0xe] }
 0x263   : > { %v3649_v36 = vor.u32 %v3647_v22, %v3646_v58  ;;  %v3651_v1 = vrot.slane %v3646_v58, 4  ;;  %v3632_v27 = vor.u32 %v3630_v39, %v3629_v24  ;;  %v3634_v19 = vrot.slane %v3629_v24, 4  ;;  %6048 = vmatmul.mubr.bf16.gmra.mrb[148].mxu1 %v11472_v25  ;;  %v11527_v37 = vld [vmem:[#allocation2 + $0x68] ss:$0 sps:$4 sm:$0x11]  }
 0x264   : > { %v3808_v51 = vsel %vm11133_vm9, %v3641_v7, %v3807_v49  ;;  %v3801_v8 = vsel %vm11133_vm9, %v3624_v44, %v3800_v32  ;;  %v4226_v34 = vshll.u32 %v7417_v54, 16  ;;  %v7448_v56 = vcombine.low %v3867_v63, %v11452_v5  ;;  %v3830_v32 = vld [vmem:[#allocation2 + $0x60] sm:$0xf]  ;;  %v3832_v24 = vld [vmem:[#allocation2 + $0x6c] sm:$0xf] }
 0x265   : > { %3809 = vst [vmem:[#allocation2 + $0xc0] sm:$0xf] %v3808_v51  ;;  %3802 = vst [vmem:[#allocation2 + $0xb4] sm:$0xf] %v3801_v8  ;;  %v3650_v20 = vsel %vm11140_vm10, %v3642_v41, %v3649_v36  ;;  %v3812_v18 = vsel %vm10874_vm4, %v3651_v1, %v3811_v26  ;;  %v3633_v48 = vsel %vm11140_vm10, %v3625_v61, %v3632_v27  ;;  %v4423_v21 = vrot.slane %v11446_v23, 1 }
 0x266   : > { %v3805_v15 = vsel %vm10874_vm4, %v3634_v19, %v3804_v45  ;;  %3810 = vst [vmem:[#allocation2 + $0xc4] sm:$0xf] %v3650_v20  ;;  %3813 = vst [vmem:[#allocation2 + $0xc8] sm:$0x1] %v3812_v18  ;;  %v7418_v53 = vcombine.low %v3828_v47, %v11499_v50  ;;  %v4224_v43 = vshrl.u32 %v7417_v54, 16  ;;  %v4228_v33 = vrot.slane %v4226_v34, 1 }
 0x267   : > { %3803 = vst [vmem:[#allocation2 + $0xb8] sm:$0xf] %v3633_v48  ;;  %3806 = vst [vmem:[#allocation2 + $0xbc] sm:$0x1] %v3805_v15  ;;  %v4422_v59 = vrot.slane %v7448_v56, 1  ;;  %v11519_v38 = vcombine.low %v3890_v14, %v11497_v28  ;;  %v4243_v40 = vshll.u32 %v11509_v10, 16  ;;  %v7449_v9 = vcombine.low %v3868_v30, %v11485_v17 }
 0x268   : > { %v4238_v25 = vshll.u32 %v7418_v53, 16  ;;  %v4229_v49 = vor.u32 %v4228_v33, %v4224_v43  ;;  %v4233_v5 = vrot.slane %v4231_v13, 1  ;;  %v4236_v12 = vshrl.u32 %v7418_v53, 16  ;;  %v11529_v26 = vld [vmem:[#allocation2 + $0x70] sm:$0xf] }
 0x269   : > { %v4424_v23 = vsel %vm767_vm0, %v4422_v59, %v4423_v21  ;;  %v7419_v46 = vcombine.low %v3830_v32, %v11516_v42  ;;  %v4245_v57 = vrot.slane %v4243_v40, 1  ;;  %v4425_v17 = vrot.slane %v7449_v9, 1  ;;  %v11533_v7 = vld [vmem:[#allocation2 + $0x64] sm:$0xf]  ;;  %v3869_v36 = vld [vmem:[#allocation2 + $0x54] sm:$0xe] }
 0x26a   : > { %6209 = vmatmul.mubr.bf16.gmra.mrb[180].mxu0 %v4424_v23  ;;  %v4240_v22 = vrot.slane %v4238_v25, 1  ;;  %v4234_v35 = vsel %vm510_vm1, %v4229_v49, %v4233_v5  ;;  %v4426_v58 = vrot.slane %v11489_v31, 1  ;;  %v11536_v44 = vcombine.low %v3832_v24, %v11529_v26  ;;  %v3892_v1 = vld [vmem:[#allocation2 + $0x60] sm:$0xf]  ;;  %v11545_v8 = vld [vmem:[#allocation2 + $0x7c] sm:$0xf] }
 0x26b   : > { %6216 = vmatprep.mubr.bf16.mxu0 %v11519_v38  ;;  %6055 = vmatprep.mubr.bf16.mxu1 %v4234_v35  ;;  %v4250_v4 = vshll.u32 %v7419_v46, 16  ;;  %v4248_v61 = vshrl.u32 %v7419_v46, 16  ;;  %v4255_v45 = vshll.u32 %v11527_v37, 16  ;;  %v11542_v31 = vcombine.low %v3892_v1, %v11533_v7  ;;  %v11548_v63 = vld [vmem:[#allocation2 + $0x74] ss:$0 sps:$4 sm:$0x11]  }
 0x26c   : > { %v4241_v11 = vor.u32 %v4240_v22, %v4236_v12  ;;  %6056 = vmatmul.mubr.bf16.gmra.mrb[152].mxu1 %v7417_v54  ;;  %v7450_v54 = vcombine.low %v3869_v36, %v11499_v50  ;;  %v4427_v27 = vsel %vm767_vm0, %v4425_v17, %v4426_v58  ;;  %v4262_v51 = vshll.u32 %v11536_v44, 16  ;;  %v3834_v18 = vld [vmem:[#allocation2 + $0x78] sm:$0xf]  ;;  %v3895_v15 = vld [vmem:[#allocation2 + $0x70] sm:$0xf] }
 0x26d   : > { %v4252_v41 = vrot.slane %v4250_v4, 1  ;;  %v4257_v3 = vrot.slane %v4255_v45, 1  ;;  %v4429_v48 = vrot.slane %v11509_v10, 1  ;;  %v11553_v13 = vcombine.low %v3834_v18, %v11545_v8  ;;  %v3894_v56 = vld [vmem:[#allocation2 + $0x6c] sm:$0xf] }
 0x26e   : > { %v4246_v39 = vsel %vm510_vm1, %v4241_v11, %v4245_v57  ;;  %v4428_v20 = vrot.slane %v7450_v54, 1  ;;  %v4264_v34 = vrot.slane %v4262_v51, 1  ;;  %v4260_v21 = vshrl.u32 %v11536_v44, 16  ;;  %v3870_v43 = vld [vmem:[#allocation2 + $0x60] sm:$0xe] }
 0x26f   : > { %6063 = vmatprep.mubr.bf16.mxu1 %v4246_v39  ;;  %v4253_v19 = vor.u32 %v4252_v41, %v4248_v61  ;;  %v4267_v47 = vshll.u32 %v11548_v63, 16  ;;  %v11557_v14 = vcombine.low %v3894_v56, %v3895_v15  ;;  %v7451_v59 = vcombine.low %v3870_v43, %v11516_v42  ;;  %v11562_v25 = vld [vmem:[#allocation2 + $0x88] sm:$0xf]  ;;  %v11565_v30 = vld [vmem:[#allocation2 + $0x80] ss:$0 sps:$4 sm:$0x11]  }
 0x270   : > { %v4265_v33 = vor.u32 %v4264_v34, %v4260_v21  ;;  %v4274_v10 = vshll.u32 %v11553_v13, 16  ;;  %v4432_v49 = vrot.slane %v11527_v37, 1  ;;  %v3836_v5 = vld [vmem:[#allocation2 + $0x84] sm:$0xf]  ;;  %v3897_v32 = vld [vmem:[#allocation2 + $0x7c] sm:$0xf] }
 0x271   : > { %v4258_v50 = vsel %vm510_vm1, %v4253_v19, %v4257_v3  ;;  %v4269_v40 = vrot.slane %v4267_v47, 1  ;;  %v4431_v9 = vrot.slane %v7451_v59, 1  ;;  %v11570_v42 = vcombine.low %v3836_v5, %v11562_v25  ;;  %v3896_v22 = vld [vmem:[#allocation2 + $0x78] sm:$0xf]  ;;  %v3871_v4 = vld [vmem:[#allocation2 + $0x6c] sm:$0xe] }
 0x272   : > { %6217 = vmatmul.mubr.bf16.gmra.mrb[184].mxu0 %v4427_v27  ;;  %v4276_v12 = vrot.slane %v4274_v10, 1  ;;  %v4272_v35 = vshrl.u32 %v11553_v13, 16  ;;  %v4279_v11 = vshll.u32 %v11565_v30, 16  ;;  %v11574_v57 = vcombine.low %v3896_v22, %v3897_v32  ;;  %v11579_v24 = vld [vmem:[#allocation2 + $0x94] sm:$0xf] }
 0x273   : > { %6224 = vmatprep.mubr.bf16.mxu0 %v11542_v31  ;;  %v4270_v23 = vsel %vm510_vm1, %v4265_v33, %v4269_v40  ;;  %v4433_v37 = vsel %vm767_vm0, %v4431_v9, %v4432_v49  ;;  %v7452_v17 = vcombine.low %v3871_v4, %v11529_v26  ;;  %v4286_v58 = vshll.u32 %v11570_v42, 16  ;;  %v11582_v41 = vld [vmem:[#allocation2 + $0x8c] ss:$0 sps:$4 sm:$0x11]   ;;  %v3838_v45 = vld [vmem:[#allocation2 + $0x90] sm:$0xf] }
 0x274   : > { %6064 = vmatmul.mubr.bf16.gmra.mrb[156].mxu1 %v7418_v53  ;;  %v4430_v53 = vsel %vm767_vm0, %v4428_v20, %v4429_v48  ;;  %v4281_v39 = vrot.slane %v4279_v11, 1  ;;  %v4435_v61 = vrot.slane %v11548_v63, 1  ;;  %v11588_v26 = vcombine.low %v3838_v45, %v11579_v24  ;;  %v3899_v27 = vld [vmem:[#allocation2 + $0x88] sm:$0xf]  ;;  %v3872_v3 = vld [vmem:[#allocation2 + $0x78] sm:$0xe] }
 0x275   : > { %6071 = vmatprep.mubr.bf16.mxu1 %v4258_v50  ;;  %v4434_v1 = vrot.slane %v7452_v17, 1  ;;  %v4288_v54 = vrot.slane %v4286_v58, 1  ;;  %v4284_v19 = vshrl.u32 %v11570_v42, 16  ;;  %v4291_v51 = vshll.u32 %v11582_v41, 16  ;;  %v3898_v20 = vld [vmem:[#allocation2 + $0x84] sm:$0xf] }
 0x276   : > { %v7453_v63 = vcombine.low %v3872_v3, %v11545_v8  ;;  %v4298_v48 = vshll.u32 %v11588_v26, 16  ;;  %v11597_v15 = vld [vmem:[#allocation2 + $0x98] ss:$0 sps:$4 sm:$0x11]   ;;  %v11599_v34 = vld [vmem:[#allocation2 + $0xa0] sm:$0xf] }
 0x277   : > { %v4436_v18 = vsel %vm767_vm0, %v4434_v1, %v4435_v61  ;;  %v4289_v50 = vor.u32 %v4288_v54, %v4284_v19  ;;  %v4293_v56 = vrot.slane %v4291_v51, 1  ;;  %v11602_v21 = vld [vmem:[#allocation2 + $0x2c] ss:$0 sps:$4 sm:$0x11]   ;;  %v3840_v43 = vld [vmem:[#allocation2 + $0x9c] sm:$0xf] }
 0x278   : > { %v4437_v47 = vrot.slane %v7453_v63, 1  ;;  %v11604_v8 = vld [vmem:[#allocation2 + $0x28] sm:$0xf]  ;;  %v4438_v33 = vrot.slane %v11565_v30, 1  ;;  %v3900_v59 = vld [vmem:[#allocation2 + $0x90] sm:$0xf]  ;;  %v11610_v49 = vcombine.low %v3840_v43, %v11599_v34 }
 0x279   : > { %v3901_v10 = vld [vmem:[#allocation2 + $0x94] sm:$0xf]  ;;  %v4300_v40 = vrot.slane %v4298_v48, 1  ;;  %v3992_v5 = vld [vmem:[#allocation2 + $0x24] sm:$0xe]  ;;  %v4303_v9 = vshll.u32 %v11597_v15, 16 }
 0x27a   : > { %6225 = vmatmul.mubr.bf16.gmra.mrb[188].mxu0 %v4430_v53  ;;  %v4294_v53 = vsel %vm510_vm1, %v4289_v50, %v4293_v56  ;;  %v3873_v32 = vld [vmem:[#allocation2 + $0x84] sm:$0xe]  ;;  %v11616_v22 = vcombine.low %v3900_v59, %v3901_v10  ;;  %v4310_v4 = vshll.u32 %v11610_v49, 16  ;;  %v11623_v17 = vld [vmem:[#allocation2 + $0xa4] ss:$0 sps:$4 sm:$0x11]  }
 0x27b   : > { %6232 = vmatprep.mubr.bf16.mxu0 %v11557_v14  ;;  %v7454_v30 = vcombine.low %v3873_v32, %v11562_v25  ;;  %v11625_v58 = vld [vmem:[#allocation2 + $0xac] sm:$0xf]  ;;  %v4305_v61 = vrot.slane %v4303_v9, 1  ;;  %v3842_v1 = vld [vmem:[#allocation2 + $0xa8] sm:$0xf]  ;;  %v4441_v19 = vrot.slane %v11582_v41, 1 }
 0x27c   : > { %6072 = vmatmul.mubr.bf16.gmra.mrb[160].mxu1 %v7419_v46  ;;  %v4277_v46 = vor.u32 %v4276_v12, %v4272_v35  ;;  %v7540_v12 = vcombine.low %v3992_v5, %v11604_v8  ;;  %v4439_v35 = vsel %vm767_vm0, %v4437_v47, %v4438_v33  ;;  %v3903_v51 = vld [vmem:[#allocation2 + $0xa0] sm:$0xf]  ;;  %v4312_v3 = vrot.slane %v4310_v4, 1  ;;  %v3902_v63 = vld [vmem:[#allocation2 + $0x9c] sm:$0xf] }
 0x27d   : > { %6079 = vmatprep.mubr.bf16.mxu1 %v4270_v23  ;;  %v4296_v23 = vshrl.u32 %v11588_v26, 16  ;;  %v4315_v50 = vshll.u32 %v11623_v17, 16  ;;  %v11645_v48 = vcombine.low %v3902_v63, %v3903_v51  ;;  %v3874_v56 = vld [vmem:[#allocation2 + $0x90] sm:$0xe]  ;;  %v4444_v10 = vrot.slane %v11597_v15, 1 }
 0x27e   : > { %v4282_v36 = vsel %vm510_vm1, %v4277_v46, %v4281_v39  ;;  %v11621_v46 = vpop.f32.mrb[128].mxu1  ;;  %v7455_v43 = vcombine.low %v3874_v56, %v11579_v24  ;;  %v9209_v59 = vld [vmem:[#allocation2 + $0xb0] ss:$0 sps:$4 sm:$0x11]   ;;  %v3905_v9 = vld [vmem:[#allocation2 + $0xac] sm:$0xf] }
 0x27f   : > { %v4301_v11 = vor.u32 %v4300_v40, %v4296_v23  ;;  %v11627_v39 = vpop.f32.mrb[129].mxu1  ;;  %v4317_v33 = vrot.slane %v4315_v50, 1  ;;  %v3844_v40 = vld [vmem:[#allocation2 + $0xb4] sm:$0xf]  ;;  %v3876_v56 = vld [vmem:[#allocation2 + $0xa8] sm:$0xe] }
 0x280   : > { %v11633_v45 = vpop.f32.mrb[130].mxu1  ;;  %v4443_v23 = vrot.slane %v7455_v43, 1  ;;  %v3906_v50 = vld [vmem:[#allocation2 + $0xb4] sm:$0xf]  ;;  %v7457_v43 = vcombine.low %v3876_v56, %v11625_v58 }
 0x281   : > { %v11635_v54 = vpop.f32.mrb[131].mxu1 }
 0x282   : > { %6233 = vmatmul.mubr.bf16.gmra.mrb[192].mxu0 %v4433_v37  ;;  %v5338_v37 = vrot.slane %v7540_v12, 1  ;;  %v3904_v12 = vld [vmem:[#allocation2 + $0xa8] sm:$0xf]  ;;  %v4445_v15 = vsel %vm767_vm0, %v4443_v23, %v4444_v10 }
 0x283   : > { %6240 = vmatprep.mubr.bf16.mxu0 %v11574_v57 }
 0x284   : > { %6080 = vmatmul.mubr.bf16.gmra.mrb[164].mxu1 %v11536_v44  ;;  %v11594_v44 = vcombine.low %v3898_v20, %v3899_v27  ;;  %v4306_v27 = vsel %vm510_vm1, %v4301_v11, %v4305_v61  ;;  %v11641_v20 = vcombine.low %v3842_v1, %v11625_v58  ;;  %v3875_v11 = vld [vmem:[#allocation2 + $0x9c] sm:$0xe] }
 0x285   : > { %6087 = vmatprep.mubr.bf16.mxu1 %v4282_v36  ;;  %v4440_v36 = vrot.slane %v7454_v30, 1  ;;  %v4327_v30 = vshll.u32 %v9209_v59, 16 }
 0x286   : > { %v4322_v41 = vshll.u32 %v11641_v20, 16 }
 0x287   : > { %v4329_v61 = vrot.slane %v4327_v30, 1  ;;  %v3908_v30 = vld [vmem:[#allocation2 + $0xc0] sm:$0xf] }
 0x288   : > { %v4324_v32 = vrot.slane %v4322_v41, 1  ;;  %v3943_v41 = vld [vmem:[#allocation2 + $0x18] sm:$0xf] }
 0x28a   : > { %6241 = vmatmul.mubr.bf16.gmra.mrb[196].mxu0 %v4436_v18  ;;  %v4308_v18 = vshrl.u32 %v11610_v49, 16 }
 0x28b   : > { %6248 = vmatprep.mubr.bf16.mxu0 %v11594_v44 }
 0x28c   : > { %6088 = vmatmul.mubr.bf16.gmra.mrb[168].mxu1 %v11553_v13  ;;  %v5339_v13 = vrot.slane %v11602_v21, 1  ;;  %v4313_v47 = vor.u32 %v4312_v3, %v4308_v18  ;;  %v3907_v3 = vld [vmem:[#allocation2 + $0xb8] sm:$0xf]  ;;  %v3944_v18 = vld [vmem:[#allocation2 + $0x1c] sm:$0xf] }
 0x28d   : > { %6095 = vmatprep.mubr.bf16.mxu1 %v4294_v53  ;;  %v11650_v53 = vld [vmem:[#allocation2 + $0xb8] sm:$0xf] }
 0x28e   : > { %v11631_v25 = vsel %vm767_vm0, %v5338_v37, %v5339_v13  ;;  %v4318_v5 = vsel %vm510_vm1, %v4313_v47, %v4317_v33  ;;  %v11657_v24 = vcombine.low %v3844_v40, %v11650_v53  ;;  %v4320_v13 = vshrl.u32 %v11641_v20, 16  ;;  %v3926_v33 = vld [vmem:[#allocation2 + $0xc] sm:$0xe]  ;;  %v9227_v40 = vld [vmem:[#allocation2 + $0x14] ss:$0 sps:$4 sm:$0x11]  }
 0x28f   : > { %12468 = vst [vmem:[#allocation13_spill] sm:$0xff] %v11631_v25  ;;  %v11674_v47 = vcombine.low %v3906_v50, %v3907_v3  ;;  %v3927_v3 = vld [vmem:[#allocation2 + $0x18] sm:$0xe] }
 0x290   : > { %v4325_v4 = vor.u32 %v4324_v32, %v4320_v13  ;;  %v4334_v37 = vshll.u32 %v11657_v24, 16  ;;  %v4449_v32 = vrot.slane %v7457_v43, 1  ;;  %v3909_v13 = vld [vmem:[#allocation2 + $0xc4] sm:$0xf]  ;;  %v4623_v43 = vshll.u32 %v9227_v40, 16 }
 0x291   : > { %12470 = vst [vmem:[#allocation16_spill] sm:$0xff] %v11674_v47 }
 0x292   : > { %6249 = vmatmul.mubr.bf16.gmra.mrb[200].mxu0 %v4439_v35  ;;  %v11660_v35 = vcombine.low %v3904_v12, %v3905_v9  ;;  %v4330_v1 = vsel %vm510_vm1, %v4325_v4, %v4329_v61  ;;  %v4336_v51 = vrot.slane %v4334_v37, 1  ;;  %v4450_v12 = vrot.slane %v9209_v59, 1  ;;  %v3877_v4 = vld [vmem:[#allocation2 + $0xb4] sm:$0xe] }
 0x293   : > { %6256 = vmatprep.mubr.bf16.mxu0 %v11616_v22  ;;  %v7458_v61 = vcombine.low %v3877_v4, %v11650_v53  ;;  %v9242_v4 = vld [vmem:[%s12299_s2 + $0x208] sm:$0xff]  }
 0x294   : > { %6096 = vmatmul.mubr.bf16.gmra.mrb[172].mxu1 %v11570_v42  ;;  %v4442_v42 = vsel %vm767_vm0, %v4440_v36, %v4441_v19  ;;  %12469 = vst [vmem:[#allocation15_spill] sm:$0xff] %v11660_v35  ;;  %v11666_v36 = vld [vmem:[#allocation2 + $0xbc] ss:$0 sps:$4 sm:$0x11]   ;;  %v4447_v19 = vrot.slane %v11623_v17, 1  ;;  %v11677_v17 = vcombine.low %v3943_v41, %v3944_v18  ;;  %v4451_v37 = vsel %vm767_vm0, %v4449_v32, %v4450_v12 }
 0x295   : > { %6103 = vmatprep.mubr.bf16.mxu1 %v4306_v27  ;;  %v4339_v63 = vshll.u32 %v11666_v36, 16  ;;  %v9310_v18 = vld [vmem:[#allocation2 + $0x1c] sm:$0xf]  ;;  %v4452_v53 = vrot.slane %v7458_v61, 1  ;;  %v4453_v56 = vrot.slane %v11666_v36, 1  ;;  %v5099_v61 = vshll.u32 %v11602_v21, 16 }
 0x296   : > { %v5082_v58 = vshll.u32 %v11677_v17, 16  ;;  %v7492_v50 = vcombine.low %v3927_v3, %v9310_v18  ;;  %v3947_v36 = vld [vmem:[#allocation2 + $0x30] sm:$0xf]  ;;  %v4628_v3 = vshrl.u32 %v11254_v6, 16  ;;  %v4642_v18 = vshll.u32 %v11364_v29, 16 }
 0x297   : > { %v4341_v10 = vrot.slane %v4339_v63, 1 }
 0x298   : > { %v5084_v59 = vrot.slane %v5082_v58, 1  ;;  %v4874_v32 = vrot.slane %v7492_v50, 1  ;;  %v4625_v58 = vrot.slane %v4623_v43, 1  ;;  %v9312_v43 = vld [vmem:[#allocation2 + $0x34] sm:$0xf] }
 0x29a   : > { %6257 = vmatmul.mubr.bf16.gmra.mrb[204].mxu0 %v4442_v42 }
 0x29b   : > { %6264 = vmatprep.mubr.bf16.mxu0 %v11645_v48 }
 0x29c   : > { %6104 = vmatmul.mubr.bf16.gmra.mrb[176].mxu1 %v11588_v26  ;;  %v7456_v26 = vcombine.low %v3875_v11, %v11599_v34  ;;  %v4332_v34 = vshrl.u32 %v11657_v24, 16  ;;  %v4618_v11 = vshll.u32 %v11207_v0, 16 }
 0x29d   : > { %6111 = vmatprep.mubr.bf16.mxu1 %v4318_v5  ;;  %v9309_v5 = vld [vmem:[#allocation2 + $0x10] sm:$0xf] }
 0x29e   : > { %v4446_v27 = vrot.slane %v7456_v26, 1  ;;  %v7491_v23 = vcombine.low %v3926_v33, %v9309_v5  ;;  %v9231_v26 = vld [vmem:[#allocation2 + $0x20] ss:$0 sps:$4 sm:$0x11]   ;;  %v3948_v5 = vld [vmem:[#allocation2 + $0x34] sm:$0xf] }
 0x29f   : > { %v5087_v63 = vshll.u32 %v9231_v26, 16 }
 0x2a0   : > { %v4448_v42 = vsel %vm767_vm0, %v4446_v27, %v4447_v19  ;;  %v3945_v27 = vld [vmem:[#allocation2 + $0x24] sm:$0xf] }
 0x2a1   : > { %v11689_v19 = vcombine.low %v3945_v27, %v11604_v8  ;;  %v4616_v8 = vshrl.u32 %v11207_v0, 16  ;;  %v9311_v27 = vld [vmem:[#allocation2 + $0x28] sm:$0xf] }
 0x2a2   : > { %6265 = vmatmul.mubr.bf16.gmra.mrb[208].mxu0 %v4445_v15  ;;  %v11684_v15 = vcombine.low %v3908_v30, %v3909_v13  ;;  %v3928_v30 = vld [vmem:[#allocation2 + $0x24] sm:$0xe] }
 0x2a3   : > { %6272 = vmatprep.mubr.bf16.mxu0 %v11660_v35  ;;  %v5094_v33 = vshll.u32 %v11689_v19, 16  ;;  %v11869_v35 = vld [vmem:[#allocation2 + $0xc8] ss:$0 sps:$4 sm:$0x11]  }
 0x2a4   : > { %6112 = vmatmul.mubr.bf16.gmra.mrb[180].mxu1 %v11610_v49  ;;  %v4337_v49 = vor.u32 %v4336_v51, %v4332_v34  ;;  %12471 = vst [vmem:[#allocation18_spill] sm:$0xff] %v11684_v15  ;;  %v4620_v51 = vrot.slane %v4618_v11, 1  ;;  %v5080_v34 = vshrl.u32 %v11677_v17, 16 }
 0x2a5   : > { %6119 = vmatprep.mubr.bf16.mxu1 %v4330_v1  ;;  %v4872_v1 = vrot.slane %v9227_v40, 1  ;;  %v5096_v0 = vrot.slane %v5094_v33, 1  ;;  %v11701_v40 = vcombine.low %v3947_v36, %v3948_v5 }
 0x2a6   : > { %v4342_v9 = vsel %vm510_vm1, %v4337_v49, %v4341_v10  ;;  %v9235_v49 = vld [vmem:[#allocation2 + $0x20] ss:$0 sps:$4 sm:$0x11]   ;;  %v5085_v41 = vor.u32 %v5084_v59, %v5080_v34  ;;  %v4630_v10 = vshll.u32 %v11254_v6, 16  ;;  %v7493_v59 = vcombine.low %v3928_v30, %v9311_v27  ;;  %v9250_v6 = vld [vmem:[%s12299_s2 + $0x210] sm:$0xff]  }
 0x2a7   : > { %v4875_v12 = vrot.slane %v9235_v49, 1  ;;  %v4635_v34 = vshll.u32 %v9235_v49, 16  ;;  %v5106_v50 = vshll.u32 %v11701_v40, 16  ;;  %v5101_v49 = vrot.slane %v5099_v61, 1 }
 0x2a8   : > { %v4632_v11 = vrot.slane %v4630_v10, 1  ;;  %v11735_v10 = vld [vmem:[#allocation2 + $0x4c] sm:$0xf]  ;;  %v11746_v30 = vld [vmem:[#allocation2 + $0x44] ss:$0 sps:$4 sm:$0x11]  }
 0x2a9   : > { %v4637_v33 = vrot.slane %v4635_v34, 1 }
 0x2aa   : > { %6273 = vmatmul.mubr.bf16.gmra.mrb[212].mxu0 %v4448_v42 }
 0x2ab   : > { %6280 = vmatprep.mubr.bf16.mxu0 %v11674_v47 }
 0x2ac   : > { %6120 = vmatmul.mubr.bf16.gmra.mrb[184].mxu1 %v11641_v20  ;;  %v4871_v20 = vrot.slane %v7491_v23, 1  ;;  %v5089_v23 = vrot.slane %v5087_v63, 1  ;;  %v11717_v63 = vld [vmem:[#allocation2 + $0x40] sm:$0xf] }
 0x2ad   : > { %6127 = vmatprep.mubr.bf16.mxu1 %v4342_v9  ;;  %v4621_v9 = vor.u32 %v4620_v51, %v4616_v8  ;;  %v4876_v51 = vsel %vm767_vm0, %v4874_v32, %v4875_v12  ;;  %v11729_v8 = vld [vmem:[#allocation2 + $0x38] ss:$0 sps:$4 sm:$0x11]   ;;  %v5104_v12 = vshrl.u32 %v11701_v40, 16 }
 0x2ae   : > { %v4873_v42 = vsel %vm767_vm0, %v4871_v20, %v4872_v1  ;;  %v5090_v13 = vsel %vm510_vm1, %v5085_v41, %v5089_v23  ;;  %v11709_v20 = vld [vmem:[#allocation2 + $0x2c] ss:$0 sps:$4 sm:$0x11]   ;;  %v11713_v1 = vadd.f32 %v11627_v39, %v11621_v46  ;;  %v11724_v46 = vadd.f32 %v11635_v54, %v11633_v45 }
 0x2af   : > { %v4626_v26 = vsel %vm510_vm1, %v4621_v9, %v4625_v58  ;;  %v4633_v39 = vor.u32 %v4632_v11, %v4628_v3  ;;  %v4877_v45 = vrot.slane %v7493_v59, 1  ;;  %v4878_v54 = vrot.slane %v11709_v20, 1  ;;  %v9258_v58 = vld [vmem:[%s12299_s2 + $0x218] sm:$0xff]  }
 0x2b0   : > { %v5108_v23 = vrot.slane %v5106_v50, 1  ;;  %v4644_v9 = vrot.slane %v4642_v18, 1  ;;  %v4881_v59 = vrot.slane %v11729_v8, 1  ;;  %v11761_v18 = vld [vmem:[#allocation2 + $0x44] ss:$0 sps:$4 sm:$0x11]  }
 0x2b1   : > { %v4638_v32 = vsel %vm510_vm1, %v4633_v39, %v4637_v33  ;;  %v4879_v61 = vsel %vm767_vm0, %v4877_v45, %v4878_v54 }
 0x2b2   : > { %6281 = vmatmul.mubr.bf16.gmra.mrb[216].mxu0 %v4451_v37  ;;  %v5092_v37 = vshrl.u32 %v11689_v19, 16  ;;  %v5109_v3 = vor.u32 %v5108_v23, %v5104_v12  ;;  %v3953_v12 = vld [vmem:[#allocation2 + $0x54] sm:$0xf] }
 0x2b3   : > { %6288 = vmatprep.mubr.bf16.mxu0 %v11684_v15  ;;  %v3999_v15 = vld [vmem:[#allocation2 + $0x78] sm:$0xe] }
 0x2b4   : > { %6128 = vmatmul.mubr.bf16.gmra.mrb[188].mxu1 %v11657_v24  ;;  %v4454_v24 = vsel %vm767_vm0, %v4452_v53, %v4453_v56  ;;  %v5097_v21 = vor.u32 %v5096_v0, %v5092_v37  ;;  %v9241_v53 = vld [vmem:[#allocation2 + $0x38] ss:$0 sps:$4 sm:$0x11]   ;;  %v3949_v56 = vld [vmem:[#allocation2 + $0x3c] sm:$0xf]  ;;  %v4647_v0 = vshll.u32 %v11709_v20, 16 }
 0x2b5   : > { %6329 = vmatprep.mubr.bf16.mxu1 %v4873_v42  ;;  %v3929_v42 = vld [vmem:[#allocation2 + $0x30] sm:$0xe]  ;;  %v5111_v36 = vshll.u32 %v9241_v53, 16  ;;  %v11753_v37 = vld [vmem:[#allocation2 + $0x48] sm:$0xe] }
 0x2b6   : > { %v7494_v41 = vcombine.low %v3929_v42, %v9312_v43  ;;  %v5102_v5 = vsel %vm510_vm1, %v5097_v21, %v5101_v49  ;;  %v7496_v50 = vcombine.low %v11753_v37, %v11476_v62  ;;  %v4649_v42 = vrot.slane %v4647_v0, 1  ;;  %v3994_v49 = vld [vmem:[#allocation2 + $0x3c] sm:$0xe] }
 0x2b7   : > { %v5113_v53 = vrot.slane %v5111_v36, 1  ;;  %v7542_v45 = vcombine.low %v3994_v49, %v11717_v63  ;;  %v3954_v36 = vld [vmem:[#allocation2 + $0x58] sm:$0xf] }
 0x2b8   : > { %v4880_v27 = vrot.slane %v7494_v41, 1 }
 0x2b9   : > { %v5114_v23 = vsel %vm510_vm1, %v5109_v3, %v5113_v53  ;;  %v3998_v3 = vld [vmem:[#allocation2 + $0x6c] sm:$0xe]  ;;  %v5344_v53 = vrot.slane %v7542_v45, 1 }
 0x2ba   : > { %6289 = vmatmul.mubr.bf16.gmra.mrb[220].mxu0 %v4454_v24  ;;  %v3930_v24 = vld [vmem:[#allocation2 + $0x3c] sm:$0xe]  ;;  %v4882_v62 = vsel %vm767_vm0, %v4880_v27, %v4881_v59  ;;  %v11791_v27 = vld [vmem:[#allocation2 + $0x5c] ss:$0 sps:$4 sm:$0x11]   ;;  %v4664_v59 = vshrl.u32 %v11443_v55, 16 }
 0x2bb   : > { %6490 = vmatprep.mubr.bf16.mxu0 %v5090_v13  ;;  %v3951_v13 = vld [vmem:[#allocation2 + $0x48] sm:$0xf]  ;;  %v7495_v20 = vcombine.low %v3930_v24, %v11439_v52  ;;  %v9266_v52 = vld [vmem:[%s12299_s2 + $0x220] sm:$0xff]   ;;  %v5345_v24 = vrot.slane %v11746_v30, 1 }
 0x2bc   : > { %6330 = vmatmul.mubr.bf16.vlgmr.msra.gmra.mrb[192].mxu1 %v4626_v26  ;;  %v4654_v26 = vshll.u32 %v11403_v16, 16 }
 0x2bd   : > { %6337 = vmatprep.mubr.bf16.mxu1 %v4876_v51  ;;  %8814 = vmatpush3.bf16.msra.mxu1 %v11408_v60  ;;  %v11732_v60 = vcombine.low %v3949_v56, %v11717_v63  ;;  %v11759_v51 = vld [vmem:[#allocation2 + $0x54] sm:$0xe]  ;;  %v11768_v56 = vld [vmem:[#allocation2 + $0x50] ss:$0 sps:$4 sm:$0x11]   ;;  %v4883_v63 = vrot.slane %v7495_v20, 1  ;;  %v11797_v20 = vcombine.low %v3953_v12, %v3954_v36 }
 0x2be   : > { %8815 = vmatprep.subr.bf16.mxu1 %v9242_v4  ;;  %v4656_v54 = vrot.slane %v4654_v26, 1  ;;  %v11813_v12 = vld [vmem:[#allocation2 + $0xa0] sm:$0xf] }
 0x2bf   : > { %v5118_v11 = vshll.u32 %v11732_v60, 16  ;;  %v5116_v33 = vshrl.u32 %v11732_v60, 16 }
 0x2c1   : > { %8816 = vmatpush3.bf16.msra.mxu1 %v9242_v4  ;;  %v11750_v4 = vcombine.low %v3951_v13, %v11735_v10  ;;  %v5120_v43 = vrot.slane %v5118_v11, 1  ;;  %v4652_v13 = vshrl.u32 %v11403_v16, 16  ;;  %v3996_v11 = vld [vmem:[#allocation2 + $0x54] sm:$0xe] }
 0x2c2   : > { %6491 = vmatmul.mubr.bf16.vlgmr.msra.gmra.mrb[224].mxu0 %v11677_v17  ;;  %8817 = vmatprep.subr.bf16.mxu1 %v9250_v6  ;;  %v4640_v17 = vshrl.u32 %v11364_v29, 16  ;;  %v4666_v29 = vshll.u32 %v11443_v55, 16 }
 0x2c3   : > { %6498 = vmatprep.mubr.bf16.mxu0 %v5102_v5  ;;  %v5130_v41 = vshll.u32 %v11750_v4, 16  ;;  %v11778_v5 = vld [vmem:[#allocation2 + $0x50] ss:$0 sps:$4 sm:$0x11]   ;;  %v5121_v26 = vor.u32 %v5120_v43, %v5116_v33  ;;  %v4657_v16 = vor.u32 %v4656_v54, %v4652_v13  ;;  %v5128_v49 = vshrl.u32 %v11750_v4, 16 }
 0x2c4   : > { %6338 = vmatmul.mubr.bf16.gmra.mrb[196].mxu1 %v4638_v32  ;;  %v4645_v34 = vor.u32 %v4644_v9, %v4640_v17  ;;  %v4659_v32 = vshll.u32 %v11729_v8, 16  ;;  %v4884_v17 = vrot.slane %v11761_v18, 1  ;;  %v4668_v0 = vrot.slane %v4666_v29, 1 }
 0x2c5   : > { %6345 = vmatprep.mubr.bf16.mxu1 %v4879_v61  ;;  %8818 = vmatpush3.bf16.msra.mxu1 %v9250_v6  ;;  %v5123_v6 = vshll.u32 %v11746_v30, 16  ;;  %v5132_v61 = vrot.slane %v5130_v41, 1  ;;  %v5135_v8 = vshll.u32 %v11768_v56, 16  ;;  %v4671_v29 = vshll.u32 %v11761_v18, 16  ;;  %v4000_v41 = vld [vmem:[#allocation2 + $0x84] sm:$0xe] }
 0x2c6   : > { %8819 = vmatprep.subr.bf16.mxu1 %v9258_v58  ;;  %v4650_v9 = vsel %vm510_vm1, %v4645_v34, %v4649_v42  ;;  %v11799_v34 = vld [vmem:[#allocation2 + $0x88] sm:$0xf]  ;;  %v4661_v42 = vrot.slane %v4659_v32, 1  ;;  %v7544_v43 = vcombine.low %v3996_v11, %v3954_v36  ;;  %v4885_v33 = vsel %vm767_vm0, %v4883_v63, %v4884_v17  ;;  %v11815_v36 = vld [vmem:[#allocation2 + $0xa4] ss:$0 sps:$4 sm:$0x11]  }
 0x2c7   : > { %v5125_v37 = vrot.slane %v5123_v6, 1  ;;  %v11802_v6 = vld [vmem:[#allocation2 + $0x74] ss:$0 sps:$4 sm:$0x11]   ;;  %v4669_v55 = vor.u32 %v4668_v0, %v4664_v59  ;;  %v4886_v54 = vrot.slane %v7496_v50, 1  ;;  %v4887_v18 = vrot.slane %v11778_v5, 1 }
 0x2c8   : > { %v5137_v32 = vrot.slane %v5135_v8, 1  ;;  %v4662_v50 = vsel %vm510_vm1, %v4657_v16, %v4661_v42  ;;  %v4673_v13 = vrot.slane %v4671_v29, 1  ;;  %v5142_v63 = vshll.u32 %v11797_v20, 16  ;;  %v11819_v17 = vld [vmem:[#allocation2 + $0x68] ss:$0 sps:$4 sm:$0x11]  }
 0x2c9   : > { %8820 = vmatpush3.bf16.msra.mxu1 %v9258_v58  ;;  %v11793_v58 = vld [vmem:[#allocation2 + $0x70] sm:$0xf]  ;;  %v5126_v45 = vsel %vm510_vm1, %v5121_v26, %v5125_v37  ;;  %v7548_v0 = vcombine.low %v4000_v41, %v11799_v34  ;;  %v11822_v11 = vld [vmem:[#allocation2 + $0xb8] sm:$0xf]  ;;  %v5351_v8 = vrot.slane %v11791_v27, 1  ;;  %v5369_v21 = vrot.slane %v11815_v36, 1 }
 0x2ca   : > { %6499 = vmatmul.mubr.bf16.gmra.mrb[228].mxu0 %v11689_v19  ;;  %8821 = vmatprep.subr.bf16.mxu1 %v9266_v52  ;;  %v9274_v19 = vld [vmem:[%s12299_s2 + $0x228] sm:$0xff]   ;;  %v3956_v59 = vld [vmem:[#allocation2 + $0x64] sm:$0xf]  ;;  %v4002_v16 = vld [vmem:[#allocation2 + $0x9c] sm:$0xe]  ;;  %v11829_v29 = vsel %vm510_vm1, %v4669_v55, %v4673_v13  ;;  %v5357_v55 = vrot.slane %v11802_v6, 1 }
 0x2cb   : > { %6506 = vmatprep.mubr.bf16.mxu0 %v5114_v23  ;;  %v11806_v23 = vld [vmem:[#allocation2 + $0x8c] ss:$0 sps:$4 sm:$0x11]   ;;  %v11834_v42 = vld [vmem:[#allocation2 + $0x7c] sm:$0xf] }
 0x2cc   : > { %6346 = vmatmul.mubr.bf16.gmra.mrb[200].mxu1 %v4650_v9  ;;  %v5133_v9 = vor.u32 %v5132_v61, %v5128_v49  ;;  %v5350_v61 = vrot.slane %v7544_v43, 1  ;;  %v4004_v49 = vld [vmem:[#allocation2 + $0xb4] sm:$0xe]  ;;  %v11837_v41 = vld [vmem:[#allocation2 + $0xbc] ss:$0 sps:$4 sm:$0x11]  }
 0x2cd   : > { %6353 = vmatprep.mubr.bf16.mxu1 %v4882_v62  ;;  %8822 = vmatpush3.bf16.msra.mxu1 %v9266_v52  ;;  %v9282_v62 = vld [vmem:[%s12299_s2 + $0x230] sm:$0xff]   ;;  %v7546_v52 = vcombine.low %v3998_v3, %v11793_v58  ;;  %v11832_v3 = vsel %vm767_vm0, %v4886_v54, %v4887_v18  ;;  %v11844_v13 = vld [vmem:[#allocation2 + $0x80] ss:$0 sps:$4 sm:$0x11]   ;;  %v7552_v54 = vcombine.low %v4004_v49, %v11822_v11  ;;  %v5144_v18 = vrot.slane %v5142_v63, 1 }
 0x2ce   : > { %8823 = vmatprep.subr.bf16.mxu1 %v9274_v19  ;;  %v5138_v43 = vsel %vm510_vm1, %v5133_v9, %v5137_v32  ;;  %v5363_v39 = vrot.slane %v11806_v23, 1  ;;  %v11848_v37 = vld [vmem:[#allocation2 + $0x94] sm:$0xf]  ;;  %v11850_v26 = vld [vmem:[#allocation2 + $0x98] ss:$0 sps:$4 sm:$0x11]   ;;  %v11855_v9 = vsel %vm767_vm0, %v5344_v53, %v5345_v24  ;;  %v11865_v25 = vsel %vm767_vm0, %v5350_v61, %v5351_v8 }
 0x2cf   : > { %12472 = vst [vmem:[#allocation19_spill] sm:$0xff] %v11855_v9  ;;  %v3995_v32 = vld [vmem:[#allocation2 + $0x48] sm:$0xe]  ;;  %v11858_v49 = vld [vmem:[#allocation2 + $0xac] sm:$0xf]  ;;  %12473 = vst [vmem:[#allocation21_spill] sm:$0xff] %v11865_v25 }
 0x2d0   : > { %v7543_v63 = vcombine.low %v3995_v32, %v11735_v10  ;;  %v3997_v30 = vld [vmem:[#allocation2 + $0x60] sm:$0xe]  ;;  %v5375_v53 = vrot.slane %v11837_v41, 1  ;;  %v5354_v9 = vrot.slane %v11819_v17, 1  ;;  %v5374_v47 = vrot.slane %v7552_v54, 1 }
 0x2d1   : > { %8824 = vmatpush3.bf16.msra.mxu1 %v9274_v19  ;;  %v9290_v19 = vld [vmem:[%s12299_s2 + $0x238] sm:$0xff]   ;;  %v12474_v61 = vshll.u32 %v11483_v2, 16  ;;  %v4001_v25 = vld [vmem:[#allocation2 + $0x90] sm:$0xe]  ;;  %v11881_v54 = vld [vmem:[#allocation2 + $0xc4] sm:$0xf] }
 0x2d2   : > { %6507 = vmatmul.mubr.bf16.gmra.mrb[232].mxu0 %v11701_v40  ;;  %v7550_v40 = vcombine.low %v4002_v16, %v11813_v12  ;;  %8825 = vmatprep.subr.bf16.mxu1 %v9282_v62  ;;  %v5362_v16 = vrot.slane %v7548_v0, 1  ;;  %v5348_v0 = vrot.slane %v11768_v56, 1  ;;  %v7547_v56 = vcombine.low %v3999_v15, %v11834_v42 }
 0x2d3   : > { %6514 = vmatprep.mubr.bf16.mxu0 %v5126_v45  ;;  %v5356_v45 = vrot.slane %v7546_v52, 1  ;;  %v3955_v52 = vld [vmem:[#allocation2 + $0x60] sm:$0xf]  ;;  %v4680_v8 = vrot.slane %v12474_v61, 1  ;;  %v12475_v61 = vshrl.u32 %v11797_v20, 16 }
 0x2d4   : > { %6354 = vmatmul.mubr.bf16.gmra.mrb[204].mxu1 %v4662_v50  ;;  %v11860_v50 = vld [vmem:[#allocation2 + $0xb0] ss:$0 sps:$4 sm:$0x11]   ;;  %v5368_v24 = vrot.slane %v7550_v40, 1  ;;  %v11877_v40 = vcombine.low %v3955_v52, %v3956_v59  ;;  %v11887_v15 = vsel %vm767_vm0, %v5362_v16, %v5363_v39  ;;  %v4676_v16 = vshrl.u32 %v11483_v2, 16 }
 0x2d5   : > { %6361 = vmatprep.mubr.bf16.mxu1 %v4885_v33  ;;  %8826 = vmatpush3.bf16.msra.mxu1 %v9282_v62  ;;  %v7545_v33 = vcombine.low %v3997_v30, %v3956_v59  ;;  %v5347_v62 = vrot.slane %v7543_v63, 1  ;;  %v11872_v10 = vsel %vm767_vm0, %v5356_v45, %v5357_v55  ;;  %v5360_v30 = vrot.slane %v11844_v13, 1  ;;  %v4003_v59 = vld [vmem:[#allocation2 + $0xa8] sm:$0xe] }
 0x2d6   : > { %8827 = vmatprep.subr.bf16.mxu1 %v9290_v19  ;;  %v5359_v45 = vrot.slane %v7547_v56, 1  ;;  %v7549_v55 = vcombine.low %v4001_v25, %v11848_v37  ;;  %v5372_v39 = vrot.slane %v11860_v50, 1  ;;  %v11903_v25 = vsel %vm767_vm0, %v5374_v47, %v5375_v53 }
 0x2d7   : > { %v5353_v32 = vrot.slane %v7545_v33, 1  ;;  %v11884_v63 = vsel %vm767_vm0, %v5347_v62, %v5348_v0  ;;  %v5366_v33 = vrot.slane %v11850_v26, 1  ;;  %v5154_v47 = vshll.u32 %v11877_v40, 16 }
 0x2d8   : > { %v11899_v0 = vsel %vm767_vm0, %v5359_v45, %v5360_v30  ;;  %v5365_v62 = vrot.slane %v7549_v55, 1  ;;  %v4683_v30 = vshll.u32 %v11778_v5, 16  ;;  %v4690_v45 = vshll.u32 %v11519_v38, 16 }
 0x2d9   : > { %8828 = vmatpush3.bf16.msra.mxu1 %v9290_v19  ;;  %v11891_v52 = vsel %vm767_vm0, %v5353_v32, %v5354_v9  ;;  %v7551_v19 = vcombine.low %v4003_v59, %v11858_v49  ;;  %v9255_v9 = vld [vmem:[#allocation2 + $0x5c] ss:$0 sps:$4 sm:$0x11]   ;;  %v5145_v32 = vor.u32 %v5144_v18, %v12475_v61  ;;  %v12476_v55 = vshll.u32 %v11791_v27, 16  ;;  %v3933_v27 = vld [vmem:[#allocation2 + $0x60] sm:$0xe] }
 0x2da   : > { %6515 = vmatmul.mubr.bf16.gmra.mrb[236].mxu0 %v11732_v60  ;;  %v11895_v60 = vsel %vm767_vm0, %v5368_v24, %v5369_v21  ;;  %v5378_v24 = vrot.slane %v11869_v35, 1  ;;  %v11915_v53 = vsel %vm767_vm0, %v5365_v62, %v5366_v33  ;;  %v12477_v18 = vcombine.low %v11759_v51, %v11497_v28 }
 0x2db   : > { %6522 = vmatprep.mubr.bf16.mxu0 %v5138_v43  ;;  %v4005_v43 = vld [vmem:[#allocation2 + $0xc0] sm:$0xe]  ;;  %v5371_v56 = vrot.slane %v7551_v19, 1  ;;  %v5149_v59 = vrot.slane %v12476_v55, 1  ;;  %v4890_v5 = vrot.slane %v9255_v9, 1  ;;  %v4685_v62 = vrot.slane %v4683_v30, 1 }
 0x2dc   : > { %6362 = vmatmul.mubr.bf16.gmra.mrb[208].mxu1 %v11829_v29  ;;  %v7553_v21 = vcombine.low %v4005_v43, %v11881_v54  ;;  %v4889_v19 = vrot.slane %v12477_v18, 1  ;;  %v3957_v43 = vld [vmem:[#allocation2 + $0x6c] sm:$0xf]  ;;  %v5152_v28 = vshrl.u32 %v11877_v40, 16  ;;  %v5159_v51 = vshll.u32 %v11819_v17, 16 }
 0x2dd   : > { %6369 = vmatprep.mubr.bf16.mxu1 %v11832_v3  ;;  %v11918_v2 = vsel %vm767_vm0, %v5371_v56, %v5372_v39  ;;  %v4681_v3 = vor.u32 %v4680_v8, %v4676_v16  ;;  %v5150_v33 = vsel %vm510_vm1, %v5145_v32, %v5149_v59  ;;  %v5156_v39 = vrot.slane %v5154_v47, 1 }
 0x2de   : > { %v5377_v29 = vrot.slane %v7553_v21, 1  ;;  %v11932_v56 = vcombine.low %v3957_v43, %v11793_v58  ;;  %v4692_v16 = vrot.slane %v4690_v45, 1  ;;  %v7498_v21 = vcombine.low %v3933_v27, %v11533_v7  ;;  %v3959_v45 = vld [vmem:[#allocation2 + $0x78] sm:$0xf] }
 0x2df   : > { %v4686_v8 = vsel %vm510_vm1, %v4681_v3, %v4685_v62  ;;  %v5157_v32 = vor.u32 %v5156_v39, %v5152_v28  ;;  %v4688_v58 = vshrl.u32 %v11519_v38, 16  ;;  %v4695_v30 = vshll.u32 %v9255_v9, 16  ;;  %v3934_v38 = vld [vmem:[#allocation2 + $0x6c] sm:$0xe]  ;;  %v9313_v39 = vld [vmem:[#allocation2 + $0x70] sm:$0xf] }
 0x2e0   : > { %v11927_v61 = vsel %vm767_vm0, %v5377_v29, %v5378_v24  ;;  %v9259_v24 = vld [vmem:[#allocation2 + $0x68] ss:$0 sps:$4 sm:$0x11]   ;;  %v5166_v47 = vshll.u32 %v11932_v56, 16  ;;  %v4702_v29 = vshll.u32 %v11542_v31, 16  ;;  %v5161_v55 = vrot.slane %v5159_v51, 1 }
 0x2e1   : > { %v4693_v59 = vor.u32 %v4692_v16, %v4688_v58  ;;  %v4892_v3 = vrot.slane %v7498_v21, 1  ;;  %v4893_v17 = vrot.slane %v9259_v24, 1  ;;  %v4697_v18 = vrot.slane %v4695_v30, 1  ;;  %v4006_v58 = vld [vmem:[#allocation2 + $0xcc] sm:$0xe] }
 0x2e2   : > { %6523 = vmatmul.mubr.bf16.gmra.mrb[240].mxu0 %v11750_v4  ;;  %v4891_v4 = vsel %vm767_vm0, %v4889_v19, %v4890_v5  ;;  %v5162_v7 = vsel %vm510_vm1, %v5157_v32, %v5161_v55  ;;  %v5168_v19 = vrot.slane %v5166_v47, 1  ;;  %v11945_v5 = vcombine.low %v3959_v45, %v11834_v42  ;;  %v3961_v47 = vld [vmem:[#allocation2 + $0x84] sm:$0xf] }
 0x2e3   : > { %6530 = vmatprep.mubr.bf16.mxu0 %v5150_v33  ;;  %v4698_v9 = vsel %vm510_vm1, %v4693_v59, %v4697_v18  ;;  %v5164_v43 = vshrl.u32 %v11932_v56, 16  ;;  %v5171_v33 = vshll.u32 %v11802_v6, 16  ;;  %v4704_v62 = vrot.slane %v4702_v29, 1 }
 0x2e4   : > { %6370 = vmatmul.mubr.bf16.gmra.mrb[212].mxu1 %v4686_v8  ;;  %v7499_v27 = vcombine.low %v3934_v38, %v9313_v39  ;;  %v9263_v8 = vld [vmem:[#allocation2 + $0x74] ss:$0 sps:$4 sm:$0x11]   ;;  %v4700_v42 = vshrl.u32 %v11542_v31, 16  ;;  %v4707_v51 = vshll.u32 %v9259_v24, 16  ;;  %v5178_v16 = vshll.u32 %v11945_v5, 16 }
 0x2e5   : > { %6377 = vmatprep.mubr.bf16.mxu1 %v4891_v4  ;;  %v5169_v28 = vor.u32 %v5168_v19, %v5164_v43  ;;  %v4714_v21 = vshll.u32 %v11557_v14, 16  ;;  %v5173_v4 = vrot.slane %v5171_v33, 1  ;;  %v4896_v30 = vrot.slane %v9263_v8, 1  ;;  %v11959_v31 = vld [vmem:[#allocation2 + $0xd0] sm:$0xf] }
 0x2e6   : > { %v4705_v32 = vor.u32 %v4704_v62, %v4700_v42  ;;  %v4895_v6 = vrot.slane %v7499_v27, 1  ;;  %v4709_v55 = vrot.slane %v4707_v51, 1  ;;  %v5180_v59 = vrot.slane %v5178_v16, 1  ;;  %v3935_v24 = vld [vmem:[#allocation2 + $0x78] sm:$0xe] }
 0x2e7   : > { %v5174_v29 = vsel %vm510_vm1, %v5169_v28, %v5173_v4  ;;  %v7554_v45 = vcombine.low %v4006_v58, %v11959_v31  ;;  %v5176_v18 = vshrl.u32 %v11945_v5, 16  ;;  %v9267_v19 = vld [vmem:[#allocation2 + $0x80] ss:$0 sps:$4 sm:$0x11]   ;;  %v9314_v38 = vld [vmem:[#allocation2 + $0x7c] sm:$0xf] }
 0x2e8   : > { %v4712_v43 = vshrl.u32 %v11557_v14, 16  ;;  %v4719_v33 = vshll.u32 %v9263_v8, 16  ;;  %v11967_v62 = vld [vmem:[#allocation2 + $0xd4] ss:$0 sps:$4 sm:$0x11]  }
 0x2e9   : > { %v5181_v39 = vor.u32 %v5180_v59, %v5176_v18  ;;  %v5380_v28 = vrot.slane %v7554_v45, 1  ;;  %v5381_v42 = vrot.slane %v11967_v62, 1  ;;  %v3963_v58 = vld [vmem:[#allocation2 + $0x90] sm:$0xf]  ;;  %v5195_v59 = vshll.u32 %v11806_v23, 16 }
 0x2ea   : > { %6531 = vmatmul.mubr.bf16.gmra.mrb[244].mxu0 %v11797_v20  ;;  %v4894_v20 = vsel %vm767_vm0, %v4892_v3, %v4893_v17  ;;  %v11957_v3 = vcombine.low %v3961_v47, %v11799_v34  ;;  %v4716_v17 = vrot.slane %v4714_v21, 1  ;;  %v4897_v34 = vsel %vm767_vm0, %v4895_v6, %v4896_v30  ;;  %v3936_v45 = vld [vmem:[#allocation2 + $0x84] sm:$0xe]  ;;  %v9271_v23 = vld [vmem:[#allocation2 + $0x8c] ss:$0 sps:$4 sm:$0x11]  }
 0x2eb   : > { %6538 = vmatprep.mubr.bf16.mxu0 %v5162_v7  ;;  %v4710_v7 = vsel %vm510_vm1, %v4705_v32, %v4709_v55  ;;  %v4721_v21 = vrot.slane %v4719_v33, 1  ;;  %v4899_v32 = vrot.slane %v9267_v19, 1  ;;  %v11975_v30 = vcombine.low %v3963_v58, %v11848_v37 }
 0x2ec   : > { %6378 = vmatmul.mubr.bf16.gmra.mrb[216].mxu1 %v4698_v9  ;;  %v7500_v9 = vcombine.low %v3935_v24, %v9314_v38  ;;  %v5190_v27 = vshll.u32 %v11957_v3, 16  ;;  %v4731_v33 = vshll.u32 %v9267_v19, 16  ;;  %v5207_v58 = vshll.u32 %v11850_v26, 16 }
 0x2ed   : > { %6385 = vmatprep.mubr.bf16.mxu1 %v4894_v20  ;;  %v4717_v20 = vor.u32 %v4716_v17, %v4712_v43  ;;  %v11980_v17 = vsel %vm767_vm0, %v5380_v28, %v5381_v42 }
 0x2ee   : > { %v4898_v4 = vrot.slane %v7500_v9, 1  ;;  %v5192_v6 = vrot.slane %v5190_v27, 1 }
 0x2ef   : > { %v4722_v55 = vsel %vm510_vm1, %v4717_v20, %v4721_v21  ;;  %v5197_v20 = vrot.slane %v5195_v59, 1 }
 0x2f0   : > { %v4900_v9 = vsel %vm767_vm0, %v4898_v4, %v4899_v32  ;;  %v3937_v4 = vld [vmem:[#allocation2 + $0x90] sm:$0xe]  ;;  %v5200_v32 = vshrl.u32 %v11975_v30, 16 }
 0x2f2   : > { %6539 = vmatmul.mubr.bf16.gmra.mrb[248].mxu0 %v11877_v40  ;;  %v5183_v40 = vshll.u32 %v11844_v13, 16  ;;  %v4726_v13 = vshll.u32 %v11574_v57, 16 }
 0x2f3   : > { %6546 = vmatprep.mubr.bf16.mxu0 %v5174_v29 }
 0x2f4   : > { %6386 = vmatmul.mubr.bf16.gmra.mrb[220].mxu1 %v4710_v7  ;;  %v5185_v51 = vrot.slane %v5183_v40, 1  ;;  %v4728_v7 = vrot.slane %v4726_v13, 1  ;;  %v9315_v40 = vld [vmem:[#allocation2 + $0x88] sm:$0xf]  ;;  %v4902_v13 = vrot.slane %v9271_v23, 1 }
 0x2f5   : > { %6393 = vmatprep.mubr.bf16.mxu1 %v4897_v34  ;;  %v7501_v38 = vcombine.low %v3936_v45, %v9315_v40  ;;  %v4724_v34 = vshrl.u32 %v11574_v57, 16  ;;  %v5209_v45 = vrot.slane %v5207_v58, 1 }
 0x2f6   : > { %v5186_v8 = vsel %vm510_vm1, %v5181_v39, %v5185_v51  ;;  %v5202_v39 = vshll.u32 %v11975_v30, 16  ;;  %v3965_v51 = vld [vmem:[#allocation2 + $0x9c] sm:$0xf] }
 0x2f7   : > { %v4729_v28 = vor.u32 %v4728_v7, %v4724_v34  ;;  %v4901_v42 = vrot.slane %v7501_v38, 1  ;;  %v11996_v19 = vcombine.low %v3965_v51, %v11813_v12  ;;  %v4736_v12 = vshrl.u32 %v11594_v44, 16 }
 0x2f8   : > { %v8421_v16 = vpop.f32.mrb[160].mxu0  ;;  %v5204_v21 = vrot.slane %v5202_v39, 1 }
 0x2f9   : > { %v8422_v14 = vpop.f32.mrb[161].mxu0  ;;  %v5214_v59 = vshll.u32 %v11996_v19, 16 }
 0x2fa   : > { %6547 = vmatmul.mubr.bf16.gmra.mrb[252].mxu0 %v11932_v56  ;;  %v8423_v47 = vadd.f32 %v8422_v14, %v8421_v16  ;;  %v8424_v29 = vpop.f32.mrb[162].mxu0  ;;  %v5188_v56 = vshrl.u32 %v11957_v3, 16  ;;  %v4733_v16 = vrot.slane %v4731_v33, 1  ;;  %v5219_v33 = vshll.u32 %v11815_v36, 16 }
 0x2fb   : > { %6554 = vmatprep.mubr.bf16.mxu0 %v5186_v8  ;;  %v8425_v24 = vpop.f32.mrb[163].mxu0  ;;  %v9316_v8 = vld [vmem:[#allocation2 + $0x94] sm:$0xf]  ;;  %v4762_v36 = vshll.u32 %v11645_v48, 16 }
 0x2fc   : > { %v11984_v18 = vadd.f32 %v8423_v47, %v11713_v1  ;;  %v8426_v37 = vadd.f32 %v8425_v24, %v8424_v29  ;;  %6394 = vmatmul.mubr.bf16.gmra.mrb[224].mxu1 %v4722_v55  ;;  %v5193_v43 = vor.u32 %v5192_v6, %v5188_v56  ;;  %v4738_v1 = vshll.u32 %v11594_v44, 16  ;;  %v9275_v47 = vld [vmem:[#allocation2 + $0x98] ss:$0 sps:$4 sm:$0x11]   ;;  %v3938_v44 = vld [vmem:[#allocation2 + $0x9c] sm:$0xe] }
 0x2fd   : > { %6401 = vmatprep.mubr.bf16.mxu1 %v4900_v9  ;;  %v7502_v6 = vcombine.low %v3937_v4, %v9316_v8  ;;  %v5205_v29 = vor.u32 %v5204_v21, %v5200_v32  ;;  %v4743_v55 = vshll.u32 %v9271_v23, 16  ;;  %v4750_v24 = vshll.u32 %v11616_v22, 16 }
 0x2fe   : > { %v11990_v27 = vadd.f32 %v8426_v37, %v11724_v46  ;;  %v5198_v57 = vsel %vm510_vm1, %v5193_v43, %v5197_v20  ;;  %v4734_v46 = vsel %vm510_vm1, %v4729_v28, %v4733_v16  ;;  %v4740_v14 = vrot.slane %v4738_v1, 1  ;;  %v3967_v37 = vld [vmem:[#allocation2 + $0xa8] sm:$0xf]  ;;  %v9317_v1 = vld [vmem:[#allocation2 + $0xa0] sm:$0xf] }
 0x2ff   : > { %v4904_v7 = vrot.slane %v7502_v6, 1  ;;  %v4905_v26 = vrot.slane %v9275_v47, 1  ;;  %v5210_v40 = vsel %vm510_vm1, %v5205_v29, %v5209_v45  ;;  %v4745_v38 = vrot.slane %v4743_v55, 1  ;;  %v9279_v28 = vld [vmem:[#allocation2 + $0xa4] ss:$0 sps:$4 sm:$0x11]  }
 0x300   : > { %v4741_v56 = vor.u32 %v4740_v14, %v4736_v12  ;;  %v5216_v9 = vrot.slane %v5214_v59, 1  ;;  %v12008_v34 = vcombine.low %v3967_v37, %v11858_v49  ;;  %v5212_v43 = vshrl.u32 %v11996_v19, 16  ;;  %v3969_v29 = vld [vmem:[#allocation2 + $0xb4] sm:$0xf] }
 0x301   : > { %v4752_v39 = vrot.slane %v4750_v24, 1  ;;  %v7503_v20 = vcombine.low %v3938_v44, %v9317_v1  ;;  %v4748_v49 = vshrl.u32 %v11616_v22, 16  ;;  %v4755_v51 = vshll.u32 %v9275_v47, 16 }
 0x302   : > { %6555 = vmatmul.mubr.bf16.gmra.mrb[0].mxu0 %v11945_v5  ;;  %v4903_v5 = vsel %vm767_vm0, %v4901_v42, %v4902_v13  ;;  %v4746_v23 = vsel %vm510_vm1, %v4741_v56, %v4745_v38  ;;  %v5217_v13 = vor.u32 %v5216_v9, %v5212_v43  ;;  %v4908_v8 = vrot.slane %v9279_v28, 1  ;;  %v3939_v56 = vld [vmem:[#allocation2 + $0xa8] sm:$0xe]  ;;  %v9318_v38 = vld [vmem:[#allocation2 + $0xac] sm:$0xf] }
 0x303   : > { %6562 = vmatprep.mubr.bf16.mxu0 %v5198_v57  ;;  %v5226_v57 = vshll.u32 %v12008_v34, 16  ;;  %v4753_v32 = vor.u32 %v4752_v39, %v4748_v49  ;;  %v4907_v14 = vrot.slane %v7503_v20, 1  ;;  %v4757_v47 = vrot.slane %v4755_v51, 1  ;;  %v9283_v43 = vld [vmem:[#allocation2 + $0xb0] ss:$0 sps:$4 sm:$0x11]  }
 0x304   : > { %6402 = vmatmul.mubr.bf16.gmra.mrb[228].mxu1 %v4734_v46  ;;  %v5221_v46 = vrot.slane %v5219_v33, 1  ;;  %v12020_v59 = vcombine.low %v3969_v29, %v11822_v11  ;;  %v5231_v37 = vshll.u32 %v11860_v50, 16  ;;  %v7504_v9 = vcombine.low %v3939_v56, %v9318_v38 }
 0x305   : > { %6409 = vmatprep.mubr.bf16.mxu1 %v4903_v5  ;;  %v5228_v12 = vrot.slane %v5226_v57, 1  ;;  %v4909_v44 = vsel %vm767_vm0, %v4907_v14, %v4908_v8  ;;  %v4760_v1 = vshrl.u32 %v11645_v48, 16  ;;  %v4767_v20 = vshll.u32 %v9279_v28, 16 }
 0x306   : > { %v5222_v22 = vsel %vm510_vm1, %v5217_v13, %v5221_v46  ;;  %v4911_v46 = vrot.slane %v9283_v43, 1 }
 0x307   : > { %v4769_v28 = vrot.slane %v4767_v20, 1 }
 0x30a   : > { %6563 = vmatmul.mubr.bf16.gmra.mrb[4].mxu0 %v11957_v3  ;;  %v4906_v3 = vsel %vm767_vm0, %v4904_v7, %v4905_v26  ;;  %v4758_v7 = vsel %vm510_vm1, %v4753_v32, %v4757_v47  ;;  %v5224_v26 = vshrl.u32 %v12008_v34, 16  ;;  %v5236_v47 = vshrl.u32 %v12020_v59, 16 }
 0x30b   : > { %6570 = vmatprep.mubr.bf16.mxu0 %v5210_v40 }
 0x30c   : > { %6410 = vmatmul.mubr.bf16.gmra.mrb[232].mxu1 %v4746_v23  ;;  %v5229_v39 = vor.u32 %v5228_v12, %v5224_v26  ;;  %v3973_v26 = vld [vmem:[#allocation2 + $0xcc] sm:$0xf] }
 0x30d   : > { %6417 = vmatprep.mubr.bf16.mxu1 %v4906_v3  ;;  %v5238_v3 = vshll.u32 %v12020_v59, 16 }
 0x30f   : > { %v8315_v42 = vpop.f32.mrb[132].mxu1  ;;  %v5240_v14 = vrot.slane %v5238_v3, 1 }
 0x310   : > { %v8316_v16 = vpop.f32.mrb[133].mxu1 }
 0x311   : > { %v8317_v21 = vadd.f32 %v8316_v16, %v8315_v42  ;;  %v8318_v4 = vpop.f32.mrb[134].mxu1  ;;  %v12478_v42 = vld [vmem:[#allocation15_spill] sm:$0xff]  ;;  %v5233_v16 = vrot.slane %v5231_v37, 1 }
 0x312   : > { %v8319_v58 = vpop.f32.mrb[135].mxu1  ;;  %6571 = vmatmul.mubr.bf16.gmra.mrb[8].mxu0 %v11975_v30  ;;  %v4764_v30 = vrot.slane %v4762_v36, 1  ;;  %v4774_v13 = vshll.u32 %v12478_v42, 16  ;;  %v4910_v36 = vrot.slane %v7504_v9, 1  ;;  %v12479_v9 = vld [vmem:[#allocation16_spill] sm:$0xff] }
 0x313   : > { %v8427_v6 = vpop.f32.mrb[164].mxu0  ;;  %v8320_v5 = vadd.f32 %v8319_v58, %v8318_v4  ;;  %6578 = vmatprep.mubr.bf16.mxu0 %v5222_v22  ;;  %v3971_v58 = vld [vmem:[#allocation2 + $0xc0] sm:$0xf]  ;;  %v5234_v48 = vsel %vm510_vm1, %v5229_v39, %v5233_v16 }
 0x314   : > { %v8428_v55 = vpop.f32.mrb[165].mxu0  ;;  %6418 = vmatmul.mubr.bf16.gmra.mrb[236].mxu1 %v4758_v7  ;;  %v12036_v8 = vcombine.low %v3971_v58, %v11881_v54  ;;  %v4776_v29 = vrot.slane %v4774_v13, 1  ;;  %v4772_v54 = vshrl.u32 %v12478_v42, 16  ;;  %v4779_v7 = vshll.u32 %v9283_v43, 16 }
 0x315   : > { %v8429_v24 = vadd.f32 %v8428_v55, %v8427_v6  ;;  %v8430_v45 = vpop.f32.mrb[166].mxu0  ;;  %6425 = vmatprep.mubr.bf16.mxu1 %v4909_v44  ;;  %v3940_v6 = vld [vmem:[#allocation2 + $0xb4] sm:$0xe]  ;;  %v12041_v55 = vld [vmem:[#allocation2 + $0xbc] ss:$0 sps:$4 sm:$0x11]   ;;  %v12050_v43 = vcombine.low %v3973_v26, %v11959_v31 }
 0x316   : > { %v8431_v40 = vpop.f32.mrb[167].mxu0  ;;  %v4786_v44 = vshll.u32 %v12479_v9, 16  ;;  %v4777_v39 = vor.u32 %v4776_v29, %v4772_v54  ;;  %v4781_v13 = vrot.slane %v4779_v7, 1  ;;  %v4914_v16 = vrot.slane %v12041_v55, 1 }
 0x317   : > { %v12026_v23 = vadd.f32 %v8429_v24, %v8317_v21  ;;  %v8432_v11 = vadd.f32 %v8431_v40, %v8430_v45  ;;  %v8321_v33 = vpop.f32.mrb[136].mxu1  ;;  %v4765_v21 = vor.u32 %v4764_v30, %v4760_v1  ;;  %v4912_v45 = vsel %vm767_vm0, %v4910_v36, %v4911_v46 }
 0x318   : > { %v8322_v50 = vpop.f32.mrb[137].mxu1  ;;  %v5250_v30 = vshll.u32 %v12036_v8, 16  ;;  %v5255_v58 = vshll.u32 %v11869_v35, 16  ;;  %v4782_v31 = vsel %vm510_vm1, %v4777_v39, %v4781_v13  ;;  %v4784_v35 = vshrl.u32 %v12479_v9, 16 }
 0x319   : > { %v12031_v49 = vadd.f32 %v8432_v11, %v8320_v5  ;;  %v8323_v51 = vadd.f32 %v8322_v50, %v8321_v33  ;;  %v8324_v57 = vpop.f32.mrb[138].mxu1  ;;  %v5243_v5 = vshll.u32 %v11837_v41, 16  ;;  %v4770_v22 = vsel %vm510_vm1, %v4765_v21, %v4769_v28 }
 0x31a   : > { %v8325_v4 = vpop.f32.mrb[139].mxu1  ;;  %6579 = vmatmul.mubr.bf16.gmra.mrb[12].mxu0 %v11996_v19  ;;  %v9319_v19 = vld [vmem:[#allocation2 + $0xb8] sm:$0xf]  ;;  %v5241_v41 = vor.u32 %v5240_v14, %v5236_v47  ;;  %v5252_v46 = vrot.slane %v5250_v30, 1  ;;  %v5248_v28 = vshrl.u32 %v12036_v8, 16  ;;  %v4788_v14 = vrot.slane %v4786_v44, 1 }
 0x31b   : > { %v8326_v32 = vadd.f32 %v8325_v4, %v8324_v57  ;;  %6586 = vmatprep.mubr.bf16.mxu0 %v5234_v48  ;;  %v7505_v24 = vcombine.low %v3940_v6, %v9319_v19  ;;  %v5245_v11 = vrot.slane %v5243_v5, 1  ;;  %v3941_v48 = vld [vmem:[#allocation2 + $0xc0] sm:$0xe]  ;;  %v5262_v6 = vshll.u32 %v12050_v43, 16  ;;  %v9320_v5 = vld [vmem:[#allocation2 + $0xc4] sm:$0xf] }
 0x31c   : > { %6426 = vmatmul.mubr.bf16.gmra.mrb[240].mxu1 %v4770_v22  ;;  %v7506_v29 = vcombine.low %v3941_v48, %v9320_v5  ;;  %v9291_v22 = vld [vmem:[#allocation2 + $0xc8] ss:$0 sps:$4 sm:$0x11]   ;;  %v5253_v47 = vor.u32 %v5252_v46, %v5248_v28  ;;  %v4791_v19 = vshll.u32 %v12041_v55, 16  ;;  %v5267_v30 = vshll.u32 %v11967_v62, 16 }
 0x31d   : > { %6433 = vmatprep.mubr.bf16.mxu1 %v4912_v45  ;;  %v4913_v57 = vrot.slane %v7505_v24, 1  ;;  %v5246_v4 = vsel %vm510_vm1, %v5241_v41, %v5245_v11  ;;  %v12480_v24 = vld [vmem:[#allocation18_spill] sm:$0xff]  ;;  %v4789_v41 = vor.u32 %v4788_v14, %v4784_v35  ;;  %v3991_v62 = vld [vmem:[#allocation2 + $0x18] sm:$0xe] }
 0x31e   : > { %v8433_v12 = vpop.f32.mrb[168].mxu0  ;;  %v4798_v45 = vshll.u32 %v12480_v24, 16  ;;  %v4916_v11 = vrot.slane %v7506_v29, 1  ;;  %v4793_v9 = vrot.slane %v4791_v19, 1  ;;  %v3993_v35 = vld [vmem:[#allocation2 + $0x30] sm:$0xe] }
 0x31f   : > { %v8434_v56 = vpop.f32.mrb[169].mxu0  ;;  %v8327_v38 = vpop.f32.mrb[140].mxu1  ;;  %v9322_v5 = vld [vmem:[#allocation2 + $0x20] ss:$0 sps:$4 sm:$0x11]  }
 0x320   : > { %v8435_v37 = vadd.f32 %v8434_v56, %v8433_v12  ;;  %v8436_v40 = vpop.f32.mrb[170].mxu0  ;;  %v8328_v1 = vpop.f32.mrb[141].mxu1  ;;  %v5257_v56 = vrot.slane %v5255_v58, 1  ;;  %v4796_v58 = vshrl.u32 %v12480_v24, 16  ;;  %v5336_v29 = vrot.slane %v9322_v5, 1 }
 0x321   : > { %v8437_v33 = vpop.f32.mrb[171].mxu0  ;;  %v8329_v50 = vadd.f32 %v8328_v1, %v8327_v38  ;;  %v8330_v42 = vpop.f32.mrb[142].mxu1  ;;  %v4794_v1 = vsel %vm510_vm1, %v4789_v41, %v4793_v9 }
 0x322   : > { %v12047_v20 = vadd.f32 %v8435_v37, %v8323_v51  ;;  %v8438_v3 = vadd.f32 %v8437_v33, %v8436_v40  ;;  %v8331_v21 = vpop.f32.mrb[143].mxu1  ;;  %6587 = vmatmul.mubr.bf16.gmra.mrb[16].mxu0 %v12008_v34  ;;  %v4915_v34 = vsel %vm767_vm0, %v4913_v57, %v4914_v16  ;;  %v5260_v37 = vshrl.u32 %v12050_v43, 16 }
 0x323   : > { %v8332_v51 = vadd.f32 %v8331_v21, %v8330_v42  ;;  %6594 = vmatprep.mubr.bf16.mxu0 %v5246_v4  ;;  %v5264_v40 = vrot.slane %v5262_v6, 1  ;;  %v4917_v33 = vrot.slane %v9291_v22, 1  ;;  %v5258_v55 = vsel %vm510_vm1, %v5253_v47, %v5257_v56  ;;  %v9321_v21 = vld [vmem:[#allocation2 + $0x1c] sm:$0xf] }
 0x324   : > { %v12055_v36 = vadd.f32 %v8438_v3, %v8326_v32  ;;  %6434 = vmatmul.mubr.bf16.gmra.mrb[244].mxu1 %v4782_v31  ;;  %v4800_v42 = vrot.slane %v4798_v45, 1  ;;  %v5269_v57 = vrot.slane %v5267_v30, 1  ;;  %v7539_v4 = vcombine.low %v3991_v62, %v9321_v21  ;;  %v9323_v45 = vld [vmem:[#allocation2 + $0x34] sm:$0xf] }
 0x325   : > { %6441 = vmatprep.mubr.bf16.mxu1 %v4915_v34  ;;  %v5265_v13 = vor.u32 %v5264_v40, %v5260_v37  ;;  %v7541_v56 = vcombine.low %v3993_v35, %v9323_v45  ;;  %v9324_v30 = vld [vmem:[#allocation2 + $0x38] ss:$0 sps:$4 sm:$0x11]  }
 0x326   : > { %v8439_v32 = vpop.f32.mrb[172].mxu0  ;;  %v4801_v28 = vor.u32 %v4800_v42, %v4796_v58  ;;  %v5335_v6 = vrot.slane %v7539_v4, 1 }
 0x327   : > { %v8440_v12 = vpop.f32.mrb[173].mxu0  ;;  %v5270_v14 = vsel %vm510_vm1, %v5265_v13, %v5269_v57  ;;  %v5341_v40 = vrot.slane %v7541_v56, 1 }
 0x328   : > { %v8441_v54 = vadd.f32 %v8440_v12, %v8439_v32  ;;  %v8442_v7 = vpop.f32.mrb[174].mxu0 }
 0x329   : > { %v8443_v26 = vpop.f32.mrb[175].mxu0 }
 0x32a   : > { %v12067_v38 = vadd.f32 %v8441_v54, %v8329_v50  ;;  %v8444_v44 = vadd.f32 %v8443_v26, %v8442_v7  ;;  %6595 = vmatmul.mubr.bf16.gmra.mrb[20].mxu0 %v12020_v59  ;;  %v4918_v50 = vsel %vm767_vm0, %v4916_v11, %v4917_v33 }
 0x32b   : > { %6602 = vmatprep.mubr.bf16.mxu0 %v5258_v55 }
 0x32c   : > { %v12071_v39 = vadd.f32 %v8444_v44, %v8332_v51  ;;  %6442 = vmatmul.mubr.bf16.gmra.mrb[248].mxu1 %v4794_v1  ;;  %v4803_v51 = vshll.u32 %v9291_v22, 16  ;;  %v5337_v22 = vsel %vm767_vm0, %v5335_v6, %v5336_v29  ;;  %v5342_v44 = vrot.slane %v9324_v30, 1 }
 0x32d   : > { %v8333_v3 = vpop.f32.mrb[144].mxu1  ;;  %6449 = vmatprep.mubr.bf16.mxu1 %v4918_v50 }
 0x32e   : > { %v8334_v16 = vpop.f32.mrb[145].mxu1  ;;  %v4805_v34 = vrot.slane %v4803_v51, 1  ;;  %v5343_v42 = vsel %vm767_vm0, %v5341_v40, %v5342_v44 }
 0x32f   : > { %v8335_v59 = vadd.f32 %v8334_v16, %v8333_v3  ;;  %v8336_v46 = vpop.f32.mrb[146].mxu1  ;;  %v12481_v3 = vld [vmem:[#allocation13_spill] sm:$0xff] }
 0x330   : > { %v8337_v48 = vpop.f32.mrb[147].mxu1  ;;  %v4806_v12 = vsel %vm510_vm1, %v4801_v28, %v4805_v34  ;;  %v12482_v28 = vld [vmem:[#allocation19_spill] sm:$0xff] }
 0x331   : > { %v8338_v31 = vadd.f32 %v8337_v48, %v8336_v46  ;;  %v8445_v32 = vpop.f32.mrb[176].mxu0 }
 0x332   : > { %6603 = vmatmul.mubr.bf16.gmra.mrb[24].mxu0 %v12036_v8  ;;  %v8446_v47 = vpop.f32.mrb[177].mxu0 }
 0x333   : > { %6610 = vmatprep.mubr.bf16.mxu0 %v5270_v14  ;;  %v8447_v19 = vadd.f32 %v8446_v47, %v8445_v32  ;;  %v8448_v24 = vpop.f32.mrb[178].mxu0 }
 0x334   : > { %6450 = vmatmul.mubr.bf16.gmra.mrb[252].mxu1 %v4806_v12  ;;  %v8449_v54 = vpop.f32.mrb[179].mxu0 }
 0x335   : > { %8829 = vmatprep.mubr.bf16.mxu1 %v5337_v22  ;;  %v12080_v7 = vadd.f32 %v8447_v19, %v8335_v59  ;;  %v8450_v26 = vadd.f32 %v8449_v54, %v8448_v24  ;;  %v12483_v54 = vld [vmem:[#allocation21_spill] sm:$0xff] }
 0x336   : > { %v8339_v8 = vpop.f32.mrb[148].mxu1 }
 0x337   : > { %v12082_v41 = vadd.f32 %v8450_v26, %v8338_v31  ;;  %v8340_v37 = vpop.f32.mrb[149].mxu1 }
 0x338   : > { %v8341_v11 = vadd.f32 %v8340_v37, %v8339_v8  ;;  %v8342_v33 = vpop.f32.mrb[150].mxu1 }
 0x339   : > { %v8343_v55 = vpop.f32.mrb[151].mxu1 }
 0x33a   : > { %6611 = vmatmul.mubr.bf16.gmra.mrb[28].mxu0 %v12050_v43  ;;  %v8344_v9 = vadd.f32 %v8343_v55, %v8342_v33 }
 0x33c   : > { %8830 = vmatmul.mubr.bf16.vlgmr.msra.gmra.mrb[0].mxu1 %v12481_v3 }
 0x33d   : > { %v8451_v1 = vpop.f32.mrb[180].mxu0  ;;  %8833 = vmatprep.mubr.bf16.mxu1 %v5343_v42 }
 0x33e   : > { %v8452_v13 = vpop.f32.mrb[181].mxu0 }
 0x33f   : > { %v8453_v57 = vadd.f32 %v8452_v13, %v8451_v1  ;;  %v8454_v62 = vpop.f32.mrb[182].mxu0  ;;  %v8345_v16 = vpop.f32.mrb[152].mxu1 }
 0x340   : > { %v8455_v50 = vpop.f32.mrb[183].mxu0  ;;  %v8346_v59 = vpop.f32.mrb[153].mxu1 }
 0x341   : > { %v12087_v21 = vadd.f32 %v8453_v57, %v8341_v11  ;;  %v8456_v4 = vadd.f32 %v8455_v50, %v8454_v62  ;;  %v8347_v43 = vadd.f32 %v8346_v59, %v8345_v16  ;;  %v8348_v46 = vpop.f32.mrb[154].mxu1 }
 0x342   : > { %v8349_v51 = vpop.f32.mrb[155].mxu1 }
 0x343   : > { %v12089_v58 = vadd.f32 %v8456_v4, %v8344_v9  ;;  %v8350_v48 = vadd.f32 %v8349_v51, %v8348_v46 }
 0x344   : > { %8834 = vmatmul.mubr.bf16.gmra.mrb[4].mxu1 %v12482_v28 }
 0x345   : > { %v8457_v31 = vpop.f32.mrb[184].mxu0  ;;  %8837 = vmatprep.mubr.bf16.mxu1 %v11884_v63 }
 0x346   : > { %v8458_v14 = vpop.f32.mrb[185].mxu0 }
 0x347   : > { %v8459_v6 = vadd.f32 %v8458_v14, %v8457_v31  ;;  %v8460_v5 = vpop.f32.mrb[186].mxu0  ;;  %v8351_v34 = vpop.f32.mrb[156].mxu1 }
 0x348   : > { %v8461_v29 = vpop.f32.mrb[187].mxu0  ;;  %v8352_v12 = vpop.f32.mrb[157].mxu1 }
 0x349   : > { %v12093_v32 = vadd.f32 %v8459_v6, %v8347_v43  ;;  %v8462_v47 = vadd.f32 %v8461_v29, %v8460_v5  ;;  %v8353_v35 = vadd.f32 %v8352_v12, %v8351_v34  ;;  %v8354_v19 = vpop.f32.mrb[158].mxu1 }
 0x34a   : > { %v8355_v22 = vpop.f32.mrb[159].mxu1 }
 0x34b   : > { %v12095_v24 = vadd.f32 %v8462_v47, %v8350_v48  ;;  %v8356_v45 = vadd.f32 %v8355_v22, %v8354_v19 }
 0x34c   : > { %8838 = vmatmul.mubr.bf16.gmra.mrb[8].mxu1 %v12483_v54 }
 0x34d   : > { %v8463_v56 = vpop.f32.mrb[188].mxu0  ;;  %8841 = vmatprep.mubr.bf16.mxu1 %v11891_v52 }
 0x34e   : > { %v8464_v26 = vpop.f32.mrb[189].mxu0 }
 0x34f   : > { %v8465_v63 = vadd.f32 %v8464_v26, %v8463_v56  ;;  %v8466_v8 = vpop.f32.mrb[190].mxu0  ;;  %v8357_v40 = vpop.f32.mrb[160].mxu1 }
 0x350   : > { %v8467_v37 = vpop.f32.mrb[191].mxu0  ;;  %v8358_v11 = vpop.f32.mrb[161].mxu1 }
 0x351   : > { %v12099_v30 = vadd.f32 %v8465_v63, %v8353_v35  ;;  %v8468_v44 = vadd.f32 %v8467_v37, %v8466_v8  ;;  %v8359_v33 = vadd.f32 %v8358_v11, %v8357_v40  ;;  %v8360_v55 = vpop.f32.mrb[162].mxu1 }
 0x352   : > { %v8361_v1 = vpop.f32.mrb[163].mxu1 }
 0x353   : > { %v12101_v9 = vadd.f32 %v8468_v44, %v8356_v45  ;;  %v8362_v3 = vadd.f32 %v8361_v1, %v8360_v55 }
 0x354   : > { %8842 = vmatmul.mubr.bf16.gmra.mrb[12].mxu1 %v11872_v10 }
 0x355   : > { %v8469_v42 = vpop.f32.mrb[192].mxu0  ;;  %8845 = vmatprep.mubr.bf16.mxu1 %v11899_v0 }
 0x356   : > { %v8470_v13 = vpop.f32.mrb[193].mxu0 }
 0x357   : > { %v8471_v52 = vadd.f32 %v8470_v13, %v8469_v42  ;;  %v8472_v57 = vpop.f32.mrb[194].mxu0  ;;  %v8363_v50 = vpop.f32.mrb[164].mxu1 }
 0x358   : > { %v8473_v62 = vpop.f32.mrb[195].mxu0  ;;  %v8364_v59 = vpop.f32.mrb[165].mxu1 }
 0x359   : > { %v12105_v16 = vadd.f32 %v8471_v52, %v8359_v33  ;;  %v8474_v4 = vadd.f32 %v8473_v62, %v8472_v57  ;;  %v8365_v43 = vadd.f32 %v8364_v59, %v8363_v50  ;;  %v8366_v46 = vpop.f32.mrb[166].mxu1 }
 0x35a   : > { %v8367_v48 = vpop.f32.mrb[167].mxu1 }
 0x35b   : > { %v12107_v51 = vadd.f32 %v8474_v4, %v8362_v3  ;;  %v8368_v31 = vadd.f32 %v8367_v48, %v8366_v46 }
 0x35c   : > { %8846 = vmatmul.mubr.bf16.gmra.mrb[16].mxu1 %v11887_v15 }
 0x35d   : > { %v8475_v28 = vpop.f32.mrb[196].mxu0  ;;  %8849 = vmatprep.mubr.bf16.mxu1 %v11915_v53 }
 0x35e   : > { %v8476_v10 = vpop.f32.mrb[197].mxu0 }
 0x35f   : > { %v8477_v0 = vadd.f32 %v8476_v10, %v8475_v28  ;;  %v8478_v14 = vpop.f32.mrb[198].mxu0  ;;  %v8369_v5 = vpop.f32.mrb[168].mxu1 }
 0x360   : > { %v8479_v6 = vpop.f32.mrb[199].mxu0  ;;  %v8370_v47 = vpop.f32.mrb[169].mxu1 }
 0x361   : > { %v12111_v29 = vadd.f32 %v8477_v0, %v8365_v43  ;;  %v8480_v34 = vadd.f32 %v8479_v6, %v8478_v14  ;;  %v8371_v12 = vadd.f32 %v8370_v47, %v8369_v5  ;;  %v8372_v35 = vpop.f32.mrb[170].mxu1 }
 0x362   : > { %v8373_v22 = vpop.f32.mrb[171].mxu1 }
 0x363   : > { %v12113_v19 = vadd.f32 %v8480_v34, %v8368_v31  ;;  %v8374_v45 = vadd.f32 %v8373_v22, %v8372_v35 }
 0x364   : > { %8850 = vmatmul.mubr.bf16.gmra.mrb[20].mxu1 %v11895_v60 }
 0x365   : > { %v8481_v56 = vpop.f32.mrb[200].mxu0  ;;  %8853 = vmatprep.mubr.bf16.mxu1 %v11918_v2 }
 0x366   : > { %v8482_v15 = vpop.f32.mrb[201].mxu0 }
 0x367   : > { %v8483_v53 = vadd.f32 %v8482_v15, %v8481_v56  ;;  %v8484_v54 = vpop.f32.mrb[202].mxu0  ;;  %v8375_v63 = vpop.f32.mrb[172].mxu1 }
 0x368   : > { %v8485_v26 = vpop.f32.mrb[203].mxu0  ;;  %v8376_v40 = vpop.f32.mrb[173].mxu1 }
 0x369   : > { %v12117_v8 = vadd.f32 %v8483_v53, %v8371_v12  ;;  %v8486_v37 = vadd.f32 %v8485_v26, %v8484_v54  ;;  %v8377_v44 = vadd.f32 %v8376_v40, %v8375_v63  ;;  %v8378_v11 = vpop.f32.mrb[174].mxu1 }
 0x36a   : > { %v8379_v55 = vpop.f32.mrb[175].mxu1 }
 0x36b   : > { %v12119_v33 = vadd.f32 %v8486_v37, %v8374_v45  ;;  %v8380_v1 = vadd.f32 %v8379_v55, %v8378_v11 }
 0x36c   : > { %8854 = vmatmul.mubr.bf16.gmra.mrb[24].mxu1 %v11903_v25 }
 0x36d   : > { %v8487_v3 = vpop.f32.mrb[204].mxu0  ;;  %8857 = vmatprep.mubr.bf16.mxu1 %v11927_v61 }
 0x36e   : > { %v8488_v60 = vpop.f32.mrb[205].mxu0 }
 0x36f   : > { %v8489_v2 = vadd.f32 %v8488_v60, %v8487_v3  ;;  %v8490_v42 = vpop.f32.mrb[206].mxu0  ;;  %v8381_v52 = vpop.f32.mrb[176].mxu1 }
 0x370   : > { %v8491_v13 = vpop.f32.mrb[207].mxu0  ;;  %v8382_v50 = vpop.f32.mrb[177].mxu1 }
 0x371   : > { %v12123_v57 = vadd.f32 %v8489_v2, %v8377_v44  ;;  %v8492_v62 = vadd.f32 %v8491_v13, %v8490_v42  ;;  %v8383_v4 = vadd.f32 %v8382_v50, %v8381_v52  ;;  %v8384_v59 = vpop.f32.mrb[178].mxu1 }
 0x372   : > { %v8385_v46 = vpop.f32.mrb[179].mxu1 }
 0x373   : > { %v12125_v43 = vadd.f32 %v8492_v62, %v8380_v1  ;;  %v8386_v48 = vadd.f32 %v8385_v46, %v8384_v59 }
 0x374   : > { %8858 = vmatmul.mubr.bf16.gmra.mrb[28].mxu1 %v11980_v17 }
 0x375   : > { %v8493_v31 = vpop.f32.mrb[208].mxu0 }
 0x376   : > { %v8494_v25 = vpop.f32.mrb[209].mxu0 }
 0x377   : > { %v8495_v28 = vadd.f32 %v8494_v25, %v8493_v31  ;;  %v8496_v61 = vpop.f32.mrb[210].mxu0  ;;  %v8387_v0 = vpop.f32.mrb[180].mxu1 }
 0x378   : > { %v8497_v10 = vpop.f32.mrb[211].mxu0  ;;  %v8388_v5 = vpop.f32.mrb[181].mxu1 }
 0x379   : > { %v12128_v14 = vadd.f32 %v8495_v28, %v8383_v4  ;;  %v8498_v6 = vadd.f32 %v8497_v10, %v8496_v61  ;;  %v8389_v34 = vadd.f32 %v8388_v5, %v8387_v0  ;;  %v8390_v47 = vpop.f32.mrb[182].mxu1 }
 0x37a   : > { %v8391_v35 = vpop.f32.mrb[183].mxu1 }
 0x37b   : > { %v12130_v12 = vadd.f32 %v8498_v6, %v8386_v48  ;;  %v8392_v22 = vadd.f32 %v8391_v35, %v8390_v47 }
 0x37d   : > { %v8499_v45 = vpop.f32.mrb[212].mxu0 }
 0x37e   : > { %v8500_v56 = vpop.f32.mrb[213].mxu0 }
 0x37f   : > { %v8501_v15 = vadd.f32 %v8500_v56, %v8499_v45  ;;  %v8502_v53 = vpop.f32.mrb[214].mxu0  ;;  %v8393_v54 = vpop.f32.mrb[184].mxu1 }
 0x380   : > { %v8503_v17 = vpop.f32.mrb[215].mxu0  ;;  %v8394_v37 = vpop.f32.mrb[185].mxu1 }
 0x381   : > { %v12132_v26 = vadd.f32 %v8501_v15, %v8389_v34  ;;  %v8504_v63 = vadd.f32 %v8503_v17, %v8502_v53  ;;  %v8395_v40 = vadd.f32 %v8394_v37, %v8393_v54  ;;  %v8396_v44 = vpop.f32.mrb[186].mxu1 }
 0x382   : > { %v8397_v55 = vpop.f32.mrb[187].mxu1 }
 0x383   : > { %v12134_v11 = vadd.f32 %v8504_v63, %v8392_v22  ;;  %v8398_v1 = vadd.f32 %v8397_v55, %v8396_v44 }
 0x385   : > { %v8505_v3 = vpop.f32.mrb[216].mxu0 }
 0x386   : > { %v8506_v60 = vpop.f32.mrb[217].mxu0 }
 0x387   : > { %v8507_v2 = vadd.f32 %v8506_v60, %v8505_v3  ;;  %v8508_v42 = vpop.f32.mrb[218].mxu0  ;;  %v8399_v52 = vpop.f32.mrb[188].mxu1 }
 0x388   : > { %v8509_v13 = vpop.f32.mrb[219].mxu0  ;;  %v8400_v4 = vpop.f32.mrb[189].mxu1 }
 0x389   : > { %v12136_v62 = vadd.f32 %v8507_v2, %v8395_v40  ;;  %v8510_v50 = vadd.f32 %v8509_v13, %v8508_v42  ;;  %v8401_v59 = vadd.f32 %v8400_v4, %v8399_v52  ;;  %v8402_v46 = vpop.f32.mrb[190].mxu1 }
 0x38a   : > { %v8403_v31 = vpop.f32.mrb[191].mxu1 }
 0x38b   : > { %v12138_v48 = vadd.f32 %v8510_v50, %v8398_v1  ;;  %v8404_v25 = vadd.f32 %v8403_v31, %v8402_v46 }
 0x38d   : > { %v8511_v28 = vpop.f32.mrb[220].mxu0 }
 0x38e   : > { %v8512_v61 = vpop.f32.mrb[221].mxu0 }
 0x38f   : > { %v8513_v10 = vadd.f32 %v8512_v61, %v8511_v28  ;;  %v8514_v0 = vpop.f32.mrb[222].mxu0  ;;  %v8533_v5 = vpop.f32.mrb[192].mxu1 }
 0x390   : > { %v8515_v6 = vpop.f32.mrb[223].mxu0  ;;  %v8534_v35 = vpop.f32.mrb[193].mxu1 }
 0x391   : > { %v12140_v34 = vadd.f32 %v8513_v10, %v8401_v59  ;;  %v8516_v47 = vadd.f32 %v8515_v6, %v8514_v0  ;;  %v8535_v22 = vadd.f32 %v8534_v35, %v8533_v5  ;;  %v8536_v45 = vpop.f32.mrb[194].mxu1 }
 0x392   : > { %v8537_v15 = vpop.f32.mrb[195].mxu1 }
 0x393   : > { %v12142_v56 = vadd.f32 %v8516_v47, %v8404_v25  ;;  %v6332_v53 = vadd.f32 %v8535_v22, %v11984_v18  ;;  %v8538_v17 = vadd.f32 %v8537_v15, %v8536_v45 }
 0x395   : > { %v8645_v54 = vpop.f32.mrb[224].mxu0  ;;  %v6335_v37 = vadd.f32 %v8538_v17, %v11990_v27 }
 0x396   : > { %v8646_v63 = vpop.f32.mrb[225].mxu0 }
 0x397   : > { %v8647_v40 = vadd.f32 %v8646_v63, %v8645_v54  ;;  %v8648_v44 = vpop.f32.mrb[226].mxu0  ;;  %v8539_v1 = vpop.f32.mrb[196].mxu1 }
 0x398   : > { %v8649_v55 = vpop.f32.mrb[227].mxu0  ;;  %v8540_v60 = vpop.f32.mrb[197].mxu1 }
 0x399   : > { %v8650_v3 = vadd.f32 %v8649_v55, %v8648_v44  ;;  %v12146_v2 = vadd.f32 %v8647_v40, %v6332_v53  ;;  %v8541_v42 = vadd.f32 %v8540_v60, %v8539_v1  ;;  %v8542_v13 = vpop.f32.mrb[198].mxu1 }
 0x39a   : > { %v8543_v52 = vpop.f32.mrb[199].mxu1 }
 0x39b   : > { %v12148_v50 = vadd.f32 %v8650_v3, %v6335_v37  ;;  %v6340_v18 = vadd.f32 %v8541_v42, %v12026_v23  ;;  %v8544_v4 = vadd.f32 %v8543_v52, %v8542_v13 }
 0x39d   : > { %v8651_v59 = vpop.f32.mrb[228].mxu0  ;;  %v6343_v27 = vadd.f32 %v8544_v4, %v12031_v49 }
 0x39e   : > { %v8652_v46 = vpop.f32.mrb[229].mxu0 }
 0x39f   : > { %v8653_v31 = vadd.f32 %v8652_v46, %v8651_v59  ;;  %v8654_v25 = vpop.f32.mrb[230].mxu0  ;;  %v8545_v61 = vpop.f32.mrb[200].mxu1 }
 0x3a0   : > { %v8655_v28 = vpop.f32.mrb[231].mxu0  ;;  %v8546_v0 = vpop.f32.mrb[201].mxu1 }
 0x3a1   : > { %v8656_v10 = vadd.f32 %v8655_v28, %v8654_v25  ;;  %v12152_v6 = vadd.f32 %v8653_v31, %v6340_v18  ;;  %v8547_v5 = vadd.f32 %v8546_v0, %v8545_v61  ;;  %v8548_v47 = vpop.f32.mrb[202].mxu1 }
 0x3a2   : > { %v8549_v35 = vpop.f32.mrb[203].mxu1 }
 0x3a3   : > { %v12154_v22 = vadd.f32 %v8656_v10, %v6343_v27  ;;  %v6348_v23 = vadd.f32 %v8547_v5, %v12047_v20  ;;  %v8550_v45 = vadd.f32 %v8549_v35, %v8548_v47 }
 0x3a5   : > { %v8657_v15 = vpop.f32.mrb[232].mxu0  ;;  %v6351_v49 = vadd.f32 %v8550_v45, %v12055_v36 }
 0x3a6   : > { %v8658_v53 = vpop.f32.mrb[233].mxu0 }
 0x3a7   : > { %v8659_v17 = vadd.f32 %v8658_v53, %v8657_v15  ;;  %v8660_v54 = vpop.f32.mrb[234].mxu0  ;;  %v8551_v37 = vpop.f32.mrb[204].mxu1 }
 0x3a8   : > { %v8661_v63 = vpop.f32.mrb[235].mxu0  ;;  %v8552_v44 = vpop.f32.mrb[205].mxu1 }
 0x3a9   : > { %v8662_v40 = vadd.f32 %v8661_v63, %v8660_v54  ;;  %v12158_v55 = vadd.f32 %v8659_v17, %v6348_v23  ;;  %v8553_v1 = vadd.f32 %v8552_v44, %v8551_v37  ;;  %v8554_v3 = vpop.f32.mrb[206].mxu1 }
 0x3aa   : > { %v8555_v60 = vpop.f32.mrb[207].mxu1 }
 0x3ab   : > { %v12160_v42 = vadd.f32 %v8662_v40, %v6351_v49  ;;  %v6356_v20 = vadd.f32 %v8553_v1, %v12067_v38  ;;  %v8556_v13 = vadd.f32 %v8555_v60, %v8554_v3 }
 0x3ad   : > { %v8663_v52 = vpop.f32.mrb[236].mxu0  ;;  %v6359_v36 = vadd.f32 %v8556_v13, %v12071_v39 }
 0x3ae   : > { %v8664_v18 = vpop.f32.mrb[237].mxu0 }
 0x3af   : > { %v8665_v4 = vadd.f32 %v8664_v18, %v8663_v52  ;;  %v8666_v59 = vpop.f32.mrb[238].mxu0  ;;  %v8557_v27 = vpop.f32.mrb[208].mxu1 }
 0x3b0   : > { %v8667_v46 = vpop.f32.mrb[239].mxu0  ;;  %v8558_v25 = vpop.f32.mrb[209].mxu1 }
 0x3b1   : > { %v8668_v31 = vadd.f32 %v8667_v46, %v8666_v59  ;;  %v12164_v28 = vadd.f32 %v8665_v4, %v6356_v20  ;;  %v8559_v61 = vadd.f32 %v8558_v25, %v8557_v27  ;;  %v8560_v10 = vpop.f32.mrb[210].mxu1 }
 0x3b2   : > { %v8561_v0 = vpop.f32.mrb[211].mxu1 }
 0x3b3   : > { %v12166_v5 = vadd.f32 %v8668_v31, %v6359_v36  ;;  %v6364_v38 = vadd.f32 %v8559_v61, %v12080_v7  ;;  %v8562_v47 = vadd.f32 %v8561_v0, %v8560_v10 }
 0x3b5   : > { %v8669_v35 = vpop.f32.mrb[240].mxu0  ;;  %v6367_v39 = vadd.f32 %v8562_v47, %v12082_v41 }
 0x3b6   : > { %v8670_v23 = vpop.f32.mrb[241].mxu0 }
 0x3b7   : > { %v8671_v45 = vadd.f32 %v8670_v23, %v8669_v35  ;;  %v8672_v15 = vpop.f32.mrb[242].mxu0  ;;  %v8563_v49 = vpop.f32.mrb[212].mxu1 }
 0x3b8   : > { %v8673_v53 = vpop.f32.mrb[243].mxu0  ;;  %v8564_v54 = vpop.f32.mrb[213].mxu1 }
 0x3b9   : > { %v8674_v17 = vadd.f32 %v8673_v53, %v8672_v15  ;;  %v12170_v63 = vadd.f32 %v8671_v45, %v6364_v38  ;;  %v8565_v37 = vadd.f32 %v8564_v54, %v8563_v49  ;;  %v8566_v40 = vpop.f32.mrb[214].mxu1 }
 0x3ba   : > { %v8567_v44 = vpop.f32.mrb[215].mxu1 }
 0x3bb   : > { %v12172_v1 = vadd.f32 %v8674_v17, %v6367_v39  ;;  %v6372_v7 = vadd.f32 %v8565_v37, %v12087_v21  ;;  %v8568_v3 = vadd.f32 %v8567_v44, %v8566_v40 }
 0x3bd   : > { %v8675_v60 = vpop.f32.mrb[244].mxu0  ;;  %v6375_v41 = vadd.f32 %v8568_v3, %v12089_v58 }
 0x3be   : > { %v8676_v20 = vpop.f32.mrb[245].mxu0 }
 0x3bf   : > { %v8677_v13 = vadd.f32 %v8676_v20, %v8675_v60  ;;  %v8678_v52 = vpop.f32.mrb[246].mxu0  ;;  %v8569_v36 = vpop.f32.mrb[216].mxu1 }
 0x3c0   : > { %v8679_v18 = vpop.f32.mrb[247].mxu0  ;;  %v8570_v59 = vpop.f32.mrb[217].mxu1 }
 0x3c1   : > { %v8680_v4 = vadd.f32 %v8679_v18, %v8678_v52  ;;  %v12176_v46 = vadd.f32 %v8677_v13, %v6372_v7  ;;  %v8571_v27 = vadd.f32 %v8570_v59, %v8569_v36  ;;  %v8572_v31 = vpop.f32.mrb[218].mxu1 }
 0x3c2   : > { %v8573_v25 = vpop.f32.mrb[219].mxu1 }
 0x3c3   : > { %v12178_v61 = vadd.f32 %v8680_v4, %v6375_v41  ;;  %v6380_v21 = vadd.f32 %v8571_v27, %v12093_v32  ;;  %v8574_v10 = vadd.f32 %v8573_v25, %v8572_v31 }
 0x3c5   : > { %v8681_v0 = vpop.f32.mrb[248].mxu0  ;;  %v6383_v58 = vadd.f32 %v8574_v10, %v12095_v24 }
 0x3c6   : > { %v8682_v38 = vpop.f32.mrb[249].mxu0 }
 0x3c7   : > { %v8683_v47 = vadd.f32 %v8682_v38, %v8681_v0  ;;  %v8684_v35 = vpop.f32.mrb[250].mxu0  ;;  %v8575_v39 = vpop.f32.mrb[220].mxu1 }
 0x3c8   : > { %v8685_v23 = vpop.f32.mrb[251].mxu0  ;;  %v8576_v15 = vpop.f32.mrb[221].mxu1 }
 0x3c9   : > { %v8686_v45 = vadd.f32 %v8685_v23, %v8684_v35  ;;  %v12182_v53 = vadd.f32 %v8683_v47, %v6380_v21  ;;  %v8577_v49 = vadd.f32 %v8576_v15, %v8575_v39  ;;  %v8578_v17 = vpop.f32.mrb[222].mxu1 }
 0x3ca   : > { %v8579_v54 = vpop.f32.mrb[223].mxu1 }
 0x3cb   : > { %v12184_v37 = vadd.f32 %v8686_v45, %v6383_v58  ;;  %v6388_v32 = vadd.f32 %v8577_v49, %v12099_v30  ;;  %v8580_v40 = vadd.f32 %v8579_v54, %v8578_v17 }
 0x3cd   : > { %v8687_v44 = vpop.f32.mrb[252].mxu0  ;;  %v6391_v24 = vadd.f32 %v8580_v40, %v12101_v9 }
 0x3ce   : > { %v8688_v7 = vpop.f32.mrb[253].mxu0 }
 0x3cf   : > { %v8689_v3 = vadd.f32 %v8688_v7, %v8687_v44  ;;  %v8690_v60 = vpop.f32.mrb[254].mxu0  ;;  %v8581_v41 = vpop.f32.mrb[224].mxu1 }
 0x3d0   : > { %v8691_v20 = vpop.f32.mrb[255].mxu0  ;;  %v8582_v52 = vpop.f32.mrb[225].mxu1 }
 0x3d1   : > { %v8692_v13 = vadd.f32 %v8691_v20, %v8690_v60  ;;  %v12188_v18 = vadd.f32 %v8689_v3, %v6388_v32  ;;  %v8583_v36 = vadd.f32 %v8582_v52, %v8581_v41  ;;  %v8584_v4 = vpop.f32.mrb[226].mxu1 }
 0x3d2   : > { %v8585_v59 = vpop.f32.mrb[227].mxu1 }
 0x3d3   : > { %v12190_v27 = vadd.f32 %v8692_v13, %v6391_v24  ;;  %v6396_v30 = vadd.f32 %v8583_v36, %v12105_v16  ;;  %v8586_v31 = vadd.f32 %v8585_v59, %v8584_v4 }
 0x3d5   : > { %v8693_v25 = vpop.f32.mrb[0].mxu0  ;;  %v6399_v9 = vadd.f32 %v8586_v31, %v12107_v51 }
 0x3d6   : > { %v8694_v21 = vpop.f32.mrb[1].mxu0 }
 0x3d7   : > { %v8695_v10 = vadd.f32 %v8694_v21, %v8693_v25  ;;  %v8696_v0 = vpop.f32.mrb[2].mxu0  ;;  %v8587_v58 = vpop.f32.mrb[228].mxu1 }
 0x3d8   : > { %v8697_v38 = vpop.f32.mrb[3].mxu0  ;;  %v8588_v35 = vpop.f32.mrb[229].mxu1 }
 0x3d9   : > { %v8698_v47 = vadd.f32 %v8697_v38, %v8696_v0  ;;  %v12194_v23 = vadd.f32 %v8695_v10, %v6396_v30  ;;  %v8589_v39 = vadd.f32 %v8588_v35, %v8587_v58  ;;  %v8590_v45 = vpop.f32.mrb[230].mxu1 }
 0x3da   : > { %v8591_v15 = vpop.f32.mrb[231].mxu1 }
 0x3db   : > { %v12196_v49 = vadd.f32 %v8698_v47, %v6399_v9  ;;  %v6404_v16 = vadd.f32 %v8589_v39, %v12111_v29  ;;  %v8592_v17 = vadd.f32 %v8591_v15, %v8590_v45 }
 0x3dd   : > { %v8699_v54 = vpop.f32.mrb[4].mxu0  ;;  %v6407_v51 = vadd.f32 %v8592_v17, %v12113_v19 }
 0x3de   : > { %v8700_v32 = vpop.f32.mrb[5].mxu0 }
 0x3df   : > { %v8701_v40 = vadd.f32 %v8700_v32, %v8699_v54  ;;  %v8702_v44 = vpop.f32.mrb[6].mxu0  ;;  %v8593_v24 = vpop.f32.mrb[232].mxu1 }
 0x3e0   : > { %v8703_v7 = vpop.f32.mrb[7].mxu0  ;;  %v8594_v60 = vpop.f32.mrb[233].mxu1 }
 0x3e1   : > { %v8704_v3 = vadd.f32 %v8703_v7, %v8702_v44  ;;  %v12200_v20 = vadd.f32 %v8701_v40, %v6404_v16  ;;  %v8595_v41 = vadd.f32 %v8594_v60, %v8593_v24  ;;  %v8596_v13 = vpop.f32.mrb[234].mxu1 }
 0x3e2   : > { %v8597_v52 = vpop.f32.mrb[235].mxu1 }
 0x3e3   : > { %v12202_v36 = vadd.f32 %v8704_v3, %v6407_v51  ;;  %v6412_v29 = vadd.f32 %v8595_v41, %v12117_v8  ;;  %v8598_v4 = vadd.f32 %v8597_v52, %v8596_v13 }
 0x3e5   : > { %v8705_v59 = vpop.f32.mrb[8].mxu0  ;;  %v6415_v19 = vadd.f32 %v8598_v4, %v12119_v33 }
 0x3e6   : > { %v8706_v30 = vpop.f32.mrb[9].mxu0 }
 0x3e7   : > { %v8707_v31 = vadd.f32 %v8706_v30, %v8705_v59  ;;  %v8708_v25 = vpop.f32.mrb[10].mxu0  ;;  %v8599_v9 = vpop.f32.mrb[236].mxu1 }
 0x3e8   : > { %v8709_v21 = vpop.f32.mrb[11].mxu0  ;;  %v8600_v0 = vpop.f32.mrb[237].mxu1 }
 0x3e9   : > { %v8710_v10 = vadd.f32 %v8709_v21, %v8708_v25  ;;  %v12206_v38 = vadd.f32 %v8707_v31, %v6412_v29  ;;  %v8601_v58 = vadd.f32 %v8600_v0, %v8599_v9  ;;  %v8602_v47 = vpop.f32.mrb[238].mxu1 }
 0x3ea   : > { %v8603_v35 = vpop.f32.mrb[239].mxu1 }
 0x3eb   : > { %v12208_v39 = vadd.f32 %v8710_v10, %v6415_v19  ;;  %v6420_v8 = vadd.f32 %v8601_v58, %v12123_v57  ;;  %v8604_v45 = vadd.f32 %v8603_v35, %v8602_v47 }
 0x3ed   : > { %v8711_v15 = vpop.f32.mrb[12].mxu0  ;;  %v6423_v33 = vadd.f32 %v8604_v45, %v12125_v43 }
 0x3ee   : > { %v8712_v16 = vpop.f32.mrb[13].mxu0 }
 0x3ef   : > { %v8713_v17 = vadd.f32 %v8712_v16, %v8711_v15  ;;  %v8714_v54 = vpop.f32.mrb[14].mxu0  ;;  %v8605_v51 = vpop.f32.mrb[240].mxu1 }
 0x3f0   : > { %v8715_v32 = vpop.f32.mrb[15].mxu0  ;;  %v8606_v44 = vpop.f32.mrb[241].mxu1 }
 0x3f1   : > { %v8716_v40 = vadd.f32 %v8715_v32, %v8714_v54  ;;  %v12212_v7 = vadd.f32 %v8713_v17, %v6420_v8  ;;  %v8607_v24 = vadd.f32 %v8606_v44, %v8605_v51  ;;  %v8608_v3 = vpop.f32.mrb[242].mxu1 }
 0x3f2   : > { %v8609_v60 = vpop.f32.mrb[243].mxu1 }
 0x3f3   : > { %v12214_v41 = vadd.f32 %v8716_v40, %v6423_v33  ;;  %v6428_v57 = vadd.f32 %v8607_v24, %v12128_v14  ;;  %v8610_v13 = vadd.f32 %v8609_v60, %v8608_v3 }
 0x3f5   : > { %v8717_v52 = vpop.f32.mrb[16].mxu0  ;;  %v6431_v43 = vadd.f32 %v8610_v13, %v12130_v12 }
 0x3f6   : > { %v8718_v29 = vpop.f32.mrb[17].mxu0 }
 0x3f7   : > { %v8719_v4 = vadd.f32 %v8718_v29, %v8717_v52  ;;  %v8720_v59 = vpop.f32.mrb[18].mxu0  ;;  %v8611_v19 = vpop.f32.mrb[244].mxu1 }
 0x3f8   : > { %v8721_v30 = vpop.f32.mrb[19].mxu0  ;;  %v8612_v25 = vpop.f32.mrb[245].mxu1 }
 0x3f9   : > { %v8722_v31 = vadd.f32 %v8721_v30, %v8720_v59  ;;  %v12218_v21 = vadd.f32 %v8719_v4, %v6428_v57  ;;  %v8613_v9 = vadd.f32 %v8612_v25, %v8611_v19  ;;  %v8614_v10 = vpop.f32.mrb[246].mxu1 }
 0x3fa   : > { %v8615_v0 = vpop.f32.mrb[247].mxu1 }
 0x3fb   : > { %v12220_v58 = vadd.f32 %v8722_v31, %v6431_v43  ;;  %v6436_v14 = vadd.f32 %v8613_v9, %v12132_v26  ;;  %v8616_v47 = vadd.f32 %v8615_v0, %v8614_v10 }
 0x3fd   : > { %v8723_v35 = vpop.f32.mrb[20].mxu0  ;;  %v6439_v12 = vadd.f32 %v8616_v47, %v12134_v11 }
 0x3fe   : > { %v8724_v8 = vpop.f32.mrb[21].mxu0 }
 0x3ff   : > { %v8725_v45 = vadd.f32 %v8724_v8, %v8723_v35  ;;  %v8726_v15 = vpop.f32.mrb[22].mxu0  ;;  %v8617_v33 = vpop.f32.mrb[248].mxu1 }
 0x400   : > { %v8727_v16 = vpop.f32.mrb[23].mxu0  ;;  %v8618_v54 = vpop.f32.mrb[249].mxu1 }
 0x401   : > { %v8728_v17 = vadd.f32 %v8727_v16, %v8726_v15  ;;  %v12224_v32 = vadd.f32 %v8725_v45, %v6436_v14  ;;  %v8619_v51 = vadd.f32 %v8618_v54, %v8617_v33  ;;  %v8620_v40 = vpop.f32.mrb[250].mxu1 }
 0x402   : > { %v8621_v44 = vpop.f32.mrb[251].mxu1 }
 0x403   : > { %v12226_v24 = vadd.f32 %v8728_v17, %v6439_v12  ;;  %v6444_v26 = vadd.f32 %v8619_v51, %v12136_v62  ;;  %v8622_v3 = vadd.f32 %v8621_v44, %v8620_v40 }
 0x405   : > { %v8729_v60 = vpop.f32.mrb[24].mxu0  ;;  %v6447_v11 = vadd.f32 %v8622_v3, %v12138_v48 }
 0x406   : > { %v8730_v57 = vpop.f32.mrb[25].mxu0 }
 0x407   : > { %v8731_v13 = vadd.f32 %v8730_v57, %v8729_v60  ;;  %v8732_v52 = vpop.f32.mrb[26].mxu0  ;;  %v8623_v43 = vpop.f32.mrb[252].mxu1 }
 0x408   : > { %v8733_v29 = vpop.f32.mrb[27].mxu0  ;;  %v8624_v59 = vpop.f32.mrb[253].mxu1 }
 0x409   : > { %v8734_v4 = vadd.f32 %v8733_v29, %v8732_v52  ;;  %v12230_v30 = vadd.f32 %v8731_v13, %v6444_v26  ;;  %v8625_v19 = vadd.f32 %v8624_v59, %v8623_v43  ;;  %v8626_v31 = vpop.f32.mrb[254].mxu1 }
 0x40a   : > { %v8627_v25 = vpop.f32.mrb[255].mxu1 }
 0x40b   : > { %v12232_v9 = vadd.f32 %v8734_v4, %v6447_v11  ;;  %v6452_v62 = vadd.f32 %v8625_v19, %v12140_v34  ;;  %v8628_v10 = vadd.f32 %v8627_v25, %v8626_v31 }
 0x40d   : > { %v8735_v0 = vpop.f32.mrb[28].mxu0  ;;  %v6455_v48 = vadd.f32 %v8628_v10, %v12142_v56 }
 0x40e   : > { %v8736_v14 = vpop.f32.mrb[29].mxu0 }
 0x40f   : > { %v8737_v47 = vadd.f32 %v8736_v14, %v8735_v0  ;;  %v8738_v35 = vpop.f32.mrb[30].mxu0  ;;  %v8831_v12 = vpop.f32.mrb[0].mxu1 }
 0x410   : > { %v8739_v8 = vpop.f32.mrb[31].mxu0  ;;  %v6662_v15 = vadd.f32 %v8831_v12, %v12152_v6  ;;  %v6653_v16 = vpop.f32.mrb[1].mxu1 }
 0x411   : > { %v8740_v45 = vadd.f32 %v8739_v8, %v8738_v35  ;;  %v12237_v33 = vadd.f32 %v8737_v47, %v6452_v62  ;;  %v6654_v17 = vadd.f32 %v6653_v16, %v12146_v2  ;;  %v8832_v54 = vpop.f32.mrb[2].mxu1 }
 0x412   : > { %v6665_v34 = vadd.f32 %v8832_v54, %v12154_v22  ;;  %v6656_v51 = vpop.f32.mrb[3].mxu1  ;;  %v6782_v44 = vmax.f32 %v6662_v15, 0.0 }
 0x413   : > { %v12242_v40 = vadd.f32 %v8740_v45, %v6455_v48  ;;  %v6657_v56 = vadd.f32 %v6656_v51, %v12148_v50  ;;  %v6780_v3 = vmax.f32 %v6654_v17, 0.0 }
 0x414   : > { %v6783_v26 = vmax.f32 %v6665_v34, 0.0 }
 0x415   : > { %v6781_v2 = vmax.f32 %v6657_v56, 0.0 }
 0x416   : > { %v7734_v6 = vpack.c.bf16 %v6783_v26, %v6782_v44 }
 0x417   : > { %v7729_v60 = vpack.c.bf16 %v6781_v2, %v6780_v3  ;;  %v8835_v57 = vpop.f32.mrb[4].mxu1 }
 0x418   : > { %7806 = vst [vmem:[%s12248_s10 + $0x8] sm:$0xff] %v7734_v6   ;;  %v6678_v22 = vadd.f32 %v8835_v57, %v12164_v28  ;;  %v6669_v11 = vpop.f32.mrb[5].mxu1 }
 0x419   : > { %7730 = vst [vmem:[%s12248_s10] sm:$0xff] %v7729_v60   ;;  %v6670_v50 = vadd.f32 %v6669_v11, %v12158_v55  ;;  %v8836_v13 = vpop.f32.mrb[6].mxu1 }
 0x41a   : > { %v6681_v52 = vadd.f32 %v8836_v13, %v12166_v5  ;;  %v6672_v29 = vpop.f32.mrb[7].mxu1  ;;  %v6786_v4 = vmax.f32 %v6678_v22, 0.0 }
 0x41b   : > { %v6673_v43 = vadd.f32 %v6672_v29, %v12160_v42  ;;  %v6784_v19 = vmax.f32 %v6670_v50, 0.0 }
 0x41c   : > { %v6787_v59 = vmax.f32 %v6681_v52, 0.0 }
 0x41d   : > { %v6785_v31 = vmax.f32 %v6673_v43, 0.0 }
 0x41e   : > { %v7744_v25 = vpack.c.bf16 %v6787_v59, %v6786_v4 }
 0x41f   : > { %v7739_v62 = vpack.c.bf16 %v6785_v31, %v6784_v19  ;;  %v8839_v10 = vpop.f32.mrb[8].mxu1 }
 0x420   : > { %7808 = vst [vmem:[%s12248_s10 + $0x18] sm:$0xff] %v7744_v25   ;;  %v6694_v28 = vadd.f32 %v8839_v10, %v12176_v46  ;;  %v6685_v0 = vpop.f32.mrb[9].mxu1 }
 0x421   : > { %7807 = vst [vmem:[%s12248_s10 + $0x10] sm:$0xff] %v7739_v62   ;;  %v6686_v55 = vadd.f32 %v6685_v0, %v12170_v63  ;;  %v8840_v5 = vpop.f32.mrb[10].mxu1 }
 0x422   : > { %v6697_v48 = vadd.f32 %v8840_v5, %v12178_v61  ;;  %v6688_v42 = vpop.f32.mrb[11].mxu1  ;;  %v6790_v47 = vmax.f32 %v6694_v28, 0.0 }
 0x423   : > { %v6689_v14 = vadd.f32 %v6688_v42, %v12172_v1  ;;  %v6788_v8 = vmax.f32 %v6686_v55, 0.0 }
 0x424   : > { %v6791_v35 = vmax.f32 %v6697_v48, 0.0 }
 0x425   : > { %v6789_v12 = vmax.f32 %v6689_v14, 0.0 }
 0x426   : > { %v7754_v45 = vpack.c.bf16 %v6791_v35, %v6790_v47 }
 0x427   : > { %v7749_v15 = vpack.c.bf16 %v6789_v12, %v6788_v8  ;;  %v8843_v16 = vpop.f32.mrb[12].mxu1 }
 0x428   : > { %7810 = vst [vmem:[%s12248_s10 + $0x28] sm:$0xff] %v7754_v45   ;;  %v6710_v46 = vadd.f32 %v8843_v16, %v12188_v18  ;;  %v6701_v17 = vpop.f32.mrb[13].mxu1 }
 0x429   : > { %7809 = vst [vmem:[%s12248_s10 + $0x20] sm:$0xff] %v7749_v15   ;;  %v6702_v63 = vadd.f32 %v6701_v17, %v12182_v53  ;;  %v8844_v61 = vpop.f32.mrb[14].mxu1 }
 0x42a   : > { %v6713_v54 = vadd.f32 %v8844_v61, %v12190_v27  ;;  %v6704_v1 = vpop.f32.mrb[15].mxu1  ;;  %v6794_v51 = vmax.f32 %v6710_v46, 0.0 }
 0x42b   : > { %v6705_v34 = vadd.f32 %v6704_v1, %v12184_v37  ;;  %v6792_v44 = vmax.f32 %v6702_v63, 0.0 }
 0x42c   : > { %v6795_v56 = vmax.f32 %v6713_v54, 0.0 }
 0x42d   : > { %v6793_v26 = vmax.f32 %v6705_v34, 0.0 }
 0x42e   : > { %v7764_v3 = vpack.c.bf16 %v6795_v56, %v6794_v51 }
 0x42f   : > { %v7759_v2 = vpack.c.bf16 %v6793_v26, %v6792_v44  ;;  %v8847_v6 = vpop.f32.mrb[16].mxu1 }
 0x430   : > { %7812 = vst [vmem:[%s12248_s10 + $0x38] sm:$0xff] %v7764_v3   ;;  %v6726_v18 = vadd.f32 %v8847_v6, %v12200_v20  ;;  %v6717_v60 = vpop.f32.mrb[17].mxu1 }
 0x431   : > { %7811 = vst [vmem:[%s12248_s10 + $0x30] sm:$0xff] %v7759_v2   ;;  %v6718_v53 = vadd.f32 %v6717_v60, %v12194_v23  ;;  %v8848_v27 = vpop.f32.mrb[18].mxu1 }
 0x432   : > { %v6729_v57 = vadd.f32 %v8848_v27, %v12202_v36  ;;  %v6720_v37 = vpop.f32.mrb[19].mxu1  ;;  %v6798_v11 = vmax.f32 %v6726_v18, 0.0 }
 0x433   : > { %v6721_v22 = vadd.f32 %v6720_v37, %v12196_v49  ;;  %v6796_v13 = vmax.f32 %v6718_v53, 0.0 }
 0x434   : > { %v6799_v50 = vmax.f32 %v6729_v57, 0.0 }
 0x435   : > { %v6797_v52 = vmax.f32 %v6721_v22, 0.0 }
 0x436   : > { %v7774_v29 = vpack.c.bf16 %v6799_v50, %v6798_v11 }
 0x437   : > { %v7769_v43 = vpack.c.bf16 %v6797_v52, %v6796_v13  ;;  %v8851_v4 = vpop.f32.mrb[20].mxu1 }
 0x438   : > { %7814 = vst [vmem:[%s12248_s10 + $0x48] sm:$0xff] %v7774_v29   ;;  %v6742_v20 = vadd.f32 %v8851_v4, %v12212_v7  ;;  %v6733_v59 = vpop.f32.mrb[21].mxu1 }
 0x439   : > { %7813 = vst [vmem:[%s12248_s10 + $0x40] sm:$0xff] %v7769_v43   ;;  %v6734_v23 = vadd.f32 %v6733_v59, %v12206_v38  ;;  %v8852_v36 = vpop.f32.mrb[22].mxu1 }
 0x43a   : > { %v6745_v19 = vadd.f32 %v8852_v36, %v12214_v41  ;;  %v6736_v49 = vpop.f32.mrb[23].mxu1  ;;  %v6802_v25 = vmax.f32 %v6742_v20, 0.0 }
 0x43b   : > { %v6737_v31 = vadd.f32 %v6736_v49, %v12208_v39  ;;  %v6800_v10 = vmax.f32 %v6734_v23, 0.0 }
 0x43c   : > { %v6803_v62 = vmax.f32 %v6745_v19, 0.0 }
 0x43d   : > { %v6801_v28 = vmax.f32 %v6737_v31, 0.0 }
 0x43e   : > { %v7784_v0 = vpack.c.bf16 %v6803_v62, %v6802_v25 }
 0x43f   : > { %v7779_v55 = vpack.c.bf16 %v6801_v28, %v6800_v10  ;;  %v8855_v5 = vpop.f32.mrb[24].mxu1 }
 0x440   : > { %7816 = vst [vmem:[%s12248_s10 + $0x58] sm:$0xff] %v7784_v0   ;;  %v6758_v7 = vadd.f32 %v8855_v5, %v12224_v32  ;;  %v6749_v48 = vpop.f32.mrb[25].mxu1 }
 0x441   : > { %7815 = vst [vmem:[%s12248_s10 + $0x50] sm:$0xff] %v7779_v55   ;;  %v6750_v38 = vadd.f32 %v6749_v48, %v12218_v21  ;;  %v8856_v41 = vpop.f32.mrb[26].mxu1 }
 0x442   : > { %v6761_v42 = vadd.f32 %v8856_v41, %v12226_v24  ;;  %v6752_v39 = vpop.f32.mrb[27].mxu1  ;;  %v6806_v47 = vmax.f32 %v6758_v7, 0.0 }
 0x443   : > { %v6753_v14 = vadd.f32 %v6752_v39, %v12220_v58  ;;  %v6804_v8 = vmax.f32 %v6750_v38, 0.0 }
 0x444   : > { %v6807_v35 = vmax.f32 %v6761_v42, 0.0 }
 0x445   : > { %v6805_v12 = vmax.f32 %v6753_v14, 0.0 }
 0x446   : > { %v7794_v45 = vpack.c.bf16 %v6807_v35, %v6806_v47 }
 0x447   : > { %v7789_v15 = vpack.c.bf16 %v6805_v12, %v6804_v8  ;;  %v8859_v16 = vpop.f32.mrb[28].mxu1 }
 0x448   : > { %7818 = vst [vmem:[%s12248_s10 + $0x68] sm:$0xff] %v7794_v45   ;;  %v6774_v32 = vadd.f32 %v8859_v16, %v12237_v33  ;;  %v6765_v46 = vpop.f32.mrb[29].mxu1 }
 0x449   : > { %7817 = vst [vmem:[%s12248_s10 + $0x60] sm:$0xff] %v7789_v15   ;;  %v6766_v21 = vadd.f32 %v6765_v46, %v12230_v30  ;;  %v8860_v24 = vpop.f32.mrb[30].mxu1 }
 0x44a   : > { %v6777_v17 = vadd.f32 %v8860_v24, %v12242_v40  ;;  %v6768_v58 = vpop.f32.mrb[31].mxu1  ;;  %v6810_v61 = vmax.f32 %v6774_v32, 0.0 }
 0x44b   : > { %v6769_v63 = vadd.f32 %v6768_v58, %v12232_v9  ;;  %v6808_v1 = vmax.f32 %v6766_v21, 0.0 }
 0x44c   : > { %v6811_v54 = vmax.f32 %v6777_v17, 0.0 }
 0x44d   : > { %v6809_v34 = vmax.f32 %v6769_v63, 0.0 }
 0x44e   : > { %v7804_v51 = vpack.c.bf16 %v6811_v54, %v6810_v61 }
 0x44f   : > { %v7799_v56 = vpack.c.bf16 %v6809_v34, %v6808_v1 }
 0x450   : > { %7820 = vst [vmem:[%s12248_s10 + $0x78] sm:$0xff] %v7804_v51  }
 0x451   : > { %7819 = vst [vmem:[%s12248_s10 + $0x70] sm:$0xff] %v7799_v56  }
 0x452 PF: > { %s13_s12 = sadd.s32 1, %s9331_s12  }
 0x453   : > { %p10_p4 = scmp.ge.s32.totalorder %s13_s12, 4  }
 0x455   :  { %12 = sbr.rel (!%p10_p4) target bundleno = 1 (0x1), region = 67 }

</bundles_post_ra>
